<compile_context>
chip_gen: v7x
topology: tpu7x:2x2x1
jax: 0.10.0
libtpu: 0.0.40
codegen_flags: <defaults>
</compile_context>

<pallas_src>
import functools

import jax
import jax.numpy as jnp
from jax.experimental import pallas as pl
from jax.experimental.pallas import tpu as pltpu


# -------------------- model dimensions (from the PyTorch spec) --------------
K_IN = 148 * 148            # 21904
DIMS = [K_IN, 300, 200, 100, 2]

TK = 5504                   # K tile (128-aligned); 4 * 5504 = 22016
K_PAD = 4 * TK              # 22016  (>= K_IN, 128-aligned)

N1 = DIMS[1]                # 300  (kept unpadded: full-dim blocks are legal)
N2 = DIMS[2]                # 200
N3 = DIMS[3]                # 100
N_OUT = DIMS[4]             # 2
N_OUT_PAD = 128             # lane-dense output tile


def _round_up(n, m):
    return ((n + m - 1) // m) * m


# -------------------------------- kernel ------------------------------------
def _catdog_kernel(x_ref, w1_ref, b1_ref, w2_ref, b2_ref, w3_ref, b3_ref,
                   w4_ref, b4_ref, o_ref, acc_ref):
    """Fused MLP. Grid axis 0 tiles the K reduction of layer 1."""
    k = pl.program_id(0)

    @pl.when(k == 0)
    def _():
        acc_ref[...] = jnp.zeros_like(acc_ref)

    # Layer 1 partial product on the MXU (f32 accumulation).
    acc_ref[...] += jnp.dot(
        x_ref[...], w1_ref[...], preferred_element_type=jnp.float32
    )

    @pl.when(k == pl.num_programs(0) - 1)
    def _():
        # Epilogue: bias+ReLU of layer 1, then the tiny layers 2-4.
        h1 = jnp.maximum(acc_ref[...] + b1_ref[...], 0.0)
        h2 = jnp.maximum(
            jnp.dot(h1, w2_ref[...], preferred_element_type=jnp.float32)
            + b2_ref[...], 0.0)
        h3 = jnp.maximum(
            jnp.dot(h2, w3_ref[...], preferred_element_type=jnp.float32)
            + b3_ref[...], 0.0)
        logits = (jnp.dot(h3, w4_ref[...], preferred_element_type=jnp.float32)
                  + b4_ref[...])
        o_ref[...] = logits.astype(o_ref.dtype)


# ------------------------------ host wrappers --------------------------------
def init_params(key):
    """PyTorch-style uniform init, matching CatDogModel's nn.Linear shapes.

    Weights stored as (in, out) = transpose of nn.Linear's (out, in).
    """
    params = []
    for din, dout in zip(DIMS[:-1], DIMS[1:]):
        key, kw, kb = jax.random.split(key, 3)
        bound = 1.0 / (din ** 0.5)
        w = jax.random.uniform(kw, (din, dout), jnp.float32, -bound, bound)
        b = jax.random.uniform(kb, (dout,), jnp.float32, -bound, bound)
        params.append((w, b))
    return params


def pad_params(params):
    """One-time prep of weights for the kernel (done at init, not per call).

    Only the layer-1 K axis is zero-padded (21904 -> 22016); all output dims
    keep their natural size except the final layer, widened to 128 lanes so
    the output store is lane-dense.
    """
    (w1, b1), (w2, b2), (w3, b3), (w4, b4) = params
    w1p = jnp.zeros((K_PAD, N1), jnp.float32).at[:K_IN, :].set(w1)
    b1p = b1.reshape(1, N1)
    w2p = w2                                                      # (300, 200)
    b2p = b2.reshape(1, N2)
    w3p = w3                                                      # (200, 100)
    b3p = b3.reshape(1, N3)
    w4p = jnp.zeros((N3, N_OUT_PAD), jnp.float32).at[:, :N_OUT].set(w4)
    b4p = jnp.zeros((1, N_OUT_PAD), jnp.float32).at[0, :N_OUT].set(b4)
    return (w1p, b1p, w2p, b2p, w3p, b3p, w4p, b4p)


@functools.partial(jax.jit, static_argnames=())
def catdog_forward(x, padded_params):
    """x: (B, 1, 148, 148) NCHW -> logits (B, 2)."""
    B = x.shape[0]
    h = x.reshape(B, -1).astype(jnp.float32)        # nn.Flatten, row-major
    M_pad = max(_round_up(B, 8), 8)
    xp = jnp.zeros((M_pad, K_PAD), jnp.float32).at[:B, :K_IN].set(h)

    w1p, b1p, w2p, b2p, w3p, b3p, w4p, b4p = padded_params

    out = pl.pallas_call(
        _catdog_kernel,
        out_shape=jax.ShapeDtypeStruct((M_pad, N_OUT_PAD), jnp.float32),
        grid_spec=pltpu.PrefetchScalarGridSpec(
            num_scalar_prefetch=0,
            grid=(K_PAD // TK,),
            in_specs=[
                # layer-1 operands, K-tiled
                pl.BlockSpec((M_pad, TK), lambda k: (0, k)),
                pl.BlockSpec((TK, N1), lambda k: (k, 0)),
                pl.BlockSpec((1, N1), lambda k: (0, 0)),
                # tiny tail layers: full, VMEM-resident blocks (fetched once)
                pl.BlockSpec((N1, N2), lambda k: (0, 0)),
                pl.BlockSpec((1, N2), lambda k: (0, 0)),
                pl.BlockSpec((N2, N3), lambda k: (0, 0)),
                pl.BlockSpec((1, N3), lambda k: (0, 0)),
                pl.BlockSpec((N3, N_OUT_PAD), lambda k: (0, 0)),
                pl.BlockSpec((1, N_OUT_PAD), lambda k: (0, 0)),
            ],
            out_specs=pl.BlockSpec((M_pad, N_OUT_PAD), lambda k: (0, 0)),
            scratch_shapes=[pltpu.VMEM((M_pad, N1), jnp.float32)],
        ),
        compiler_params=pltpu.CompilerParams(
            dimension_semantics=("arbitrary",),
            vmem_limit_bytes=40 * 1024 * 1024,
        ),
    )(xp, w1p, b1p, w2p, b2p, w3p, b3p, w4p, b4p)

    return out[:B, :N_OUT]


def catdog_reference(x, params):
    """Plain-JAX reference for correctness checking."""
    B = x.shape[0]
    h = x.reshape(B, -1).astype(jnp.float32)
    n_layers = len(params)
    for i, (w, b) in enumerate(params):
        h = h @ w + b
        if i < n_layers - 1:
            h = jnp.maximum(h, 0.0)
    return h


if __name__ == "__main__":
    key = jax.random.PRNGKey(0)
    key, k_x = jax.random.split(key)

    # Batch of 2 single-channel 148x148 "images" (NCHW) — the smallest shape
    # the module's 148*148 -> 300 first Linear allows.
    x = jax.random.normal(k_x, (2, 1, 148, 148), dtype=jnp.float32)
    params = init_params(key)
    padded_params = pad_params(params)   # prepared once, reused every call

    logits = catdog_forward(x, padded_params)
    logits = jax.block_until_ready(logits)

    ref = catdog_reference(x, params)
    assert logits.shape == (2, 2), logits.shape
    assert jnp.allclose(logits, ref, atol=1e-3, rtol=1e-3), (logits, ref)

    print("KERNEL_OK")
</pallas_src>

<mosaic_0001>
module attributes {stable_mosaic.version = 11 : i64} {
  func.func @_catdog_kernel(%arg0: i32, %arg1: memref<8x5504xf32, #tpu.memory_space<vmem>>, %arg2: memref<5504x300xf32, #tpu.memory_space<vmem>>, %arg3: memref<1x300xf32, #tpu.memory_space<vmem>>, %arg4: memref<300x200xf32, #tpu.memory_space<vmem>>, %arg5: memref<1x200xf32, #tpu.memory_space<vmem>>, %arg6: memref<200x100xf32, #tpu.memory_space<vmem>>, %arg7: memref<1x100xf32, #tpu.memory_space<vmem>>, %arg8: memref<100x128xf32, #tpu.memory_space<vmem>>, %arg9: memref<1x128xf32, #tpu.memory_space<vmem>>, %arg10: memref<8x128xf32, #tpu.memory_space<vmem>>, %arg11: memref<8x300xf32, #tpu.memory_space<vmem>>) attributes {dimension_semantics = [#tpu.dimension_semantics<arbitrary>], iteration_bounds = array<i64: 4>, scalar_prefetch = 0 : i64, scratch_operands = 1 : i64, tpu.core_type = #tpu.core_type<tc>, window_params = [{transform_indices = @transform_0, window_bounds = array<i64: 8, 5504>}, {transform_indices = @transform_1, window_bounds = array<i64: 5504, 300>}, {pipeline_mode = #tpu.pipeline_mode<synchronous>, transform_indices = @transform_2, window_bounds = array<i64: 1, 300>}, {pipeline_mode = #tpu.pipeline_mode<synchronous>, transform_indices = @transform_3, window_bounds = array<i64: 300, 200>}, {pipeline_mode = #tpu.pipeline_mode<synchronous>, transform_indices = @transform_4, window_bounds = array<i64: 1, 200>}, {pipeline_mode = #tpu.pipeline_mode<synchronous>, transform_indices = @transform_5, window_bounds = array<i64: 200, 100>}, {pipeline_mode = #tpu.pipeline_mode<synchronous>, transform_indices = @transform_6, window_bounds = array<i64: 1, 100>}, {pipeline_mode = #tpu.pipeline_mode<synchronous>, transform_indices = @transform_7, window_bounds = array<i64: 100, 128>}, {pipeline_mode = #tpu.pipeline_mode<synchronous>, transform_indices = @transform_8, window_bounds = array<i64: 1, 128>}, {pipeline_mode = #tpu.pipeline_mode<synchronous>, transform_indices = @transform_9, window_bounds = array<i64: 8, 128>}]} {
    %c0_i32 = arith.constant 0 : i32
    %0 = arith.cmpi eq, %arg0, %c0_i32 : i32
    %1 = arith.extui %0 : i1 to i32
    %c0_i32_0 = arith.constant 0 : i32
    %2 = arith.cmpi ne, %1, %c0_i32_0 : i32
    scf.if %2 {
      %cst_9 = arith.constant 0.000000e+00 : f32
      %12 = vector.broadcast %cst_9 : f32 to vector<8x300xf32>
      %c0_10 = arith.constant 0 : index
      %c0_11 = arith.constant 0 : index
      %13 = vector.load %arg11[%c0_10, %c0_11] : memref<8x300xf32, #tpu.memory_space<vmem>>, vector<8x300xf32>
      tpu.vector_store %arg11[%c0_10, %c0_11], %12 {strides = array<i32>} : memref<8x300xf32, #tpu.memory_space<vmem>>, vector<8x300xf32>,
    } else {
    }
    %c0 = arith.constant 0 : index
    %c0_1 = arith.constant 0 : index
    %3 = vector.load %arg11[%c0, %c0_1] : memref<8x300xf32, #tpu.memory_space<vmem>>, vector<8x300xf32>
    %c0_2 = arith.constant 0 : index
    %c0_3 = arith.constant 0 : index
    %4 = vector.load %arg1[%c0_2, %c0_3] : memref<8x5504xf32, #tpu.memory_space<vmem>>, vector<8x5504xf32>
    %c0_4 = arith.constant 0 : index
    %c0_5 = arith.constant 0 : index
    %5 = vector.load %arg2[%c0_4, %c0_5] : memref<5504x300xf32, #tpu.memory_space<vmem>>, vector<5504x300xf32>
    %cst = arith.constant dense<0.000000e+00> : vector<8x300xf32>
    %6 = tpu.matmul %4, %5, %cst {dimension_numbers = #tpu.dot_dimension_numbers<[1], [0], [0], [1], [0, 0, 1, 1], [], []>} : vector<8x5504xf32>, vector<5504x300xf32>, vector<8x300xf32> -> vector<8x300xf32>
    %7 = arith.addf %3, %6 : vector<8x300xf32>
    %c0_6 = arith.constant 0 : index
    %c0_7 = arith.constant 0 : index
    %8 = vector.load %arg11[%c0_6, %c0_7] : memref<8x300xf32, #tpu.memory_space<vmem>>, vector<8x300xf32>
    tpu.vector_store %arg11[%c0_6, %c0_7], %7 {strides = array<i32>} : memref<8x300xf32, #tpu.memory_space<vmem>>, vector<8x300xf32>,
    %c3_i32 = arith.constant 3 : i32
    %9 = arith.cmpi eq, %arg0, %c3_i32 : i32
    %10 = arith.extui %9 : i1 to i32
    %c0_i32_8 = arith.constant 0 : i32
    %11 = arith.cmpi ne, %10, %c0_i32_8 : i32
    scf.if %11 {
      %c0_9 = arith.constant 0 : index
      %c0_10 = arith.constant 0 : index
      %12 = vector.load %arg11[%c0_9, %c0_10] : memref<8x300xf32, #tpu.memory_space<vmem>>, vector<8x300xf32>
      %c0_11 = arith.constant 0 : index
      %c0_12 = arith.constant 0 : index
      %13 = vector.load %arg3[%c0_11, %c0_12] : memref<1x300xf32, #tpu.memory_space<vmem>>, vector<1x300xf32>
      %14 = vector.broadcast %13 : vector<1x300xf32> to vector<8x300xf32>
      %15 = arith.addf %12, %14 : vector<8x300xf32>
      %cst_13 = arith.constant 0.000000e+00 : f32
      %16 = vector.broadcast %cst_13 : f32 to vector<8x300xf32>
      %17 = arith.maximumf %15, %16 : vector<8x300xf32>
      %c0_14 = arith.constant 0 : index
      %c0_15 = arith.constant 0 : index
      %18 = vector.load %arg4[%c0_14, %c0_15] : memref<300x200xf32, #tpu.memory_space<vmem>>, vector<300x200xf32>
      %cst_16 = arith.constant dense<0.000000e+00> : vector<8x200xf32>
      %19 = tpu.matmul %17, %18, %cst_16 {dimension_numbers = #tpu.dot_dimension_numbers<[1], [0], [0], [1], [0, 0, 1, 1], [], []>} : vector<8x300xf32>, vector<300x200xf32>, vector<8x200xf32> -> vector<8x200xf32>
      %c0_17 = arith.constant 0 : index
      %c0_18 = arith.constant 0 : index
      %20 = vector.load %arg5[%c0_17, %c0_18] : memref<1x200xf32, #tpu.memory_space<vmem>>, vector<1x200xf32>
      %21 = vector.broadcast %20 : vector<1x200xf32> to vector<8x200xf32>
      %22 = arith.addf %19, %21 : vector<8x200xf32>
      %cst_19 = arith.constant 0.000000e+00 : f32
      %23 = vector.broadcast %cst_19 : f32 to vector<8x200xf32>
      %24 = arith.maximumf %22, %23 : vector<8x200xf32>
      %c0_20 = arith.constant 0 : index
      %c0_21 = arith.constant 0 : index
      %25 = vector.load %arg6[%c0_20, %c0_21] : memref<200x100xf32, #tpu.memory_space<vmem>>, vector<200x100xf32>
      %cst_22 = arith.constant dense<0.000000e+00> : vector<8x100xf32>
      %26 = tpu.matmul %24, %25, %cst_22 {dimension_numbers = #tpu.dot_dimension_numbers<[1], [0], [0], [1], [0, 0, 1, 1], [], []>} : vector<8x200xf32>, vector<200x100xf32>, vector<8x100xf32> -> vector<8x100xf32>
      %c0_23 = arith.constant 0 : index
      %c0_24 = arith.constant 0 : index
      %27 = vector.load %arg7[%c0_23, %c0_24] : memref<1x100xf32, #tpu.memory_space<vmem>>, vector<1x100xf32>
      %28 = vector.broadcast %27 : vector<1x100xf32> to vector<8x100xf32>
      %29 = arith.addf %26, %28 : vector<8x100xf32>
      %cst_25 = arith.constant 0.000000e+00 : f32
      %30 = vector.broadcast %cst_25 : f32 to vector<8x100xf32>
      %31 = arith.maximumf %29, %30 : vector<8x100xf32>
      %c0_26 = arith.constant 0 : index
      %c0_27 = arith.constant 0 : index
      %32 = vector.load %arg8[%c0_26, %c0_27] : memref<100x128xf32, #tpu.memory_space<vmem>>, vector<100x128xf32>
      %cst_28 = arith.constant dense<0.000000e+00> : vector<8x128xf32>
      %33 = tpu.matmul %31, %32, %cst_28 {dimension_numbers = #tpu.dot_dimension_numbers<[1], [0], [0], [1], [0, 0, 1, 1], [], []>} : vector<8x100xf32>, vector<100x128xf32>, vector<8x128xf32> -> vector<8x128xf32>
      %c0_29 = arith.constant 0 : index
      %c0_30 = arith.constant 0 : index
      %34 = vector.load %arg9[%c0_29, %c0_30] : memref<1x128xf32, #tpu.memory_space<vmem>>, vector<1x128xf32>
      %35 = vector.broadcast %34 : vector<1x128xf32> to vector<8x128xf32>
      %36 = arith.addf %33, %35 : vector<8x128xf32>
      %c0_31 = arith.constant 0 : index
      %c0_32 = arith.constant 0 : index
      %37 = vector.load %arg10[%c0_31, %c0_32] : memref<8x128xf32, #tpu.memory_space<vmem>>, vector<8x128xf32>
      tpu.vector_store %arg10[%c0_31, %c0_32], %36 {strides = array<i32>} : memref<8x128xf32, #tpu.memory_space<vmem>>, vector<8x128xf32>,
    } else {
    }
    return
  }
  func.func @transform_0(%arg0: i32) -> (i32, i32) {
    %c0_i32 = arith.constant 0 : i32
    %c0_i32_0 = arith.constant 0 : i32
    return %c0_i32, %arg0 : i32, i32
  }
  func.func @transform_1(%arg0: i32) -> (i32, i32) {
    %c0_i32 = arith.constant 0 : i32
    %c0_i32_0 = arith.constant 0 : i32
    return %arg0, %c0_i32 : i32, i32
  }
  func.func @transform_2(%arg0: i32) -> (i32, i32) {
    %c0_i32 = arith.constant 0 : i32
    %c0_i32_0 = arith.constant 0 : i32
    %c0_i32_1 = arith.constant 0 : i32
    return %c0_i32, %c0_i32_0 : i32, i32
  }
  func.func @transform_3(%arg0: i32) -> (i32, i32) {
    %c0_i32 = arith.constant 0 : i32
    %c0_i32_0 = arith.constant 0 : i32
    %c0_i32_1 = arith.constant 0 : i32
    return %c0_i32, %c0_i32_0 : i32, i32
  }
  func.func @transform_4(%arg0: i32) -> (i32, i32) {
    %c0_i32 = arith.constant 0 : i32
    %c0_i32_0 = arith.constant 0 : i32
    %c0_i32_1 = arith.constant 0 : i32
    return %c0_i32, %c0_i32_0 : i32, i32
  }
  func.func @transform_5(%arg0: i32) -> (i32, i32) {
    %c0_i32 = arith.constant 0 : i32
    %c0_i32_0 = arith.constant 0 : i32
    %c0_i32_1 = arith.constant 0 : i32
    return %c0_i32, %c0_i32_0 : i32, i32
  }
  func.func @transform_6(%arg0: i32) -> (i32, i32) {
    %c0_i32 = arith.constant 0 : i32
    %c0_i32_0 = arith.constant 0 : i32
    %c0_i32_1 = arith.constant 0 : i32
    return %c0_i32, %c0_i32_0 : i32, i32
  }
  func.func @transform_7(%arg0: i32) -> (i32, i32) {
    %c0_i32 = arith.constant 0 : i32
    %c0_i32_0 = arith.constant 0 : i32
    %c0_i32_1 = arith.constant 0 : i32
    return %c0_i32, %c0_i32_0 : i32, i32
  }
  func.func @transform_8(%arg0: i32) -> (i32, i32) {
    %c0_i32 = arith.constant 0 : i32
    %c0_i32_0 = arith.constant 0 : i32
    %c0_i32_1 = arith.constant 0 : i32
    return %c0_i32, %c0_i32_0 : i32, i32
  }
  func.func @transform_9(%arg0: i32) -> (i32, i32) {
    %c0_i32 = arith.constant 0 : i32
    %c0_i32_0 = arith.constant 0 : i32
    %c0_i32_1 = arith.constant 0 : i32
    return %c0_i32, %c0_i32_0 : i32, i32
  }
}

</mosaic_0001>

<bundles_post_ra>
// kernel: catdog_forward.1
= control target key start
LH: loop header
LB: loop body
LE: loop exit
PB: predicated region body
PF: predicated region fallthrough
CT: control target
= control target key end

     0   :  { %14 = vsyncpa [#allocation4], 0  ;;  %s12173_s0 = inlined_call_operand.vmem [shape: f32[8,22016], index: 0, kind: input, shape index: {}]   ;;  %s12174_s1 = inlined_call_operand.hbm [shape: f32[22016,300], index: 1, kind: input, shape index: {}]   ;;  %s12175_s2 = inlined_call_operand.vmem [shape: f32[1,300], index: 2, kind: input, shape index: {}]   ;;  %s12176_s3 = inlined_call_operand.vmem [shape: f32[300,200], index: 3, kind: input, shape index: {}]   ;;  %s12177_s4 = inlined_call_operand.vmem [shape: f32[1,200], index: 4, kind: input, shape index: {}]   ;;  %s12178_s5 = inlined_call_operand.vmem [shape: f32[200,100], index: 5, kind: input, shape index: {}]   ;;  %s12179_s6 = inlined_call_operand.vmem [shape: f32[1,100], index: 6, kind: input, shape index: {}]   ;;  %s12180_s7 = inlined_call_operand.vmem [shape: f32[100,128], index: 7, kind: input, shape index: {}]   ;;  %s12181_s8 = inlined_call_operand.vmem [shape: f32[1,128], index: 8, kind: input, shape index: {}]   ;;  %s12182_s9 = inlined_call_operand.vmem [shape: f32[8,128], index: 9, kind: output, shape index: {}]  }
   0x1   :  { %16 = vsyncpa [#allocation4 + $0x1], 0  ;;  %s9428_s30 = smov 0   ;;  %s9430_s10 = smov 0  }
   0x2   :  { %s9432_s11 = smov 0   ;;  %s9434_s12 = smov 0  }
   0x3 LB: > { %s9447_s13 = sadd.s32 4294967295, %s9365_s12   ;;  %s9450_s14 = sadd.s32 1, %s9365_s12   ;;  %s9365_s12 = sphi %s9434_s12, %s12188_s12   ;;  %s9361_s11 = sphi %s9432_s11, %s12187_s11   ;;  %s9357_s10 = sphi %s9430_s10, %s12186_s10   ;;  %s9353_s30 = sphi %s9428_s30, %s12185_s30  }
   0x4   : > { %s52_s15 = ssub.s32 %s9365_s12, %s9450_s14  ;;  %s55_s16 = sadd.s32 1, %s9361_s11 }
   0x5   : > { %p53_p0 = scmp.eq.s32.totalorder %s52_s15, 0  ;;  %p62_p1 = scmp.ne.s32.totalorder %s9361_s11, %s9357_s10 }
   0x6   : > { %p63_p2 = scmp.eq.s32.totalorder %s9365_s12, 0  ;;  %p68_p3 = scmp.ne.s32.totalorder %s9357_s10, %s9353_s30 }
   0x7   : > { %s9460_s17 = scalar_select %p53_p0, %s9361_s11, %s55_s16  }
   0x8   : > { %p64_p4 = por %p63_p2, %p62_p1  ;;  %p69_p5 = scmp.eq.s32.totalorder %s9447_s13, 0 }
   0x9   : > { %p9224_p6 = scmp.lt.s32.totalorder %s9365_s12, 4  ;;  %s290_s19 = sand.u32 1, %s9361_s11  }
   0xa   : > { %p9464_p7 = por %p69_p5, %p68_p3  ;;  %s9215_s20 = smul.u32 16512, %s290_s19 }
   0xb   : > { %p9469_p8 = pnand %p9224_p6, %p64_p4  ;;  %s9225_s22 = smul.u32 264192, %s9365_s12 }
   0xc   : > { %s294_s23 = scalar_lea.vmem [#allocation3], %s9215_s20  ;;  %s9481_s28 = scalar_lea.sflag [#allocation4], %s290_s19 }
   0xd   : > { %s302_s24 = sshll.u32 %s294_s23, 4  ;;  %s9477_s27 = scalar_lea.hbm %s12174_s1, %s9225_s22  ;;  %s9479_s24 = int_to_ptr.vmem [resolvable:$true] %s302_s24 }
   0xe   : > { %s9301_s29 = scalar_lea.hbm %s9477_s27, 264192  ;;  %p9303_p10 = pneg %p9469_p8 }
   0xf   : > { %p9302_p9 = scmp.ne.s32.totalorder %s9477_s27, %s9301_s29  ;;  %s9306_s16 = scalar_lea.hbm %s12174_s1, 1056768 }
  0x10   : > { %p9307_p13 = scmp.lt.u32.totalorder %s9477_s27, %s12174_s1  ;;  %p9308_p0 = scmp.lt.u32.totalorder %s9306_s16, %s9301_s29 }
  0x11   : > { %p9304_p11 = pnand %p9303_p10, %p9302_p9  ;;  %p9310_p2 = scmp.lt.u32.totalorder %s9301_s29, %s9477_s27 }
  0x12   : > { %p9309_p1 = por %p9308_p0, %p9307_p13 }
  0x13   : > { %p9305_p12 = pneg %p9304_p11 }
  0x14   : > { %p9311_p3 = por %p9310_p2, %p9309_p1 }
  0x16   : > { %p9312_p4 = pnand %p9311_p3, %p9305_p12 }
  0x18   : > { %9315 = shalt.err (!%p9312_p4)
}
  0x19   : > { %s9316_s19 = scalar_lea.vmem %s9479_s24, 264192  ;;  %s9367_s23 = smov [#allocation3]  }
  0x1a   : > { %p9317_p5 = scmp.ne.s32.totalorder %s9479_s24, %s9316_s19  ;;  %s9321_s25 = sshll.u32 %s9367_s23, 4  ;;  %s9322_s25 = int_to_ptr.vmem [resolvable:$false] %s9321_s25 }
  0x1b   : > { %s9323_s26 = scalar_lea.vmem %s9322_s25, 528384  ;;  %p9324_p11 = scmp.lt.s32.totalorder %s9479_s24, %s9322_s25 }
  0x1c   : > { %p9319_p6 = pnand %p9317_p5, %p9303_p10  ;;  %p9325_p13 = scmp.lt.s32.totalorder %s9323_s26, %s9316_s19 }
  0x1e   : > { %p9320_p9 = pneg %p9319_p6  ;;  %p9326_p0 = por %p9325_p13, %p9324_p11 }
  0x20   : > { %p9327_p1 = pnand %p9326_p0, %p9320_p9 }
  0x22   : > { %9330 = shalt.err (!%p9327_p1)
}
  0x23   : > { %s9368_s29 = smov 384   ;;  %s9369_s30 = smov 24  }
  0x24   : > { %9223 = dma.hbm_to_vmem [thread:$0]  (!%p9469_p8), %s9477_s27, 264192, %s9479_s24, %s9481_s28, %s9368_s29, %s9368_s29, %s9369_s30  }
  0x25   : > { %p6121_p10 = scmp.ge.s32.totalorder %s9365_s12, 1  ;;  %p310_p12 = scmp.lt.s32.totalorder %s9365_s12, 5 }
  0x27   : > { %p311_p2 = pnand %p6121_p10, %p310_p12 }
  0x28   : > { %s316_s15 = sand.u32 (!%p311_p2), 1, %s9357_s10  }
  0x29   : > { %314 = sbr.rel (%p311_p2) target bundleno = 2059 (0x80b), region = 56  ;;  %s317_s20 = scalar_lea.sflag (!%p311_p2), [#allocation4], %s316_s15 }
  0x2a   : > { %s9217_s16 = smul.u32 (!%p311_p2), 16512, %s316_s15 }
  0x2c   : > { %s9512_s22 = scalar_lea.vmem (!%p311_p2), [#allocation3], %s9217_s16 }
  0x30   : > { %9348 = dma.done.wait (%p9464_p7), %s317_s20, 264192  }
  0x31   : > { %9350 = vsyncadd (%p9464_p7), %s317_s20, 4294703104  ;;  %s355_s19 = smul.u32 43, %s9447_s13  ;;  %p6123_p8 = scmp.ne.s32.totalorder %s9447_s13, 0 }
  0x32   : > { %vm368_vm0 = vcmask (!%p6123_p8), 359424   ;;  %v9370_v0 = vmov (!%p6123_p8), 0.0  }
  0x33   : > { %p356_p3 = scmp.lt.s32.totalorder %s355_s19, 171  ;;  %365 = sbr.rel (%p6123_p8) target bundleno = 58 (0x3a), region = 64  ;;  %366 = vst [vmem:[#allocation2] sm:$0xff] (!%p6123_p8), %v9370_v0  ;;  %367 = vst [vmem:[#allocation2 + $0x8] sm:$0xff] (!%p6123_p8), %v9370_v0 }
  0x34   : > { %369 = vst.msk [vmem:[#allocation2 + $0x10] sm:$0xff] (!%p6123_p8), %vm368_vm0, %v9370_v0 }
  0x35   : > { %s12190_s19 = smov (!%p356_p3, %s355_s19), 171 }
  0x36   : > { %s6122_s21 = sshll.u32 %s12190_s19, 3 }
  0x37   : > { %s9522_s27 = scalar_lea.vmem %s12173_s0, %s6122_s21 }
  0x3a PF: > { %v417_v1 = vld [vmem:[%s9512_s22 + $0x8] sm:$0xff]  ;;  %v420_v2 = vld [vmem:[%s9512_s22 + $0x20] sm:$0xff]  ;;  %v419_v7 = vld [vmem:[%s9512_s22 + $0x18] sm:$0xff]  ;;  %vm9372_vm1 = vmmov 0   ;;  %vm5587_vm2 = vcmask 359424   ;;  %p6124_p7 = scmp.ne.s32.totalorder %s9447_s13, 3 }
  0x3b   : > { %v897_v3 = vld [vmem:[%s9512_s22 + $0xf08] sm:$0xff]  ;;  %v6965_v4 = vpack.c.bf16 %v420_v2, %v417_v1  ;;  %v900_v5 = vld [vmem:[%s9512_s22 + $0xf20] sm:$0xff]  ;;  %v899_v11 = vld [vmem:[%s9512_s22 + $0xf18] sm:$0xff]  ;;  %vm5710_vm3 = vcmask (!%p6124_p7), 1043456   ;;  %vm9376_vm4 = vmmov (!%p6124_p7), 1   ;;  %vm5893_vm6 = vcmask (!%p6124_p7), 588800  }
  0x3c   : > { %v416_v6 = vld [vmem:[%s9512_s22] sm:$0xff]  ;;  %v7285_v8 = vpack.c.bf16 %v900_v5, %v897_v3  ;;  %v423_v12 = vld [vmem:[%s9512_s22 + $0x38] sm:$0xff]  ;;  %v426_v14 = vld [vmem:[%s9512_s22 + $0x50] sm:$0xff]  ;;  %vm9377_vm7 = vmmov (!%p6124_p7), 0   ;;  %vm5988_vm8 = vcmask (!%p6124_p7), 818176  }
  0x3d   : > { %v6967_v9 = vpack.c.bf16 %v419_v7, %v416_v6  ;;  %v896_v10 = vld [vmem:[%s9512_s22 + $0xf00] sm:$0xff]  ;;  %6966 = vmatprep.subr.bf16.mxu1 %v6965_v4  ;;  %v903_v15 = vld [vmem:[%s9512_s22 + $0xf38] sm:$0xff]  ;;  %v906_v16 = vld [vmem:[%s9512_s22 + $0xf50] sm:$0xff]  ;;  %v6969_v17 = vpack.c.bf16 %v426_v14, %v423_v12 }
  0x3e   : > { %v7287_v13 = vpack.c.bf16 %v899_v11, %v896_v10  ;;  %7286 = vmatprep.subr.bf16.mxu0 %v7285_v8  ;;  %v7289_v18 = vpack.c.bf16 %v906_v16, %v903_v15  ;;  %v422_v19 = vld [vmem:[%s9512_s22 + $0x30] sm:$0xff]  ;;  %v425_v20 = vld [vmem:[%s9512_s22 + $0x48] sm:$0xff]  ;;  %v432_v25 = vld [vmem:[%s9512_s22 + $0x80] sm:$0xff] }
  0x3f   : > { %6968 = vmatpush1.bf16.msra.mxu1 %v6967_v9  ;;  %v902_v21 = vld [vmem:[%s9512_s22 + $0xf30] sm:$0xff]  ;;  %v6971_v22 = vpack.c.bf16 %v425_v20, %v422_v19  ;;  %v905_v23 = vld [vmem:[%s9512_s22 + $0xf48] sm:$0xff]  ;;  %v912_v29 = vld [vmem:[%s9512_s22 + $0xf80] sm:$0xff] }
  0x40   : > { %7288 = vmatpush1.bf16.msra.mxu0 %v7287_v13  ;;  %v429_v24 = vld [vmem:[%s9512_s22 + $0x68] sm:$0xff]  ;;  %6970 = vmatprep.subr.bf16.mxu1 %v6969_v17  ;;  %v7291_v26 = vpack.c.bf16 %v905_v23, %v902_v21  ;;  %v428_v30 = vld [vmem:[%s9512_s22 + $0x60] sm:$0xff]  ;;  %v431_v32 = vld [vmem:[%s9512_s22 + $0x78] sm:$0xff] }
  0x41   : > { %7290 = vmatprep.subr.bf16.mxu0 %v7289_v18  ;;  %v6973_v27 = vpack.c.bf16 %v432_v25, %v429_v24  ;;  %v909_v28 = vld [vmem:[%s9512_s22 + $0xf68] sm:$0xff]  ;;  %v908_v33 = vld [vmem:[%s9512_s22 + $0xf60] sm:$0xff]  ;;  %v911_v34 = vld [vmem:[%s9512_s22 + $0xf78] sm:$0xff]  ;;  %v6975_v35 = vpack.c.bf16 %v431_v32, %v428_v30 }
  0x42   : > { %v7293_v31 = vpack.c.bf16 %v912_v29, %v909_v28  ;;  %v435_v36 = vld [vmem:[%s9512_s22 + $0x98] sm:$0xff]  ;;  %v438_v37 = vld [vmem:[%s9512_s22 + $0xb0] sm:$0xff]  ;;  %v7295_v39 = vpack.c.bf16 %v911_v34, %v908_v33  ;;  %v437_v43 = vld [vmem:[%s9512_s22 + $0xa8] sm:$0xff] }
  0x43   : > { %6972 = vmatpush1.bf16.msra.mxu1 %v6971_v22  ;;  %v915_v38 = vld [vmem:[%s9512_s22 + $0xf98] sm:$0xff]  ;;  %v6977_v40 = vpack.c.bf16 %v438_v37, %v435_v36  ;;  %v918_v41 = vld [vmem:[%s9512_s22 + $0xfb0] sm:$0xff]  ;;  %v917_v46 = vld [vmem:[%s9512_s22 + $0xfa8] sm:$0xff] }
  0x44   : > { %7292 = vmatpush1.bf16.msra.mxu0 %v7291_v26  ;;  %6974 = vmatprep.subr.bf16.mxu1 %v6973_v27  ;;  %v434_v42 = vld [vmem:[%s9512_s22 + $0x90] sm:$0xff]  ;;  %v7297_v44 = vpack.c.bf16 %v918_v41, %v915_v38  ;;  %v441_v47 = vld [vmem:[%s9512_s22 + $0xc8] sm:$0xff]  ;;  %v444_v48 = vld [vmem:[%s9512_s22 + $0xe0] sm:$0xff] }
  0x45   : > { %7294 = vmatprep.subr.bf16.mxu0 %v7293_v31  ;;  %v914_v45 = vld [vmem:[%s9512_s22 + $0xf90] sm:$0xff]  ;;  %v921_v49 = vld [vmem:[%s9512_s22 + $0xfc8] sm:$0xff]  ;;  %v924_v50 = vld [vmem:[%s9512_s22 + $0xfe0] sm:$0xff]  ;;  %v6979_v51 = vpack.c.bf16 %v437_v43, %v434_v42  ;;  %v6981_v53 = vpack.c.bf16 %v444_v48, %v441_v47 }
  0x46   : > { %v7299_v52 = vpack.c.bf16 %v917_v46, %v914_v45  ;;  %v440_v54 = vld [vmem:[%s9512_s22 + $0xc0] sm:$0xff]  ;;  %v443_v55 = vld [vmem:[%s9512_s22 + $0xd8] sm:$0xff]  ;;  %v7301_v57 = vpack.c.bf16 %v924_v50, %v921_v49  ;;  %v450_v60 = vld [vmem:[%s9512_s22 + $0x110] sm:$0xff] }
  0x47   : > { %6976 = vmatpush1.bf16.msra.mxu1 %v6975_v35  ;;  %v920_v56 = vld [vmem:[%s9512_s22 + $0xfc0] sm:$0xff]  ;;  %v923_v58 = vld [vmem:[%s9512_s22 + $0xfd8] sm:$0xff]  ;;  %v930_v62 = vld [vmem:[%s9512_s22 + $0x1010] sm:$0xff]  ;;  %v6983_v63 = vpack.c.bf16 %v443_v55, %v440_v54 }
  0x48   : > { %7296 = vmatpush1.bf16.msra.mxu0 %v7295_v39  ;;  %6978 = vmatprep.subr.bf16.mxu1 %v6977_v40  ;;  %v447_v59 = vld [vmem:[%s9512_s22 + $0xf8] sm:$0xff]  ;;  %v7303_v0 = vpack.c.bf16 %v923_v58, %v920_v56  ;;  %v446_v2 = vld [vmem:[%s9512_s22 + $0xf0] sm:$0xff]  ;;  %v449_v3 = vld [vmem:[%s9512_s22 + $0x108] sm:$0xff] }
  0x49   : > { %7298 = vmatprep.subr.bf16.mxu0 %v7297_v44  ;;  %v927_v61 = vld [vmem:[%s9512_s22 + $0xff8] sm:$0xff]  ;;  %v6985_v1 = vpack.c.bf16 %v450_v60, %v447_v59  ;;  %v926_v4 = vld [vmem:[%s9512_s22 + $0xff0] sm:$0xff]  ;;  %v929_v6 = vld [vmem:[%s9512_s22 + $0x1008] sm:$0xff]  ;;  %v6987_v11 = vpack.c.bf16 %v449_v3, %v446_v2 }
  0x4a   : > { %v7305_v5 = vpack.c.bf16 %v930_v62, %v927_v61  ;;  %v453_v7 = vld [vmem:[%s9512_s22 + $0x128] sm:$0xff]  ;;  %v456_v8 = vld [vmem:[%s9512_s22 + $0x140] sm:$0xff]  ;;  %v7307_v12 = vpack.c.bf16 %v929_v6, %v926_v4  ;;  %v455_v15 = vld [vmem:[%s9512_s22 + $0x138] sm:$0xff] }
  0x4b   : > { %6980 = vmatpush1.bf16.msra.mxu1 %v6979_v51  ;;  %v933_v9 = vld [vmem:[%s9512_s22 + $0x1028] sm:$0xff]  ;;  %v936_v10 = vld [vmem:[%s9512_s22 + $0x1040] sm:$0xff]  ;;  %v6989_v13 = vpack.c.bf16 %v456_v8, %v453_v7  ;;  %v935_v18 = vld [vmem:[%s9512_s22 + $0x1038] sm:$0xff] }
  0x4c   : > { %7300 = vmatpush1.bf16.msra.mxu0 %v7299_v52  ;;  %6982 = vmatprep.subr.bf16.mxu1 %v6981_v53  ;;  %v452_v14 = vld [vmem:[%s9512_s22 + $0x120] sm:$0xff]  ;;  %v7309_v17 = vpack.c.bf16 %v936_v10, %v933_v9  ;;  %v459_v19 = vld [vmem:[%s9512_s22 + $0x158] sm:$0xff]  ;;  %v462_v20 = vld [vmem:[%s9512_s22 + $0x170] sm:$0xff] }
  0x4d   : > { %7302 = vmatprep.subr.bf16.mxu0 %v7301_v57  ;;  %v932_v16 = vld [vmem:[%s9512_s22 + $0x1020] sm:$0xff]  ;;  %v939_v21 = vld [vmem:[%s9512_s22 + $0x1058] sm:$0xff]  ;;  %v942_v22 = vld [vmem:[%s9512_s22 + $0x1070] sm:$0xff]  ;;  %v6991_v23 = vpack.c.bf16 %v455_v15, %v452_v14  ;;  %v6993_v25 = vpack.c.bf16 %v462_v20, %v459_v19 }
  0x4e   : > { %v7311_v24 = vpack.c.bf16 %v935_v18, %v932_v16  ;;  %v458_v26 = vld [vmem:[%s9512_s22 + $0x150] sm:$0xff]  ;;  %v461_v27 = vld [vmem:[%s9512_s22 + $0x168] sm:$0xff]  ;;  %v7313_v29 = vpack.c.bf16 %v942_v22, %v939_v21  ;;  %v468_v32 = vld [vmem:[%s9512_s22 + $0x1a0] sm:$0xff] }
  0x4f   : > { %6984 = vmatpush1.bf16.msra.mxu1 %v6983_v63  ;;  %v938_v28 = vld [vmem:[%s9512_s22 + $0x1050] sm:$0xff]  ;;  %v941_v30 = vld [vmem:[%s9512_s22 + $0x1068] sm:$0xff]  ;;  %v948_v34 = vld [vmem:[%s9512_s22 + $0x10a0] sm:$0xff]  ;;  %v6995_v35 = vpack.c.bf16 %v461_v27, %v458_v26 }
  0x50   : > { %7304 = vmatpush1.bf16.msra.mxu0 %v7303_v0  ;;  %6986 = vmatprep.subr.bf16.mxu1 %v6985_v1  ;;  %v465_v31 = vld [vmem:[%s9512_s22 + $0x188] sm:$0xff]  ;;  %v7315_v36 = vpack.c.bf16 %v941_v30, %v938_v28  ;;  %v464_v38 = vld [vmem:[%s9512_s22 + $0x180] sm:$0xff]  ;;  %v467_v39 = vld [vmem:[%s9512_s22 + $0x198] sm:$0xff] }
  0x51   : > { %7306 = vmatprep.subr.bf16.mxu0 %v7305_v5  ;;  %v945_v33 = vld [vmem:[%s9512_s22 + $0x1088] sm:$0xff]  ;;  %v6997_v37 = vpack.c.bf16 %v468_v32, %v465_v31  ;;  %v944_v40 = vld [vmem:[%s9512_s22 + $0x1080] sm:$0xff]  ;;  %v947_v42 = vld [vmem:[%s9512_s22 + $0x1098] sm:$0xff]  ;;  %v6999_v47 = vpack.c.bf16 %v467_v39, %v464_v38 }
  0x52   : > { %v7317_v41 = vpack.c.bf16 %v948_v34, %v945_v33  ;;  %v471_v43 = vld [vmem:[%s9512_s22 + $0x1b8] sm:$0xff]  ;;  %v474_v44 = vld [vmem:[%s9512_s22 + $0x1d0] sm:$0xff]  ;;  %v7319_v48 = vpack.c.bf16 %v947_v42, %v944_v40  ;;  %v473_v51 = vld [vmem:[%s9512_s22 + $0x1c8] sm:$0xff] }
  0x53   : > { %6988 = vmatpush1.bf16.msra.mxu1 %v6987_v11  ;;  %v951_v45 = vld [vmem:[%s9512_s22 + $0x10b8] sm:$0xff]  ;;  %v954_v46 = vld [vmem:[%s9512_s22 + $0x10d0] sm:$0xff]  ;;  %v7001_v49 = vpack.c.bf16 %v474_v44, %v471_v43  ;;  %v953_v54 = vld [vmem:[%s9512_s22 + $0x10c8] sm:$0xff] }
  0x54   : > { %7308 = vmatpush1.bf16.msra.mxu0 %v7307_v12  ;;  %6990 = vmatprep.subr.bf16.mxu1 %v6989_v13  ;;  %v470_v50 = vld [vmem:[%s9512_s22 + $0x1b0] sm:$0xff]  ;;  %v7321_v53 = vpack.c.bf16 %v954_v46, %v951_v45  ;;  %v477_v55 = vld [vmem:[%s9512_s22 + $0x1e8] sm:$0xff]  ;;  %v480_v56 = vld [vmem:[%s9512_s22 + $0x200] sm:$0xff] }
  0x55   : > { %7310 = vmatprep.subr.bf16.mxu0 %v7309_v17  ;;  %v950_v52 = vld [vmem:[%s9512_s22 + $0x10b0] sm:$0xff]  ;;  %v957_v57 = vld [vmem:[%s9512_s22 + $0x10e8] sm:$0xff]  ;;  %v960_v58 = vld [vmem:[%s9512_s22 + $0x1100] sm:$0xff]  ;;  %v7003_v59 = vpack.c.bf16 %v473_v51, %v470_v50  ;;  %v7005_v61 = vpack.c.bf16 %v480_v56, %v477_v55 }
  0x56   : > { %v7323_v60 = vpack.c.bf16 %v953_v54, %v950_v52  ;;  %v476_v62 = vld [vmem:[%s9512_s22 + $0x1e0] sm:$0xff]  ;;  %v479_v63 = vld [vmem:[%s9512_s22 + $0x1f8] sm:$0xff]  ;;  %v7325_v1 = vpack.c.bf16 %v960_v58, %v957_v57  ;;  %v486_v4 = vld [vmem:[%s9512_s22 + $0x230] sm:$0xff] }
  0x57   : > { %6992 = vmatpush1.bf16.msra.mxu1 %v6991_v23  ;;  %v956_v0 = vld [vmem:[%s9512_s22 + $0x10e0] sm:$0xff]  ;;  %v959_v2 = vld [vmem:[%s9512_s22 + $0x10f8] sm:$0xff]  ;;  %v966_v6 = vld [vmem:[%s9512_s22 + $0x1130] sm:$0xff]  ;;  %v7007_v7 = vpack.c.bf16 %v479_v63, %v476_v62 }
  0x58   : > { %7312 = vmatpush1.bf16.msra.mxu0 %v7311_v24  ;;  %6994 = vmatprep.subr.bf16.mxu1 %v6993_v25  ;;  %v483_v3 = vld [vmem:[%s9512_s22 + $0x218] sm:$0xff]  ;;  %v482_v8 = vld [vmem:[%s9512_s22 + $0x210] sm:$0xff]  ;;  %v7327_v9 = vpack.c.bf16 %v959_v2, %v956_v0  ;;  %v485_v11 = vld [vmem:[%s9512_s22 + $0x228] sm:$0xff] }
  0x59   : > { %7314 = vmatprep.subr.bf16.mxu0 %v7313_v29  ;;  %v963_v5 = vld [vmem:[%s9512_s22 + $0x1118] sm:$0xff]  ;;  %v7009_v10 = vpack.c.bf16 %v486_v4, %v483_v3  ;;  %v962_v12 = vld [vmem:[%s9512_s22 + $0x1110] sm:$0xff]  ;;  %v965_v13 = vld [vmem:[%s9512_s22 + $0x1128] sm:$0xff]  ;;  %v7011_v21 = vpack.c.bf16 %v485_v11, %v482_v8 }
  0x5a   : > { %v7329_v14 = vpack.c.bf16 %v966_v6, %v963_v5  ;;  %v489_v15 = vld [vmem:[%s9512_s22 + $0x248] sm:$0xff]  ;;  %v492_v16 = vld [vmem:[%s9512_s22 + $0x260] sm:$0xff]  ;;  %v374_v17 = vld [vmem:[%s9522_s27 + $0x8] sm:$0xff]  ;;  %v7331_v22 = vpack.c.bf16 %v965_v13, %v962_v12 }
  0x5b   : > { %6996 = vmatpush1.bf16.msra.mxu1 %v6995_v35  ;;  %v969_v18 = vld [vmem:[%s9512_s22 + $0x1148] sm:$0xff]  ;;  %v972_v19 = vld [vmem:[%s9512_s22 + $0x1160] sm:$0xff]  ;;  %2544 = vmatprep.mubr.f32.mxu1 %v374_v17  ;;  %v7013_v23 = vpack.c.bf16 %v492_v16, %v489_v15  ;;  %v491_v25 = vld [vmem:[%s9512_s22 + $0x258] sm:$0xff] }
  0x5c   : > { %7316 = vmatpush1.bf16.msra.mxu0 %v7315_v36  ;;  %6998 = vmatprep.subr.bf16.mxu1 %v6997_v37  ;;  %v384_v20 = vld [vmem:[%s9522_s27 + $0x58] sm:$0xff]  ;;  %v7333_v27 = vpack.c.bf16 %v972_v19, %v969_v18  ;;  %v971_v28 = vld [vmem:[%s9512_s22 + $0x1158] sm:$0xff]  ;;  %v498_v30 = vld [vmem:[%s9512_s22 + $0x290] sm:$0xff] }
  0x5d   : > { %7318 = vmatprep.subr.bf16.mxu0 %v7317_v41  ;;  %2899 = vmatprep.mubr.f32.mxu0 %v384_v20  ;;  %v488_v24 = vld [vmem:[%s9512_s22 + $0x240] sm:$0xff]  ;;  %v495_v29 = vld [vmem:[%s9512_s22 + $0x278] sm:$0xff]  ;;  %v978_v32 = vld [vmem:[%s9512_s22 + $0x1190] sm:$0xff] }
  0x5e   : > { %v968_v26 = vld [vmem:[%s9512_s22 + $0x1140] sm:$0xff]  ;;  %v975_v31 = vld [vmem:[%s9512_s22 + $0x1178] sm:$0xff]  ;;  %v7015_v33 = vpack.c.bf16 %v491_v25, %v488_v24  ;;  %v7017_v35 = vpack.c.bf16 %v498_v30, %v495_v29  ;;  %v494_v36 = vld [vmem:[%s9512_s22 + $0x270] sm:$0xff] }
  0x5f   : > { %7000 = vmatpush1.bf16.msra.mxu1 %v6999_v47  ;;  %v7335_v34 = vpack.c.bf16 %v971_v28, %v968_v26  ;;  %v497_v37 = vld [vmem:[%s9512_s22 + $0x288] sm:$0xff]  ;;  %v974_v38 = vld [vmem:[%s9512_s22 + $0x1170] sm:$0xff]  ;;  %v7337_v39 = vpack.c.bf16 %v978_v32, %v975_v31  ;;  %v504_v42 = vld [vmem:[%s9512_s22 + $0x2c0] sm:$0xff] }
  0x60   : > { %7320 = vmatpush1.bf16.msra.mxu0 %v7319_v48  ;;  %7002 = vmatprep.subr.bf16.mxu1 %v7001_v49  ;;  %v977_v40 = vld [vmem:[%s9512_s22 + $0x1188] sm:$0xff]  ;;  %v984_v44 = vld [vmem:[%s9512_s22 + $0x11c0] sm:$0xff]  ;;  %v7019_v45 = vpack.c.bf16 %v497_v37, %v494_v36  ;;  %v503_v49 = vld [vmem:[%s9512_s22 + $0x2b8] sm:$0xff] }
  0x61   : > { %7322 = vmatprep.subr.bf16.mxu0 %v7321_v53  ;;  %v501_v41 = vld [vmem:[%s9512_s22 + $0x2a8] sm:$0xff]  ;;  %v7339_v46 = vpack.c.bf16 %v977_v40, %v974_v38  ;;  %v500_v48 = vld [vmem:[%s9512_s22 + $0x2a0] sm:$0xff]  ;;  %v983_v52 = vld [vmem:[%s9512_s22 + $0x11b8] sm:$0xff] }
  0x62   : > { %v981_v43 = vld [vmem:[%s9512_s22 + $0x11a8] sm:$0xff]  ;;  %v7021_v47 = vpack.c.bf16 %v504_v42, %v501_v41  ;;  %v980_v50 = vld [vmem:[%s9512_s22 + $0x11a0] sm:$0xff]  ;;  %v507_v53 = vld [vmem:[%s9512_s22 + $0x2d8] sm:$0xff]  ;;  %v7023_v57 = vpack.c.bf16 %v503_v49, %v500_v48 }
  0x63   : > { %7004 = vmatpush1.bf16.msra.mxu1 %v7003_v59  ;;  %v7341_v51 = vpack.c.bf16 %v984_v44, %v981_v43  ;;  %v510_v54 = vld [vmem:[%s9512_s22 + $0x2f0] sm:$0xff]  ;;  %v987_v55 = vld [vmem:[%s9512_s22 + $0x11d8] sm:$0xff]  ;;  %v7343_v58 = vpack.c.bf16 %v983_v52, %v980_v50  ;;  %v989_v0 = vld [vmem:[%s9512_s22 + $0x11e8] sm:$0xff] }
  0x64   : > { %7324 = vmatpush1.bf16.msra.mxu0 %v7323_v60  ;;  %7006 = vmatprep.subr.bf16.mxu1 %v7005_v61  ;;  %v990_v56 = vld [vmem:[%s9512_s22 + $0x11f0] sm:$0xff]  ;;  %v7025_v59 = vpack.c.bf16 %v510_v54, %v507_v53  ;;  %v509_v61 = vld [vmem:[%s9512_s22 + $0x2e8] sm:$0xff]  ;;  %v516_v2 = vld [vmem:[%s9512_s22 + $0x320] sm:$0xff] }
  0x65   : > { %7326 = vmatprep.subr.bf16.mxu0 %v7325_v1  ;;  %v506_v60 = vld [vmem:[%s9512_s22 + $0x2d0] sm:$0xff]  ;;  %v7345_v63 = vpack.c.bf16 %v990_v56, %v987_v55  ;;  %v513_v1 = vld [vmem:[%s9512_s22 + $0x308] sm:$0xff]  ;;  %v996_v4 = vld [vmem:[%s9512_s22 + $0x1220] sm:$0xff] }
  0x66   : > { %v986_v62 = vld [vmem:[%s9512_s22 + $0x11d0] sm:$0xff]  ;;  %v993_v3 = vld [vmem:[%s9512_s22 + $0x1208] sm:$0xff]  ;;  %v7027_v5 = vpack.c.bf16 %v509_v61, %v506_v60  ;;  %v512_v8 = vld [vmem:[%s9512_s22 + $0x300] sm:$0xff] }
  0x67   : > { %7008 = vmatpush1.bf16.msra.mxu1 %v7007_v7  ;;  %v7347_v6 = vpack.c.bf16 %v989_v0, %v986_v62  ;;  %v7029_v7 = vpack.c.bf16 %v516_v2, %v513_v1  ;;  %v7349_v11 = vpack.c.bf16 %v996_v4, %v993_v3  ;;  %v995_v12 = vld [vmem:[%s9512_s22 + $0x1218] sm:$0xff]  ;;  %v1002_v16 = vld [vmem:[%s9512_s22 + $0x1250] sm:$0xff]  ;;  %v373_v17 = vld [vmem:[%s9522_s27] sm:$0xff] }
  0x68   : > { %7328 = vmatpush1.bf16.msra.mxu0 %v7327_v9  ;;  %7010 = vmatprep.subr.bf16.mxu1 %v7009_v10  ;;  %v515_v9 = vld [vmem:[%s9512_s22 + $0x318] sm:$0xff]  ;;  %v992_v10 = vld [vmem:[%s9512_s22 + $0x1200] sm:$0xff]  ;;  %v998_v24 = vld [vmem:[%s9512_s22 + $0x1230] sm:$0xff] }
  0x69   : > { %7330 = vmatprep.subr.bf16.mxu0 %v7329_v14  ;;  %v519_v13 = vld [vmem:[%s9512_s22 + $0x338] sm:$0xff]  ;;  %v522_v14 = vld [vmem:[%s9512_s22 + $0x350] sm:$0xff]  ;;  %v7031_v18 = vpack.c.bf16 %v515_v9, %v512_v8  ;;  %v7351_v20 = vpack.c.bf16 %v995_v12, %v992_v10  ;;  %v1001_v26 = vld [vmem:[%s9512_s22 + $0x1248] sm:$0xff] }
  0x6a   : > { %v999_v15 = vld [vmem:[%s9512_s22 + $0x1238] sm:$0xff]  ;;  %v528_v28 = vld [vmem:[%s9512_s22 + $0x380] sm:$0xff]  ;;  %v1005_v29 = vld [vmem:[%s9512_s22 + $0x1268] sm:$0xff]  ;;  %v7355_v32 = vpack.c.bf16 %v1001_v26, %v998_v24 }
  0x6b   : > { %7012 = vmatpush1.bf16.msra.mxu1 %v7011_v21  ;;  %v383_v19 = vld [vmem:[%s9522_s27 + $0x50] sm:$0xff]  ;;  %v7033_v21 = vpack.c.bf16 %v522_v14, %v519_v13  ;;  %v7353_v25 = vpack.c.bf16 %v1002_v16, %v999_v15  ;;  %v1008_v30 = vld [vmem:[%s9512_s22 + $0x1280] sm:$0xff]  ;;  %v534_v40 = vld [vmem:[%s9512_s22 + $0x3b0] sm:$0xff] }
  0x6c   : > { %7332 = vmatpush1.bf16.msra.mxu0 %v7331_v22  ;;  %7014 = vmatprep.subr.bf16.mxu1 %v7013_v23  ;;  %v518_v22 = vld [vmem:[%s9512_s22 + $0x330] sm:$0xff]  ;;  %v521_v23 = vld [vmem:[%s9512_s22 + $0x348] sm:$0xff]  ;;  %v1004_v36 = vld [vmem:[%s9512_s22 + $0x1260] sm:$0xff]  ;;  %v7357_v37 = vpack.c.bf16 %v1008_v30, %v1005_v29 }
  0x6d   : > { %7334 = vmatprep.subr.bf16.mxu0 %v7333_v27  ;;  %v525_v27 = vld [vmem:[%s9512_s22 + $0x368] sm:$0xff]  ;;  %v7035_v31 = vpack.c.bf16 %v521_v23, %v518_v22  ;;  %v1007_v38 = vld [vmem:[%s9512_s22 + $0x1278] sm:$0xff]  ;;  %v1014_v42 = vld [vmem:[%s9512_s22 + $0x12b0] sm:$0xff] }
  0x6e   : > { %v1011_v41 = vld [vmem:[%s9512_s22 + $0x1298] sm:$0xff]  ;;  %v7359_v44 = vpack.c.bf16 %v1007_v38, %v1004_v36  ;;  %v1010_v48 = vld [vmem:[%s9512_s22 + $0x1290] sm:$0xff]  ;;  %v1013_v50 = vld [vmem:[%s9512_s22 + $0x12a8] sm:$0xff] }
  0x6f   : > { %7016 = vmatpush1.bf16.msra.mxu1 %v7015_v33  ;;  %v7037_v33 = vpack.c.bf16 %v528_v28, %v525_v27  ;;  %v7361_v49 = vpack.c.bf16 %v1014_v42, %v1011_v41  ;;  %v540_v52 = vld [vmem:[%s9512_s22 + $0x3e0] sm:$0xff]  ;;  %v1017_v53 = vld [vmem:[%s9512_s22 + $0x12c8] sm:$0xff]  ;;  %v7363_v56 = vpack.c.bf16 %v1013_v50, %v1010_v48  ;;  %v1019_v62 = vld [vmem:[%s9512_s22 + $0x12d8] sm:$0xff] }
  0x70   : > { %7336 = vmatpush1.bf16.msra.mxu0 %v7335_v34  ;;  %7018 = vmatprep.subr.bf16.mxu1 %v7017_v35  ;;  %v524_v34 = vld [vmem:[%s9512_s22 + $0x360] sm:$0xff]  ;;  %v527_v35 = vld [vmem:[%s9512_s22 + $0x378] sm:$0xff]  ;;  %v546_v0 = vld [vmem:[%s9512_s22 + $0x410] sm:$0xff] }
  0x71   : > { %7338 = vmatprep.subr.bf16.mxu0 %v7337_v39  ;;  %v531_v39 = vld [vmem:[%s9512_s22 + $0x398] sm:$0xff]  ;;  %v7039_v43 = vpack.c.bf16 %v527_v35, %v524_v34  ;;  %v1020_v54 = vld [vmem:[%s9512_s22 + $0x12e0] sm:$0xff]  ;;  %v1026_v2 = vld [vmem:[%s9512_s22 + $0x1310] sm:$0xff] }
  0x72   : > { %v1016_v60 = vld [vmem:[%s9512_s22 + $0x12c0] sm:$0xff]  ;;  %v7365_v61 = vpack.c.bf16 %v1020_v54, %v1017_v53  ;;  %v1023_v1 = vld [vmem:[%s9512_s22 + $0x12f8] sm:$0xff]  ;;  %v1022_v8 = vld [vmem:[%s9512_s22 + $0x12f0] sm:$0xff] }
  0x73   : > { %7020 = vmatpush1.bf16.msra.mxu1 %v7019_v45  ;;  %v7041_v45 = vpack.c.bf16 %v534_v40, %v531_v39  ;;  %v7367_v4 = vpack.c.bf16 %v1019_v62, %v1016_v60  ;;  %v7369_v9 = vpack.c.bf16 %v1026_v2, %v1023_v1  ;;  %v1025_v10 = vld [vmem:[%s9512_s22 + $0x1308] sm:$0xff]  ;;  %v552_v12 = vld [vmem:[%s9512_s22 + $0x440] sm:$0xff]  ;;  %v555_v23 = vld [vmem:[%s9512_s22 + $0x458] sm:$0xff] }
  0x74   : > { %7340 = vmatpush1.bf16.msra.mxu0 %v7339_v46  ;;  %7022 = vmatprep.subr.bf16.mxu1 %v7021_v47  ;;  %v530_v46 = vld [vmem:[%s9512_s22 + $0x390] sm:$0xff]  ;;  %v533_v47 = vld [vmem:[%s9512_s22 + $0x3a8] sm:$0xff]  ;;  %v1032_v14 = vld [vmem:[%s9512_s22 + $0x1340] sm:$0xff] }
  0x75   : > { %7342 = vmatprep.subr.bf16.mxu0 %v7341_v51  ;;  %v537_v51 = vld [vmem:[%s9512_s22 + $0x3c8] sm:$0xff]  ;;  %v7043_v55 = vpack.c.bf16 %v533_v47, %v530_v46  ;;  %v548_v16 = vld [vmem:[%s9512_s22 + $0x420] sm:$0xff]  ;;  %v558_v24 = vld [vmem:[%s9512_s22 + $0x470] sm:$0xff] }
  0x76   : > { %v1029_v13 = vld [vmem:[%s9512_s22 + $0x1328] sm:$0xff]  ;;  %v1035_v26 = vld [vmem:[%s9512_s22 + $0x1358] sm:$0xff]  ;;  %v1038_v27 = vld [vmem:[%s9512_s22 + $0x1370] sm:$0xff] }
  0x77   : > { %7024 = vmatpush1.bf16.msra.mxu1 %v7023_v57  ;;  %v7045_v57 = vpack.c.bf16 %v540_v52, %v537_v51  ;;  %v7373_v22 = vpack.c.bf16 %v1032_v14, %v1029_v13  ;;  %v386_v28 = vld [vmem:[%s9522_s27 + $0x68] sm:$0xff]  ;;  %v7377_v35 = vpack.c.bf16 %v1038_v27, %v1035_v26  ;;  %v1037_v36 = vld [vmem:[%s9512_s22 + $0x1368] sm:$0xff]  ;;  %v564_v38 = vld [vmem:[%s9512_s22 + $0x4a0] sm:$0xff] }
  0x78   : > { %7344 = vmatpush1.bf16.msra.mxu0 %v7343_v58  ;;  %7026 = vmatprep.subr.bf16.mxu1 %v7025_v59  ;;  %v536_v58 = vld [vmem:[%s9512_s22 + $0x3c0] sm:$0xff]  ;;  %v539_v59 = vld [vmem:[%s9512_s22 + $0x3d8] sm:$0xff]  ;;  %v1034_v34 = vld [vmem:[%s9512_s22 + $0x1350] sm:$0xff] }
  0x79   : > { %7346 = vmatprep.subr.bf16.mxu0 %v7345_v63  ;;  %v543_v63 = vld [vmem:[%s9512_s22 + $0x3f8] sm:$0xff]  ;;  %v7047_v3 = vpack.c.bf16 %v539_v59, %v536_v58  ;;  %v1041_v39 = vld [vmem:[%s9512_s22 + $0x1388] sm:$0xff]  ;;  %v1044_v40 = vld [vmem:[%s9512_s22 + $0x13a0] sm:$0xff]  ;;  %v7379_v42 = vpack.c.bf16 %v1037_v36, %v1034_v34 }
  0x7a   : > { %v1040_v46 = vld [vmem:[%s9512_s22 + $0x1380] sm:$0xff]  ;;  %v7381_v47 = vpack.c.bf16 %v1044_v40, %v1041_v39  ;;  %v1043_v48 = vld [vmem:[%s9512_s22 + $0x1398] sm:$0xff]  ;;  %v570_v50 = vld [vmem:[%s9512_s22 + $0x4d0] sm:$0xff] }
  0x7b   : > { %7028 = vmatpush1.bf16.msra.mxu1 %v7027_v5  ;;  %v7049_v5 = vpack.c.bf16 %v546_v0, %v543_v63  ;;  %v1047_v51 = vld [vmem:[%s9512_s22 + $0x13b8] sm:$0xff]  ;;  %v1050_v52 = vld [vmem:[%s9512_s22 + $0x13d0] sm:$0xff]  ;;  %v7383_v54 = vpack.c.bf16 %v1043_v48, %v1040_v46  ;;  %v1049_v60 = vld [vmem:[%s9512_s22 + $0x13c8] sm:$0xff] }
  0x7c   : > { %7348 = vmatpush1.bf16.msra.mxu0 %v7347_v6  ;;  %7030 = vmatprep.subr.bf16.mxu1 %v7029_v7  ;;  %v542_v6 = vld [vmem:[%s9512_s22 + $0x3f0] sm:$0xff]  ;;  %v545_v7 = vld [vmem:[%s9512_s22 + $0x408] sm:$0xff]  ;;  %v7385_v59 = vpack.c.bf16 %v1050_v52, %v1047_v51  ;;  %v576_v62 = vld [vmem:[%s9512_s22 + $0x500] sm:$0xff] }
  0x7d   : > { %7350 = vmatprep.subr.bf16.mxu0 %v7349_v11  ;;  %v549_v11 = vld [vmem:[%s9512_s22 + $0x428] sm:$0xff]  ;;  %v7051_v15 = vpack.c.bf16 %v545_v7, %v542_v6  ;;  %v1046_v58 = vld [vmem:[%s9512_s22 + $0x13b0] sm:$0xff]  ;;  %v1056_v0 = vld [vmem:[%s9512_s22 + $0x1400] sm:$0xff] }
  0x7e   : > { %2545 = vmatmul.mubr.f32.vlgmr.msra.gmra.mrb[0].mxu1 %v373_v17  ;;  %v7371_v17 = vpack.c.bf16 %v1025_v10, %v1022_v8  ;;  %v1053_v63 = vld [vmem:[%s9512_s22 + $0x13e8] sm:$0xff]  ;;  %v7387_v2 = vpack.c.bf16 %v1049_v60, %v1046_v58  ;;  %v1052_v6 = vld [vmem:[%s9512_s22 + $0x13e0] sm:$0xff]  ;;  %v1055_v8 = vld [vmem:[%s9512_s22 + $0x13f8] sm:$0xff] }
  0x7f   : > { %7032 = vmatpush1.bf16.msra.mxu1 %v7031_v18  ;;  %2900 = vmatmul.mubr.f32.vlgmr.msra.gmra.mrb[0].mxu0 %v383_v19  ;;  %v7053_v18 = vpack.c.bf16 %v552_v12, %v549_v11  ;;  %v551_v19 = vld [vmem:[%s9512_s22 + $0x438] sm:$0xff]  ;;  %v7389_v7 = vpack.c.bf16 %v1056_v0, %v1053_v63  ;;  %v582_v10 = vld [vmem:[%s9512_s22 + $0x530] sm:$0xff]  ;;  %v7391_v14 = vpack.c.bf16 %v1055_v8, %v1052_v6  ;;  %v600_v46 = vld [vmem:[%s9512_s22 + $0x5c0] sm:$0xff] }
  0x80   : > { %7352 = vmatpush1.bf16.msra.mxu0 %v7351_v20  ;;  %7034 = vmatprep.subr.bf16.mxu1 %v7033_v21  ;;  %v1028_v20 = vld [vmem:[%s9512_s22 + $0x1320] sm:$0xff]  ;;  %v1031_v21 = vld [vmem:[%s9512_s22 + $0x1338] sm:$0xff]  ;;  %v7055_v29 = vpack.c.bf16 %v551_v19, %v548_v16  ;;  %v1062_v12 = vld [vmem:[%s9512_s22 + $0x1430] sm:$0xff] }
  0x81   : > { %7354 = vmatprep.subr.bf16.mxu0 %v7353_v25  ;;  %v376_v25 = vld [vmem:[%s9522_s27 + $0x18] sm:$0xff]  ;;  %2970 = vmatprep.mubr.f32.mxu0 %v386_v28  ;;  %v7375_v30 = vpack.c.bf16 %v1031_v21, %v1028_v20  ;;  %v1059_v11 = vld [vmem:[%s9512_s22 + $0x1418] sm:$0xff]  ;;  %v578_v16 = vld [vmem:[%s9512_s22 + $0x510] sm:$0xff] }
  0x82   : > { %2615 = vmatprep.mubr.f32.mxu1 %v376_v25  ;;  %v7393_v19 = vpack.c.bf16 %v1062_v12, %v1059_v11  ;;  %v1061_v20 = vld [vmem:[%s9512_s22 + $0x1428] sm:$0xff]  ;;  %v584_v28 = vld [vmem:[%s9512_s22 + $0x540] sm:$0xff]  ;;  %v594_v34 = vld [vmem:[%s9512_s22 + $0x590] sm:$0xff] }
  0x83   : > { %7036 = vmatpush1.bf16.msra.mxu1 %v7035_v31  ;;  %v7057_v31 = vpack.c.bf16 %v558_v24, %v555_v23  ;;  %v585_v21 = vld [vmem:[%s9512_s22 + $0x548] sm:$0xff]  ;;  %v1068_v24 = vld [vmem:[%s9512_s22 + $0x1460] sm:$0xff]  ;;  %v1074_v36 = vld [vmem:[%s9512_s22 + $0x1490] sm:$0xff] }
  0x84   : > { %7356 = vmatpush1.bf16.msra.mxu0 %v7355_v32  ;;  %7038 = vmatprep.subr.bf16.mxu1 %v7037_v33  ;;  %v554_v32 = vld [vmem:[%s9512_s22 + $0x450] sm:$0xff]  ;;  %v557_v33 = vld [vmem:[%s9512_s22 + $0x468] sm:$0xff]  ;;  %v1080_v48 = vld [vmem:[%s9512_s22 + $0x14c0] sm:$0xff] }
  0x85   : > { %7358 = vmatprep.subr.bf16.mxu0 %v7357_v37  ;;  %v561_v37 = vld [vmem:[%s9512_s22 + $0x488] sm:$0xff]  ;;  %v7059_v41 = vpack.c.bf16 %v557_v33, %v554_v32  ;;  %v1067_v32 = vld [vmem:[%s9512_s22 + $0x1458] sm:$0xff]  ;;  %v590_v40 = vld [vmem:[%s9512_s22 + $0x570] sm:$0xff] }
  0x86   : > { %v1065_v23 = vld [vmem:[%s9512_s22 + $0x1448] sm:$0xff]  ;;  %v591_v33 = vld [vmem:[%s9512_s22 + $0x578] sm:$0xff]  ;;  %v596_v52 = vld [vmem:[%s9512_s22 + $0x5a0] sm:$0xff] }
  0x87   : > { %7040 = vmatpush1.bf16.msra.mxu1 %v7039_v43  ;;  %v7061_v43 = vpack.c.bf16 %v564_v38, %v561_v37  ;;  %v7081_v39 = vpack.c.bf16 %v594_v34, %v591_v33  ;;  %v606_v58 = vld [vmem:[%s9512_s22 + $0x5f0] sm:$0xff]  ;;  %v612_v6 = vld [vmem:[%s9512_s22 + $0x620] sm:$0xff]  ;;  %v1101_v33 = vld [vmem:[%s9512_s22 + $0x1568] sm:$0xff] }
  0x88   : > { %7360 = vmatpush1.bf16.msra.mxu0 %v7359_v44  ;;  %7042 = vmatprep.subr.bf16.mxu1 %v7041_v45  ;;  %v560_v44 = vld [vmem:[%s9512_s22 + $0x480] sm:$0xff]  ;;  %v563_v45 = vld [vmem:[%s9512_s22 + $0x498] sm:$0xff]  ;;  %v1086_v60 = vld [vmem:[%s9512_s22 + $0x14f0] sm:$0xff] }
  0x89   : > { %7362 = vmatprep.subr.bf16.mxu0 %v7361_v49  ;;  %v567_v49 = vld [vmem:[%s9512_s22 + $0x4b8] sm:$0xff]  ;;  %v7063_v53 = vpack.c.bf16 %v563_v45, %v560_v44  ;;  %v1073_v44 = vld [vmem:[%s9512_s22 + $0x1488] sm:$0xff]  ;;  %v602_v0 = vld [vmem:[%s9512_s22 + $0x5d0] sm:$0xff] }
  0x8a   : > { %v597_v45 = vld [vmem:[%s9512_s22 + $0x5a8] sm:$0xff]  ;;  %v1092_v8 = vld [vmem:[%s9512_s22 + $0x1520] sm:$0xff]  ;;  %vm9110_vm5 = vmpackc.low (!%p6124_p7), %vm5710_vm3, %vm9376_vm4 }
  0x8b   : > { %7044 = vmatpush1.bf16.msra.mxu1 %v7043_v55  ;;  %v7065_v55 = vpack.c.bf16 %v570_v50, %v567_v49  ;;  %v7085_v51 = vpack.c.bf16 %v600_v46, %v597_v45  ;;  %v608_v12 = vld [vmem:[%s9512_s22 + $0x600] sm:$0xff]  ;;  %v627_v45 = vld [vmem:[%s9512_s22 + $0x698] sm:$0xff]  ;;  %v630_v46 = vld [vmem:[%s9512_s22 + $0x6b0] sm:$0xff] }
  0x8c   : > { %7364 = vmatpush1.bf16.msra.mxu0 %v7363_v56  ;;  %7046 = vmatprep.subr.bf16.mxu1 %v7045_v57  ;;  %v566_v56 = vld [vmem:[%s9512_s22 + $0x4b0] sm:$0xff]  ;;  %v569_v57 = vld [vmem:[%s9512_s22 + $0x4c8] sm:$0xff]  ;;  %v1104_v34 = vld [vmem:[%s9512_s22 + $0x1580] sm:$0xff] }
  0x8d   : > { %7366 = vmatprep.subr.bf16.mxu0 %v7365_v61  ;;  %v573_v61 = vld [vmem:[%s9512_s22 + $0x4e8] sm:$0xff]  ;;  %v7067_v1 = vpack.c.bf16 %v569_v57, %v566_v56  ;;  %v1079_v56 = vld [vmem:[%s9512_s22 + $0x14b8] sm:$0xff] }
  0x8e   : > { %v603_v57 = vld [vmem:[%s9512_s22 + $0x5d8] sm:$0xff] }
  0x8f   : > { %7048 = vmatpush1.bf16.msra.mxu1 %v7047_v3  ;;  %v7069_v3 = vpack.c.bf16 %v576_v62, %v573_v61  ;;  %v7089_v63 = vpack.c.bf16 %v606_v58, %v603_v57  ;;  %v633_v57 = vld [vmem:[%s9512_s22 + $0x6c8] sm:$0xff]  ;;  %v636_v58 = vld [vmem:[%s9512_s22 + $0x6e0] sm:$0xff] }
  0x90   : > { %7368 = vmatpush1.bf16.msra.mxu0 %v7367_v4  ;;  %7050 = vmatprep.subr.bf16.mxu1 %v7049_v5  ;;  %v572_v4 = vld [vmem:[%s9512_s22 + $0x4e0] sm:$0xff]  ;;  %v575_v5 = vld [vmem:[%s9512_s22 + $0x4f8] sm:$0xff] }
  0x91   : > { %7370 = vmatprep.subr.bf16.mxu0 %v7369_v9  ;;  %v579_v9 = vld [vmem:[%s9512_s22 + $0x518] sm:$0xff]  ;;  %v7071_v13 = vpack.c.bf16 %v575_v5, %v572_v4  ;;  %v1085_v4 = vld [vmem:[%s9512_s22 + $0x14e8] sm:$0xff] }
  0x92   : > { %v609_v5 = vld [vmem:[%s9512_s22 + $0x608] sm:$0xff] }
  0x93   : > { %7052 = vmatpush1.bf16.msra.mxu1 %v7051_v15  ;;  %v7073_v15 = vpack.c.bf16 %v582_v10, %v579_v9  ;;  %v7093_v11 = vpack.c.bf16 %v612_v6, %v609_v5  ;;  %v639_v5 = vld [vmem:[%s9512_s22 + $0x6f8] sm:$0xff]  ;;  %v642_v6 = vld [vmem:[%s9512_s22 + $0x710] sm:$0xff] }
  0x94   : > { %7372 = vmatpush1.bf16.msra.mxu0 %v7371_v17  ;;  %7054 = vmatprep.subr.bf16.mxu1 %v7053_v18  ;;  %v581_v17 = vld [vmem:[%s9512_s22 + $0x528] sm:$0xff]  ;;  %v1058_v18 = vld [vmem:[%s9512_s22 + $0x1410] sm:$0xff] }
  0x95   : > { %7374 = vmatprep.subr.bf16.mxu0 %v7373_v22  ;;  %v588_v22 = vld [vmem:[%s9512_s22 + $0x560] sm:$0xff]  ;;  %v7075_v25 = vpack.c.bf16 %v581_v17, %v578_v16  ;;  %v7395_v26 = vpack.c.bf16 %v1061_v20, %v1058_v18  ;;  %v1091_v16 = vld [vmem:[%s9512_s22 + $0x1518] sm:$0xff]  ;;  %v618_v18 = vld [vmem:[%s9512_s22 + $0x650] sm:$0xff] }
  0x96   : > { %v7077_v27 = vpack.c.bf16 %v588_v22, %v585_v21  ;;  %v615_v17 = vld [vmem:[%s9512_s22 + $0x638] sm:$0xff]  ;;  %v1098_v20 = vld [vmem:[%s9512_s22 + $0x1550] sm:$0xff] }
  0x97   : > { %7056 = vmatpush1.bf16.msra.mxu1 %v7055_v29  ;;  %v587_v29 = vld [vmem:[%s9512_s22 + $0x558] sm:$0xff] }
  0x98   : > { %7376 = vmatpush1.bf16.msra.mxu0 %v7375_v30  ;;  %7058 = vmatprep.subr.bf16.mxu1 %v7057_v31  ;;  %v1064_v30 = vld [vmem:[%s9512_s22 + $0x1440] sm:$0xff]  ;;  %v7397_v31 = vpack.c.bf16 %v1068_v24, %v1065_v23  ;;  %v7079_v37 = vpack.c.bf16 %v587_v29, %v584_v28  ;;  %v375_v21 = vld [vmem:[%s9522_s27 + $0x10] sm:$0xff]  ;;  %v385_v23 = vld [vmem:[%s9522_s27 + $0x60] sm:$0xff] }
  0x99   : > { %7378 = vmatprep.subr.bf16.mxu0 %v7377_v35  ;;  %v1071_v35 = vld [vmem:[%s9512_s22 + $0x1478] sm:$0xff]  ;;  %v7399_v38 = vpack.c.bf16 %v1067_v32, %v1064_v30  ;;  %v1094_v28 = vld [vmem:[%s9512_s22 + $0x1530] sm:$0xff]  ;;  %v1097_v30 = vld [vmem:[%s9512_s22 + $0x1548] sm:$0xff] }
  0x9a   : > { %v624_v32 = vld [vmem:[%s9512_s22 + $0x680] sm:$0xff] }
  0x9b   : > { %7060 = vmatpush1.bf16.msra.mxu1 %v7059_v41  ;;  %v593_v41 = vld [vmem:[%s9512_s22 + $0x588] sm:$0xff] }
  0x9c   : > { %7380 = vmatpush1.bf16.msra.mxu0 %v7379_v42  ;;  %7062 = vmatprep.subr.bf16.mxu1 %v7061_v43  ;;  %v1070_v42 = vld [vmem:[%s9512_s22 + $0x1470] sm:$0xff]  ;;  %v7401_v43 = vpack.c.bf16 %v1074_v36, %v1071_v35  ;;  %v7083_v49 = vpack.c.bf16 %v593_v41, %v590_v40  ;;  %v620_v40 = vld [vmem:[%s9512_s22 + $0x660] sm:$0xff]  ;;  %v623_v41 = vld [vmem:[%s9512_s22 + $0x678] sm:$0xff] }
  0x9d   : > { %7382 = vmatprep.subr.bf16.mxu0 %v7381_v47  ;;  %v1077_v47 = vld [vmem:[%s9512_s22 + $0x14a8] sm:$0xff]  ;;  %v7403_v50 = vpack.c.bf16 %v1073_v44, %v1070_v42  ;;  %v378_v35 = vld [vmem:[%s9522_s27 + $0x28] sm:$0xff]  ;;  %v1100_v42 = vld [vmem:[%s9512_s22 + $0x1560] sm:$0xff] }
  0x9e   : > { %v1103_v44 = vld [vmem:[%s9512_s22 + $0x1578] sm:$0xff] }
  0x9f   : > { %7064 = vmatpush1.bf16.msra.mxu1 %v7063_v53  ;;  %v599_v53 = vld [vmem:[%s9512_s22 + $0x5b8] sm:$0xff] }
  0xa0   : > { %7384 = vmatpush1.bf16.msra.mxu0 %v7383_v54  ;;  %7066 = vmatprep.subr.bf16.mxu1 %v7065_v55  ;;  %v1076_v54 = vld [vmem:[%s9512_s22 + $0x14a0] sm:$0xff]  ;;  %v7405_v55 = vpack.c.bf16 %v1080_v48, %v1077_v47  ;;  %v7087_v61 = vpack.c.bf16 %v599_v53, %v596_v52  ;;  %v1107_v47 = vld [vmem:[%s9512_s22 + $0x1598] sm:$0xff]  ;;  %v1110_v48 = vld [vmem:[%s9512_s22 + $0x15b0] sm:$0xff] }
  0xa1   : > { %7386 = vmatprep.subr.bf16.mxu0 %v7385_v59  ;;  %v1083_v59 = vld [vmem:[%s9512_s22 + $0x14d8] sm:$0xff]  ;;  %v7407_v62 = vpack.c.bf16 %v1079_v56, %v1076_v54  ;;  %v626_v52 = vld [vmem:[%s9512_s22 + $0x690] sm:$0xff]  ;;  %v629_v53 = vld [vmem:[%s9512_s22 + $0x6a8] sm:$0xff] }
  0xa2   : > { %v1106_v54 = vld [vmem:[%s9512_s22 + $0x1590] sm:$0xff]  ;;  %v1109_v56 = vld [vmem:[%s9512_s22 + $0x15a8] sm:$0xff] }
  0xa3   : > { %7068 = vmatpush1.bf16.msra.mxu1 %v7067_v1  ;;  %v605_v1 = vld [vmem:[%s9512_s22 + $0x5e8] sm:$0xff] }
  0xa4   : > { %7388 = vmatpush1.bf16.msra.mxu0 %v7387_v2  ;;  %7070 = vmatprep.subr.bf16.mxu1 %v7069_v3  ;;  %v1082_v2 = vld [vmem:[%s9512_s22 + $0x14d0] sm:$0xff]  ;;  %v7409_v3 = vpack.c.bf16 %v1086_v60, %v1083_v59  ;;  %v7091_v9 = vpack.c.bf16 %v605_v1, %v602_v0  ;;  %v1113_v59 = vld [vmem:[%s9512_s22 + $0x15c8] sm:$0xff]  ;;  %v1116_v60 = vld [vmem:[%s9512_s22 + $0x15e0] sm:$0xff] }
  0xa5   : > { %7390 = vmatprep.subr.bf16.mxu0 %v7389_v7  ;;  %v1089_v7 = vld [vmem:[%s9512_s22 + $0x1508] sm:$0xff]  ;;  %v7411_v10 = vpack.c.bf16 %v1085_v4, %v1082_v2  ;;  %v632_v0 = vld [vmem:[%s9512_s22 + $0x6c0] sm:$0xff]  ;;  %v635_v1 = vld [vmem:[%s9512_s22 + $0x6d8] sm:$0xff] }
  0xa6   : > { %v1112_v2 = vld [vmem:[%s9512_s22 + $0x15c0] sm:$0xff]  ;;  %v1115_v4 = vld [vmem:[%s9512_s22 + $0x15d8] sm:$0xff] }
  0xa7   : > { %7072 = vmatpush1.bf16.msra.mxu1 %v7071_v13  ;;  %v611_v13 = vld [vmem:[%s9512_s22 + $0x618] sm:$0xff] }
  0xa8   : > { %7392 = vmatpush1.bf16.msra.mxu0 %v7391_v14  ;;  %7074 = vmatprep.subr.bf16.mxu1 %v7073_v15  ;;  %v1088_v14 = vld [vmem:[%s9512_s22 + $0x1500] sm:$0xff]  ;;  %v7413_v15 = vpack.c.bf16 %v1092_v8, %v1089_v7  ;;  %v7095_v22 = vpack.c.bf16 %v611_v13, %v608_v12  ;;  %v1119_v7 = vld [vmem:[%s9512_s22 + $0x15f8] sm:$0xff]  ;;  %v1122_v8 = vld [vmem:[%s9512_s22 + $0x1610] sm:$0xff] }
  0xa9   : > { %7394 = vmatprep.subr.bf16.mxu0 %v7393_v19  ;;  %v1095_v19 = vld [vmem:[%s9512_s22 + $0x1538] sm:$0xff]  ;;  %v7415_v24 = vpack.c.bf16 %v1091_v16, %v1088_v14  ;;  %v638_v12 = vld [vmem:[%s9512_s22 + $0x6f0] sm:$0xff]  ;;  %v641_v13 = vld [vmem:[%s9512_s22 + $0x708] sm:$0xff] }
  0xaa   : > { %v7417_v29 = vpack.c.bf16 %v1098_v20, %v1095_v19  ;;  %v1118_v14 = vld [vmem:[%s9512_s22 + $0x15f0] sm:$0xff]  ;;  %v1121_v16 = vld [vmem:[%s9512_s22 + $0x1608] sm:$0xff]  ;;  %v1128_v20 = vld [vmem:[%s9512_s22 + $0x1640] sm:$0xff] }
  0xab   : > { %7076 = vmatpush1.bf16.msra.mxu1 %v7075_v25  ;;  %v7097_v25 = vpack.c.bf16 %v618_v18, %v615_v17  ;;  %v645_v17 = vld [vmem:[%s9512_s22 + $0x728] sm:$0xff]  ;;  %v648_v18 = vld [vmem:[%s9512_s22 + $0x740] sm:$0xff] }
  0xac   : > { %7396 = vmatpush1.bf16.msra.mxu0 %v7395_v26  ;;  %7078 = vmatprep.subr.bf16.mxu1 %v7077_v27  ;;  %v614_v26 = vld [vmem:[%s9512_s22 + $0x630] sm:$0xff]  ;;  %v617_v27 = vld [vmem:[%s9512_s22 + $0x648] sm:$0xff] }
  0xad   : > { %7398 = vmatprep.subr.bf16.mxu0 %v7397_v31  ;;  %v621_v31 = vld [vmem:[%s9512_s22 + $0x668] sm:$0xff]  ;;  %v7099_v36 = vpack.c.bf16 %v617_v27, %v614_v26  ;;  %v1124_v26 = vld [vmem:[%s9512_s22 + $0x1620] sm:$0xff] }
  0xae   : > { %v1125_v19 = vld [vmem:[%s9512_s22 + $0x1628] sm:$0xff] }
  0xaf   : > { %7080 = vmatpush1.bf16.msra.mxu1 %v7079_v37  ;;  %v388_v37 = vld [vmem:[%s9522_s27 + $0x78] sm:$0xff]  ;;  %v7437_v27 = vpack.c.bf16 %v1128_v20, %v1125_v19  ;;  %v674_v20 = vld [vmem:[%s9512_s22 + $0x810] sm:$0xff] }
  0xb0   : > { %7400 = vmatpush1.bf16.msra.mxu0 %v7399_v38  ;;  %7082 = vmatprep.subr.bf16.mxu1 %v7081_v39  ;;  %v7419_v38 = vpack.c.bf16 %v1097_v30, %v1094_v28  ;;  %v7101_v39 = vpack.c.bf16 %v624_v32, %v621_v31  ;;  %v1127_v28 = vld [vmem:[%s9512_s22 + $0x1638] sm:$0xff]  ;;  %v654_v30 = vld [vmem:[%s9512_s22 + $0x770] sm:$0xff] }
  0xb1   : > { %7402 = vmatprep.subr.bf16.mxu0 %v7401_v43  ;;  %v7421_v43 = vpack.c.bf16 %v1104_v34, %v1101_v33  ;;  %v1131_v31 = vld [vmem:[%s9512_s22 + $0x1658] sm:$0xff]  ;;  %v1134_v32 = vld [vmem:[%s9512_s22 + $0x1670] sm:$0xff]  ;;  %v7439_v34 = vpack.c.bf16 %v1127_v28, %v1124_v26  ;;  %v684_v26 = vld [vmem:[%s9512_s22 + $0x860] sm:$0xff] }
  0xb2   : > { %v1164_v28 = vld [vmem:[%s9512_s22 + $0x1760] sm:$0xff] }
  0xb3   : > { %7084 = vmatpush1.bf16.msra.mxu1 %v7083_v49  ;;  %v7103_v49 = vpack.c.bf16 %v623_v41, %v620_v40  ;;  %v1133_v40 = vld [vmem:[%s9512_s22 + $0x1668] sm:$0xff] }
  0xb4   : > { %7404 = vmatpush1.bf16.msra.mxu0 %v7403_v50  ;;  %7086 = vmatprep.subr.bf16.mxu1 %v7085_v51  ;;  %v7423_v50 = vpack.c.bf16 %v1103_v44, %v1100_v42  ;;  %v7105_v51 = vpack.c.bf16 %v630_v46, %v627_v45  ;;  %v657_v41 = vld [vmem:[%s9512_s22 + $0x788] sm:$0xff]  ;;  %v660_v42 = vld [vmem:[%s9512_s22 + $0x7a0] sm:$0xff] }
  0xb5   : > { %7406 = vmatprep.subr.bf16.mxu0 %v7405_v55  ;;  %v7425_v55 = vpack.c.bf16 %v1110_v48, %v1107_v47  ;;  %v1140_v44 = vld [vmem:[%s9512_s22 + $0x16a0] sm:$0xff]  ;;  %v7125_v47 = vpack.c.bf16 %v660_v42, %v657_v41 }
  0xb6   : > { %v656_v48 = vld [vmem:[%s9512_s22 + $0x780] sm:$0xff] }
  0xb7   : > { %7088 = vmatpush1.bf16.msra.mxu1 %v7087_v61  ;;  %v7107_v61 = vpack.c.bf16 %v629_v53, %v626_v52  ;;  %v1139_v52 = vld [vmem:[%s9512_s22 + $0x1698] sm:$0xff] }
  0xb8   : > { %7408 = vmatpush1.bf16.msra.mxu0 %v7407_v62  ;;  %7090 = vmatprep.subr.bf16.mxu1 %v7089_v63  ;;  %v7427_v62 = vpack.c.bf16 %v1109_v56, %v1106_v54  ;;  %v7109_v63 = vpack.c.bf16 %v636_v58, %v633_v57  ;;  %v663_v53 = vld [vmem:[%s9512_s22 + $0x7b8] sm:$0xff]  ;;  %v666_v54 = vld [vmem:[%s9512_s22 + $0x7d0] sm:$0xff] }
  0xb9   : > { %7410 = vmatprep.subr.bf16.mxu0 %v7409_v3  ;;  %v7429_v3 = vpack.c.bf16 %v1116_v60, %v1113_v59  ;;  %v1146_v56 = vld [vmem:[%s9512_s22 + $0x16d0] sm:$0xff]  ;;  %v7129_v59 = vpack.c.bf16 %v666_v54, %v663_v53 }
  0xba   : > { %v662_v60 = vld [vmem:[%s9512_s22 + $0x7b0] sm:$0xff] }
  0xbb   : > { %7092 = vmatpush1.bf16.msra.mxu1 %v7091_v9  ;;  %v7111_v9 = vpack.c.bf16 %v635_v1, %v632_v0  ;;  %v1145_v0 = vld [vmem:[%s9512_s22 + $0x16c8] sm:$0xff] }
  0xbc   : > { %7412 = vmatpush1.bf16.msra.mxu0 %v7411_v10  ;;  %7094 = vmatprep.subr.bf16.mxu1 %v7093_v11  ;;  %v7431_v10 = vpack.c.bf16 %v1115_v4, %v1112_v2  ;;  %v7113_v11 = vpack.c.bf16 %v642_v6, %v639_v5  ;;  %v669_v1 = vld [vmem:[%s9512_s22 + $0x7e8] sm:$0xff]  ;;  %v672_v2 = vld [vmem:[%s9512_s22 + $0x800] sm:$0xff] }
  0xbd   : > { %7414 = vmatprep.subr.bf16.mxu0 %v7413_v15  ;;  %v7433_v15 = vpack.c.bf16 %v1122_v8, %v1119_v7  ;;  %v1152_v4 = vld [vmem:[%s9512_s22 + $0x1700] sm:$0xff]  ;;  %v7133_v7 = vpack.c.bf16 %v672_v2, %v669_v1 }
  0xbe   : > { %2616 = vmatmul.mubr.f32.vlgmr.msra.gmra.mrb[0].mxu1 %v375_v21  ;;  %v7115_v21 = vpack.c.bf16 %v641_v13, %v638_v12  ;;  %v668_v8 = vld [vmem:[%s9512_s22 + $0x7e0] sm:$0xff]  ;;  %v1151_v12 = vld [vmem:[%s9512_s22 + $0x16f8] sm:$0xff] }
  0xbf   : > { %7096 = vmatpush1.bf16.msra.mxu1 %v7095_v22  ;;  %2971 = vmatmul.mubr.f32.vlgmr.msra.gmra.mrb[0].mxu0 %v385_v23  ;;  %v7435_v22 = vpack.c.bf16 %v1121_v16, %v1118_v14  ;;  %v7117_v23 = vpack.c.bf16 %v648_v18, %v645_v17  ;;  %v675_v13 = vld [vmem:[%s9512_s22 + $0x818] sm:$0xff]  ;;  %v678_v14 = vld [vmem:[%s9512_s22 + $0x830] sm:$0xff] }
  0xc0   : > { %7416 = vmatpush1.bf16.msra.mxu0 %v7415_v24  ;;  %7098 = vmatprep.subr.bf16.mxu1 %v7097_v25  ;;  %v644_v24 = vld [vmem:[%s9512_s22 + $0x720] sm:$0xff]  ;;  %v647_v25 = vld [vmem:[%s9512_s22 + $0x738] sm:$0xff]  ;;  %v1158_v16 = vld [vmem:[%s9512_s22 + $0x1730] sm:$0xff]  ;;  %v7137_v19 = vpack.c.bf16 %v678_v14, %v675_v13 }
  0xc1   : > { %7418 = vmatprep.subr.bf16.mxu0 %v7417_v29  ;;  %2686 = vmatprep.mubr.f32.mxu1 %v378_v35  ;;  %v651_v29 = vld [vmem:[%s9512_s22 + $0x758] sm:$0xff]  ;;  %v7119_v33 = vpack.c.bf16 %v647_v25, %v644_v24  ;;  %v1157_v24 = vld [vmem:[%s9512_s22 + $0x1728] sm:$0xff] }
  0xc2   : > { %3041 = vmatprep.mubr.f32.mxu0 %v388_v37  ;;  %v7121_v35 = vpack.c.bf16 %v654_v30, %v651_v29  ;;  %v653_v37 = vld [vmem:[%s9512_s22 + $0x768] sm:$0xff] }
  0xc3   : > { %7100 = vmatpush1.bf16.msra.mxu1 %v7099_v36  ;;  %v650_v36 = vld [vmem:[%s9512_s22 + $0x750] sm:$0xff]  ;;  %v681_v25 = vld [vmem:[%s9512_s22 + $0x848] sm:$0xff] }
  0xc4   : > { %7420 = vmatpush1.bf16.msra.mxu0 %v7419_v38  ;;  %7102 = vmatprep.subr.bf16.mxu1 %v7101_v39  ;;  %v1130_v38 = vld [vmem:[%s9512_s22 + $0x1650] sm:$0xff]  ;;  %v7441_v39 = vpack.c.bf16 %v1134_v32, %v1131_v31  ;;  %v7123_v45 = vpack.c.bf16 %v653_v37, %v650_v36  ;;  %v7141_v31 = vpack.c.bf16 %v684_v26, %v681_v25  ;;  %v680_v32 = vld [vmem:[%s9512_s22 + $0x840] sm:$0xff]  ;;  %v1163_v36 = vld [vmem:[%s9512_s22 + $0x1758] sm:$0xff] }
  0xc5   : > { %7422 = vmatprep.subr.bf16.mxu0 %v7421_v43  ;;  %v1137_v43 = vld [vmem:[%s9512_s22 + $0x1688] sm:$0xff]  ;;  %v7443_v46 = vpack.c.bf16 %v1133_v40, %v1130_v38  ;;  %v687_v37 = vld [vmem:[%s9512_s22 + $0x878] sm:$0xff]  ;;  %v690_v38 = vld [vmem:[%s9512_s22 + $0x890] sm:$0xff] }
  0xc6   : > { %v1170_v40 = vld [vmem:[%s9512_s22 + $0x1790] sm:$0xff]  ;;  %v377_v25 = vld [vmem:[%s9522_s27 + $0x20] sm:$0xff] }
  0xc7   : > { %7104 = vmatpush1.bf16.msra.mxu1 %v7103_v49  ;;  %v659_v49 = vld [vmem:[%s9512_s22 + $0x798] sm:$0xff] }
  0xc8   : > { %7424 = vmatpush1.bf16.msra.mxu0 %v7423_v50  ;;  %7106 = vmatprep.subr.bf16.mxu1 %v7105_v51  ;;  %v1136_v50 = vld [vmem:[%s9512_s22 + $0x1680] sm:$0xff]  ;;  %v7445_v51 = vpack.c.bf16 %v1140_v44, %v1137_v43  ;;  %v7127_v57 = vpack.c.bf16 %v659_v49, %v656_v48  ;;  %v7145_v43 = vpack.c.bf16 %v690_v38, %v687_v37  ;;  %v686_v44 = vld [vmem:[%s9512_s22 + $0x870] sm:$0xff]  ;;  %v1169_v48 = vld [vmem:[%s9512_s22 + $0x1788] sm:$0xff] }
  0xc9   : > { %7426 = vmatprep.subr.bf16.mxu0 %v7425_v55  ;;  %v1143_v55 = vld [vmem:[%s9512_s22 + $0x16b8] sm:$0xff]  ;;  %v7447_v58 = vpack.c.bf16 %v1139_v52, %v1136_v50  ;;  %v693_v49 = vld [vmem:[%s9512_s22 + $0x8a8] sm:$0xff]  ;;  %v696_v50 = vld [vmem:[%s9512_s22 + $0x8c0] sm:$0xff] }
  0xca   : > { %v1176_v52 = vld [vmem:[%s9512_s22 + $0x17c0] sm:$0xff]  ;;  %v1197_v37 = vld [vmem:[%s9512_s22 + $0x1868] sm:$0xff] }
  0xcb   : > { %7108 = vmatpush1.bf16.msra.mxu1 %v7107_v61  ;;  %v665_v61 = vld [vmem:[%s9512_s22 + $0x7c8] sm:$0xff]  ;;  %v1200_v38 = vld [vmem:[%s9512_s22 + $0x1880] sm:$0xff] }
  0xcc   : > { %7428 = vmatpush1.bf16.msra.mxu0 %v7427_v62  ;;  %7110 = vmatprep.subr.bf16.mxu1 %v7109_v63  ;;  %v1142_v62 = vld [vmem:[%s9512_s22 + $0x16b0] sm:$0xff]  ;;  %v7449_v63 = vpack.c.bf16 %v1146_v56, %v1143_v55  ;;  %v7131_v5 = vpack.c.bf16 %v665_v61, %v662_v60  ;;  %v7149_v55 = vpack.c.bf16 %v696_v50, %v693_v49  ;;  %v692_v56 = vld [vmem:[%s9512_s22 + $0x8a0] sm:$0xff]  ;;  %v1175_v60 = vld [vmem:[%s9512_s22 + $0x17b8] sm:$0xff] }
  0xcd   : > { %7430 = vmatprep.subr.bf16.mxu0 %v7429_v3  ;;  %v1149_v3 = vld [vmem:[%s9512_s22 + $0x16e8] sm:$0xff]  ;;  %v7451_v6 = vpack.c.bf16 %v1145_v0, %v1142_v62  ;;  %v699_v61 = vld [vmem:[%s9512_s22 + $0x8d8] sm:$0xff]  ;;  %v702_v62 = vld [vmem:[%s9512_s22 + $0x8f0] sm:$0xff] }
  0xce   : > { %v1182_v0 = vld [vmem:[%s9512_s22 + $0x17f0] sm:$0xff]  ;;  %v723_v49 = vld [vmem:[%s9512_s22 + $0x998] sm:$0xff] }
  0xcf   : > { %7112 = vmatpush1.bf16.msra.mxu1 %v7111_v9  ;;  %v671_v9 = vld [vmem:[%s9512_s22 + $0x7f8] sm:$0xff]  ;;  %v726_v50 = vld [vmem:[%s9512_s22 + $0x9b0] sm:$0xff] }
  0xd0   : > { %7432 = vmatpush1.bf16.msra.mxu0 %v7431_v10  ;;  %7114 = vmatprep.subr.bf16.mxu1 %v7113_v11  ;;  %v1148_v10 = vld [vmem:[%s9512_s22 + $0x16e0] sm:$0xff]  ;;  %v7453_v11 = vpack.c.bf16 %v1152_v4, %v1149_v3  ;;  %v7135_v17 = vpack.c.bf16 %v671_v9, %v668_v8  ;;  %v7153_v3 = vpack.c.bf16 %v702_v62, %v699_v61  ;;  %v698_v4 = vld [vmem:[%s9512_s22 + $0x8d0] sm:$0xff]  ;;  %v1181_v8 = vld [vmem:[%s9512_s22 + $0x17e8] sm:$0xff] }
  0xd1   : > { %7434 = vmatprep.subr.bf16.mxu0 %v7433_v15  ;;  %v1155_v15 = vld [vmem:[%s9512_s22 + $0x1718] sm:$0xff]  ;;  %v7455_v18 = vpack.c.bf16 %v1151_v12, %v1148_v10  ;;  %v705_v9 = vld [vmem:[%s9512_s22 + $0x908] sm:$0xff]  ;;  %v708_v10 = vld [vmem:[%s9512_s22 + $0x920] sm:$0xff] }
  0xd2   : > { %v1188_v12 = vld [vmem:[%s9512_s22 + $0x1820] sm:$0xff]  ;;  %v729_v61 = vld [vmem:[%s9512_s22 + $0x9c8] sm:$0xff] }
  0xd3   : > { %7116 = vmatpush1.bf16.msra.mxu1 %v7115_v21  ;;  %v677_v21 = vld [vmem:[%s9512_s22 + $0x828] sm:$0xff]  ;;  %v732_v62 = vld [vmem:[%s9512_s22 + $0x9e0] sm:$0xff] }
  0xd4   : > { %7436 = vmatpush1.bf16.msra.mxu0 %v7435_v22  ;;  %7118 = vmatprep.subr.bf16.mxu1 %v7117_v23  ;;  %v1154_v22 = vld [vmem:[%s9512_s22 + $0x1710] sm:$0xff]  ;;  %v7457_v23 = vpack.c.bf16 %v1158_v16, %v1155_v15  ;;  %v7139_v29 = vpack.c.bf16 %v677_v21, %v674_v20  ;;  %v7157_v15 = vpack.c.bf16 %v708_v10, %v705_v9  ;;  %v704_v16 = vld [vmem:[%s9512_s22 + $0x900] sm:$0xff]  ;;  %v1187_v20 = vld [vmem:[%s9512_s22 + $0x1818] sm:$0xff] }
  0xd5   : > { %7438 = vmatprep.subr.bf16.mxu0 %v7437_v27  ;;  %v1161_v27 = vld [vmem:[%s9512_s22 + $0x1748] sm:$0xff]  ;;  %v7459_v30 = vpack.c.bf16 %v1157_v24, %v1154_v22  ;;  %v711_v21 = vld [vmem:[%s9512_s22 + $0x938] sm:$0xff]  ;;  %v714_v22 = vld [vmem:[%s9512_s22 + $0x950] sm:$0xff] }
  0xd6   : > { %v1194_v24 = vld [vmem:[%s9512_s22 + $0x1850] sm:$0xff]  ;;  %v735_v9 = vld [vmem:[%s9512_s22 + $0x9f8] sm:$0xff] }
  0xd7   : > { %7120 = vmatpush1.bf16.msra.mxu1 %v7119_v33  ;;  %v683_v33 = vld [vmem:[%s9512_s22 + $0x858] sm:$0xff]  ;;  %v738_v10 = vld [vmem:[%s9512_s22 + $0xa10] sm:$0xff] }
  0xd8   : > { %7440 = vmatpush1.bf16.msra.mxu0 %v7439_v34  ;;  %7122 = vmatprep.subr.bf16.mxu1 %v7121_v35  ;;  %v1160_v34 = vld [vmem:[%s9512_s22 + $0x1740] sm:$0xff]  ;;  %v7461_v35 = vpack.c.bf16 %v1164_v28, %v1161_v27  ;;  %v7143_v41 = vpack.c.bf16 %v683_v33, %v680_v32  ;;  %v387_v27 = vld [vmem:[%s9522_s27 + $0x70] sm:$0xff]  ;;  %v1190_v32 = vld [vmem:[%s9512_s22 + $0x1830] sm:$0xff] }
  0xd9   : > { %7442 = vmatprep.subr.bf16.mxu0 %v7441_v39  ;;  %v1167_v39 = vld [vmem:[%s9512_s22 + $0x1778] sm:$0xff]  ;;  %v7463_v42 = vpack.c.bf16 %v1163_v36, %v1160_v34  ;;  %v1193_v34 = vld [vmem:[%s9512_s22 + $0x1848] sm:$0xff]  ;;  %v720_v36 = vld [vmem:[%s9512_s22 + $0x980] sm:$0xff] }
  0xdb   : > { %7124 = vmatpush1.bf16.msra.mxu1 %v7123_v45  ;;  %v689_v45 = vld [vmem:[%s9512_s22 + $0x888] sm:$0xff] }
  0xdc   : > { %7444 = vmatpush1.bf16.msra.mxu0 %v7443_v46  ;;  %7126 = vmatprep.subr.bf16.mxu1 %v7125_v47  ;;  %v1166_v46 = vld [vmem:[%s9512_s22 + $0x1770] sm:$0xff]  ;;  %v7465_v47 = vpack.c.bf16 %v1170_v40, %v1167_v39  ;;  %v7147_v53 = vpack.c.bf16 %v689_v45, %v686_v44  ;;  %v380_v39 = vld [vmem:[%s9522_s27 + $0x38] sm:$0xff]  ;;  %v719_v45 = vld [vmem:[%s9512_s22 + $0x978] sm:$0xff] }
  0xdd   : > { %7446 = vmatprep.subr.bf16.mxu0 %v7445_v51  ;;  %v1173_v51 = vld [vmem:[%s9512_s22 + $0x17a8] sm:$0xff]  ;;  %v7467_v54 = vpack.c.bf16 %v1169_v48, %v1166_v46  ;;  %v716_v44 = vld [vmem:[%s9512_s22 + $0x960] sm:$0xff]  ;;  %v1199_v48 = vld [vmem:[%s9512_s22 + $0x1878] sm:$0xff] }
  0xde   : > { %v1196_v46 = vld [vmem:[%s9512_s22 + $0x1860] sm:$0xff] }
  0xdf   : > { %7128 = vmatpush1.bf16.msra.mxu1 %v7127_v57  ;;  %v695_v57 = vld [vmem:[%s9512_s22 + $0x8b8] sm:$0xff] }
  0xe0   : > { %7448 = vmatpush1.bf16.msra.mxu0 %v7447_v58  ;;  %7130 = vmatprep.subr.bf16.mxu1 %v7129_v59  ;;  %v1172_v58 = vld [vmem:[%s9512_s22 + $0x17a0] sm:$0xff]  ;;  %v7469_v59 = vpack.c.bf16 %v1176_v52, %v1173_v51  ;;  %v7151_v1 = vpack.c.bf16 %v695_v57, %v692_v56  ;;  %v1203_v51 = vld [vmem:[%s9512_s22 + $0x1898] sm:$0xff]  ;;  %v1206_v52 = vld [vmem:[%s9512_s22 + $0x18b0] sm:$0xff] }
  0xe1   : > { %7450 = vmatprep.subr.bf16.mxu0 %v7449_v63  ;;  %v1179_v63 = vld [vmem:[%s9512_s22 + $0x17d8] sm:$0xff]  ;;  %v7471_v2 = vpack.c.bf16 %v1175_v60, %v1172_v58  ;;  %v722_v56 = vld [vmem:[%s9512_s22 + $0x990] sm:$0xff]  ;;  %v725_v57 = vld [vmem:[%s9512_s22 + $0x9a8] sm:$0xff] }
  0xe2   : > { %v1202_v58 = vld [vmem:[%s9512_s22 + $0x1890] sm:$0xff]  ;;  %v1205_v60 = vld [vmem:[%s9512_s22 + $0x18a8] sm:$0xff] }
  0xe3   : > { %7132 = vmatpush1.bf16.msra.mxu1 %v7131_v5  ;;  %v701_v5 = vld [vmem:[%s9512_s22 + $0x8e8] sm:$0xff] }
  0xe4   : > { %7452 = vmatpush1.bf16.msra.mxu0 %v7451_v6  ;;  %7134 = vmatprep.subr.bf16.mxu1 %v7133_v7  ;;  %v1178_v6 = vld [vmem:[%s9512_s22 + $0x17d0] sm:$0xff]  ;;  %v7473_v7 = vpack.c.bf16 %v1182_v0, %v1179_v63  ;;  %v7155_v13 = vpack.c.bf16 %v701_v5, %v698_v4  ;;  %v1209_v63 = vld [vmem:[%s9512_s22 + $0x18c8] sm:$0xff]  ;;  %v1212_v0 = vld [vmem:[%s9512_s22 + $0x18e0] sm:$0xff] }
  0xe5   : > { %7454 = vmatprep.subr.bf16.mxu0 %v7453_v11  ;;  %v1185_v11 = vld [vmem:[%s9512_s22 + $0x1808] sm:$0xff]  ;;  %v7475_v14 = vpack.c.bf16 %v1181_v8, %v1178_v6  ;;  %v728_v4 = vld [vmem:[%s9512_s22 + $0x9c0] sm:$0xff]  ;;  %v731_v5 = vld [vmem:[%s9512_s22 + $0x9d8] sm:$0xff] }
  0xe6   : > { %v1208_v6 = vld [vmem:[%s9512_s22 + $0x18c0] sm:$0xff]  ;;  %v1211_v8 = vld [vmem:[%s9512_s22 + $0x18d8] sm:$0xff] }
  0xe7   : > { %7136 = vmatpush1.bf16.msra.mxu1 %v7135_v17  ;;  %v707_v17 = vld [vmem:[%s9512_s22 + $0x918] sm:$0xff] }
  0xe8   : > { %7456 = vmatpush1.bf16.msra.mxu0 %v7455_v18  ;;  %7138 = vmatprep.subr.bf16.mxu1 %v7137_v19  ;;  %v1184_v18 = vld [vmem:[%s9512_s22 + $0x1800] sm:$0xff]  ;;  %v7477_v19 = vpack.c.bf16 %v1188_v12, %v1185_v11  ;;  %v7159_v26 = vpack.c.bf16 %v707_v17, %v704_v16  ;;  %v1215_v11 = vld [vmem:[%s9512_s22 + $0x18f8] sm:$0xff]  ;;  %v1218_v12 = vld [vmem:[%s9512_s22 + $0x1910] sm:$0xff] }
  0xe9   : > { %7458 = vmatprep.subr.bf16.mxu0 %v7457_v23  ;;  %v1191_v23 = vld [vmem:[%s9512_s22 + $0x1838] sm:$0xff]  ;;  %v7479_v28 = vpack.c.bf16 %v1187_v20, %v1184_v18  ;;  %v734_v16 = vld [vmem:[%s9512_s22 + $0x9f0] sm:$0xff]  ;;  %v737_v17 = vld [vmem:[%s9512_s22 + $0xa08] sm:$0xff] }
  0xea   : > { %v7481_v33 = vpack.c.bf16 %v1194_v24, %v1191_v23  ;;  %v1214_v18 = vld [vmem:[%s9512_s22 + $0x18f0] sm:$0xff]  ;;  %v1217_v20 = vld [vmem:[%s9512_s22 + $0x1908] sm:$0xff]  ;;  %v1224_v24 = vld [vmem:[%s9512_s22 + $0x1940] sm:$0xff] }
  0xeb   : > { %7140 = vmatpush1.bf16.msra.mxu1 %v7139_v29  ;;  %v7161_v29 = vpack.c.bf16 %v714_v22, %v711_v21  ;;  %v741_v21 = vld [vmem:[%s9512_s22 + $0xa28] sm:$0xff]  ;;  %v744_v22 = vld [vmem:[%s9512_s22 + $0xa40] sm:$0xff] }
  0xec   : > { %7460 = vmatpush1.bf16.msra.mxu0 %v7459_v30  ;;  %7142 = vmatprep.subr.bf16.mxu1 %v7141_v31  ;;  %v710_v30 = vld [vmem:[%s9512_s22 + $0x930] sm:$0xff]  ;;  %v713_v31 = vld [vmem:[%s9512_s22 + $0x948] sm:$0xff] }
  0xed   : > { %7462 = vmatprep.subr.bf16.mxu0 %v7461_v35  ;;  %v717_v35 = vld [vmem:[%s9512_s22 + $0x968] sm:$0xff]  ;;  %v7163_v40 = vpack.c.bf16 %v713_v31, %v710_v30  ;;  %v1220_v30 = vld [vmem:[%s9512_s22 + $0x1920] sm:$0xff] }
  0xee   : > { %v1221_v23 = vld [vmem:[%s9512_s22 + $0x1928] sm:$0xff] }
  0xef   : > { %7144 = vmatpush1.bf16.msra.mxu1 %v7143_v41  ;;  %v390_v41 = vld [vmem:[%s9522_s27 + $0x88] sm:$0xff]  ;;  %v7501_v31 = vpack.c.bf16 %v1224_v24, %v1221_v23 }
  0xf0   : > { %7464 = vmatpush1.bf16.msra.mxu0 %v7463_v42  ;;  %7146 = vmatprep.subr.bf16.mxu1 %v7145_v43  ;;  %v7483_v42 = vpack.c.bf16 %v1193_v34, %v1190_v32  ;;  %v7165_v43 = vpack.c.bf16 %v720_v36, %v717_v35  ;;  %v1223_v32 = vld [vmem:[%s9512_s22 + $0x1938] sm:$0xff]  ;;  %v750_v34 = vld [vmem:[%s9512_s22 + $0xa70] sm:$0xff] }
  0xf1   : > { %7466 = vmatprep.subr.bf16.mxu0 %v7465_v47  ;;  %v7485_v47 = vpack.c.bf16 %v1200_v38, %v1197_v37  ;;  %v1227_v35 = vld [vmem:[%s9512_s22 + $0x1958] sm:$0xff]  ;;  %v1230_v36 = vld [vmem:[%s9512_s22 + $0x1970] sm:$0xff]  ;;  %v7503_v38 = vpack.c.bf16 %v1223_v32, %v1220_v30  ;;  %v780_v30 = vld [vmem:[%s9512_s22 + $0xb60] sm:$0xff] }
  0xf2   : > { %v770_v24 = vld [vmem:[%s9512_s22 + $0xb10] sm:$0xff]  ;;  %v1260_v32 = vld [vmem:[%s9512_s22 + $0x1a60] sm:$0xff] }
  0xf3   : > { %7148 = vmatpush1.bf16.msra.mxu1 %v7147_v53  ;;  %v7167_v53 = vpack.c.bf16 %v719_v45, %v716_v44  ;;  %v1229_v44 = vld [vmem:[%s9512_s22 + $0x1968] sm:$0xff] }
  0xf4   : > { %7468 = vmatpush1.bf16.msra.mxu0 %v7467_v54  ;;  %7150 = vmatprep.subr.bf16.mxu1 %v7149_v55  ;;  %v7487_v54 = vpack.c.bf16 %v1199_v48, %v1196_v46  ;;  %v7169_v55 = vpack.c.bf16 %v726_v50, %v723_v49  ;;  %v753_v45 = vld [vmem:[%s9512_s22 + $0xa88] sm:$0xff]  ;;  %v756_v46 = vld [vmem:[%s9512_s22 + $0xaa0] sm:$0xff] }
  0xf5   : > { %7470 = vmatprep.subr.bf16.mxu0 %v7469_v59  ;;  %v7489_v59 = vpack.c.bf16 %v1206_v52, %v1203_v51  ;;  %v1236_v48 = vld [vmem:[%s9512_s22 + $0x19a0] sm:$0xff]  ;;  %v7189_v51 = vpack.c.bf16 %v756_v46, %v753_v45 }
  0xf6   : > { %v752_v52 = vld [vmem:[%s9512_s22 + $0xa80] sm:$0xff] }
  0xf7   : > { %7152 = vmatpush1.bf16.msra.mxu1 %v7151_v1  ;;  %v7171_v1 = vpack.c.bf16 %v725_v57, %v722_v56  ;;  %v1235_v56 = vld [vmem:[%s9512_s22 + $0x1998] sm:$0xff] }
  0xf8   : > { %7472 = vmatpush1.bf16.msra.mxu0 %v7471_v2  ;;  %7154 = vmatprep.subr.bf16.mxu1 %v7153_v3  ;;  %v7491_v2 = vpack.c.bf16 %v1205_v60, %v1202_v58  ;;  %v7173_v3 = vpack.c.bf16 %v732_v62, %v729_v61  ;;  %v759_v57 = vld [vmem:[%s9512_s22 + $0xab8] sm:$0xff]  ;;  %v762_v58 = vld [vmem:[%s9512_s22 + $0xad0] sm:$0xff] }
  0xf9   : > { %7474 = vmatprep.subr.bf16.mxu0 %v7473_v7  ;;  %v7493_v7 = vpack.c.bf16 %v1212_v0, %v1209_v63  ;;  %v1242_v60 = vld [vmem:[%s9512_s22 + $0x19d0] sm:$0xff]  ;;  %v7193_v63 = vpack.c.bf16 %v762_v58, %v759_v57 }
  0xfa   : > { %v758_v0 = vld [vmem:[%s9512_s22 + $0xab0] sm:$0xff] }
  0xfb   : > { %7156 = vmatpush1.bf16.msra.mxu1 %v7155_v13  ;;  %v7175_v13 = vpack.c.bf16 %v731_v5, %v728_v4  ;;  %v1241_v4 = vld [vmem:[%s9512_s22 + $0x19c8] sm:$0xff] }
  0xfc   : > { %7476 = vmatpush1.bf16.msra.mxu0 %v7475_v14  ;;  %7158 = vmatprep.subr.bf16.mxu1 %v7157_v15  ;;  %v7495_v14 = vpack.c.bf16 %v1211_v8, %v1208_v6  ;;  %v7177_v15 = vpack.c.bf16 %v738_v10, %v735_v9  ;;  %v765_v5 = vld [vmem:[%s9512_s22 + $0xae8] sm:$0xff]  ;;  %v768_v6 = vld [vmem:[%s9512_s22 + $0xb00] sm:$0xff] }
  0xfd   : > { %7478 = vmatprep.subr.bf16.mxu0 %v7477_v19  ;;  %v7497_v19 = vpack.c.bf16 %v1218_v12, %v1215_v11  ;;  %v1248_v8 = vld [vmem:[%s9512_s22 + $0x1a00] sm:$0xff]  ;;  %v7197_v11 = vpack.c.bf16 %v768_v6, %v765_v5 }
  0xfe   : > { %2687 = vmatmul.mubr.f32.vlgmr.msra.gmra.mrb[0].mxu1 %v377_v25  ;;  %v7179_v25 = vpack.c.bf16 %v737_v17, %v734_v16  ;;  %v764_v12 = vld [vmem:[%s9512_s22 + $0xae0] sm:$0xff]  ;;  %v1247_v16 = vld [vmem:[%s9512_s22 + $0x19f8] sm:$0xff] }
  0xff   : > { %7160 = vmatpush1.bf16.msra.mxu1 %v7159_v26  ;;  %3042 = vmatmul.mubr.f32.vlgmr.msra.gmra.mrb[0].mxu0 %v387_v27  ;;  %v7499_v26 = vpack.c.bf16 %v1217_v20, %v1214_v18  ;;  %v7181_v27 = vpack.c.bf16 %v744_v22, %v741_v21  ;;  %v771_v17 = vld [vmem:[%s9512_s22 + $0xb18] sm:$0xff]  ;;  %v774_v18 = vld [vmem:[%s9512_s22 + $0xb30] sm:$0xff] }
 0x100   : > { %7480 = vmatpush1.bf16.msra.mxu0 %v7479_v28  ;;  %7162 = vmatprep.subr.bf16.mxu1 %v7161_v29  ;;  %v740_v28 = vld [vmem:[%s9512_s22 + $0xa20] sm:$0xff]  ;;  %v743_v29 = vld [vmem:[%s9512_s22 + $0xa38] sm:$0xff]  ;;  %v1254_v20 = vld [vmem:[%s9512_s22 + $0x1a30] sm:$0xff]  ;;  %v7201_v23 = vpack.c.bf16 %v774_v18, %v771_v17 }
 0x101   : > { %7482 = vmatprep.subr.bf16.mxu0 %v7481_v33  ;;  %2757 = vmatprep.mubr.f32.mxu1 %v380_v39  ;;  %v747_v33 = vld [vmem:[%s9512_s22 + $0xa58] sm:$0xff]  ;;  %v7183_v37 = vpack.c.bf16 %v743_v29, %v740_v28  ;;  %v1253_v28 = vld [vmem:[%s9512_s22 + $0x1a28] sm:$0xff] }
 0x102   : > { %3112 = vmatprep.mubr.f32.mxu0 %v390_v41  ;;  %v7185_v39 = vpack.c.bf16 %v750_v34, %v747_v33  ;;  %v749_v41 = vld [vmem:[%s9512_s22 + $0xa68] sm:$0xff] }
 0x103   : > { %7164 = vmatpush1.bf16.msra.mxu1 %v7163_v40  ;;  %v746_v40 = vld [vmem:[%s9512_s22 + $0xa50] sm:$0xff]  ;;  %v777_v29 = vld [vmem:[%s9512_s22 + $0xb48] sm:$0xff] }
 0x104   : > { %7484 = vmatpush1.bf16.msra.mxu0 %v7483_v42  ;;  %7166 = vmatprep.subr.bf16.mxu1 %v7165_v43  ;;  %v1226_v42 = vld [vmem:[%s9512_s22 + $0x1950] sm:$0xff]  ;;  %v7505_v43 = vpack.c.bf16 %v1230_v36, %v1227_v35  ;;  %v7187_v49 = vpack.c.bf16 %v749_v41, %v746_v40  ;;  %v7205_v35 = vpack.c.bf16 %v780_v30, %v777_v29  ;;  %v776_v36 = vld [vmem:[%s9512_s22 + $0xb40] sm:$0xff]  ;;  %v1259_v40 = vld [vmem:[%s9512_s22 + $0x1a58] sm:$0xff] }
 0x105   : > { %7486 = vmatprep.subr.bf16.mxu0 %v7485_v47  ;;  %v1233_v47 = vld [vmem:[%s9512_s22 + $0x1988] sm:$0xff]  ;;  %v7507_v50 = vpack.c.bf16 %v1229_v44, %v1226_v42  ;;  %v783_v41 = vld [vmem:[%s9512_s22 + $0xb78] sm:$0xff]  ;;  %v786_v42 = vld [vmem:[%s9512_s22 + $0xb90] sm:$0xff] }
 0x106   : > { %v1266_v44 = vld [vmem:[%s9512_s22 + $0x1a90] sm:$0xff]  ;;  %v379_v29 = vld [vmem:[%s9522_s27 + $0x30] sm:$0xff] }
 0x107   : > { %7168 = vmatpush1.bf16.msra.mxu1 %v7167_v53  ;;  %v755_v53 = vld [vmem:[%s9512_s22 + $0xa98] sm:$0xff] }
 0x108   : > { %7488 = vmatpush1.bf16.msra.mxu0 %v7487_v54  ;;  %7170 = vmatprep.subr.bf16.mxu1 %v7169_v55  ;;  %v1232_v54 = vld [vmem:[%s9512_s22 + $0x1980] sm:$0xff]  ;;  %v7509_v55 = vpack.c.bf16 %v1236_v48, %v1233_v47  ;;  %v7191_v61 = vpack.c.bf16 %v755_v53, %v752_v52  ;;  %v7209_v47 = vpack.c.bf16 %v786_v42, %v783_v41  ;;  %v782_v48 = vld [vmem:[%s9512_s22 + $0xb70] sm:$0xff]  ;;  %v1265_v52 = vld [vmem:[%s9512_s22 + $0x1a88] sm:$0xff] }
 0x109   : > { %7490 = vmatprep.subr.bf16.mxu0 %v7489_v59  ;;  %v1239_v59 = vld [vmem:[%s9512_s22 + $0x19b8] sm:$0xff]  ;;  %v7511_v62 = vpack.c.bf16 %v1235_v56, %v1232_v54  ;;  %v789_v53 = vld [vmem:[%s9512_s22 + $0xba8] sm:$0xff]  ;;  %v792_v54 = vld [vmem:[%s9512_s22 + $0xbc0] sm:$0xff] }
 0x10a   : > { %v1272_v56 = vld [vmem:[%s9512_s22 + $0x1ac0] sm:$0xff]  ;;  %v1293_v41 = vld [vmem:[%s9512_s22 + $0x1b68] sm:$0xff] }
 0x10b   : > { %7172 = vmatpush1.bf16.msra.mxu1 %v7171_v1  ;;  %v761_v1 = vld [vmem:[%s9512_s22 + $0xac8] sm:$0xff]  ;;  %v1296_v42 = vld [vmem:[%s9512_s22 + $0x1b80] sm:$0xff] }
 0x10c   : > { %7492 = vmatpush1.bf16.msra.mxu0 %v7491_v2  ;;  %7174 = vmatprep.subr.bf16.mxu1 %v7173_v3  ;;  %v1238_v2 = vld [vmem:[%s9512_s22 + $0x19b0] sm:$0xff]  ;;  %v7513_v3 = vpack.c.bf16 %v1242_v60, %v1239_v59  ;;  %v7195_v9 = vpack.c.bf16 %v761_v1, %v758_v0  ;;  %v7213_v59 = vpack.c.bf16 %v792_v54, %v789_v53  ;;  %v788_v60 = vld [vmem:[%s9512_s22 + $0xba0] sm:$0xff]  ;;  %v1271_v0 = vld [vmem:[%s9512_s22 + $0x1ab8] sm:$0xff] }
 0x10d   : > { %7494 = vmatprep.subr.bf16.mxu0 %v7493_v7  ;;  %v1245_v7 = vld [vmem:[%s9512_s22 + $0x19e8] sm:$0xff]  ;;  %v7515_v10 = vpack.c.bf16 %v1241_v4, %v1238_v2  ;;  %v795_v1 = vld [vmem:[%s9512_s22 + $0xbd8] sm:$0xff]  ;;  %v798_v2 = vld [vmem:[%s9512_s22 + $0xbf0] sm:$0xff] }
 0x10e   : > { %v1278_v4 = vld [vmem:[%s9512_s22 + $0x1af0] sm:$0xff]  ;;  %v819_v53 = vld [vmem:[%s9512_s22 + $0xc98] sm:$0xff] }
 0x10f   : > { %7176 = vmatpush1.bf16.msra.mxu1 %v7175_v13  ;;  %v767_v13 = vld [vmem:[%s9512_s22 + $0xaf8] sm:$0xff]  ;;  %v822_v54 = vld [vmem:[%s9512_s22 + $0xcb0] sm:$0xff] }
 0x110   : > { %7496 = vmatpush1.bf16.msra.mxu0 %v7495_v14  ;;  %7178 = vmatprep.subr.bf16.mxu1 %v7177_v15  ;;  %v1244_v14 = vld [vmem:[%s9512_s22 + $0x19e0] sm:$0xff]  ;;  %v7517_v15 = vpack.c.bf16 %v1248_v8, %v1245_v7  ;;  %v7199_v21 = vpack.c.bf16 %v767_v13, %v764_v12  ;;  %v7217_v7 = vpack.c.bf16 %v798_v2, %v795_v1  ;;  %v794_v8 = vld [vmem:[%s9512_s22 + $0xbd0] sm:$0xff]  ;;  %v1277_v12 = vld [vmem:[%s9512_s22 + $0x1ae8] sm:$0xff] }
 0x111   : > { %7498 = vmatprep.subr.bf16.mxu0 %v7497_v19  ;;  %v1251_v19 = vld [vmem:[%s9512_s22 + $0x1a18] sm:$0xff]  ;;  %v7519_v22 = vpack.c.bf16 %v1247_v16, %v1244_v14  ;;  %v801_v13 = vld [vmem:[%s9512_s22 + $0xc08] sm:$0xff]  ;;  %v804_v14 = vld [vmem:[%s9512_s22 + $0xc20] sm:$0xff] }
 0x112   : > { %v1284_v16 = vld [vmem:[%s9512_s22 + $0x1b20] sm:$0xff]  ;;  %v825_v1 = vld [vmem:[%s9512_s22 + $0xcc8] sm:$0xff] }
 0x113   : > { %7180 = vmatpush1.bf16.msra.mxu1 %v7179_v25  ;;  %v773_v25 = vld [vmem:[%s9512_s22 + $0xb28] sm:$0xff]  ;;  %v828_v2 = vld [vmem:[%s9512_s22 + $0xce0] sm:$0xff] }
 0x114   : > { %7500 = vmatpush1.bf16.msra.mxu0 %v7499_v26  ;;  %7182 = vmatprep.subr.bf16.mxu1 %v7181_v27  ;;  %v1250_v26 = vld [vmem:[%s9512_s22 + $0x1a10] sm:$0xff]  ;;  %v7521_v27 = vpack.c.bf16 %v1254_v20, %v1251_v19  ;;  %v7203_v33 = vpack.c.bf16 %v773_v25, %v770_v24  ;;  %v7221_v19 = vpack.c.bf16 %v804_v14, %v801_v13  ;;  %v800_v20 = vld [vmem:[%s9512_s22 + $0xc00] sm:$0xff]  ;;  %v1283_v24 = vld [vmem:[%s9512_s22 + $0x1b18] sm:$0xff] }
 0x115   : > { %7502 = vmatprep.subr.bf16.mxu0 %v7501_v31  ;;  %v1257_v31 = vld [vmem:[%s9512_s22 + $0x1a48] sm:$0xff]  ;;  %v7523_v34 = vpack.c.bf16 %v1253_v28, %v1250_v26  ;;  %v807_v25 = vld [vmem:[%s9512_s22 + $0xc38] sm:$0xff]  ;;  %v810_v26 = vld [vmem:[%s9512_s22 + $0xc50] sm:$0xff] }
 0x116   : > { %v1290_v28 = vld [vmem:[%s9512_s22 + $0x1b50] sm:$0xff]  ;;  %v831_v13 = vld [vmem:[%s9512_s22 + $0xcf8] sm:$0xff] }
 0x117   : > { %7184 = vmatpush1.bf16.msra.mxu1 %v7183_v37  ;;  %v779_v37 = vld [vmem:[%s9512_s22 + $0xb58] sm:$0xff]  ;;  %v834_v14 = vld [vmem:[%s9512_s22 + $0xd10] sm:$0xff] }
 0x118   : > { %7504 = vmatpush1.bf16.msra.mxu0 %v7503_v38  ;;  %7186 = vmatprep.subr.bf16.mxu1 %v7185_v39  ;;  %v1256_v38 = vld [vmem:[%s9512_s22 + $0x1a40] sm:$0xff]  ;;  %v7525_v39 = vpack.c.bf16 %v1260_v32, %v1257_v31  ;;  %v7207_v45 = vpack.c.bf16 %v779_v37, %v776_v36  ;;  %v389_v31 = vld [vmem:[%s9522_s27 + $0x80] sm:$0xff]  ;;  %v1286_v36 = vld [vmem:[%s9512_s22 + $0x1b30] sm:$0xff] }
 0x119   : > { %7506 = vmatprep.subr.bf16.mxu0 %v7505_v43  ;;  %v1263_v43 = vld [vmem:[%s9512_s22 + $0x1a78] sm:$0xff]  ;;  %v7527_v46 = vpack.c.bf16 %v1259_v40, %v1256_v38  ;;  %v1289_v38 = vld [vmem:[%s9512_s22 + $0x1b48] sm:$0xff]  ;;  %v816_v40 = vld [vmem:[%s9512_s22 + $0xc80] sm:$0xff] }
 0x11b   : > { %7188 = vmatpush1.bf16.msra.mxu1 %v7187_v49  ;;  %v785_v49 = vld [vmem:[%s9512_s22 + $0xb88] sm:$0xff] }
 0x11c   : > { %7508 = vmatpush1.bf16.msra.mxu0 %v7507_v50  ;;  %7190 = vmatprep.subr.bf16.mxu1 %v7189_v51  ;;  %v1262_v50 = vld [vmem:[%s9512_s22 + $0x1a70] sm:$0xff]  ;;  %v7529_v51 = vpack.c.bf16 %v1266_v44, %v1263_v43  ;;  %v7211_v57 = vpack.c.bf16 %v785_v49, %v782_v48  ;;  %v812_v48 = vld [vmem:[%s9512_s22 + $0xc60] sm:$0xff]  ;;  %v815_v49 = vld [vmem:[%s9512_s22 + $0xc78] sm:$0xff] }
 0x11d   : > { %7510 = vmatprep.subr.bf16.mxu0 %v7509_v55  ;;  %v1269_v55 = vld [vmem:[%s9512_s22 + $0x1aa8] sm:$0xff]  ;;  %v7531_v58 = vpack.c.bf16 %v1265_v52, %v1262_v50  ;;  %v382_v43 = vld [vmem:[%s9522_s27 + $0x48] sm:$0xff]  ;;  %v1292_v50 = vld [vmem:[%s9512_s22 + $0x1b60] sm:$0xff] }
 0x11e   : > { %v1295_v52 = vld [vmem:[%s9512_s22 + $0x1b78] sm:$0xff] }
 0x11f   : > { %7192 = vmatpush1.bf16.msra.mxu1 %v7191_v61  ;;  %v791_v61 = vld [vmem:[%s9512_s22 + $0xbb8] sm:$0xff] }
 0x120   : > { %7512 = vmatpush1.bf16.msra.mxu0 %v7511_v62  ;;  %7194 = vmatprep.subr.bf16.mxu1 %v7193_v63  ;;  %v1268_v62 = vld [vmem:[%s9512_s22 + $0x1aa0] sm:$0xff]  ;;  %v7533_v63 = vpack.c.bf16 %v1272_v56, %v1269_v55  ;;  %v7215_v5 = vpack.c.bf16 %v791_v61, %v788_v60  ;;  %v1299_v55 = vld [vmem:[%s9512_s22 + $0x1b98] sm:$0xff]  ;;  %v1302_v56 = vld [vmem:[%s9512_s22 + $0x1bb0] sm:$0xff] }
 0x121   : > { %7514 = vmatprep.subr.bf16.mxu0 %v7513_v3  ;;  %v1275_v3 = vld [vmem:[%s9512_s22 + $0x1ad8] sm:$0xff]  ;;  %v7535_v6 = vpack.c.bf16 %v1271_v0, %v1268_v62  ;;  %v818_v60 = vld [vmem:[%s9512_s22 + $0xc90] sm:$0xff]  ;;  %v821_v61 = vld [vmem:[%s9512_s22 + $0xca8] sm:$0xff] }
 0x122   : > { %v1298_v62 = vld [vmem:[%s9512_s22 + $0x1b90] sm:$0xff]  ;;  %v1301_v0 = vld [vmem:[%s9512_s22 + $0x1ba8] sm:$0xff] }
 0x123   : > { %7196 = vmatpush1.bf16.msra.mxu1 %v7195_v9  ;;  %v797_v9 = vld [vmem:[%s9512_s22 + $0xbe8] sm:$0xff] }
 0x124   : > { %7516 = vmatpush1.bf16.msra.mxu0 %v7515_v10  ;;  %7198 = vmatprep.subr.bf16.mxu1 %v7197_v11  ;;  %v1274_v10 = vld [vmem:[%s9512_s22 + $0x1ad0] sm:$0xff]  ;;  %v7537_v11 = vpack.c.bf16 %v1278_v4, %v1275_v3  ;;  %v7219_v17 = vpack.c.bf16 %v797_v9, %v794_v8  ;;  %v1305_v3 = vld [vmem:[%s9512_s22 + $0x1bc8] sm:$0xff]  ;;  %v1308_v4 = vld [vmem:[%s9512_s22 + $0x1be0] sm:$0xff] }
 0x125   : > { %7518 = vmatprep.subr.bf16.mxu0 %v7517_v15  ;;  %v1281_v15 = vld [vmem:[%s9512_s22 + $0x1b08] sm:$0xff]  ;;  %v7539_v18 = vpack.c.bf16 %v1277_v12, %v1274_v10  ;;  %v824_v8 = vld [vmem:[%s9512_s22 + $0xcc0] sm:$0xff]  ;;  %v827_v9 = vld [vmem:[%s9512_s22 + $0xcd8] sm:$0xff] }
 0x126   : > { %v1304_v10 = vld [vmem:[%s9512_s22 + $0x1bc0] sm:$0xff]  ;;  %v1307_v12 = vld [vmem:[%s9512_s22 + $0x1bd8] sm:$0xff] }
 0x127   : > { %7200 = vmatpush1.bf16.msra.mxu1 %v7199_v21  ;;  %v803_v21 = vld [vmem:[%s9512_s22 + $0xc18] sm:$0xff] }
 0x128   : > { %7520 = vmatpush1.bf16.msra.mxu0 %v7519_v22  ;;  %7202 = vmatprep.subr.bf16.mxu1 %v7201_v23  ;;  %v1280_v22 = vld [vmem:[%s9512_s22 + $0x1b00] sm:$0xff]  ;;  %v7541_v23 = vpack.c.bf16 %v1284_v16, %v1281_v15  ;;  %v7223_v30 = vpack.c.bf16 %v803_v21, %v800_v20  ;;  %v1311_v15 = vld [vmem:[%s9512_s22 + $0x1bf8] sm:$0xff]  ;;  %v1314_v16 = vld [vmem:[%s9512_s22 + $0x1c10] sm:$0xff] }
 0x129   : > { %7522 = vmatprep.subr.bf16.mxu0 %v7521_v27  ;;  %v1287_v27 = vld [vmem:[%s9512_s22 + $0x1b38] sm:$0xff]  ;;  %v7543_v32 = vpack.c.bf16 %v1283_v24, %v1280_v22  ;;  %v830_v20 = vld [vmem:[%s9512_s22 + $0xcf0] sm:$0xff]  ;;  %v833_v21 = vld [vmem:[%s9512_s22 + $0xd08] sm:$0xff] }
 0x12a   : > { %v7545_v37 = vpack.c.bf16 %v1290_v28, %v1287_v27  ;;  %v1310_v22 = vld [vmem:[%s9512_s22 + $0x1bf0] sm:$0xff]  ;;  %v1313_v24 = vld [vmem:[%s9512_s22 + $0x1c08] sm:$0xff]  ;;  %v1320_v28 = vld [vmem:[%s9512_s22 + $0x1c40] sm:$0xff] }
 0x12b   : > { %7204 = vmatpush1.bf16.msra.mxu1 %v7203_v33  ;;  %v7225_v33 = vpack.c.bf16 %v810_v26, %v807_v25  ;;  %v837_v25 = vld [vmem:[%s9512_s22 + $0xd28] sm:$0xff]  ;;  %v840_v26 = vld [vmem:[%s9512_s22 + $0xd40] sm:$0xff] }
 0x12c   : > { %7524 = vmatpush1.bf16.msra.mxu0 %v7523_v34  ;;  %7206 = vmatprep.subr.bf16.mxu1 %v7205_v35  ;;  %v806_v34 = vld [vmem:[%s9512_s22 + $0xc30] sm:$0xff]  ;;  %v809_v35 = vld [vmem:[%s9512_s22 + $0xc48] sm:$0xff] }
 0x12d   : > { %7526 = vmatprep.subr.bf16.mxu0 %v7525_v39  ;;  %v813_v39 = vld [vmem:[%s9512_s22 + $0xc68] sm:$0xff]  ;;  %v7227_v44 = vpack.c.bf16 %v809_v35, %v806_v34  ;;  %v1316_v34 = vld [vmem:[%s9512_s22 + $0x1c20] sm:$0xff] }
 0x12e   : > { %v1317_v27 = vld [vmem:[%s9512_s22 + $0x1c28] sm:$0xff] }
 0x12f   : > { %7208 = vmatpush1.bf16.msra.mxu1 %v7207_v45  ;;  %v392_v45 = vld [vmem:[%s9522_s27 + $0x98] sm:$0xff]  ;;  %v7565_v35 = vpack.c.bf16 %v1320_v28, %v1317_v27  ;;  %v866_v28 = vld [vmem:[%s9512_s22 + $0xe10] sm:$0xff] }
 0x130   : > { %7528 = vmatpush1.bf16.msra.mxu0 %v7527_v46  ;;  %7210 = vmatprep.subr.bf16.mxu1 %v7209_v47  ;;  %v7547_v46 = vpack.c.bf16 %v1289_v38, %v1286_v36  ;;  %v7229_v47 = vpack.c.bf16 %v816_v40, %v813_v39  ;;  %v1319_v36 = vld [vmem:[%s9512_s22 + $0x1c38] sm:$0xff]  ;;  %v846_v38 = vld [vmem:[%s9512_s22 + $0xd70] sm:$0xff] }
 0x131   : > { %7530 = vmatprep.subr.bf16.mxu0 %v7529_v51  ;;  %v7549_v51 = vpack.c.bf16 %v1296_v42, %v1293_v41  ;;  %v1323_v39 = vld [vmem:[%s9512_s22 + $0x1c58] sm:$0xff]  ;;  %v1326_v40 = vld [vmem:[%s9512_s22 + $0x1c70] sm:$0xff]  ;;  %v7567_v42 = vpack.c.bf16 %v1319_v36, %v1316_v34  ;;  %v876_v34 = vld [vmem:[%s9512_s22 + $0xe60] sm:$0xff] }
 0x132   : > { %v1356_v36 = vld [vmem:[%s9512_s22 + $0x1d60] sm:$0xff] }
 0x133   : > { %7212 = vmatpush1.bf16.msra.mxu1 %v7211_v57  ;;  %v7231_v57 = vpack.c.bf16 %v815_v49, %v812_v48  ;;  %v1325_v48 = vld [vmem:[%s9512_s22 + $0x1c68] sm:$0xff] }
 0x134   : > { %7532 = vmatpush1.bf16.msra.mxu0 %v7531_v58  ;;  %7214 = vmatprep.subr.bf16.mxu1 %v7213_v59  ;;  %v7551_v58 = vpack.c.bf16 %v1295_v52, %v1292_v50  ;;  %v7233_v59 = vpack.c.bf16 %v822_v54, %v819_v53  ;;  %v849_v49 = vld [vmem:[%s9512_s22 + $0xd88] sm:$0xff]  ;;  %v852_v50 = vld [vmem:[%s9512_s22 + $0xda0] sm:$0xff] }
 0x135   : > { %7534 = vmatprep.subr.bf16.mxu0 %v7533_v63  ;;  %v7553_v63 = vpack.c.bf16 %v1302_v56, %v1299_v55  ;;  %v1332_v52 = vld [vmem:[%s9512_s22 + $0x1ca0] sm:$0xff]  ;;  %v7253_v55 = vpack.c.bf16 %v852_v50, %v849_v49 }
 0x136   : > { %v848_v56 = vld [vmem:[%s9512_s22 + $0xd80] sm:$0xff] }
 0x137   : > { %7216 = vmatpush1.bf16.msra.mxu1 %v7215_v5  ;;  %v7235_v5 = vpack.c.bf16 %v821_v61, %v818_v60  ;;  %v1331_v60 = vld [vmem:[%s9512_s22 + $0x1c98] sm:$0xff] }
 0x138   : > { %7536 = vmatpush1.bf16.msra.mxu0 %v7535_v6  ;;  %7218 = vmatprep.subr.bf16.mxu1 %v7217_v7  ;;  %v7555_v6 = vpack.c.bf16 %v1301_v0, %v1298_v62  ;;  %v7237_v7 = vpack.c.bf16 %v828_v2, %v825_v1  ;;  %v855_v61 = vld [vmem:[%s9512_s22 + $0xdb8] sm:$0xff]  ;;  %v858_v62 = vld [vmem:[%s9512_s22 + $0xdd0] sm:$0xff] }
 0x139   : > { %7538 = vmatprep.subr.bf16.mxu0 %v7537_v11  ;;  %v7557_v11 = vpack.c.bf16 %v1308_v4, %v1305_v3  ;;  %v1338_v0 = vld [vmem:[%s9512_s22 + $0x1cd0] sm:$0xff]  ;;  %v7257_v3 = vpack.c.bf16 %v858_v62, %v855_v61 }
 0x13a   : > { %v854_v4 = vld [vmem:[%s9512_s22 + $0xdb0] sm:$0xff] }
 0x13b   : > { %7220 = vmatpush1.bf16.msra.mxu1 %v7219_v17  ;;  %v7239_v17 = vpack.c.bf16 %v827_v9, %v824_v8  ;;  %v1337_v8 = vld [vmem:[%s9512_s22 + $0x1cc8] sm:$0xff] }
 0x13c   : > { %7540 = vmatpush1.bf16.msra.mxu0 %v7539_v18  ;;  %7222 = vmatprep.subr.bf16.mxu1 %v7221_v19  ;;  %v7559_v18 = vpack.c.bf16 %v1307_v12, %v1304_v10  ;;  %v7241_v19 = vpack.c.bf16 %v834_v14, %v831_v13  ;;  %v861_v9 = vld [vmem:[%s9512_s22 + $0xde8] sm:$0xff]  ;;  %v864_v10 = vld [vmem:[%s9512_s22 + $0xe00] sm:$0xff] }
 0x13d   : > { %7542 = vmatprep.subr.bf16.mxu0 %v7541_v23  ;;  %v7561_v23 = vpack.c.bf16 %v1314_v16, %v1311_v15  ;;  %v1344_v12 = vld [vmem:[%s9512_s22 + $0x1d00] sm:$0xff]  ;;  %v7261_v15 = vpack.c.bf16 %v864_v10, %v861_v9 }
 0x13e   : > { %2758 = vmatmul.mubr.f32.vlgmr.msra.gmra.mrb[0].mxu1 %v379_v29  ;;  %v7243_v29 = vpack.c.bf16 %v833_v21, %v830_v20  ;;  %v860_v16 = vld [vmem:[%s9512_s22 + $0xde0] sm:$0xff]  ;;  %v1343_v20 = vld [vmem:[%s9512_s22 + $0x1cf8] sm:$0xff] }
 0x13f   : > { %7224 = vmatpush1.bf16.msra.mxu1 %v7223_v30  ;;  %3113 = vmatmul.mubr.f32.vlgmr.msra.gmra.mrb[0].mxu0 %v389_v31  ;;  %v7563_v30 = vpack.c.bf16 %v1313_v24, %v1310_v22  ;;  %v7245_v31 = vpack.c.bf16 %v840_v26, %v837_v25  ;;  %v867_v21 = vld [vmem:[%s9512_s22 + $0xe18] sm:$0xff]  ;;  %v870_v22 = vld [vmem:[%s9512_s22 + $0xe30] sm:$0xff] }
 0x140   : > { %7544 = vmatpush1.bf16.msra.mxu0 %v7543_v32  ;;  %7226 = vmatprep.subr.bf16.mxu1 %v7225_v33  ;;  %v836_v32 = vld [vmem:[%s9512_s22 + $0xd20] sm:$0xff]  ;;  %v839_v33 = vld [vmem:[%s9512_s22 + $0xd38] sm:$0xff]  ;;  %v1350_v24 = vld [vmem:[%s9512_s22 + $0x1d30] sm:$0xff]  ;;  %v7265_v27 = vpack.c.bf16 %v870_v22, %v867_v21 }
 0x141   : > { %7546 = vmatprep.subr.bf16.mxu0 %v7545_v37  ;;  %2828 = vmatprep.mubr.f32.mxu1 %v382_v43  ;;  %v843_v37 = vld [vmem:[%s9512_s22 + $0xd58] sm:$0xff]  ;;  %v7247_v41 = vpack.c.bf16 %v839_v33, %v836_v32  ;;  %v1349_v32 = vld [vmem:[%s9512_s22 + $0x1d28] sm:$0xff] }
 0x142   : > { %3183 = vmatprep.mubr.f32.mxu0 %v392_v45  ;;  %v7249_v43 = vpack.c.bf16 %v846_v38, %v843_v37  ;;  %v845_v45 = vld [vmem:[%s9512_s22 + $0xd68] sm:$0xff] }
 0x143   : > { %7228 = vmatpush1.bf16.msra.mxu1 %v7227_v44  ;;  %v842_v44 = vld [vmem:[%s9512_s22 + $0xd50] sm:$0xff]  ;;  %v873_v33 = vld [vmem:[%s9512_s22 + $0xe48] sm:$0xff] }
 0x144   : > { %7548 = vmatpush1.bf16.msra.mxu0 %v7547_v46  ;;  %7230 = vmatprep.subr.bf16.mxu1 %v7229_v47  ;;  %v1322_v46 = vld [vmem:[%s9512_s22 + $0x1c50] sm:$0xff]  ;;  %v7569_v47 = vpack.c.bf16 %v1326_v40, %v1323_v39  ;;  %v7251_v53 = vpack.c.bf16 %v845_v45, %v842_v44  ;;  %v7269_v39 = vpack.c.bf16 %v876_v34, %v873_v33  ;;  %v872_v40 = vld [vmem:[%s9512_s22 + $0xe40] sm:$0xff]  ;;  %v1355_v44 = vld [vmem:[%s9512_s22 + $0x1d58] sm:$0xff] }
 0x145   : > { %7550 = vmatprep.subr.bf16.mxu0 %v7549_v51  ;;  %v1329_v51 = vld [vmem:[%s9512_s22 + $0x1c88] sm:$0xff]  ;;  %v7571_v54 = vpack.c.bf16 %v1325_v48, %v1322_v46  ;;  %v879_v45 = vld [vmem:[%s9512_s22 + $0xe78] sm:$0xff]  ;;  %v882_v46 = vld [vmem:[%s9512_s22 + $0xe90] sm:$0xff] }
 0x146   : > { %v1362_v48 = vld [vmem:[%s9512_s22 + $0x1d90] sm:$0xff]  ;;  %v381_v33 = vld [vmem:[%s9522_s27 + $0x40] sm:$0xff]  ;;  %v391_v34 = vld [vmem:[%s9522_s27 + $0x90] sm:$0xff] }
 0x147   : > { %7232 = vmatpush1.bf16.msra.mxu1 %v7231_v57  ;;  %v851_v57 = vld [vmem:[%s9512_s22 + $0xd98] sm:$0xff] }
 0x148   : > { %7552 = vmatpush1.bf16.msra.mxu0 %v7551_v58  ;;  %7234 = vmatprep.subr.bf16.mxu1 %v7233_v59  ;;  %v1328_v58 = vld [vmem:[%s9512_s22 + $0x1c80] sm:$0xff]  ;;  %v7573_v59 = vpack.c.bf16 %v1332_v52, %v1329_v51  ;;  %v7255_v1 = vpack.c.bf16 %v851_v57, %v848_v56  ;;  %v7273_v51 = vpack.c.bf16 %v882_v46, %v879_v45  ;;  %v878_v52 = vld [vmem:[%s9512_s22 + $0xe70] sm:$0xff]  ;;  %v1361_v56 = vld [vmem:[%s9512_s22 + $0x1d88] sm:$0xff] }
 0x149   : > { %7554 = vmatprep.subr.bf16.mxu0 %v7553_v63  ;;  %v1335_v63 = vld [vmem:[%s9512_s22 + $0x1cb8] sm:$0xff]  ;;  %v7575_v2 = vpack.c.bf16 %v1331_v60, %v1328_v58  ;;  %v885_v57 = vld [vmem:[%s9512_s22 + $0xea8] sm:$0xff]  ;;  %v888_v58 = vld [vmem:[%s9512_s22 + $0xec0] sm:$0xff] }
 0x14a   : > { %v1368_v60 = vld [vmem:[%s9512_s22 + $0x1dc0] sm:$0xff]  ;;  %v1389_v45 = vld [vmem:[%s9512_s22 + $0x1e68] sm:$0xff] }
 0x14b   : > { %7236 = vmatpush1.bf16.msra.mxu1 %v7235_v5  ;;  %v857_v5 = vld [vmem:[%s9512_s22 + $0xdc8] sm:$0xff]  ;;  %v1392_v46 = vld [vmem:[%s9512_s22 + $0x1e80] sm:$0xff] }
 0x14c   : > { %7556 = vmatpush1.bf16.msra.mxu0 %v7555_v6  ;;  %7238 = vmatprep.subr.bf16.mxu1 %v7237_v7  ;;  %v1334_v6 = vld [vmem:[%s9512_s22 + $0x1cb0] sm:$0xff]  ;;  %v7577_v7 = vpack.c.bf16 %v1338_v0, %v1335_v63  ;;  %v7259_v13 = vpack.c.bf16 %v857_v5, %v854_v4  ;;  %v7277_v63 = vpack.c.bf16 %v888_v58, %v885_v57  ;;  %v884_v0 = vld [vmem:[%s9512_s22 + $0xea0] sm:$0xff]  ;;  %v1367_v4 = vld [vmem:[%s9512_s22 + $0x1db8] sm:$0xff] }
 0x14d   : > { %7558 = vmatprep.subr.bf16.mxu0 %v7557_v11  ;;  %v1341_v11 = vld [vmem:[%s9512_s22 + $0x1ce8] sm:$0xff]  ;;  %v7579_v14 = vpack.c.bf16 %v1337_v8, %v1334_v6  ;;  %v891_v5 = vld [vmem:[%s9512_s22 + $0xed8] sm:$0xff]  ;;  %v894_v6 = vld [vmem:[%s9512_s22 + $0xef0] sm:$0xff] }
 0x14e   : > { %v1374_v8 = vld [vmem:[%s9512_s22 + $0x1df0] sm:$0xff]  ;;  %v487_v57 = vld [vmem:[%s9512_s22 + $0x238] sm:$0xff] }
 0x14f   : > { %7240 = vmatpush1.bf16.msra.mxu1 %v7239_v17  ;;  %v863_v17 = vld [vmem:[%s9512_s22 + $0xdf8] sm:$0xff]  ;;  %v9268_v58 = vld [vmem:[%s9522_s27 + $0x8] sm:$0xff] }
 0x150   : > { %7560 = vmatpush1.bf16.msra.mxu0 %v7559_v18  ;;  %7242 = vmatprep.subr.bf16.mxu1 %v7241_v19  ;;  %v1340_v18 = vld [vmem:[%s9512_s22 + $0x1ce0] sm:$0xff]  ;;  %v7581_v19 = vpack.c.bf16 %v1344_v12, %v1341_v11  ;;  %v7263_v25 = vpack.c.bf16 %v863_v17, %v860_v16  ;;  %v7281_v11 = vpack.c.bf16 %v894_v6, %v891_v5  ;;  %v890_v12 = vld [vmem:[%s9512_s22 + $0xed0] sm:$0xff]  ;;  %v1373_v16 = vld [vmem:[%s9512_s22 + $0x1de8] sm:$0xff] }
 0x151   : > { %7562 = vmatprep.subr.bf16.mxu0 %v7561_v23  ;;  %v1347_v23 = vld [vmem:[%s9512_s22 + $0x1d18] sm:$0xff]  ;;  %v7583_v26 = vpack.c.bf16 %v1343_v20, %v1340_v18  ;;  %v466_v17 = vld [vmem:[%s9512_s22 + $0x190] sm:$0xff]  ;;  %v469_v18 = vld [vmem:[%s9512_s22 + $0x1a8] sm:$0xff] }
 0x152   : > { %v1380_v20 = vld [vmem:[%s9512_s22 + $0x1e20] sm:$0xff]  ;;  %v490_v5 = vld [vmem:[%s9512_s22 + $0x250] sm:$0xff]  ;;  %v493_v6 = vld [vmem:[%s9512_s22 + $0x268] sm:$0xff] }
 0x153   : > { %7244 = vmatpush1.bf16.msra.mxu1 %v7243_v29  ;;  %v869_v29 = vld [vmem:[%s9512_s22 + $0xe28] sm:$0xff] }
 0x154   : > { %7564 = vmatpush1.bf16.msra.mxu0 %v7563_v30  ;;  %7246 = vmatprep.subr.bf16.mxu1 %v7245_v31  ;;  %v1346_v30 = vld [vmem:[%s9512_s22 + $0x1d10] sm:$0xff]  ;;  %v7585_v31 = vpack.c.bf16 %v1350_v24, %v1347_v23  ;;  %v7267_v37 = vpack.c.bf16 %v869_v29, %v866_v28  ;;  %v8341_v23 = vpack.c.bf16 %v469_v18, %v466_v17  ;;  %v1376_v24 = vld [vmem:[%s9512_s22 + $0x1e00] sm:$0xff]  ;;  %v1379_v28 = vld [vmem:[%s9512_s22 + $0x1e18] sm:$0xff] }
 0x155   : > { %7566 = vmatprep.subr.bf16.mxu0 %v7565_v35  ;;  %v1353_v35 = vld [vmem:[%s9512_s22 + $0x1d48] sm:$0xff]  ;;  %v7587_v38 = vpack.c.bf16 %v1349_v32, %v1346_v30  ;;  %v472_v29 = vld [vmem:[%s9512_s22 + $0x1c0] sm:$0xff]  ;;  %v475_v30 = vld [vmem:[%s9512_s22 + $0x1d8] sm:$0xff] }
 0x156   : > { %v1386_v32 = vld [vmem:[%s9512_s22 + $0x1e50] sm:$0xff]  ;;  %v496_v17 = vld [vmem:[%s9512_s22 + $0x280] sm:$0xff]  ;;  %v499_v18 = vld [vmem:[%s9512_s22 + $0x298] sm:$0xff] }
 0x157   : > { %7248 = vmatpush1.bf16.msra.mxu1 %v7247_v41  ;;  %v875_v41 = vld [vmem:[%s9512_s22 + $0xe58] sm:$0xff] }
 0x158   : > { %7568 = vmatpush1.bf16.msra.mxu0 %v7567_v42  ;;  %7250 = vmatprep.subr.bf16.mxu1 %v7249_v43  ;;  %v1352_v42 = vld [vmem:[%s9512_s22 + $0x1d40] sm:$0xff]  ;;  %v7589_v43 = vpack.c.bf16 %v1356_v36, %v1353_v35  ;;  %v7271_v49 = vpack.c.bf16 %v875_v41, %v872_v40  ;;  %v7607_v36 = vpack.c.bf16 %v1379_v28, %v1376_v24  ;;  %v427_v40 = vld [vmem:[%s9512_s22 + $0x58] sm:$0xff]  ;;  %v1406_v24 = vld [vmem:[%s9512_s22 + $0x1ef0] sm:$0xff] }
 0x159   : > { %7570 = vmatprep.subr.bf16.mxu0 %v7569_v47  ;;  %v1359_v47 = vld [vmem:[%s9512_s22 + $0x1d78] sm:$0xff]  ;;  %v7591_v50 = vpack.c.bf16 %v1355_v44, %v1352_v42  ;;  %v1385_v42 = vld [vmem:[%s9512_s22 + $0x1e48] sm:$0xff] }
 0x15a   : > { %v481_v44 = vld [vmem:[%s9512_s22 + $0x208] sm:$0xff] }
 0x15b   : > { %7252 = vmatpush1.bf16.msra.mxu1 %v7251_v53  ;;  %v881_v53 = vld [vmem:[%s9512_s22 + $0xe88] sm:$0xff] }
 0x15c   : > { %7572 = vmatpush1.bf16.msra.mxu0 %v7571_v54  ;;  %7254 = vmatprep.subr.bf16.mxu1 %v7253_v55  ;;  %v1358_v54 = vld [vmem:[%s9512_s22 + $0x1d70] sm:$0xff]  ;;  %v7593_v55 = vpack.c.bf16 %v1362_v48, %v1359_v47  ;;  %v7275_v61 = vpack.c.bf16 %v881_v53, %v878_v52  ;;  %v433_v53 = vld [vmem:[%s9512_s22 + $0x88] sm:$0xff] }
 0x15d   : > { %7574 = vmatprep.subr.bf16.mxu0 %v7573_v59  ;;  %v1365_v59 = vld [vmem:[%s9512_s22 + $0x1da8] sm:$0xff]  ;;  %v7595_v62 = vpack.c.bf16 %v1361_v56, %v1358_v54  ;;  %v394_v48 = vld [vmem:[%s9522_s27 + $0xa8] sm:$0xff]  ;;  %v7613_v54 = vpack.c.bf16 %v1392_v46, %v1389_v45  ;;  %v484_v56 = vld [vmem:[%s9512_s22 + $0x220] sm:$0xff] }
 0x15e   : > { %v430_v52 = vld [vmem:[%s9512_s22 + $0x70] sm:$0xff]  ;;  %v1409_v28 = vld [vmem:[%s9512_s22 + $0x1f08] sm:$0xff] }
 0x15f   : > { %7256 = vmatpush1.bf16.msra.mxu1 %v7255_v1  ;;  %v887_v1 = vld [vmem:[%s9512_s22 + $0xeb8] sm:$0xff] }
 0x160   : > { %7576 = vmatpush1.bf16.msra.mxu0 %v7575_v2  ;;  %7258 = vmatprep.subr.bf16.mxu1 %v7257_v3  ;;  %v1364_v2 = vld [vmem:[%s9512_s22 + $0x1da0] sm:$0xff]  ;;  %v7597_v3 = vpack.c.bf16 %v1368_v60, %v1365_v59  ;;  %v7279_v9 = vpack.c.bf16 %v887_v1, %v884_v0  ;;  %v1395_v59 = vld [vmem:[%s9512_s22 + $0x1e98] sm:$0xff]  ;;  %v1398_v60 = vld [vmem:[%s9512_s22 + $0x1eb0] sm:$0xff] }
 0x161   : > { %7578 = vmatprep.subr.bf16.mxu0 %v7577_v7  ;;  %v1371_v7 = vld [vmem:[%s9512_s22 + $0x1dd8] sm:$0xff]  ;;  %v7599_v10 = vpack.c.bf16 %v1367_v4, %v1364_v2  ;;  %v1394_v0 = vld [vmem:[%s9512_s22 + $0x1e90] sm:$0xff]  ;;  %v436_v1 = vld [vmem:[%s9512_s22 + $0xa0] sm:$0xff] }
 0x162   : > { %v439_v2 = vld [vmem:[%s9512_s22 + $0xb8] sm:$0xff]  ;;  %v1397_v4 = vld [vmem:[%s9512_s22 + $0x1ea8] sm:$0xff] }
 0x163   : > { %7260 = vmatpush1.bf16.msra.mxu1 %v7259_v13  ;;  %v893_v13 = vld [vmem:[%s9512_s22 + $0xee8] sm:$0xff] }
 0x164   : > { %7580 = vmatpush1.bf16.msra.mxu0 %v7579_v14  ;;  %7262 = vmatprep.subr.bf16.mxu1 %v7261_v15  ;;  %v1370_v14 = vld [vmem:[%s9512_s22 + $0x1dd0] sm:$0xff]  ;;  %v7601_v15 = vpack.c.bf16 %v1374_v8, %v1371_v7  ;;  %v7283_v21 = vpack.c.bf16 %v893_v13, %v890_v12  ;;  %v1401_v7 = vld [vmem:[%s9512_s22 + $0x1ec8] sm:$0xff]  ;;  %v1404_v8 = vld [vmem:[%s9512_s22 + $0x1ee0] sm:$0xff] }
 0x165   : > { %7582 = vmatprep.subr.bf16.mxu0 %v7581_v19  ;;  %v1377_v19 = vld [vmem:[%s9512_s22 + $0x1e08] sm:$0xff]  ;;  %v7603_v22 = vpack.c.bf16 %v1373_v16, %v1370_v14  ;;  %v1400_v12 = vld [vmem:[%s9512_s22 + $0x1ec0] sm:$0xff]  ;;  %v442_v13 = vld [vmem:[%s9512_s22 + $0xd0] sm:$0xff] }
 0x166   : > { %v445_v14 = vld [vmem:[%s9512_s22 + $0xe8] sm:$0xff]  ;;  %v1403_v16 = vld [vmem:[%s9512_s22 + $0x1ed8] sm:$0xff] }
 0x167   : > { %7264 = vmatpush1.bf16.msra.mxu1 %v7263_v25  ;;  %v418_v25 = vld [vmem:[%s9512_s22 + $0x10] sm:$0xff] }
 0x168   : > { %7584 = vmatpush1.bf16.msra.mxu0 %v7583_v26  ;;  %7266 = vmatprep.subr.bf16.mxu1 %v7265_v27  ;;  %v421_v26 = vld [vmem:[%s9512_s22 + $0x28] sm:$0xff]  ;;  %v7605_v27 = vpack.c.bf16 %v1380_v20, %v1377_v19  ;;  %v1407_v19 = vld [vmem:[%s9512_s22 + $0x1ef8] sm:$0xff]  ;;  %v1410_v20 = vld [vmem:[%s9512_s22 + $0x1f10] sm:$0xff] }
 0x169   : > { %7586 = vmatprep.subr.bf16.mxu0 %v7585_v31  ;;  %v1383_v31 = vld [vmem:[%s9512_s22 + $0x1e38] sm:$0xff]  ;;  %v8343_v35 = vpack.c.bf16 %v421_v26, %v418_v25  ;;  %v448_v25 = vld [vmem:[%s9512_s22 + $0x100] sm:$0xff] }
 0x16a   : > { %v7609_v41 = vpack.c.bf16 %v1386_v32, %v1383_v31  ;;  %v451_v26 = vld [vmem:[%s9512_s22 + $0x118] sm:$0xff]  ;;  %v1413_v31 = vld [vmem:[%s9512_s22 + $0x1f28] sm:$0xff]  ;;  %v1416_v32 = vld [vmem:[%s9512_s22 + $0x1f40] sm:$0xff] }
 0x16b   : > { %7268 = vmatpush1.bf16.msra.mxu1 %v7267_v37  ;;  %v8345_v37 = vpack.c.bf16 %v475_v30, %v472_v29  ;;  %v502_v29 = vld [vmem:[%s9512_s22 + $0x2b0] sm:$0xff]  ;;  %v505_v30 = vld [vmem:[%s9512_s22 + $0x2c8] sm:$0xff] }
 0x16c   : > { %7588 = vmatpush1.bf16.msra.mxu0 %v7587_v38  ;;  %7270 = vmatprep.subr.bf16.mxu1 %v7269_v39  ;;  %v1382_v38 = vld [vmem:[%s9512_s22 + $0x1e30] sm:$0xff]  ;;  %v424_v39 = vld [vmem:[%s9512_s22 + $0x40] sm:$0xff] }
 0x16d   : > { %7590 = vmatprep.subr.bf16.mxu0 %v7589_v43  ;;  %v478_v43 = vld [vmem:[%s9512_s22 + $0x1f0] sm:$0xff]  ;;  %v8347_v47 = vpack.c.bf16 %v427_v40, %v424_v39  ;;  %v7629_v39 = vpack.c.bf16 %v1416_v32, %v1413_v31  ;;  %v1415_v40 = vld [vmem:[%s9512_s22 + $0x1f38] sm:$0xff] }
 0x16f   : > { %7272 = vmatpush1.bf16.msra.mxu1 %v7271_v49  ;;  %v7611_v49 = vpack.c.bf16 %v1385_v42, %v1382_v38  ;;  %v457_v38 = vld [vmem:[%s9512_s22 + $0x148] sm:$0xff]  ;;  %v511_v42 = vld [vmem:[%s9512_s22 + $0x2f8] sm:$0xff] }
 0x170   : > { %7592 = vmatpush1.bf16.msra.mxu0 %v7591_v50  ;;  %7274 = vmatprep.subr.bf16.mxu1 %v7273_v51  ;;  %v8349_v50 = vpack.c.bf16 %v481_v44, %v478_v43  ;;  %v1388_v51 = vld [vmem:[%s9512_s22 + $0x1e60] sm:$0xff]  ;;  %v1419_v43 = vld [vmem:[%s9512_s22 + $0x1f58] sm:$0xff]  ;;  %v1422_v44 = vld [vmem:[%s9512_s22 + $0x1f70] sm:$0xff] }
 0x171   : > { %7594 = vmatprep.subr.bf16.mxu0 %v7593_v55  ;;  %v1391_v55 = vld [vmem:[%s9512_s22 + $0x1e78] sm:$0xff] }
 0x173   : > { %7276 = vmatpush1.bf16.msra.mxu1 %v7275_v61  ;;  %v8351_v61 = vpack.c.bf16 %v433_v53, %v430_v52  ;;  %v1421_v52 = vld [vmem:[%s9512_s22 + $0x1f68] sm:$0xff]  ;;  %v562_v53 = vld [vmem:[%s9512_s22 + $0x490] sm:$0xff] }
 0x174   : > { %7596 = vmatpush1.bf16.msra.mxu0 %v7595_v62  ;;  %7278 = vmatprep.subr.bf16.mxu1 %v7277_v63  ;;  %v7615_v62 = vpack.c.bf16 %v1391_v55, %v1388_v51  ;;  %v8353_v63 = vpack.c.bf16 %v487_v57, %v484_v56  ;;  %v7633_v51 = vpack.c.bf16 %v1422_v44, %v1419_v43  ;;  %v1425_v55 = vld [vmem:[%s9512_s22 + $0x1f88] sm:$0xff]  ;;  %v1428_v56 = vld [vmem:[%s9512_s22 + $0x1fa0] sm:$0xff] }
 0x175   : > { %7598 = vmatprep.subr.bf16.mxu0 %v7597_v3  ;;  %v7617_v3 = vpack.c.bf16 %v1398_v60, %v1395_v59  ;;  %v1424_v60 = vld [vmem:[%s9512_s22 + $0x1f80] sm:$0xff] }
 0x177   : > { %7280 = vmatpush1.bf16.msra.mxu1 %v7279_v9  ;;  %v8355_v9 = vpack.c.bf16 %v439_v2, %v436_v1  ;;  %v568_v1 = vld [vmem:[%s9512_s22 + $0x4c0] sm:$0xff]  ;;  %v571_v2 = vld [vmem:[%s9512_s22 + $0x4d8] sm:$0xff] }
 0x178   : > { %7600 = vmatpush1.bf16.msra.mxu0 %v7599_v10  ;;  %7282 = vmatprep.subr.bf16.mxu1 %v7281_v11  ;;  %v7619_v10 = vpack.c.bf16 %v1397_v4, %v1394_v0  ;;  %v8357_v11 = vpack.c.bf16 %v493_v6, %v490_v5  ;;  %v1427_v0 = vld [vmem:[%s9512_s22 + $0x1f98] sm:$0xff]  ;;  %v1434_v4 = vld [vmem:[%s9512_s22 + $0x1fd0] sm:$0xff] }
 0x179   : > { %7602 = vmatprep.subr.bf16.mxu0 %v7601_v15  ;;  %v7621_v15 = vpack.c.bf16 %v1404_v8, %v1401_v7  ;;  %v7639_v6 = vpack.c.bf16 %v1427_v0, %v1424_v60  ;;  %v8377_v7 = vpack.c.bf16 %v571_v2, %v568_v1  ;;  %v1430_v8 = vld [vmem:[%s9512_s22 + $0x1fb0] sm:$0xff]  ;;  %v547_v60 = vld [vmem:[%s9512_s22 + $0x418] sm:$0xff]  ;;  %v601_v0 = vld [vmem:[%s9512_s22 + $0x5c8] sm:$0xff] }
 0x17a   : > { %v1461_v1 = vld [vmem:[%s9512_s22 + $0x20a8] sm:$0xff]  ;;  %v1464_v2 = vld [vmem:[%s9512_s22 + $0x20c0] sm:$0xff] }
 0x17b   : > { %7284 = vmatpush1.bf16.msra.mxu1 %v7283_v21  ;;  %v8359_v21 = vpack.c.bf16 %v445_v14, %v442_v13  ;;  %v574_v13 = vld [vmem:[%s9512_s22 + $0x4f0] sm:$0xff]  ;;  %v577_v14 = vld [vmem:[%s9512_s22 + $0x508] sm:$0xff] }
 0x17c   : > { %7604 = vmatpush1.bf16.msra.mxu0 %v7603_v22  ;;  %8342 = vmatprep.subr.bf16.mxu1 %v8341_v23  ;;  %v7623_v22 = vpack.c.bf16 %v1403_v16, %v1400_v12  ;;  %v8361_v23 = vpack.c.bf16 %v499_v18, %v496_v17  ;;  %v1433_v12 = vld [vmem:[%s9512_s22 + $0x1fc8] sm:$0xff]  ;;  %v1440_v17 = vld [vmem:[%s9512_s22 + $0x2000] sm:$0xff] }
 0x17d   : > { %7606 = vmatprep.subr.bf16.mxu0 %v7605_v27  ;;  %v7625_v27 = vpack.c.bf16 %v1410_v20, %v1407_v19  ;;  %v1437_v16 = vld [vmem:[%s9512_s22 + $0x1fe8] sm:$0xff]  ;;  %v9270_v19 = vld [vmem:[%s9522_s27 + $0x18] sm:$0xff]  ;;  %v7643_v20 = vpack.c.bf16 %v1433_v12, %v1430_v8  ;;  %v607_v12 = vld [vmem:[%s9512_s22 + $0x5f8] sm:$0xff] }
 0x17e   : > { %2829 = vmatmul.mubr.f32.vlgmr.msra.gmra.mrb[0].mxu1 %v381_v33  ;;  %v8363_v33 = vpack.c.bf16 %v451_v26, %v448_v25  ;;  %v7645_v25 = vpack.c.bf16 %v1440_v17, %v1437_v16  ;;  %v1439_v26 = vld [vmem:[%s9512_s22 + $0x1ff8] sm:$0xff]  ;;  %v553_v8 = vld [vmem:[%s9512_s22 + $0x448] sm:$0xff] }
 0x17f   : > { %3184 = vmatmul.mubr.f32.vlgmr.msra.gmra.mrb[0].mxu0 %v391_v34  ;;  %8344 = vmatpush3.bf16.msra.mxu1 %v8343_v35  ;;  %v7627_v34 = vpack.c.bf16 %v1409_v28, %v1406_v24  ;;  %v8365_v35 = vpack.c.bf16 %v505_v30, %v502_v29  ;;  %v529_v24 = vld [vmem:[%s9512_s22 + $0x388] sm:$0xff]  ;;  %v583_v28 = vld [vmem:[%s9512_s22 + $0x538] sm:$0xff]  ;;  %v1446_v30 = vld [vmem:[%s9512_s22 + $0x2030] sm:$0xff] }
 0x180   : > { %7608 = vmatpush1.bf16.msra.mxu0 %v7607_v36  ;;  %8346 = vmatprep.subr.bf16.mxu1 %v8345_v37  ;;  %v1412_v36 = vld [vmem:[%s9512_s22 + $0x1f20] sm:$0xff]  ;;  %v454_v37 = vld [vmem:[%s9512_s22 + $0x130] sm:$0xff]  ;;  %v1443_v29 = vld [vmem:[%s9512_s22 + $0x2018] sm:$0xff] }
 0x181   : > { %7610 = vmatprep.subr.bf16.mxu0 %v7609_v41  ;;  %4106 = vmatprep.mubr.f32.mxu1 %v9268_v58  ;;  %v508_v41 = vld [vmem:[%s9512_s22 + $0x2e0] sm:$0xff]  ;;  %v8367_v45 = vpack.c.bf16 %v457_v38, %v454_v37  ;;  %v7631_v46 = vpack.c.bf16 %v1415_v40, %v1412_v36  ;;  %v535_v36 = vld [vmem:[%s9512_s22 + $0x3b8] sm:$0xff]  ;;  %v7649_v37 = vpack.c.bf16 %v1446_v30, %v1443_v29  ;;  %v1445_v38 = vld [vmem:[%s9512_s22 + $0x2028] sm:$0xff] }
 0x182   : > { %3254 = vmatprep.mubr.f32.mxu0 %v394_v48  ;;  %v1418_v48 = vld [vmem:[%s9512_s22 + $0x1f50] sm:$0xff]  ;;  %v589_v40 = vld [vmem:[%s9512_s22 + $0x568] sm:$0xff]  ;;  %v1472_v30 = vld [vmem:[%s9512_s22 + $0x2100] sm:$0xff] }
 0x183   : > { %8348 = vmatpush3.bf16.msra.mxu1 %v8347_v47  ;;  %v8369_v47 = vpack.c.bf16 %v511_v42, %v508_v41  ;;  %v7635_v58 = vpack.c.bf16 %v1421_v52, %v1418_v48  ;;  %v1449_v41 = vld [vmem:[%s9512_s22 + $0x2048] sm:$0xff]  ;;  %v1452_v42 = vld [vmem:[%s9512_s22 + $0x2060] sm:$0xff]  ;;  %v595_v52 = vld [vmem:[%s9512_s22 + $0x598] sm:$0xff] }
 0x184   : > { %7612 = vmatpush1.bf16.msra.mxu0 %v7611_v49  ;;  %8350 = vmatprep.subr.bf16.mxu1 %v8349_v50  ;;  %v460_v49 = vld [vmem:[%s9512_s22 + $0x160] sm:$0xff]  ;;  %v463_v50 = vld [vmem:[%s9512_s22 + $0x178] sm:$0xff]  ;;  %v541_v48 = vld [vmem:[%s9512_s22 + $0x3e8] sm:$0xff] }
 0x185   : > { %7614 = vmatprep.subr.bf16.mxu0 %v7613_v54  ;;  %v565_v54 = vld [vmem:[%s9512_s22 + $0x4a8] sm:$0xff]  ;;  %v8371_v57 = vpack.c.bf16 %v463_v50, %v460_v49  ;;  %v7653_v49 = vpack.c.bf16 %v1452_v42, %v1449_v41  ;;  %v1451_v50 = vld [vmem:[%s9512_s22 + $0x2058] sm:$0xff] }
 0x186   : > { %v8373_v59 = vpack.c.bf16 %v565_v54, %v562_v53  ;;  %v1455_v53 = vld [vmem:[%s9512_s22 + $0x2078] sm:$0xff]  ;;  %v1458_v54 = vld [vmem:[%s9512_s22 + $0x2090] sm:$0xff] }
 0x187   : > { %8352 = vmatpush3.bf16.msra.mxu1 %v8351_v61  ;;  %v514_v61 = vld [vmem:[%s9512_s22 + $0x310] sm:$0xff] }
 0x188   : > { %7616 = vmatpush1.bf16.msra.mxu0 %v7615_v62  ;;  %8354 = vmatprep.subr.bf16.mxu1 %v8353_v63  ;;  %v517_v62 = vld [vmem:[%s9512_s22 + $0x328] sm:$0xff]  ;;  %v7637_v63 = vpack.c.bf16 %v1428_v56, %v1425_v55 }
 0x189   : > { %7618 = vmatprep.subr.bf16.mxu0 %v7617_v3  ;;  %v1431_v3 = vld [vmem:[%s9512_s22 + $0x1fb8] sm:$0xff]  ;;  %v8375_v5 = vpack.c.bf16 %v517_v62, %v514_v61  ;;  %v7657_v61 = vpack.c.bf16 %v1458_v54, %v1455_v53  ;;  %v1457_v62 = vld [vmem:[%s9512_s22 + $0x2088] sm:$0xff]  ;;  %v396_v54 = vld [vmem:[%s9522_s27 + $0xb8] sm:$0xff] }
 0x18b   : > { %8356 = vmatpush3.bf16.msra.mxu1 %v8355_v9  ;;  %v520_v9 = vld [vmem:[%s9512_s22 + $0x340] sm:$0xff] }
 0x18c   : > { %7620 = vmatpush1.bf16.msra.mxu0 %v7619_v10  ;;  %8358 = vmatprep.subr.bf16.mxu1 %v8357_v11  ;;  %v523_v10 = vld [vmem:[%s9512_s22 + $0x358] sm:$0xff]  ;;  %v7641_v11 = vpack.c.bf16 %v1434_v4, %v1431_v3 }
 0x18d   : > { %7622 = vmatprep.subr.bf16.mxu0 %v7621_v15  ;;  %v9269_v15 = vld [vmem:[%s9522_s27] sm:$0xff]  ;;  %v8379_v18 = vpack.c.bf16 %v523_v10, %v520_v9  ;;  %v7661_v9 = vpack.c.bf16 %v1464_v2, %v1461_v1  ;;  %v1463_v10 = vld [vmem:[%s9512_s22 + $0x20b8] sm:$0xff]  ;;  %v1494_v2 = vld [vmem:[%s9512_s22 + $0x21b0] sm:$0xff] }
 0x18e   : > { %v1491_v1 = vld [vmem:[%s9512_s22 + $0x2198] sm:$0xff] }
 0x18f   : > { %8360 = vmatpush3.bf16.msra.mxu1 %v8359_v21  ;;  %v8381_v21 = vpack.c.bf16 %v577_v14, %v574_v13  ;;  %v1467_v13 = vld [vmem:[%s9512_s22 + $0x20d8] sm:$0xff]  ;;  %v1470_v14 = vld [vmem:[%s9512_s22 + $0x20f0] sm:$0xff] }
 0x190   : > { %7624 = vmatpush1.bf16.msra.mxu0 %v7623_v22  ;;  %8362 = vmatprep.subr.bf16.mxu1 %v8361_v23  ;;  %v1436_v22 = vld [vmem:[%s9512_s22 + $0x1fe0] sm:$0xff]  ;;  %v526_v23 = vld [vmem:[%s9512_s22 + $0x370] sm:$0xff] }
 0x191   : > { %7626 = vmatprep.subr.bf16.mxu0 %v7625_v27  ;;  %v580_v27 = vld [vmem:[%s9512_s22 + $0x520] sm:$0xff]  ;;  %v8383_v31 = vpack.c.bf16 %v529_v24, %v526_v23  ;;  %v7647_v32 = vpack.c.bf16 %v1439_v26, %v1436_v22  ;;  %v1469_v22 = vld [vmem:[%s9512_s22 + $0x20e8] sm:$0xff]  ;;  %v658_v23 = vld [vmem:[%s9512_s22 + $0x790] sm:$0xff] }
 0x192   : > { %v661_v24 = vld [vmem:[%s9512_s22 + $0x7a8] sm:$0xff]  ;;  %v1476_v26 = vld [vmem:[%s9512_s22 + $0x2120] sm:$0xff] }
 0x193   : > { %8364 = vmatpush3.bf16.msra.mxu1 %v8363_v33  ;;  %v8385_v33 = vpack.c.bf16 %v583_v28, %v580_v27  ;;  %v8405_v29 = vpack.c.bf16 %v661_v24, %v658_v23  ;;  %v688_v23 = vld [vmem:[%s9512_s22 + $0x880] sm:$0xff]  ;;  %v691_v24 = vld [vmem:[%s9512_s22 + $0x898] sm:$0xff] }
 0x194   : > { %7628 = vmatpush1.bf16.msra.mxu0 %v7627_v34  ;;  %8366 = vmatprep.subr.bf16.mxu1 %v8365_v35  ;;  %v1442_v34 = vld [vmem:[%s9512_s22 + $0x2010] sm:$0xff]  ;;  %v532_v35 = vld [vmem:[%s9512_s22 + $0x3a0] sm:$0xff] }
 0x195   : > { %7630 = vmatprep.subr.bf16.mxu0 %v7629_v39  ;;  %v586_v39 = vld [vmem:[%s9512_s22 + $0x550] sm:$0xff]  ;;  %v8387_v43 = vpack.c.bf16 %v535_v36, %v532_v35  ;;  %v7651_v44 = vpack.c.bf16 %v1445_v38, %v1442_v34  ;;  %v1475_v34 = vld [vmem:[%s9512_s22 + $0x2118] sm:$0xff]  ;;  %v664_v35 = vld [vmem:[%s9512_s22 + $0x7c0] sm:$0xff] }
 0x196   : > { %v667_v36 = vld [vmem:[%s9512_s22 + $0x7d8] sm:$0xff]  ;;  %v1482_v38 = vld [vmem:[%s9512_s22 + $0x2150] sm:$0xff]  ;;  %v7671_v41 = vpack.c.bf16 %v1475_v34, %v1472_v30  ;;  %v1505_v34 = vld [vmem:[%s9512_s22 + $0x2208] sm:$0xff] }
 0x197   : > { %8368 = vmatpush3.bf16.msra.mxu1 %v8367_v45  ;;  %v8389_v45 = vpack.c.bf16 %v589_v40, %v586_v39  ;;  %v393_v39 = vld [vmem:[%s9522_s27 + $0xa0] sm:$0xff]  ;;  %v8409_v42 = vpack.c.bf16 %v667_v36, %v664_v35  ;;  %v1502_v30 = vld [vmem:[%s9512_s22 + $0x21f0] sm:$0xff] }
 0x198   : > { %7632 = vmatpush1.bf16.msra.mxu0 %v7631_v46  ;;  %8370 = vmatprep.subr.bf16.mxu1 %v8369_v47  ;;  %v1448_v46 = vld [vmem:[%s9512_s22 + $0x2040] sm:$0xff]  ;;  %v538_v47 = vld [vmem:[%s9512_s22 + $0x3d0] sm:$0xff]  ;;  %v697_v36 = vld [vmem:[%s9512_s22 + $0x8c8] sm:$0xff] }
 0x199   : > { %7634 = vmatprep.subr.bf16.mxu0 %v7633_v51  ;;  %v592_v51 = vld [vmem:[%s9512_s22 + $0x580] sm:$0xff]  ;;  %v8391_v55 = vpack.c.bf16 %v541_v48, %v538_v47  ;;  %v7655_v56 = vpack.c.bf16 %v1451_v50, %v1448_v46  ;;  %v1481_v47 = vld [vmem:[%s9512_s22 + $0x2148] sm:$0xff]  ;;  %v670_v48 = vld [vmem:[%s9512_s22 + $0x7f0] sm:$0xff] }
 0x19a   : > { %v9271_v50 = vld [vmem:[%s9522_s27 + $0x10] sm:$0xff]  ;;  %v694_v35 = vld [vmem:[%s9512_s22 + $0x8b0] sm:$0xff] }
 0x19b   : > { %8372 = vmatpush3.bf16.msra.mxu1 %v8371_v57  ;;  %v8393_v57 = vpack.c.bf16 %v595_v52, %v592_v51  ;;  %v1485_v51 = vld [vmem:[%s9512_s22 + $0x2168] sm:$0xff]  ;;  %v1488_v52 = vld [vmem:[%s9512_s22 + $0x2180] sm:$0xff] }
 0x19c   : > { %7636 = vmatpush1.bf16.msra.mxu0 %v7635_v58  ;;  %8374 = vmatprep.subr.bf16.mxu1 %v8373_v59  ;;  %v1454_v58 = vld [vmem:[%s9512_s22 + $0x2070] sm:$0xff]  ;;  %v544_v59 = vld [vmem:[%s9512_s22 + $0x400] sm:$0xff] }
 0x19d   : > { %7638 = vmatprep.subr.bf16.mxu0 %v7637_v63  ;;  %v598_v63 = vld [vmem:[%s9512_s22 + $0x5b0] sm:$0xff]  ;;  %v8395_v3 = vpack.c.bf16 %v547_v60, %v544_v59  ;;  %v7659_v4 = vpack.c.bf16 %v1457_v62, %v1454_v58  ;;  %v625_v59 = vld [vmem:[%s9512_s22 + $0x688] sm:$0xff]  ;;  %v7677_v60 = vpack.c.bf16 %v1488_v52, %v1485_v51  ;;  %v676_v62 = vld [vmem:[%s9512_s22 + $0x820] sm:$0xff] }
 0x19e   : > { %4107 = vmatmul.mubr.f32.vlgmr.msra.gmra.mrb[2].mxu1 %v9269_v15  ;;  %v622_v58 = vld [vmem:[%s9512_s22 + $0x670] sm:$0xff] }
 0x19f   : > { %8376 = vmatpush3.bf16.msra.mxu1 %v8375_v5  ;;  %4176 = vmatprep.mubr.f32.mxu1 %v9270_v19  ;;  %v8397_v5 = vpack.c.bf16 %v601_v0, %v598_v63  ;;  %v556_v19 = vld [vmem:[%s9512_s22 + $0x460] sm:$0xff]  ;;  %v679_v63 = vld [vmem:[%s9512_s22 + $0x838] sm:$0xff]  ;;  %v9272_v0 = vld [vmem:[%s9522_s27 + $0x28] sm:$0xff] }
 0x1a0   : > { %7640 = vmatpush1.bf16.msra.mxu0 %v7639_v6  ;;  %8378 = vmatprep.subr.bf16.mxu1 %v8377_v7  ;;  %v1460_v6 = vld [vmem:[%s9512_s22 + $0x20a0] sm:$0xff]  ;;  %v550_v7 = vld [vmem:[%s9512_s22 + $0x430] sm:$0xff] }
 0x1a1   : > { %7642 = vmatprep.subr.bf16.mxu0 %v7641_v11  ;;  %v604_v11 = vld [vmem:[%s9512_s22 + $0x5e0] sm:$0xff]  ;;  %v8399_v15 = vpack.c.bf16 %v553_v8, %v550_v7  ;;  %v7663_v16 = vpack.c.bf16 %v1463_v10, %v1460_v6  ;;  %v1490_v6 = vld [vmem:[%s9512_s22 + $0x2190] sm:$0xff]  ;;  %v631_v8 = vld [vmem:[%s9512_s22 + $0x6b8] sm:$0xff] }
 0x1a2   : > { %v8401_v17 = vpack.c.bf16 %v607_v12, %v604_v11  ;;  %v628_v7 = vld [vmem:[%s9512_s22 + $0x6a0] sm:$0xff]  ;;  %v1493_v10 = vld [vmem:[%s9512_s22 + $0x21a8] sm:$0xff]  ;;  %v682_v11 = vld [vmem:[%s9512_s22 + $0x850] sm:$0xff] }
 0x1a3   : > { %8380 = vmatpush3.bf16.msra.mxu1 %v8379_v18  ;;  %v1466_v18 = vld [vmem:[%s9512_s22 + $0x20d0] sm:$0xff]  ;;  %v685_v12 = vld [vmem:[%s9512_s22 + $0x868] sm:$0xff] }
 0x1a4   : > { %7644 = vmatpush1.bf16.msra.mxu0 %v7643_v20  ;;  %8382 = vmatprep.subr.bf16.mxu1 %v8381_v21  ;;  %v559_v20 = vld [vmem:[%s9512_s22 + $0x478] sm:$0xff]  ;;  %v7665_v21 = vpack.c.bf16 %v1470_v14, %v1467_v13  ;;  %v7667_v28 = vpack.c.bf16 %v1469_v22, %v1466_v18  ;;  %v1497_v13 = vld [vmem:[%s9512_s22 + $0x21c8] sm:$0xff]  ;;  %v1500_v14 = vld [vmem:[%s9512_s22 + $0x21e0] sm:$0xff] }
 0x1a5   : > { %7646 = vmatprep.subr.bf16.mxu0 %v7645_v25  ;;  %v1473_v25 = vld [vmem:[%s9512_s22 + $0x2108] sm:$0xff]  ;;  %v8403_v27 = vpack.c.bf16 %v559_v20, %v556_v19  ;;  %v1496_v18 = vld [vmem:[%s9512_s22 + $0x21c0] sm:$0xff]  ;;  %v634_v19 = vld [vmem:[%s9512_s22 + $0x6d0] sm:$0xff] }
 0x1a6   : > { %v637_v20 = vld [vmem:[%s9512_s22 + $0x6e8] sm:$0xff]  ;;  %v1499_v22 = vld [vmem:[%s9512_s22 + $0x21d8] sm:$0xff] }
 0x1a7   : > { %8384 = vmatpush3.bf16.msra.mxu1 %v8383_v31  ;;  %v610_v31 = vld [vmem:[%s9512_s22 + $0x610] sm:$0xff] }
 0x1a8   : > { %7648 = vmatpush1.bf16.msra.mxu0 %v7647_v32  ;;  %8386 = vmatprep.subr.bf16.mxu1 %v8385_v33  ;;  %v613_v32 = vld [vmem:[%s9512_s22 + $0x628] sm:$0xff]  ;;  %v7669_v33 = vpack.c.bf16 %v1476_v26, %v1473_v25  ;;  %v1503_v25 = vld [vmem:[%s9512_s22 + $0x21f8] sm:$0xff]  ;;  %v1506_v26 = vld [vmem:[%s9512_s22 + $0x2210] sm:$0xff] }
 0x1a9   : > { %7650 = vmatprep.subr.bf16.mxu0 %v7649_v37  ;;  %v1479_v37 = vld [vmem:[%s9512_s22 + $0x2138] sm:$0xff]  ;;  %v8407_v40 = vpack.c.bf16 %v613_v32, %v610_v31  ;;  %v640_v31 = vld [vmem:[%s9512_s22 + $0x700] sm:$0xff] }
 0x1aa   : > { %v7673_v46 = vpack.c.bf16 %v1482_v38, %v1479_v37  ;;  %v643_v32 = vld [vmem:[%s9512_s22 + $0x718] sm:$0xff]  ;;  %v1509_v37 = vld [vmem:[%s9512_s22 + $0x2228] sm:$0xff]  ;;  %v1512_v38 = vld [vmem:[%s9512_s22 + $0x2240] sm:$0xff] }
 0x1ab   : > { %8388 = vmatpush3.bf16.msra.mxu1 %v8387_v43  ;;  %v1478_v43 = vld [vmem:[%s9512_s22 + $0x2130] sm:$0xff] }
 0x1ac   : > { %7652 = vmatpush1.bf16.msra.mxu0 %v7651_v44  ;;  %8390 = vmatprep.subr.bf16.mxu1 %v8389_v45  ;;  %v616_v44 = vld [vmem:[%s9512_s22 + $0x640] sm:$0xff]  ;;  %v619_v45 = vld [vmem:[%s9512_s22 + $0x658] sm:$0xff] }
 0x1ad   : > { %7654 = vmatprep.subr.bf16.mxu0 %v7653_v49  ;;  %v673_v49 = vld [vmem:[%s9512_s22 + $0x808] sm:$0xff]  ;;  %v8411_v53 = vpack.c.bf16 %v619_v45, %v616_v44  ;;  %v7693_v45 = vpack.c.bf16 %v1512_v38, %v1509_v37 }
 0x1ae   : > { %v649_v44 = vld [vmem:[%s9512_s22 + $0x748] sm:$0xff] }
 0x1af   : > { %8392 = vmatpush3.bf16.msra.mxu1 %v8391_v55  ;;  %v7675_v55 = vpack.c.bf16 %v1481_v47, %v1478_v43  ;;  %v646_v43 = vld [vmem:[%s9512_s22 + $0x730] sm:$0xff]  ;;  %v700_v47 = vld [vmem:[%s9512_s22 + $0x8e0] sm:$0xff] }
 0x1b0   : > { %7656 = vmatpush1.bf16.msra.mxu0 %v7655_v56  ;;  %8394 = vmatprep.subr.bf16.mxu1 %v8393_v57  ;;  %v8413_v56 = vpack.c.bf16 %v673_v49, %v670_v48  ;;  %v1484_v57 = vld [vmem:[%s9512_s22 + $0x2160] sm:$0xff]  ;;  %v703_v48 = vld [vmem:[%s9512_s22 + $0x8f8] sm:$0xff]  ;;  %v8431_v51 = vpack.c.bf16 %v649_v44, %v646_v43  ;;  %v1541_v44 = vld [vmem:[%s9512_s22 + $0x2328] sm:$0xff] }
 0x1b1   : > { %7658 = vmatprep.subr.bf16.mxu0 %v7657_v61  ;;  %v1487_v61 = vld [vmem:[%s9512_s22 + $0x2178] sm:$0xff] }
 0x1b2   : > { %v1515_v49 = vld [vmem:[%s9512_s22 + $0x2258] sm:$0xff] }
 0x1b3   : > { %8396 = vmatpush3.bf16.msra.mxu1 %v8395_v3  ;;  %v8415_v3 = vpack.c.bf16 %v625_v59, %v622_v58  ;;  %v1517_v58 = vld [vmem:[%s9512_s22 + $0x2268] sm:$0xff]  ;;  %v754_v59 = vld [vmem:[%s9512_s22 + $0xa90] sm:$0xff] }
 0x1b4   : > { %7660 = vmatpush1.bf16.msra.mxu0 %v7659_v4  ;;  %8398 = vmatprep.subr.bf16.mxu1 %v8397_v5  ;;  %v7679_v4 = vpack.c.bf16 %v1487_v61, %v1484_v57  ;;  %v8417_v5 = vpack.c.bf16 %v679_v63, %v676_v62  ;;  %v1521_v61 = vld [vmem:[%s9512_s22 + $0x2288] sm:$0xff]  ;;  %v1524_v62 = vld [vmem:[%s9512_s22 + $0x22a0] sm:$0xff] }
 0x1b5   : > { %7662 = vmatprep.subr.bf16.mxu0 %v7661_v9  ;;  %v7681_v9 = vpack.c.bf16 %v1494_v2, %v1491_v1  ;;  %v1520_v2 = vld [vmem:[%s9512_s22 + $0x2280] sm:$0xff] }
 0x1b7   : > { %8400 = vmatpush3.bf16.msra.mxu1 %v8399_v15  ;;  %v8419_v15 = vpack.c.bf16 %v631_v8, %v628_v7  ;;  %v760_v7 = vld [vmem:[%s9512_s22 + $0xac0] sm:$0xff]  ;;  %v763_v8 = vld [vmem:[%s9512_s22 + $0xad8] sm:$0xff] }
 0x1b8   : > { %7664 = vmatpush1.bf16.msra.mxu0 %v7663_v16  ;;  %8402 = vmatprep.subr.bf16.mxu1 %v8401_v17  ;;  %v7683_v16 = vpack.c.bf16 %v1493_v10, %v1490_v6  ;;  %v8421_v17 = vpack.c.bf16 %v685_v12, %v682_v11  ;;  %v1523_v6 = vld [vmem:[%s9512_s22 + $0x2298] sm:$0xff]  ;;  %v1530_v10 = vld [vmem:[%s9512_s22 + $0x22d0] sm:$0xff] }
 0x1b9   : > { %7666 = vmatprep.subr.bf16.mxu0 %v7665_v21  ;;  %v7685_v21 = vpack.c.bf16 %v1500_v14, %v1497_v13  ;;  %v7703_v12 = vpack.c.bf16 %v1523_v6, %v1520_v2  ;;  %v8441_v13 = vpack.c.bf16 %v763_v8, %v760_v7  ;;  %v1526_v14 = vld [vmem:[%s9512_s22 + $0x22b0] sm:$0xff]  ;;  %v739_v2 = vld [vmem:[%s9512_s22 + $0xa18] sm:$0xff]  ;;  %v793_v6 = vld [vmem:[%s9512_s22 + $0xbc8] sm:$0xff] }
 0x1ba   : > { %v1557_v7 = vld [vmem:[%s9512_s22 + $0x23a8] sm:$0xff]  ;;  %v1560_v8 = vld [vmem:[%s9512_s22 + $0x23c0] sm:$0xff] }
 0x1bb   : > { %8404 = vmatpush3.bf16.msra.mxu1 %v8403_v27  ;;  %v8423_v27 = vpack.c.bf16 %v637_v20, %v634_v19  ;;  %v766_v19 = vld [vmem:[%s9512_s22 + $0xaf0] sm:$0xff]  ;;  %v769_v20 = vld [vmem:[%s9512_s22 + $0xb08] sm:$0xff] }
 0x1bc   : > { %7668 = vmatpush1.bf16.msra.mxu0 %v7667_v28  ;;  %8406 = vmatprep.subr.bf16.mxu1 %v8405_v29  ;;  %v7687_v28 = vpack.c.bf16 %v1499_v22, %v1496_v18  ;;  %v8425_v29 = vpack.c.bf16 %v691_v24, %v688_v23  ;;  %v1529_v18 = vld [vmem:[%s9512_s22 + $0x22c8] sm:$0xff]  ;;  %v1536_v23 = vld [vmem:[%s9512_s22 + $0x2300] sm:$0xff] }
 0x1bd   : > { %7670 = vmatprep.subr.bf16.mxu0 %v7669_v33  ;;  %v7689_v33 = vpack.c.bf16 %v1506_v26, %v1503_v25  ;;  %v1533_v22 = vld [vmem:[%s9512_s22 + $0x22e8] sm:$0xff]  ;;  %v9274_v25 = vld [vmem:[%s9522_s27 + $0x38] sm:$0xff]  ;;  %v7707_v26 = vpack.c.bf16 %v1529_v18, %v1526_v14  ;;  %v799_v18 = vld [vmem:[%s9512_s22 + $0xbf8] sm:$0xff] }
 0x1be   : > { %4177 = vmatmul.mubr.f32.vlgmr.msra.gmra.mrb[4].mxu1 %v9271_v50  ;;  %v1518_v50 = vld [vmem:[%s9512_s22 + $0x2270] sm:$0xff]  ;;  %v745_v14 = vld [vmem:[%s9512_s22 + $0xa48] sm:$0xff] }
 0x1bf   : > { %3255 = vmatmul.mubr.f32.vlgmr.msra.gmra.mrb[0].mxu0 %v393_v39  ;;  %8408 = vmatpush3.bf16.msra.mxu1 %v8407_v40  ;;  %v8427_v39 = vpack.c.bf16 %v643_v32, %v640_v31  ;;  %v7691_v40 = vpack.c.bf16 %v1505_v34, %v1502_v30  ;;  %v7697_v57 = vpack.c.bf16 %v1518_v50, %v1515_v49  ;;  %v721_v30 = vld [vmem:[%s9512_s22 + $0x988] sm:$0xff]  ;;  %v1535_v32 = vld [vmem:[%s9512_s22 + $0x22f8] sm:$0xff] }
 0x1c0   : > { %7672 = vmatpush1.bf16.msra.mxu0 %v7671_v41  ;;  %8410 = vmatprep.subr.bf16.mxu1 %v8409_v42  ;;  %v8429_v41 = vpack.c.bf16 %v697_v36, %v694_v35  ;;  %v1508_v42 = vld [vmem:[%s9512_s22 + $0x2220] sm:$0xff]  ;;  %v7709_v31 = vpack.c.bf16 %v1536_v23, %v1533_v22  ;;  %v775_v34 = vld [vmem:[%s9512_s22 + $0xb38] sm:$0xff]  ;;  %v1542_v36 = vld [vmem:[%s9512_s22 + $0x2330] sm:$0xff] }
 0x1c1   : > { %7674 = vmatprep.subr.bf16.mxu0 %v7673_v46  ;;  %4246 = vmatprep.mubr.f32.mxu1 %v9272_v0  ;;  %v1511_v46 = vld [vmem:[%s9512_s22 + $0x2238] sm:$0xff] }
 0x1c2   : > { %3325 = vmatprep.mubr.f32.mxu0 %v396_v54  ;;  %v7695_v52 = vpack.c.bf16 %v1511_v46, %v1508_v42  ;;  %v1514_v54 = vld [vmem:[%s9512_s22 + $0x2250] sm:$0xff]  ;;  %v1539_v35 = vld [vmem:[%s9512_s22 + $0x2318] sm:$0xff]  ;;  %v781_v46 = vld [vmem:[%s9512_s22 + $0xb68] sm:$0xff] }
 0x1c3   : > { %8412 = vmatpush3.bf16.msra.mxu1 %v8411_v53  ;;  %v8433_v53 = vpack.c.bf16 %v703_v48, %v700_v47  ;;  %v7699_v0 = vpack.c.bf16 %v1517_v58, %v1514_v54  ;;  %v727_v42 = vld [vmem:[%s9512_s22 + $0x9b8] sm:$0xff]  ;;  %v7713_v43 = vpack.c.bf16 %v1542_v36, %v1539_v35  ;;  %v1545_v47 = vld [vmem:[%s9512_s22 + $0x2348] sm:$0xff]  ;;  %v1548_v48 = vld [vmem:[%s9512_s22 + $0x2360] sm:$0xff] }
 0x1c4   : > { %7676 = vmatpush1.bf16.msra.mxu0 %v7675_v55  ;;  %8414 = vmatprep.subr.bf16.mxu1 %v8413_v56  ;;  %v652_v55 = vld [vmem:[%s9512_s22 + $0x760] sm:$0xff]  ;;  %v655_v56 = vld [vmem:[%s9512_s22 + $0x778] sm:$0xff]  ;;  %v733_v54 = vld [vmem:[%s9512_s22 + $0x9e8] sm:$0xff] }
 0x1c5   : > { %7678 = vmatprep.subr.bf16.mxu0 %v7677_v60  ;;  %v757_v60 = vld [vmem:[%s9512_s22 + $0xaa8] sm:$0xff]  ;;  %v8435_v63 = vpack.c.bf16 %v655_v56, %v652_v55  ;;  %v7717_v55 = vpack.c.bf16 %v1548_v48, %v1545_v47  ;;  %v1547_v56 = vld [vmem:[%s9512_s22 + $0x2358] sm:$0xff]  ;;  %v1568_v36 = vld [vmem:[%s9512_s22 + $0x2400] sm:$0xff] }
 0x1c6   : > { %v8437_v1 = vpack.c.bf16 %v757_v60, %v754_v59  ;;  %v787_v58 = vld [vmem:[%s9512_s22 + $0xb98] sm:$0xff]  ;;  %v1554_v60 = vld [vmem:[%s9512_s22 + $0x2390] sm:$0xff] }
 0x1c7   : > { %8416 = vmatpush3.bf16.msra.mxu1 %v8415_v3  ;;  %v706_v3 = vld [vmem:[%s9512_s22 + $0x910] sm:$0xff]  ;;  %v1551_v59 = vld [vmem:[%s9512_s22 + $0x2378] sm:$0xff] }
 0x1c8   : > { %7680 = vmatpush1.bf16.msra.mxu0 %v7679_v4  ;;  %8418 = vmatprep.subr.bf16.mxu1 %v8417_v5  ;;  %v709_v4 = vld [vmem:[%s9512_s22 + $0x928] sm:$0xff]  ;;  %v7701_v5 = vpack.c.bf16 %v1524_v62, %v1521_v61 }
 0x1c9   : > { %7682 = vmatprep.subr.bf16.mxu0 %v7681_v9  ;;  %v1527_v9 = vld [vmem:[%s9512_s22 + $0x22b8] sm:$0xff]  ;;  %v8439_v11 = vpack.c.bf16 %v709_v4, %v706_v3  ;;  %v7721_v3 = vpack.c.bf16 %v1554_v60, %v1551_v59  ;;  %v1553_v4 = vld [vmem:[%s9512_s22 + $0x2388] sm:$0xff]  ;;  %v398_v60 = vld [vmem:[%s9522_s27 + $0xc8] sm:$0xff] }
 0x1cb   : > { %8420 = vmatpush3.bf16.msra.mxu1 %v8419_v15  ;;  %v712_v15 = vld [vmem:[%s9512_s22 + $0x940] sm:$0xff] }
 0x1cc   : > { %7684 = vmatpush1.bf16.msra.mxu0 %v7683_v16  ;;  %8422 = vmatprep.subr.bf16.mxu1 %v8421_v17  ;;  %v715_v16 = vld [vmem:[%s9512_s22 + $0x958] sm:$0xff]  ;;  %v7705_v17 = vpack.c.bf16 %v1530_v10, %v1527_v9 }
 0x1cd   : > { %7686 = vmatprep.subr.bf16.mxu0 %v7685_v21  ;;  %v9273_v21 = vld [vmem:[%s9522_s27 + $0x20] sm:$0xff]  ;;  %v8443_v24 = vpack.c.bf16 %v715_v16, %v712_v15  ;;  %v7725_v15 = vpack.c.bf16 %v1560_v8, %v1557_v7  ;;  %v1559_v16 = vld [vmem:[%s9512_s22 + $0x23b8] sm:$0xff]  ;;  %v1590_v8 = vld [vmem:[%s9512_s22 + $0x24b0] sm:$0xff] }
 0x1ce   : > { %v1587_v7 = vld [vmem:[%s9512_s22 + $0x2498] sm:$0xff] }
 0x1cf   : > { %8424 = vmatpush3.bf16.msra.mxu1 %v8423_v27  ;;  %v8445_v27 = vpack.c.bf16 %v769_v20, %v766_v19  ;;  %v1563_v19 = vld [vmem:[%s9512_s22 + $0x23d8] sm:$0xff]  ;;  %v1566_v20 = vld [vmem:[%s9512_s22 + $0x23f0] sm:$0xff] }
 0x1d0   : > { %7688 = vmatpush1.bf16.msra.mxu0 %v7687_v28  ;;  %8426 = vmatprep.subr.bf16.mxu1 %v8425_v29  ;;  %v1532_v28 = vld [vmem:[%s9512_s22 + $0x22e0] sm:$0xff]  ;;  %v718_v29 = vld [vmem:[%s9512_s22 + $0x970] sm:$0xff] }
 0x1d1   : > { %7690 = vmatprep.subr.bf16.mxu0 %v7689_v33  ;;  %v772_v33 = vld [vmem:[%s9512_s22 + $0xb20] sm:$0xff]  ;;  %v8447_v37 = vpack.c.bf16 %v721_v30, %v718_v29  ;;  %v7711_v38 = vpack.c.bf16 %v1535_v32, %v1532_v28  ;;  %v1565_v28 = vld [vmem:[%s9512_s22 + $0x23e8] sm:$0xff]  ;;  %v850_v29 = vld [vmem:[%s9512_s22 + $0xd90] sm:$0xff] }
 0x1d2   : > { %v853_v30 = vld [vmem:[%s9512_s22 + $0xda8] sm:$0xff]  ;;  %v1572_v32 = vld [vmem:[%s9512_s22 + $0x2420] sm:$0xff] }
 0x1d3   : > { %8428 = vmatpush3.bf16.msra.mxu1 %v8427_v39  ;;  %v8449_v39 = vpack.c.bf16 %v775_v34, %v772_v33  ;;  %v8469_v35 = vpack.c.bf16 %v853_v30, %v850_v29  ;;  %v880_v29 = vld [vmem:[%s9512_s22 + $0xe80] sm:$0xff]  ;;  %v883_v30 = vld [vmem:[%s9512_s22 + $0xe98] sm:$0xff] }
 0x1d4   : > { %7692 = vmatpush1.bf16.msra.mxu0 %v7691_v40  ;;  %8430 = vmatprep.subr.bf16.mxu1 %v8429_v41  ;;  %v1538_v40 = vld [vmem:[%s9512_s22 + $0x2310] sm:$0xff]  ;;  %v724_v41 = vld [vmem:[%s9512_s22 + $0x9a0] sm:$0xff] }
 0x1d5   : > { %7694 = vmatprep.subr.bf16.mxu0 %v7693_v45  ;;  %v778_v45 = vld [vmem:[%s9512_s22 + $0xb50] sm:$0xff]  ;;  %v8451_v49 = vpack.c.bf16 %v727_v42, %v724_v41  ;;  %v7715_v50 = vpack.c.bf16 %v1541_v44, %v1538_v40  ;;  %v1571_v40 = vld [vmem:[%s9512_s22 + $0x2418] sm:$0xff]  ;;  %v856_v41 = vld [vmem:[%s9512_s22 + $0xdc0] sm:$0xff] }
 0x1d6   : > { %v859_v42 = vld [vmem:[%s9512_s22 + $0xdd8] sm:$0xff]  ;;  %v1578_v44 = vld [vmem:[%s9512_s22 + $0x2450] sm:$0xff]  ;;  %v7735_v47 = vpack.c.bf16 %v1571_v40, %v1568_v36  ;;  %v1601_v40 = vld [vmem:[%s9512_s22 + $0x2508] sm:$0xff] }
 0x1d7   : > { %8432 = vmatpush3.bf16.msra.mxu1 %v8431_v51  ;;  %v8453_v51 = vpack.c.bf16 %v781_v46, %v778_v45  ;;  %v395_v45 = vld [vmem:[%s9522_s27 + $0xb0] sm:$0xff]  ;;  %v8473_v48 = vpack.c.bf16 %v859_v42, %v856_v41  ;;  %v1598_v36 = vld [vmem:[%s9512_s22 + $0x24f0] sm:$0xff]  ;;  %v889_v42 = vld [vmem:[%s9512_s22 + $0xec8] sm:$0xff] }
 0x1d8   : > { %7696 = vmatpush1.bf16.msra.mxu0 %v7695_v52  ;;  %8434 = vmatprep.subr.bf16.mxu1 %v8433_v53  ;;  %v1544_v52 = vld [vmem:[%s9512_s22 + $0x2340] sm:$0xff]  ;;  %v730_v53 = vld [vmem:[%s9512_s22 + $0x9d0] sm:$0xff] }
 0x1d9   : > { %7698 = vmatprep.subr.bf16.mxu0 %v7697_v57  ;;  %v784_v57 = vld [vmem:[%s9512_s22 + $0xb80] sm:$0xff]  ;;  %v8455_v61 = vpack.c.bf16 %v733_v54, %v730_v53  ;;  %v7719_v62 = vpack.c.bf16 %v1547_v56, %v1544_v52  ;;  %v1577_v53 = vld [vmem:[%s9512_s22 + $0x2448] sm:$0xff]  ;;  %v862_v54 = vld [vmem:[%s9512_s22 + $0xdf0] sm:$0xff] }
 0x1da   : > { %v9275_v56 = vld [vmem:[%s9522_s27 + $0x30] sm:$0xff]  ;;  %v886_v41 = vld [vmem:[%s9512_s22 + $0xeb0] sm:$0xff] }
 0x1db   : > { %8436 = vmatpush3.bf16.msra.mxu1 %v8435_v63  ;;  %v8457_v63 = vpack.c.bf16 %v787_v58, %v784_v57  ;;  %v1581_v57 = vld [vmem:[%s9512_s22 + $0x2468] sm:$0xff]  ;;  %v1584_v58 = vld [vmem:[%s9512_s22 + $0x2480] sm:$0xff] }
 0x1dc   : > { %7700 = vmatpush1.bf16.msra.mxu0 %v7699_v0  ;;  %8438 = vmatprep.subr.bf16.mxu1 %v8437_v1  ;;  %v1550_v0 = vld [vmem:[%s9512_s22 + $0x2370] sm:$0xff]  ;;  %v736_v1 = vld [vmem:[%s9512_s22 + $0xa00] sm:$0xff] }
 0x1dd   : > { %7702 = vmatprep.subr.bf16.mxu0 %v7701_v5  ;;  %v790_v5 = vld [vmem:[%s9512_s22 + $0xbb0] sm:$0xff]  ;;  %v8459_v9 = vpack.c.bf16 %v739_v2, %v736_v1  ;;  %v7723_v10 = vpack.c.bf16 %v1553_v4, %v1550_v0  ;;  %v817_v1 = vld [vmem:[%s9512_s22 + $0xc88] sm:$0xff]  ;;  %v7741_v2 = vpack.c.bf16 %v1584_v58, %v1581_v57  ;;  %v868_v4 = vld [vmem:[%s9512_s22 + $0xe20] sm:$0xff] }
 0x1de   : > { %4247 = vmatmul.mubr.f32.vlgmr.msra.gmra.mrb[6].mxu1 %v9273_v21  ;;  %v814_v0 = vld [vmem:[%s9512_s22 + $0xc70] sm:$0xff] }
 0x1df   : > { %8440 = vmatpush3.bf16.msra.mxu1 %v8439_v11  ;;  %4316 = vmatprep.mubr.f32.mxu1 %v9274_v25  ;;  %v8461_v11 = vpack.c.bf16 %v793_v6, %v790_v5  ;;  %v748_v25 = vld [vmem:[%s9512_s22 + $0xa60] sm:$0xff]  ;;  %v871_v5 = vld [vmem:[%s9512_s22 + $0xe38] sm:$0xff]  ;;  %v9276_v6 = vld [vmem:[%s9522_s27 + $0x48] sm:$0xff] }
 0x1e0   : > { %7704 = vmatpush1.bf16.msra.mxu0 %v7703_v12  ;;  %8442 = vmatprep.subr.bf16.mxu1 %v8441_v13  ;;  %v1556_v12 = vld [vmem:[%s9512_s22 + $0x23a0] sm:$0xff]  ;;  %v742_v13 = vld [vmem:[%s9512_s22 + $0xa30] sm:$0xff] }
 0x1e1   : > { %7706 = vmatprep.subr.bf16.mxu0 %v7705_v17  ;;  %v796_v17 = vld [vmem:[%s9512_s22 + $0xbe0] sm:$0xff]  ;;  %v8463_v21 = vpack.c.bf16 %v745_v14, %v742_v13  ;;  %v7727_v22 = vpack.c.bf16 %v1559_v16, %v1556_v12  ;;  %v1586_v12 = vld [vmem:[%s9512_s22 + $0x2490] sm:$0xff]  ;;  %v823_v14 = vld [vmem:[%s9512_s22 + $0xcb8] sm:$0xff] }
 0x1e2   : > { %v8465_v23 = vpack.c.bf16 %v799_v18, %v796_v17  ;;  %v820_v13 = vld [vmem:[%s9512_s22 + $0xca0] sm:$0xff]  ;;  %v1589_v16 = vld [vmem:[%s9512_s22 + $0x24a8] sm:$0xff]  ;;  %v874_v17 = vld [vmem:[%s9512_s22 + $0xe50] sm:$0xff] }
 0x1e3   : > { %8444 = vmatpush3.bf16.msra.mxu1 %v8443_v24  ;;  %v1562_v24 = vld [vmem:[%s9512_s22 + $0x23d0] sm:$0xff]  ;;  %v877_v18 = vld [vmem:[%s9512_s22 + $0xe68] sm:$0xff] }
 0x1e4   : > { %7708 = vmatpush1.bf16.msra.mxu0 %v7707_v26  ;;  %8446 = vmatprep.subr.bf16.mxu1 %v8445_v27  ;;  %v751_v26 = vld [vmem:[%s9512_s22 + $0xa78] sm:$0xff]  ;;  %v7729_v27 = vpack.c.bf16 %v1566_v20, %v1563_v19  ;;  %v7731_v34 = vpack.c.bf16 %v1565_v28, %v1562_v24  ;;  %v1593_v19 = vld [vmem:[%s9512_s22 + $0x24c8] sm:$0xff]  ;;  %v1596_v20 = vld [vmem:[%s9512_s22 + $0x24e0] sm:$0xff] }
 0x1e5   : > { %7710 = vmatprep.subr.bf16.mxu0 %v7709_v31  ;;  %v1569_v31 = vld [vmem:[%s9512_s22 + $0x2408] sm:$0xff]  ;;  %v8467_v33 = vpack.c.bf16 %v751_v26, %v748_v25  ;;  %v1592_v24 = vld [vmem:[%s9512_s22 + $0x24c0] sm:$0xff]  ;;  %v826_v25 = vld [vmem:[%s9512_s22 + $0xcd0] sm:$0xff] }
 0x1e6   : > { %v829_v26 = vld [vmem:[%s9512_s22 + $0xce8] sm:$0xff]  ;;  %v1595_v28 = vld [vmem:[%s9512_s22 + $0x24d8] sm:$0xff] }
 0x1e7   : > { %8448 = vmatpush3.bf16.msra.mxu1 %v8447_v37  ;;  %v802_v37 = vld [vmem:[%s9512_s22 + $0xc10] sm:$0xff] }
 0x1e8   : > { %7712 = vmatpush1.bf16.msra.mxu0 %v7711_v38  ;;  %8450 = vmatprep.subr.bf16.mxu1 %v8449_v39  ;;  %v805_v38 = vld [vmem:[%s9512_s22 + $0xc28] sm:$0xff]  ;;  %v7733_v39 = vpack.c.bf16 %v1572_v32, %v1569_v31  ;;  %v1599_v31 = vld [vmem:[%s9512_s22 + $0x24f8] sm:$0xff]  ;;  %v1602_v32 = vld [vmem:[%s9512_s22 + $0x2510] sm:$0xff] }
 0x1e9   : > { %7714 = vmatprep.subr.bf16.mxu0 %v7713_v43  ;;  %v1575_v43 = vld [vmem:[%s9512_s22 + $0x2438] sm:$0xff]  ;;  %v8471_v46 = vpack.c.bf16 %v805_v38, %v802_v37  ;;  %v832_v37 = vld [vmem:[%s9512_s22 + $0xd00] sm:$0xff] }
 0x1ea   : > { %v7737_v52 = vpack.c.bf16 %v1578_v44, %v1575_v43  ;;  %v835_v38 = vld [vmem:[%s9512_s22 + $0xd18] sm:$0xff]  ;;  %v1605_v43 = vld [vmem:[%s9512_s22 + $0x2528] sm:$0xff]  ;;  %v1608_v44 = vld [vmem:[%s9512_s22 + $0x2540] sm:$0xff] }
 0x1eb   : > { %8452 = vmatpush3.bf16.msra.mxu1 %v8451_v49  ;;  %v1574_v49 = vld [vmem:[%s9512_s22 + $0x2430] sm:$0xff] }
 0x1ec   : > { %7716 = vmatpush1.bf16.msra.mxu0 %v7715_v50  ;;  %8454 = vmatprep.subr.bf16.mxu1 %v8453_v51  ;;  %v808_v50 = vld [vmem:[%s9512_s22 + $0xc40] sm:$0xff]  ;;  %v811_v51 = vld [vmem:[%s9512_s22 + $0xc58] sm:$0xff] }
 0x1ed   : > { %7718 = vmatprep.subr.bf16.mxu0 %v7717_v55  ;;  %v865_v55 = vld [vmem:[%s9512_s22 + $0xe08] sm:$0xff]  ;;  %v8475_v59 = vpack.c.bf16 %v811_v51, %v808_v50  ;;  %v7757_v51 = vpack.c.bf16 %v1608_v44, %v1605_v43 }
 0x1ee   : > { %v841_v50 = vld [vmem:[%s9512_s22 + $0xd48] sm:$0xff] }
 0x1ef   : > { %8456 = vmatpush3.bf16.msra.mxu1 %v8455_v61  ;;  %v7739_v61 = vpack.c.bf16 %v1577_v53, %v1574_v49  ;;  %v838_v49 = vld [vmem:[%s9512_s22 + $0xd30] sm:$0xff]  ;;  %v892_v53 = vld [vmem:[%s9512_s22 + $0xee0] sm:$0xff] }
 0x1f0   : > { %7720 = vmatpush1.bf16.msra.mxu0 %v7719_v62  ;;  %8458 = vmatprep.subr.bf16.mxu1 %v8457_v63  ;;  %v8477_v62 = vpack.c.bf16 %v865_v55, %v862_v54  ;;  %v1580_v63 = vld [vmem:[%s9512_s22 + $0x2460] sm:$0xff]  ;;  %v895_v54 = vld [vmem:[%s9512_s22 + $0xef8] sm:$0xff]  ;;  %v8495_v57 = vpack.c.bf16 %v841_v50, %v838_v49  ;;  %v1637_v50 = vld [vmem:[%s9512_s22 + $0x2628] sm:$0xff] }
 0x1f1   : > { %7722 = vmatprep.subr.bf16.mxu0 %v7721_v3  ;;  %v1583_v3 = vld [vmem:[%s9512_s22 + $0x2478] sm:$0xff] }
 0x1f2   : > { %v1611_v55 = vld [vmem:[%s9512_s22 + $0x2558] sm:$0xff] }
 0x1f3   : > { %8460 = vmatpush3.bf16.msra.mxu1 %v8459_v9  ;;  %v8479_v9 = vpack.c.bf16 %v817_v1, %v814_v0  ;;  %v1613_v0 = vld [vmem:[%s9512_s22 + $0x2568] sm:$0xff]  ;;  %v946_v1 = vld [vmem:[%s9512_s22 + $0x1090] sm:$0xff] }
 0x1f4   : > { %7724 = vmatpush1.bf16.msra.mxu0 %v7723_v10  ;;  %8462 = vmatprep.subr.bf16.mxu1 %v8461_v11  ;;  %v7743_v10 = vpack.c.bf16 %v1583_v3, %v1580_v63  ;;  %v8481_v11 = vpack.c.bf16 %v871_v5, %v868_v4  ;;  %v1617_v3 = vld [vmem:[%s9512_s22 + $0x2588] sm:$0xff]  ;;  %v1620_v4 = vld [vmem:[%s9512_s22 + $0x25a0] sm:$0xff] }
 0x1f5   : > { %7726 = vmatprep.subr.bf16.mxu0 %v7725_v15  ;;  %v7745_v15 = vpack.c.bf16 %v1590_v8, %v1587_v7  ;;  %v1616_v8 = vld [vmem:[%s9512_s22 + $0x2580] sm:$0xff] }
 0x1f7   : > { %8464 = vmatpush3.bf16.msra.mxu1 %v8463_v21  ;;  %v8483_v21 = vpack.c.bf16 %v823_v14, %v820_v13  ;;  %v952_v13 = vld [vmem:[%s9512_s22 + $0x10c0] sm:$0xff]  ;;  %v955_v14 = vld [vmem:[%s9512_s22 + $0x10d8] sm:$0xff] }
 0x1f8   : > { %7728 = vmatpush1.bf16.msra.mxu0 %v7727_v22  ;;  %8466 = vmatprep.subr.bf16.mxu1 %v8465_v23  ;;  %v7747_v22 = vpack.c.bf16 %v1589_v16, %v1586_v12  ;;  %v8485_v23 = vpack.c.bf16 %v877_v18, %v874_v17  ;;  %v1619_v12 = vld [vmem:[%s9512_s22 + $0x2598] sm:$0xff]  ;;  %v1626_v16 = vld [vmem:[%s9512_s22 + $0x25d0] sm:$0xff] }
 0x1f9   : > { %7730 = vmatprep.subr.bf16.mxu0 %v7729_v27  ;;  %v7749_v27 = vpack.c.bf16 %v1596_v20, %v1593_v19  ;;  %v7767_v18 = vpack.c.bf16 %v1619_v12, %v1616_v8  ;;  %v8505_v19 = vpack.c.bf16 %v955_v14, %v952_v13  ;;  %v1622_v20 = vld [vmem:[%s9512_s22 + $0x25b0] sm:$0xff]  ;;  %v931_v8 = vld [vmem:[%s9512_s22 + $0x1018] sm:$0xff]  ;;  %v985_v12 = vld [vmem:[%s9512_s22 + $0x11c8] sm:$0xff] }
 0x1fa   : > { %v1653_v13 = vld [vmem:[%s9512_s22 + $0x26a8] sm:$0xff]  ;;  %v1656_v14 = vld [vmem:[%s9512_s22 + $0x26c0] sm:$0xff] }
 0x1fb   : > { %8468 = vmatpush3.bf16.msra.mxu1 %v8467_v33  ;;  %v8487_v33 = vpack.c.bf16 %v829_v26, %v826_v25  ;;  %v958_v25 = vld [vmem:[%s9512_s22 + $0x10f0] sm:$0xff]  ;;  %v961_v26 = vld [vmem:[%s9512_s22 + $0x1108] sm:$0xff] }
 0x1fc   : > { %7732 = vmatpush1.bf16.msra.mxu0 %v7731_v34  ;;  %8470 = vmatprep.subr.bf16.mxu1 %v8469_v35  ;;  %v7751_v34 = vpack.c.bf16 %v1595_v28, %v1592_v24  ;;  %v8489_v35 = vpack.c.bf16 %v883_v30, %v880_v29  ;;  %v1625_v24 = vld [vmem:[%s9512_s22 + $0x25c8] sm:$0xff]  ;;  %v1632_v29 = vld [vmem:[%s9512_s22 + $0x2600] sm:$0xff] }
 0x1fd   : > { %7734 = vmatprep.subr.bf16.mxu0 %v7733_v39  ;;  %v7753_v39 = vpack.c.bf16 %v1602_v32, %v1599_v31  ;;  %v1629_v28 = vld [vmem:[%s9512_s22 + $0x25e8] sm:$0xff]  ;;  %v9278_v31 = vld [vmem:[%s9522_s27 + $0x58] sm:$0xff]  ;;  %v7771_v32 = vpack.c.bf16 %v1625_v24, %v1622_v20  ;;  %v991_v24 = vld [vmem:[%s9512_s22 + $0x11f8] sm:$0xff] }
 0x1fe   : > { %4317 = vmatmul.mubr.f32.vlgmr.msra.gmra.mrb[8].mxu1 %v9275_v56  ;;  %v1614_v56 = vld [vmem:[%s9512_s22 + $0x2570] sm:$0xff]  ;;  %v937_v20 = vld [vmem:[%s9512_s22 + $0x1048] sm:$0xff] }
 0x1ff   : > { %3326 = vmatmul.mubr.f32.vlgmr.msra.gmra.mrb[0].mxu0 %v395_v45  ;;  %8472 = vmatpush3.bf16.msra.mxu1 %v8471_v46  ;;  %v8491_v45 = vpack.c.bf16 %v835_v38, %v832_v37  ;;  %v7755_v46 = vpack.c.bf16 %v1601_v40, %v1598_v36  ;;  %v7761_v63 = vpack.c.bf16 %v1614_v56, %v1611_v55  ;;  %v913_v36 = vld [vmem:[%s9512_s22 + $0xf88] sm:$0xff]  ;;  %v1631_v38 = vld [vmem:[%s9512_s22 + $0x25f8] sm:$0xff] }
 0x200   : > { %7736 = vmatpush1.bf16.msra.mxu0 %v7735_v47  ;;  %8474 = vmatprep.subr.bf16.mxu1 %v8473_v48  ;;  %v8493_v47 = vpack.c.bf16 %v889_v42, %v886_v41  ;;  %v1604_v48 = vld [vmem:[%s9512_s22 + $0x2520] sm:$0xff]  ;;  %v7773_v37 = vpack.c.bf16 %v1632_v29, %v1629_v28  ;;  %v967_v40 = vld [vmem:[%s9512_s22 + $0x1138] sm:$0xff]  ;;  %v1638_v42 = vld [vmem:[%s9512_s22 + $0x2630] sm:$0xff] }
 0x201   : > { %7738 = vmatprep.subr.bf16.mxu0 %v7737_v52  ;;  %4386 = vmatprep.mubr.f32.mxu1 %v9276_v6  ;;  %v1607_v52 = vld [vmem:[%s9512_s22 + $0x2538] sm:$0xff] }
 0x202   : > { %3396 = vmatprep.mubr.f32.mxu0 %v398_v60  ;;  %v7759_v58 = vpack.c.bf16 %v1607_v52, %v1604_v48  ;;  %v1610_v60 = vld [vmem:[%s9512_s22 + $0x2550] sm:$0xff]  ;;  %v1635_v41 = vld [vmem:[%s9512_s22 + $0x2618] sm:$0xff]  ;;  %v973_v52 = vld [vmem:[%s9512_s22 + $0x1168] sm:$0xff] }
 0x203   : > { %8476 = vmatpush3.bf16.msra.mxu1 %v8475_v59  ;;  %v8497_v59 = vpack.c.bf16 %v895_v54, %v892_v53  ;;  %v7763_v6 = vpack.c.bf16 %v1613_v0, %v1610_v60  ;;  %v919_v48 = vld [vmem:[%s9512_s22 + $0xfb8] sm:$0xff]  ;;  %v7777_v49 = vpack.c.bf16 %v1638_v42, %v1635_v41  ;;  %v1641_v53 = vld [vmem:[%s9512_s22 + $0x2648] sm:$0xff]  ;;  %v1644_v54 = vld [vmem:[%s9512_s22 + $0x2660] sm:$0xff] }
 0x204   : > { %7740 = vmatpush1.bf16.msra.mxu0 %v7739_v61  ;;  %8478 = vmatprep.subr.bf16.mxu1 %v8477_v62  ;;  %v844_v61 = vld [vmem:[%s9512_s22 + $0xd60] sm:$0xff]  ;;  %v847_v62 = vld [vmem:[%s9512_s22 + $0xd78] sm:$0xff]  ;;  %v925_v60 = vld [vmem:[%s9512_s22 + $0xfe8] sm:$0xff] }
 0x205   : > { %7742 = vmatprep.subr.bf16.mxu0 %v7741_v2  ;;  %v949_v2 = vld [vmem:[%s9512_s22 + $0x10a8] sm:$0xff]  ;;  %v8499_v5 = vpack.c.bf16 %v847_v62, %v844_v61  ;;  %v7781_v61 = vpack.c.bf16 %v1644_v54, %v1641_v53  ;;  %v1643_v62 = vld [vmem:[%s9512_s22 + $0x2658] sm:$0xff]  ;;  %v1664_v42 = vld [vmem:[%s9512_s22 + $0x2700] sm:$0xff] }
 0x206   : > { %v8501_v7 = vpack.c.bf16 %v949_v2, %v946_v1  ;;  %v979_v0 = vld [vmem:[%s9512_s22 + $0x1198] sm:$0xff]  ;;  %v1650_v2 = vld [vmem:[%s9512_s22 + $0x2690] sm:$0xff] }
 0x207   : > { %8480 = vmatpush3.bf16.msra.mxu1 %v8479_v9  ;;  %v898_v9 = vld [vmem:[%s9512_s22 + $0xf10] sm:$0xff]  ;;  %v1647_v1 = vld [vmem:[%s9512_s22 + $0x2678] sm:$0xff] }
 0x208   : > { %7744 = vmatpush1.bf16.msra.mxu0 %v7743_v10  ;;  %8482 = vmatprep.subr.bf16.mxu1 %v8481_v11  ;;  %v901_v10 = vld [vmem:[%s9512_s22 + $0xf28] sm:$0xff]  ;;  %v7765_v11 = vpack.c.bf16 %v1620_v4, %v1617_v3 }
 0x209   : > { %7746 = vmatprep.subr.bf16.mxu0 %v7745_v15  ;;  %v1623_v15 = vld [vmem:[%s9512_s22 + $0x25b8] sm:$0xff]  ;;  %v8503_v17 = vpack.c.bf16 %v901_v10, %v898_v9  ;;  %v7785_v9 = vpack.c.bf16 %v1650_v2, %v1647_v1  ;;  %v1649_v10 = vld [vmem:[%s9512_s22 + $0x2688] sm:$0xff]  ;;  %v400_v2 = vld [vmem:[%s9522_s27 + $0xd8] sm:$0xff] }
 0x20b   : > { %8484 = vmatpush3.bf16.msra.mxu1 %v8483_v21  ;;  %v904_v21 = vld [vmem:[%s9512_s22 + $0xf40] sm:$0xff] }
 0x20c   : > { %7748 = vmatpush1.bf16.msra.mxu0 %v7747_v22  ;;  %8486 = vmatprep.subr.bf16.mxu1 %v8485_v23  ;;  %v907_v22 = vld [vmem:[%s9512_s22 + $0xf58] sm:$0xff]  ;;  %v7769_v23 = vpack.c.bf16 %v1626_v16, %v1623_v15 }
 0x20d   : > { %7750 = vmatprep.subr.bf16.mxu0 %v7749_v27  ;;  %v9277_v27 = vld [vmem:[%s9522_s27 + $0x40] sm:$0xff]  ;;  %v8507_v30 = vpack.c.bf16 %v907_v22, %v904_v21  ;;  %v7789_v21 = vpack.c.bf16 %v1656_v14, %v1653_v13  ;;  %v1655_v22 = vld [vmem:[%s9512_s22 + $0x26b8] sm:$0xff]  ;;  %v1686_v14 = vld [vmem:[%s9512_s22 + $0x27b0] sm:$0xff] }
 0x20e   : > { %v1683_v13 = vld [vmem:[%s9512_s22 + $0x2798] sm:$0xff] }
 0x20f   : > { %8488 = vmatpush3.bf16.msra.mxu1 %v8487_v33  ;;  %v8509_v33 = vpack.c.bf16 %v961_v26, %v958_v25  ;;  %v1659_v25 = vld [vmem:[%s9512_s22 + $0x26d8] sm:$0xff]  ;;  %v1662_v26 = vld [vmem:[%s9512_s22 + $0x26f0] sm:$0xff] }
 0x210   : > { %7752 = vmatpush1.bf16.msra.mxu0 %v7751_v34  ;;  %8490 = vmatprep.subr.bf16.mxu1 %v8489_v35  ;;  %v1628_v34 = vld [vmem:[%s9512_s22 + $0x25e0] sm:$0xff]  ;;  %v910_v35 = vld [vmem:[%s9512_s22 + $0xf70] sm:$0xff] }
 0x211   : > { %7754 = vmatprep.subr.bf16.mxu0 %v7753_v39  ;;  %v964_v39 = vld [vmem:[%s9512_s22 + $0x1120] sm:$0xff]  ;;  %v8511_v43 = vpack.c.bf16 %v913_v36, %v910_v35  ;;  %v7775_v44 = vpack.c.bf16 %v1631_v38, %v1628_v34  ;;  %v1661_v34 = vld [vmem:[%s9512_s22 + $0x26e8] sm:$0xff]  ;;  %v1042_v35 = vld [vmem:[%s9512_s22 + $0x1390] sm:$0xff] }
 0x212   : > { %v1045_v36 = vld [vmem:[%s9512_s22 + $0x13a8] sm:$0xff]  ;;  %v1668_v38 = vld [vmem:[%s9512_s22 + $0x2720] sm:$0xff] }
 0x213   : > { %8492 = vmatpush3.bf16.msra.mxu1 %v8491_v45  ;;  %v8513_v45 = vpack.c.bf16 %v967_v40, %v964_v39  ;;  %v8533_v41 = vpack.c.bf16 %v1045_v36, %v1042_v35  ;;  %v1072_v35 = vld [vmem:[%s9512_s22 + $0x1480] sm:$0xff]  ;;  %v1075_v36 = vld [vmem:[%s9512_s22 + $0x1498] sm:$0xff] }
 0x214   : > { %7756 = vmatpush1.bf16.msra.mxu0 %v7755_v46  ;;  %8494 = vmatprep.subr.bf16.mxu1 %v8493_v47  ;;  %v1634_v46 = vld [vmem:[%s9512_s22 + $0x2610] sm:$0xff]  ;;  %v916_v47 = vld [vmem:[%s9512_s22 + $0xfa0] sm:$0xff] }
 0x215   : > { %7758 = vmatprep.subr.bf16.mxu0 %v7757_v51  ;;  %v970_v51 = vld [vmem:[%s9512_s22 + $0x1150] sm:$0xff]  ;;  %v8515_v55 = vpack.c.bf16 %v919_v48, %v916_v47  ;;  %v7779_v56 = vpack.c.bf16 %v1637_v50, %v1634_v46  ;;  %v1667_v46 = vld [vmem:[%s9512_s22 + $0x2718] sm:$0xff]  ;;  %v1048_v47 = vld [vmem:[%s9512_s22 + $0x13c0] sm:$0xff] }
 0x216   : > { %v1051_v48 = vld [vmem:[%s9512_s22 + $0x13d8] sm:$0xff]  ;;  %v1674_v50 = vld [vmem:[%s9512_s22 + $0x2750] sm:$0xff]  ;;  %v7799_v53 = vpack.c.bf16 %v1667_v46, %v1664_v42  ;;  %v1697_v46 = vld [vmem:[%s9512_s22 + $0x2808] sm:$0xff] }
 0x217   : > { %8496 = vmatpush3.bf16.msra.mxu1 %v8495_v57  ;;  %v8517_v57 = vpack.c.bf16 %v973_v52, %v970_v51  ;;  %v397_v51 = vld [vmem:[%s9522_s27 + $0xc0] sm:$0xff]  ;;  %v8537_v54 = vpack.c.bf16 %v1051_v48, %v1048_v47  ;;  %v1694_v42 = vld [vmem:[%s9512_s22 + $0x27f0] sm:$0xff] }
 0x218   : > { %7760 = vmatpush1.bf16.msra.mxu0 %v7759_v58  ;;  %8498 = vmatprep.subr.bf16.mxu1 %v8497_v59  ;;  %v1640_v58 = vld [vmem:[%s9512_s22 + $0x2640] sm:$0xff]  ;;  %v922_v59 = vld [vmem:[%s9512_s22 + $0xfd0] sm:$0xff]  ;;  %v1081_v48 = vld [vmem:[%s9512_s22 + $0x14c8] sm:$0xff] }
 0x219   : > { %7762 = vmatprep.subr.bf16.mxu0 %v7761_v63  ;;  %v976_v63 = vld [vmem:[%s9512_s22 + $0x1180] sm:$0xff]  ;;  %v8519_v3 = vpack.c.bf16 %v925_v60, %v922_v59  ;;  %v7783_v4 = vpack.c.bf16 %v1643_v62, %v1640_v58  ;;  %v1673_v59 = vld [vmem:[%s9512_s22 + $0x2748] sm:$0xff]  ;;  %v1054_v60 = vld [vmem:[%s9512_s22 + $0x13f0] sm:$0xff] }
 0x21a   : > { %v9279_v62 = vld [vmem:[%s9522_s27 + $0x50] sm:$0xff]  ;;  %v1078_v47 = vld [vmem:[%s9512_s22 + $0x14b0] sm:$0xff] }
 0x21b   : > { %8500 = vmatpush3.bf16.msra.mxu1 %v8499_v5  ;;  %v8521_v5 = vpack.c.bf16 %v979_v0, %v976_v63  ;;  %v1677_v63 = vld [vmem:[%s9512_s22 + $0x2768] sm:$0xff]  ;;  %v1680_v0 = vld [vmem:[%s9512_s22 + $0x2780] sm:$0xff] }
 0x21c   : > { %7764 = vmatpush1.bf16.msra.mxu0 %v7763_v6  ;;  %8502 = vmatprep.subr.bf16.mxu1 %v8501_v7  ;;  %v1646_v6 = vld [vmem:[%s9512_s22 + $0x2670] sm:$0xff]  ;;  %v928_v7 = vld [vmem:[%s9512_s22 + $0x1000] sm:$0xff] }
 0x21d   : > { %7766 = vmatprep.subr.bf16.mxu0 %v7765_v11  ;;  %v982_v11 = vld [vmem:[%s9512_s22 + $0x11b0] sm:$0xff]  ;;  %v8523_v15 = vpack.c.bf16 %v931_v8, %v928_v7  ;;  %v7787_v16 = vpack.c.bf16 %v1649_v10, %v1646_v6  ;;  %v1009_v7 = vld [vmem:[%s9512_s22 + $0x1288] sm:$0xff]  ;;  %v7805_v8 = vpack.c.bf16 %v1680_v0, %v1677_v63  ;;  %v1060_v10 = vld [vmem:[%s9512_s22 + $0x1420] sm:$0xff] }
 0x21e   : > { %4387 = vmatmul.mubr.f32.vlgmr.msra.gmra.mrb[10].mxu1 %v9277_v27  ;;  %v1006_v6 = vld [vmem:[%s9512_s22 + $0x1270] sm:$0xff]  ;;  %v1707_v63 = vld [vmem:[%s9512_s22 + $0x2858] sm:$0xff] }
 0x21f   : > { %8504 = vmatpush3.bf16.msra.mxu1 %v8503_v17  ;;  %4456 = vmatprep.mubr.f32.mxu1 %v9278_v31  ;;  %v8525_v17 = vpack.c.bf16 %v985_v12, %v982_v11  ;;  %v940_v31 = vld [vmem:[%s9512_s22 + $0x1060] sm:$0xff]  ;;  %v1063_v11 = vld [vmem:[%s9512_s22 + $0x1438] sm:$0xff]  ;;  %v9280_v12 = vld [vmem:[%s9522_s27 + $0x68] sm:$0xff] }
 0x220   : > { %7768 = vmatpush1.bf16.msra.mxu0 %v7767_v18  ;;  %8506 = vmatprep.subr.bf16.mxu1 %v8505_v19  ;;  %v1652_v18 = vld [vmem:[%s9512_s22 + $0x26a0] sm:$0xff]  ;;  %v934_v19 = vld [vmem:[%s9512_s22 + $0x1030] sm:$0xff] }
 0x221   : > { %7770 = vmatprep.subr.bf16.mxu0 %v7769_v23  ;;  %v988_v23 = vld [vmem:[%s9512_s22 + $0x11e0] sm:$0xff]  ;;  %v8527_v27 = vpack.c.bf16 %v937_v20, %v934_v19  ;;  %v7791_v28 = vpack.c.bf16 %v1655_v22, %v1652_v18  ;;  %v1682_v18 = vld [vmem:[%s9512_s22 + $0x2790] sm:$0xff]  ;;  %v1015_v20 = vld [vmem:[%s9512_s22 + $0x12b8] sm:$0xff] }
 0x222   : > { %v8529_v29 = vpack.c.bf16 %v991_v24, %v988_v23  ;;  %v1012_v19 = vld [vmem:[%s9512_s22 + $0x12a0] sm:$0xff]  ;;  %v1685_v22 = vld [vmem:[%s9512_s22 + $0x27a8] sm:$0xff]  ;;  %v1066_v23 = vld [vmem:[%s9512_s22 + $0x1450] sm:$0xff] }
 0x223   : > { %8508 = vmatpush3.bf16.msra.mxu1 %v8507_v30  ;;  %v1658_v30 = vld [vmem:[%s9512_s22 + $0x26d0] sm:$0xff]  ;;  %v1069_v24 = vld [vmem:[%s9512_s22 + $0x1468] sm:$0xff] }
 0x224   : > { %7772 = vmatpush1.bf16.msra.mxu0 %v7771_v32  ;;  %8510 = vmatprep.subr.bf16.mxu1 %v8509_v33  ;;  %v943_v32 = vld [vmem:[%s9512_s22 + $0x1078] sm:$0xff]  ;;  %v7793_v33 = vpack.c.bf16 %v1662_v26, %v1659_v25  ;;  %v7795_v40 = vpack.c.bf16 %v1661_v34, %v1658_v30  ;;  %v1689_v25 = vld [vmem:[%s9512_s22 + $0x27c8] sm:$0xff]  ;;  %v1692_v26 = vld [vmem:[%s9512_s22 + $0x27e0] sm:$0xff] }
 0x225   : > { %7774 = vmatprep.subr.bf16.mxu0 %v7773_v37  ;;  %v1665_v37 = vld [vmem:[%s9512_s22 + $0x2708] sm:$0xff]  ;;  %v8531_v39 = vpack.c.bf16 %v943_v32, %v940_v31  ;;  %v1688_v30 = vld [vmem:[%s9512_s22 + $0x27c0] sm:$0xff]  ;;  %v1018_v31 = vld [vmem:[%s9512_s22 + $0x12d0] sm:$0xff] }
 0x226   : > { %v1021_v32 = vld [vmem:[%s9512_s22 + $0x12e8] sm:$0xff]  ;;  %v1691_v34 = vld [vmem:[%s9512_s22 + $0x27d8] sm:$0xff]  ;;  %v1710_v0 = vld [vmem:[%s9512_s22 + $0x2870] sm:$0xff] }
 0x227   : > { %8512 = vmatpush3.bf16.msra.mxu1 %v8511_v43  ;;  %v994_v43 = vld [vmem:[%s9512_s22 + $0x1210] sm:$0xff] }
 0x228   : > { %7776 = vmatpush1.bf16.msra.mxu0 %v7775_v44  ;;  %8514 = vmatprep.subr.bf16.mxu1 %v8513_v45  ;;  %v997_v44 = vld [vmem:[%s9512_s22 + $0x1228] sm:$0xff]  ;;  %v7797_v45 = vpack.c.bf16 %v1668_v38, %v1665_v37  ;;  %v1695_v37 = vld [vmem:[%s9512_s22 + $0x27f8] sm:$0xff]  ;;  %v1698_v38 = vld [vmem:[%s9512_s22 + $0x2810] sm:$0xff] }
 0x229   : > { %7778 = vmatprep.subr.bf16.mxu0 %v7777_v49  ;;  %v1671_v49 = vld [vmem:[%s9512_s22 + $0x2738] sm:$0xff]  ;;  %v8535_v52 = vpack.c.bf16 %v997_v44, %v994_v43  ;;  %v1024_v43 = vld [vmem:[%s9512_s22 + $0x1300] sm:$0xff] }
 0x22a   : > { %v7801_v58 = vpack.c.bf16 %v1674_v50, %v1671_v49  ;;  %v1027_v44 = vld [vmem:[%s9512_s22 + $0x1318] sm:$0xff]  ;;  %v1701_v49 = vld [vmem:[%s9512_s22 + $0x2828] sm:$0xff]  ;;  %v1704_v50 = vld [vmem:[%s9512_s22 + $0x2840] sm:$0xff] }
 0x22b   : > { %8516 = vmatpush3.bf16.msra.mxu1 %v8515_v55  ;;  %v1670_v55 = vld [vmem:[%s9512_s22 + $0x2730] sm:$0xff] }
 0x22c   : > { %7780 = vmatpush1.bf16.msra.mxu0 %v7779_v56  ;;  %8518 = vmatprep.subr.bf16.mxu1 %v8517_v57  ;;  %v1000_v56 = vld [vmem:[%s9512_s22 + $0x1240] sm:$0xff]  ;;  %v1003_v57 = vld [vmem:[%s9512_s22 + $0x1258] sm:$0xff] }
 0x22d   : > { %7782 = vmatprep.subr.bf16.mxu0 %v7781_v61  ;;  %v1057_v61 = vld [vmem:[%s9512_s22 + $0x1408] sm:$0xff]  ;;  %v8539_v1 = vpack.c.bf16 %v1003_v57, %v1000_v56 }
 0x22e   : > { %v1033_v56 = vld [vmem:[%s9512_s22 + $0x1348] sm:$0xff] }
 0x22f   : > { %8520 = vmatpush3.bf16.msra.mxu1 %v8519_v3  ;;  %v7803_v3 = vpack.c.bf16 %v1673_v59, %v1670_v55  ;;  %v1030_v55 = vld [vmem:[%s9512_s22 + $0x1330] sm:$0xff]  ;;  %v1703_v59 = vld [vmem:[%s9512_s22 + $0x2838] sm:$0xff] }
 0x230   : > { %7784 = vmatpush1.bf16.msra.mxu0 %v7783_v4  ;;  %8522 = vmatprep.subr.bf16.mxu1 %v8521_v5  ;;  %v8541_v4 = vpack.c.bf16 %v1057_v61, %v1054_v60  ;;  %v1676_v5 = vld [vmem:[%s9512_s22 + $0x2760] sm:$0xff]  ;;  %v1087_v61 = vld [vmem:[%s9512_s22 + $0x14f8] sm:$0xff] }
 0x231   : > { %7786 = vmatprep.subr.bf16.mxu0 %v7785_v9  ;;  %v1679_v9 = vld [vmem:[%s9512_s22 + $0x2778] sm:$0xff]  ;;  %v1084_v60 = vld [vmem:[%s9512_s22 + $0x14e0] sm:$0xff] }
 0x233   : > { %8524 = vmatpush3.bf16.msra.mxu1 %v8523_v15  ;;  %v8543_v15 = vpack.c.bf16 %v1009_v7, %v1006_v6  ;;  %v1039_v6 = vld [vmem:[%s9512_s22 + $0x1378] sm:$0xff]  ;;  %v7825_v7 = vpack.c.bf16 %v1710_v0, %v1707_v63  ;;  %v1737_v63 = vld [vmem:[%s9512_s22 + $0x2948] sm:$0xff]  ;;  %v1740_v0 = vld [vmem:[%s9512_s22 + $0x2960] sm:$0xff] }
 0x234   : > { %7788 = vmatpush1.bf16.msra.mxu0 %v7787_v16  ;;  %8526 = vmatprep.subr.bf16.mxu1 %v8525_v17  ;;  %v7807_v16 = vpack.c.bf16 %v1679_v9, %v1676_v5  ;;  %v8545_v17 = vpack.c.bf16 %v1063_v11, %v1060_v10  ;;  %v1036_v5 = vld [vmem:[%s9512_s22 + $0x1360] sm:$0xff]  ;;  %v1138_v9 = vld [vmem:[%s9512_s22 + $0x1690] sm:$0xff]  ;;  %v1141_v10 = vld [vmem:[%s9512_s22 + $0x16a8] sm:$0xff] }
 0x235   : > { %7790 = vmatprep.subr.bf16.mxu0 %v7789_v21  ;;  %v7809_v21 = vpack.c.bf16 %v1686_v14, %v1683_v13  ;;  %v1713_v11 = vld [vmem:[%s9512_s22 + $0x2888] sm:$0xff]  ;;  %v8563_v13 = vpack.c.bf16 %v1039_v6, %v1036_v5  ;;  %v1114_v5 = vld [vmem:[%s9512_s22 + $0x15d0] sm:$0xff] }
 0x236   : > { %v1117_v6 = vld [vmem:[%s9512_s22 + $0x15e8] sm:$0xff] }
 0x237   : > { %8528 = vmatpush3.bf16.msra.mxu1 %v8527_v27  ;;  %v8547_v27 = vpack.c.bf16 %v1015_v20, %v1012_v19  ;;  %v1715_v20 = vld [vmem:[%s9512_s22 + $0x2898] sm:$0xff] }
 0x238   : > { %7792 = vmatpush1.bf16.msra.mxu0 %v7791_v28  ;;  %8530 = vmatprep.subr.bf16.mxu1 %v8529_v29  ;;  %v7811_v28 = vpack.c.bf16 %v1685_v22, %v1682_v18  ;;  %v8549_v29 = vpack.c.bf16 %v1069_v24, %v1066_v23  ;;  %v1093_v18 = vld [vmem:[%s9512_s22 + $0x1528] sm:$0xff]  ;;  %v1147_v22 = vld [vmem:[%s9512_s22 + $0x16d8] sm:$0xff]  ;;  %v1722_v24 = vld [vmem:[%s9512_s22 + $0x28d0] sm:$0xff] }
 0x239   : > { %7794 = vmatprep.subr.bf16.mxu0 %v7793_v33  ;;  %v7813_v33 = vpack.c.bf16 %v1692_v26, %v1689_v25  ;;  %v1719_v23 = vld [vmem:[%s9512_s22 + $0x28b8] sm:$0xff] }
 0x23b   : > { %8532 = vmatpush3.bf16.msra.mxu1 %v8531_v39  ;;  %v8551_v39 = vpack.c.bf16 %v1021_v32, %v1018_v31  ;;  %v7833_v31 = vpack.c.bf16 %v1722_v24, %v1719_v23  ;;  %v1721_v32 = vld [vmem:[%s9512_s22 + $0x28c8] sm:$0xff]  ;;  %v1752_v24 = vld [vmem:[%s9512_s22 + $0x29c0] sm:$0xff] }
 0x23c   : > { %7796 = vmatpush1.bf16.msra.mxu0 %v7795_v40  ;;  %8534 = vmatprep.subr.bf16.mxu1 %v8533_v41  ;;  %v7815_v40 = vpack.c.bf16 %v1691_v34, %v1688_v30  ;;  %v8553_v41 = vpack.c.bf16 %v1075_v36, %v1072_v35  ;;  %v1099_v30 = vld [vmem:[%s9512_s22 + $0x1558] sm:$0xff]  ;;  %v1153_v34 = vld [vmem:[%s9512_s22 + $0x1708] sm:$0xff] }
 0x23d   : > { %7798 = vmatprep.subr.bf16.mxu0 %v7797_v45  ;;  %v7817_v45 = vpack.c.bf16 %v1698_v38, %v1695_v37  ;;  %v9281_v35 = vld [vmem:[%s9522_s27 + $0x60] sm:$0xff]  ;;  %v1728_v37 = vld [vmem:[%s9512_s22 + $0x2900] sm:$0xff] }
 0x23e   : > { %4457 = vmatmul.mubr.f32.vlgmr.msra.gmra.mrb[12].mxu1 %v9279_v62  ;;  %v1725_v36 = vld [vmem:[%s9512_s22 + $0x28e8] sm:$0xff] }
 0x23f   : > { %3397 = vmatmul.mubr.f32.vlgmr.msra.gmra.mrb[0].mxu0 %v397_v51  ;;  %8536 = vmatpush3.bf16.msra.mxu1 %v8535_v52  ;;  %v8555_v51 = vpack.c.bf16 %v1027_v44, %v1024_v43  ;;  %v7819_v52 = vpack.c.bf16 %v1697_v46, %v1694_v42  ;;  %v1724_v42 = vld [vmem:[%s9512_s22 + $0x28e0] sm:$0xff]  ;;  %v1102_v43 = vld [vmem:[%s9512_s22 + $0x1570] sm:$0xff]  ;;  %v1105_v44 = vld [vmem:[%s9512_s22 + $0x1588] sm:$0xff] }
 0x240   : > { %7800 = vmatpush1.bf16.msra.mxu0 %v7799_v53  ;;  %8538 = vmatprep.subr.bf16.mxu1 %v8537_v54  ;;  %v8557_v53 = vpack.c.bf16 %v1081_v48, %v1078_v47  ;;  %v1700_v54 = vld [vmem:[%s9512_s22 + $0x2820] sm:$0xff]  ;;  %v1727_v46 = vld [vmem:[%s9512_s22 + $0x28f8] sm:$0xff]  ;;  %v1749_v23 = vld [vmem:[%s9512_s22 + $0x29a8] sm:$0xff] }
 0x241   : > { %7802 = vmatprep.subr.bf16.mxu0 %v7801_v58  ;;  %4526 = vmatprep.mubr.f32.mxu1 %v9280_v12  ;;  %v7821_v58 = vpack.c.bf16 %v1704_v50, %v1701_v49  ;;  %v1716_v12 = vld [vmem:[%s9512_s22 + $0x28a0] sm:$0xff]  ;;  %v1159_v48 = vld [vmem:[%s9512_s22 + $0x1738] sm:$0xff]  ;;  %v1734_v50 = vld [vmem:[%s9512_s22 + $0x2930] sm:$0xff] }
 0x242   : > { %3467 = vmatprep.mubr.f32.mxu0 %v400_v2  ;;  %v7823_v2 = vpack.c.bf16 %v1703_v59, %v1700_v54  ;;  %v7829_v19 = vpack.c.bf16 %v1716_v12, %v1713_v11  ;;  %v1156_v47 = vld [vmem:[%s9512_s22 + $0x1720] sm:$0xff]  ;;  %v1731_v49 = vld [vmem:[%s9512_s22 + $0x2918] sm:$0xff]  ;;  %v1730_v54 = vld [vmem:[%s9512_s22 + $0x2910] sm:$0xff] }
 0x243   : > { %8540 = vmatpush3.bf16.msra.mxu1 %v8539_v1  ;;  %v8559_v1 = vpack.c.bf16 %v1033_v56, %v1030_v55  ;;  %v1108_v55 = vld [vmem:[%s9512_s22 + $0x15a0] sm:$0xff]  ;;  %v1111_v56 = vld [vmem:[%s9512_s22 + $0x15b8] sm:$0xff]  ;;  %v1733_v59 = vld [vmem:[%s9512_s22 + $0x2928] sm:$0xff] }
 0x244   : > { %7804 = vmatpush1.bf16.msra.mxu0 %v7803_v3  ;;  %8542 = vmatprep.subr.bf16.mxu1 %v8541_v4  ;;  %v8561_v3 = vpack.c.bf16 %v1087_v61, %v1084_v60  ;;  %v1706_v4 = vld [vmem:[%s9512_s22 + $0x2850] sm:$0xff]  ;;  %v1165_v61 = vld [vmem:[%s9512_s22 + $0x1768] sm:$0xff]  ;;  %v1743_v11 = vld [vmem:[%s9512_s22 + $0x2978] sm:$0xff] }
 0x245   : > { %7806 = vmatprep.subr.bf16.mxu0 %v7805_v8  ;;  %v1709_v8 = vld [vmem:[%s9512_s22 + $0x2868] sm:$0xff]  ;;  %v1162_v60 = vld [vmem:[%s9512_s22 + $0x1750] sm:$0xff] }
 0x246   : > { %v7827_v14 = vpack.c.bf16 %v1709_v8, %v1706_v4  ;;  %v1736_v4 = vld [vmem:[%s9512_s22 + $0x2940] sm:$0xff]  ;;  %v1739_v8 = vld [vmem:[%s9512_s22 + $0x2958] sm:$0xff]  ;;  %v1746_v12 = vld [vmem:[%s9512_s22 + $0x2990] sm:$0xff] }
 0x247   : > { %8544 = vmatpush3.bf16.msra.mxu1 %v8543_v15  ;;  %v8565_v15 = vpack.c.bf16 %v1141_v10, %v1138_v9  ;;  %v1168_v9 = vld [vmem:[%s9512_s22 + $0x1780] sm:$0xff]  ;;  %v1171_v10 = vld [vmem:[%s9512_s22 + $0x1798] sm:$0xff] }
 0x248   : > { %7808 = vmatpush1.bf16.msra.mxu0 %v7807_v16  ;;  %8546 = vmatprep.subr.bf16.mxu1 %v8545_v17  ;;  %v1712_v16 = vld [vmem:[%s9512_s22 + $0x2880] sm:$0xff]  ;;  %v1090_v17 = vld [vmem:[%s9512_s22 + $0x1510] sm:$0xff] }
 0x249   : > { %7810 = vmatprep.subr.bf16.mxu0 %v7809_v21  ;;  %v1144_v21 = vld [vmem:[%s9512_s22 + $0x16c0] sm:$0xff]  ;;  %v8567_v25 = vpack.c.bf16 %v1093_v18, %v1090_v17  ;;  %v7831_v26 = vpack.c.bf16 %v1715_v20, %v1712_v16  ;;  %v1742_v16 = vld [vmem:[%s9512_s22 + $0x2970] sm:$0xff]  ;;  %v1123_v18 = vld [vmem:[%s9512_s22 + $0x1618] sm:$0xff] }
 0x24a   : > { %v1120_v17 = vld [vmem:[%s9512_s22 + $0x1600] sm:$0xff]  ;;  %v1745_v20 = vld [vmem:[%s9512_s22 + $0x2988] sm:$0xff] }
 0x24b   : > { %8548 = vmatpush3.bf16.msra.mxu1 %v8547_v27  ;;  %v8569_v27 = vpack.c.bf16 %v1147_v22, %v1144_v21  ;;  %v1174_v21 = vld [vmem:[%s9512_s22 + $0x17b0] sm:$0xff]  ;;  %v1177_v22 = vld [vmem:[%s9512_s22 + $0x17c8] sm:$0xff] }
 0x24c   : > { %7812 = vmatpush1.bf16.msra.mxu0 %v7811_v28  ;;  %8550 = vmatprep.subr.bf16.mxu1 %v8549_v29  ;;  %v1718_v28 = vld [vmem:[%s9512_s22 + $0x28b0] sm:$0xff]  ;;  %v1096_v29 = vld [vmem:[%s9512_s22 + $0x1540] sm:$0xff] }
 0x24d   : > { %7814 = vmatprep.subr.bf16.mxu0 %v7813_v33  ;;  %v1150_v33 = vld [vmem:[%s9512_s22 + $0x16f0] sm:$0xff]  ;;  %v8571_v38 = vpack.c.bf16 %v1099_v30, %v1096_v29  ;;  %v1129_v30 = vld [vmem:[%s9512_s22 + $0x1648] sm:$0xff] }
 0x24e   : > { %v1126_v29 = vld [vmem:[%s9512_s22 + $0x1630] sm:$0xff] }
 0x24f   : > { %8552 = vmatpush3.bf16.msra.mxu1 %v8551_v39  ;;  %v9282_v39 = vld [vmem:[%s9522_s27 + $0x78] sm:$0xff] }
 0x250   : > { %7816 = vmatpush1.bf16.msra.mxu0 %v7815_v40  ;;  %8554 = vmatprep.subr.bf16.mxu1 %v8553_v41  ;;  %v7835_v40 = vpack.c.bf16 %v1721_v32, %v1718_v28  ;;  %v8573_v41 = vpack.c.bf16 %v1153_v34, %v1150_v33  ;;  %v1748_v28 = vld [vmem:[%s9512_s22 + $0x29a0] sm:$0xff]  ;;  %v1751_v32 = vld [vmem:[%s9512_s22 + $0x29b8] sm:$0xff] }
 0x251   : > { %v10644_v57 = vpop.f32.mrb[0].mxu1  ;;  %7818 = vmatprep.subr.bf16.mxu0 %v7817_v45  ;;  %v7837_v45 = vpack.c.bf16 %v1728_v37, %v1725_v36  ;;  %v1180_v33 = vld [vmem:[%s9512_s22 + $0x17e0] sm:$0xff]  ;;  %v1183_v34 = vld [vmem:[%s9512_s22 + $0x17f8] sm:$0xff]  ;;  %v1758_v37 = vld [vmem:[%s9512_s22 + $0x29f0] sm:$0xff] }
 0x252   : > { %v10649_v62 = vpop.f32.mrb[1].mxu1  ;;  %v1755_v36 = vld [vmem:[%s9512_s22 + $0x29d8] sm:$0xff] }
 0x253   : > { %8556 = vmatpush3.bf16.msra.mxu1 %v8555_v51  ;;  %v8575_v51 = vpack.c.bf16 %v1105_v44, %v1102_v43  ;;  %v1754_v43 = vld [vmem:[%s9512_s22 + $0x29d0] sm:$0xff]  ;;  %v1132_v44 = vld [vmem:[%s9512_s22 + $0x1660] sm:$0xff] }
 0x254   : > { %7820 = vmatpush1.bf16.msra.mxu0 %v7819_v52  ;;  %8558 = vmatprep.subr.bf16.mxu1 %v8557_v53  ;;  %v7839_v52 = vpack.c.bf16 %v1727_v46, %v1724_v42  ;;  %v8577_v53 = vpack.c.bf16 %v1159_v48, %v1156_v47  ;;  %v8593_v42 = vpack.c.bf16 %v1183_v34, %v1180_v33  ;;  %v1757_v47 = vld [vmem:[%s9512_s22 + $0x29e8] sm:$0xff]  ;;  %v1234_v48 = vld [vmem:[%s9512_s22 + $0x1990] sm:$0xff]  ;;  %v1204_v34 = vld [vmem:[%s9512_s22 + $0x18a0] sm:$0xff] }
 0x255   : > { %7822 = vmatprep.subr.bf16.mxu0 %v7821_v58  ;;  %v7841_v58 = vpack.c.bf16 %v1734_v50, %v1731_v49  ;;  %v7857_v46 = vpack.c.bf16 %v1758_v37, %v1755_v36  ;;  %v1237_v49 = vld [vmem:[%s9512_s22 + $0x19a8] sm:$0xff]  ;;  %v1778_v33 = vld [vmem:[%s9512_s22 + $0x2a90] sm:$0xff] }
 0x256   : > { %v1761_v50 = vld [vmem:[%s9512_s22 + $0x2a08] sm:$0xff] }
 0x257   : > { %8560 = vmatpush3.bf16.msra.mxu1 %v8559_v1  ;;  %v8579_v1 = vpack.c.bf16 %v1111_v56, %v1108_v55  ;;  %v1760_v55 = vld [vmem:[%s9512_s22 + $0x2a00] sm:$0xff]  ;;  %v1186_v56 = vld [vmem:[%s9512_s22 + $0x1810] sm:$0xff]  ;;  %v1781_v37 = vld [vmem:[%s9512_s22 + $0x2aa8] sm:$0xff] }
 0x258   : > { %7824 = vmatpush1.bf16.msra.mxu0 %v7823_v2  ;;  %8562 = vmatprep.subr.bf16.mxu1 %v8561_v3  ;;  %v7843_v2 = vpack.c.bf16 %v1733_v59, %v1730_v54  ;;  %v8581_v3 = vpack.c.bf16 %v1165_v61, %v1162_v60  ;;  %v8597_v54 = vpack.c.bf16 %v1237_v49, %v1234_v48  ;;  %v1763_v60 = vld [vmem:[%s9512_s22 + $0x2a18] sm:$0xff]  ;;  %v1240_v61 = vld [vmem:[%s9512_s22 + $0x19c0] sm:$0xff]  ;;  %v1213_v48 = vld [vmem:[%s9512_s22 + $0x18e8] sm:$0xff] }
 0x259   : > { %7826 = vmatprep.subr.bf16.mxu0 %v7825_v7  ;;  %v7845_v7 = vpack.c.bf16 %v1740_v0, %v1737_v63  ;;  %v1243_v63 = vld [vmem:[%s9512_s22 + $0x19d8] sm:$0xff] }
 0x25a   : > { %v1767_v0 = vld [vmem:[%s9512_s22 + $0x2a38] sm:$0xff] }
 0x25b   : > { %8564 = vmatpush3.bf16.msra.mxu1 %v8563_v13  ;;  %v8583_v13 = vpack.c.bf16 %v1117_v6, %v1114_v5  ;;  %v8601_v5 = vpack.c.bf16 %v1243_v63, %v1240_v61  ;;  %v1766_v6 = vld [vmem:[%s9512_s22 + $0x2a30] sm:$0xff]  ;;  %v1219_v61 = vld [vmem:[%s9512_s22 + $0x1918] sm:$0xff] }
 0x25c   : > { %7828 = vmatpush1.bf16.msra.mxu0 %v7827_v14  ;;  %8566 = vmatprep.subr.bf16.mxu1 %v8565_v15  ;;  %v7847_v14 = vpack.c.bf16 %v1739_v8, %v1736_v4  ;;  %v8585_v15 = vpack.c.bf16 %v1171_v10, %v1168_v9  ;;  %v7863_v4 = vpack.c.bf16 %v1763_v60, %v1760_v55  ;;  %v1195_v8 = vld [vmem:[%s9512_s22 + $0x1858] sm:$0xff]  ;;  %v1769_v10 = vld [vmem:[%s9512_s22 + $0x2a48] sm:$0xff]  ;;  %v1216_v60 = vld [vmem:[%s9512_s22 + $0x1900] sm:$0xff] }
 0x25d   : > { %7830 = vmatprep.subr.bf16.mxu0 %v7829_v19  ;;  %v7849_v19 = vpack.c.bf16 %v1746_v12, %v1743_v11  ;;  %v1246_v11 = vld [vmem:[%s9512_s22 + $0x19f0] sm:$0xff]  ;;  %v1249_v12 = vld [vmem:[%s9512_s22 + $0x1a08] sm:$0xff] }
 0x25e   : > { %4527 = vmatmul.mubr.f32.vlgmr.msra.gmra.mrb[14].mxu1 %v9281_v35 }
 0x25f   : > { %8568 = vmatpush3.bf16.msra.mxu1 %v8567_v25  ;;  %4596 = vmatprep.mubr.f32.mxu1 %v9282_v39  ;;  %v8587_v25 = vpack.c.bf16 %v1123_v18, %v1120_v17  ;;  %v8591_v39 = vpack.c.bf16 %v1129_v30, %v1126_v29  ;;  %v402_v17 = vld [vmem:[%s9522_s27 + $0xe8] sm:$0xff]  ;;  %v7867_v18 = vpack.c.bf16 %v1769_v10, %v1766_v6  ;;  %v1225_v10 = vld [vmem:[%s9512_s22 + $0x1948] sm:$0xff] }
 0x260   : > { %7832 = vmatpush1.bf16.msra.mxu0 %v7831_v26  ;;  %8570 = vmatprep.subr.bf16.mxu1 %v8569_v27  ;;  %v7851_v26 = vpack.c.bf16 %v1745_v20, %v1742_v16  ;;  %v8589_v27 = vpack.c.bf16 %v1177_v22, %v1174_v21  ;;  %v1772_v20 = vld [vmem:[%s9512_s22 + $0x2a60] sm:$0xff]  ;;  %v1198_v21 = vld [vmem:[%s9512_s22 + $0x1870] sm:$0xff]  ;;  %v1201_v22 = vld [vmem:[%s9512_s22 + $0x1888] sm:$0xff] }
 0x261   : > { %7834 = vmatprep.subr.bf16.mxu0 %v7833_v31  ;;  %v7853_v31 = vpack.c.bf16 %v1752_v24, %v1749_v23  ;;  %v1775_v24 = vld [vmem:[%s9512_s22 + $0x2a78] sm:$0xff]  ;;  %v1782_v29 = vld [vmem:[%s9512_s22 + $0x2ab0] sm:$0xff]  ;;  %v8607_v30 = vpack.c.bf16 %v1201_v22, %v1198_v21 }
 0x263   : > { %8572 = vmatpush3.bf16.msra.mxu1 %v8571_v38 }
 0x264   : > { %7836 = vmatpush1.bf16.msra.mxu0 %v7835_v40  ;;  %8574 = vmatprep.subr.bf16.mxu1 %v8573_v41  ;;  %v7855_v41 = vpack.c.bf16 %v1751_v32, %v1748_v28  ;;  %v1779_v28 = vld [vmem:[%s9512_s22 + $0x2a98] sm:$0xff] }
 0x265   : > { %7838 = vmatprep.subr.bf16.mxu0 %v7837_v45  ;;  %v1135_v45 = vld [vmem:[%s9512_s22 + $0x1678] sm:$0xff]  ;;  %v7873_v36 = vpack.c.bf16 %v1782_v29, %v1779_v28  ;;  %v1805_v28 = vld [vmem:[%s9512_s22 + $0x2b68] sm:$0xff]  ;;  %v1330_v29 = vld [vmem:[%s9512_s22 + $0x1c90] sm:$0xff] }
 0x267   : > { %8576 = vmatpush3.bf16.msra.mxu1 %v8575_v51  ;;  %v1764_v51 = vld [vmem:[%s9512_s22 + $0x2a20] sm:$0xff] }
 0x268   : > { %7840 = vmatpush1.bf16.msra.mxu0 %v7839_v52  ;;  %8578 = vmatprep.subr.bf16.mxu1 %v8577_v53  ;;  %v8595_v52 = vpack.c.bf16 %v1135_v45, %v1132_v44  ;;  %v7859_v53 = vpack.c.bf16 %v1757_v47, %v1754_v43  ;;  %v7861_v59 = vpack.c.bf16 %v1764_v51, %v1761_v50  ;;  %v1210_v47 = vld [vmem:[%s9512_s22 + $0x18d0] sm:$0xff]  ;;  %v1787_v50 = vld [vmem:[%s9512_s22 + $0x2ad8] sm:$0xff]  ;;  %v1264_v51 = vld [vmem:[%s9512_s22 + $0x1a80] sm:$0xff] }
 0x269   : > { %7842 = vmatprep.subr.bf16.mxu0 %v7841_v58  ;;  %v1189_v58 = vld [vmem:[%s9512_s22 + $0x1828] sm:$0xff]  ;;  %v7875_v44 = vpack.c.bf16 %v1781_v37, %v1778_v33  ;;  %v8615_v55 = vpack.c.bf16 %v1213_v48, %v1210_v47  ;;  %v1814_v48 = vld [vmem:[%s9512_s22 + $0x2bb0] sm:$0xff] }
 0x26a   : > { %v1285_v37 = vld [vmem:[%s9512_s22 + $0x1b28] sm:$0xff] }
 0x26b   : > { %8580 = vmatpush3.bf16.msra.mxu1 %v8579_v1  ;;  %v1770_v1 = vld [vmem:[%s9512_s22 + $0x2a50] sm:$0xff] }
 0x26c   : > { %7844 = vmatpush1.bf16.msra.mxu0 %v7843_v2  ;;  %8582 = vmatprep.subr.bf16.mxu1 %v8581_v3  ;;  %v399_v2 = vld [vmem:[%s9522_s27 + $0xd0] sm:$0xff]  ;;  %v8599_v3 = vpack.c.bf16 %v1189_v58, %v1186_v56  ;;  %v7865_v9 = vpack.c.bf16 %v1770_v1, %v1767_v0  ;;  %v1793_v0 = vld [vmem:[%s9512_s22 + $0x2b08] sm:$0xff]  ;;  %v1270_v1 = vld [vmem:[%s9512_s22 + $0x1ab0] sm:$0xff] }
 0x26d   : > { %7846 = vmatprep.subr.bf16.mxu0 %v7845_v7  ;;  %v1192_v7 = vld [vmem:[%s9512_s22 + $0x1840] sm:$0xff] }
 0x26e   : > { %v8603_v16 = vpack.c.bf16 %v1195_v8, %v1192_v7  ;;  %v1796_v8 = vld [vmem:[%s9512_s22 + $0x2b20] sm:$0xff] }
 0x26f   : > { %8584 = vmatpush3.bf16.msra.mxu1 %v8583_v13  ;;  %v9283_v13 = vld [vmem:[%s9522_s27 + $0x70] sm:$0xff] }
 0x270   : > { %7848 = vmatpush1.bf16.msra.mxu0 %v7847_v14  ;;  %8586 = vmatprep.subr.bf16.mxu1 %v8585_v15  ;;  %v1773_v14 = vld [vmem:[%s9512_s22 + $0x2a68] sm:$0xff]  ;;  %v1776_v15 = vld [vmem:[%s9512_s22 + $0x2a80] sm:$0xff] }
 0x271   : > { %7850 = vmatprep.subr.bf16.mxu0 %v7849_v19  ;;  %v6167_v35 = vpop.f32.mrb[2].mxu1  ;;  %v8605_v19 = vpack.c.bf16 %v1249_v12, %v1246_v11  ;;  %v7869_v23 = vpack.c.bf16 %v1776_v15, %v1773_v14  ;;  %v1276_v14 = vld [vmem:[%s9512_s22 + $0x1ae0] sm:$0xff]  ;;  %v1279_v15 = vld [vmem:[%s9512_s22 + $0x1af8] sm:$0xff] }
 0x272   : > { %v6168_v38 = vpop.f32.mrb[3].mxu1  ;;  %v8625_v22 = vpack.c.bf16 %v1279_v15, %v1276_v14  ;;  %v1303_v14 = vld [vmem:[%s9512_s22 + $0x1bb8] sm:$0xff] }
 0x273   : > { %8588 = vmatpush3.bf16.msra.mxu1 %v8587_v25  ;;  %v10719_v40 = vadd.f32 %v6168_v38, %v6167_v35  ;;  %v1252_v25 = vld [vmem:[%s9512_s22 + $0x1a20] sm:$0xff]  ;;  %v1207_v35 = vld [vmem:[%s9512_s22 + $0x18b8] sm:$0xff]  ;;  %v1258_v38 = vld [vmem:[%s9512_s22 + $0x1a50] sm:$0xff] }
 0x274   : > { %7852 = vmatpush1.bf16.msra.mxu0 %v7851_v26  ;;  %8590 = vmatprep.subr.bf16.mxu1 %v8589_v27  ;;  %v1255_v26 = vld [vmem:[%s9512_s22 + $0x1a38] sm:$0xff]  ;;  %v9284_v27 = vld [vmem:[%s9522_s27 + $0x88] sm:$0xff]  ;;  %v8611_v43 = vpack.c.bf16 %v1207_v35, %v1204_v34  ;;  %v1808_v35 = vld [vmem:[%s9512_s22 + $0x2b80] sm:$0xff] }
 0x275   : > { %7854 = vmatprep.subr.bf16.mxu0 %v7853_v31  ;;  %v7871_v31 = vpack.c.bf16 %v1775_v24, %v1772_v20  ;;  %v8609_v32 = vpack.c.bf16 %v1255_v26, %v1252_v25  ;;  %v1228_v24 = vld [vmem:[%s9512_s22 + $0x1960] sm:$0xff]  ;;  %v1231_v25 = vld [vmem:[%s9512_s22 + $0x1978] sm:$0xff] }
 0x276   : > { %v8627_v33 = vpack.c.bf16 %v1231_v25, %v1228_v24  ;;  %v1832_v24 = vld [vmem:[%s9512_s22 + $0x2c40] sm:$0xff]  ;;  %v1306_v25 = vld [vmem:[%s9512_s22 + $0x1bd0] sm:$0xff] }
 0x277   : > { %8592 = vmatpush3.bf16.msra.mxu1 %v8591_v39  ;;  %v1261_v39 = vld [vmem:[%s9512_s22 + $0x1a68] sm:$0xff] }
 0x278   : > { %7856 = vmatpush1.bf16.msra.mxu0 %v7855_v41  ;;  %8594 = vmatprep.subr.bf16.mxu1 %v8593_v42  ;;  %v1785_v41 = vld [vmem:[%s9512_s22 + $0x2ac8] sm:$0xff]  ;;  %v1788_v42 = vld [vmem:[%s9512_s22 + $0x2ae0] sm:$0xff]  ;;  %v8613_v45 = vpack.c.bf16 %v1261_v39, %v1258_v38  ;;  %v1811_v39 = vld [vmem:[%s9512_s22 + $0x2b98] sm:$0xff] }
 0x279   : > { %7858 = vmatprep.subr.bf16.mxu0 %v7857_v46  ;;  %v1784_v46 = vld [vmem:[%s9512_s22 + $0x2ac0] sm:$0xff]  ;;  %v7877_v49 = vpack.c.bf16 %v1788_v42, %v1785_v41  ;;  %v1339_v42 = vld [vmem:[%s9512_s22 + $0x1cd8] sm:$0xff] }
 0x27a   : > { %v7879_v56 = vpack.c.bf16 %v1787_v50, %v1784_v46  ;;  %v1336_v41 = vld [vmem:[%s9512_s22 + $0x1cc0] sm:$0xff]  ;;  %v7895_v46 = vpack.c.bf16 %v1811_v39, %v1808_v35  ;;  %v1291_v50 = vld [vmem:[%s9512_s22 + $0x1b58] sm:$0xff] }
 0x27b   : > { %8596 = vmatpush3.bf16.msra.mxu1 %v8595_v52  ;;  %v1267_v52 = vld [vmem:[%s9512_s22 + $0x1a98] sm:$0xff]  ;;  %v8633_v47 = vpack.c.bf16 %v1339_v42, %v1336_v41  ;;  %v1841_v41 = vld [vmem:[%s9512_s22 + $0x2c88] sm:$0xff]  ;;  %v1366_v42 = vld [vmem:[%s9512_s22 + $0x1db0] sm:$0xff] }
 0x27c   : > { %7860 = vmatpush1.bf16.msra.mxu0 %v7859_v53  ;;  %8598 = vmatprep.subr.bf16.mxu1 %v8597_v54  ;;  %v1791_v53 = vld [vmem:[%s9512_s22 + $0x2af8] sm:$0xff]  ;;  %v1794_v54 = vld [vmem:[%s9512_s22 + $0x2b10] sm:$0xff]  ;;  %v8617_v58 = vpack.c.bf16 %v1267_v52, %v1264_v51  ;;  %v1817_v52 = vld [vmem:[%s9512_s22 + $0x2bc8] sm:$0xff] }
 0x27d   : > { %7862 = vmatprep.subr.bf16.mxu0 %v7861_v59  ;;  %v1790_v59 = vld [vmem:[%s9512_s22 + $0x2af0] sm:$0xff]  ;;  %v7881_v63 = vpack.c.bf16 %v1794_v54, %v1791_v53  ;;  %v1345_v54 = vld [vmem:[%s9512_s22 + $0x1d08] sm:$0xff] }
 0x27e   : > { %4597 = vmatmul.mubr.f32.vlgmr.msra.gmra.mrb[16].mxu1 %v9283_v13  ;;  %v7883_v6 = vpack.c.bf16 %v1793_v0, %v1790_v59  ;;  %v1799_v13 = vld [vmem:[%s9512_s22 + $0x2b38] sm:$0xff]  ;;  %v1342_v53 = vld [vmem:[%s9512_s22 + $0x1cf0] sm:$0xff]  ;;  %v1820_v0 = vld [vmem:[%s9512_s22 + $0x2be0] sm:$0xff] }
 0x27f   : > { %3468 = vmatmul.mubr.f32.vlgmr.msra.gmra.mrb[0].mxu0 %v399_v2  ;;  %8600 = vmatpush3.bf16.msra.mxu1 %v8599_v3  ;;  %v1273_v2 = vld [vmem:[%s9512_s22 + $0x1ac8] sm:$0xff]  ;;  %v7887_v21 = vpack.c.bf16 %v1799_v13, %v1796_v8  ;;  %v1830_v8 = vld [vmem:[%s9512_s22 + $0x2c30] sm:$0xff]  ;;  %v1300_v13 = vld [vmem:[%s9512_s22 + $0x1ba0] sm:$0xff] }
 0x280   : > { %7864 = vmatpush1.bf16.msra.mxu0 %v7863_v4  ;;  %8602 = vmatprep.subr.bf16.mxu1 %v8601_v5  ;;  %v1797_v3 = vld [vmem:[%s9512_s22 + $0x2b28] sm:$0xff]  ;;  %v1800_v4 = vld [vmem:[%s9512_s22 + $0x2b40] sm:$0xff]  ;;  %v8619_v5 = vpack.c.bf16 %v1219_v61, %v1216_v60  ;;  %v8621_v7 = vpack.c.bf16 %v1273_v2, %v1270_v1  ;;  %v7899_v61 = vpack.c.bf16 %v1817_v52, %v1814_v48  ;;  %v1294_v1 = vld [vmem:[%s9512_s22 + $0x1b70] sm:$0xff] }
 0x281   : > { %7866 = vmatprep.subr.bf16.mxu0 %v7865_v9  ;;  %4666 = vmatprep.mubr.f32.mxu1 %v9284_v27  ;;  %v1222_v9 = vld [vmem:[%s9512_s22 + $0x1930] sm:$0xff]  ;;  %v7885_v12 = vpack.c.bf16 %v1800_v4, %v1797_v3  ;;  %v9286_v60 = vld [vmem:[%s9522_s27 + $0x98] sm:$0xff]  ;;  %v1297_v2 = vld [vmem:[%s9512_s22 + $0x1b88] sm:$0xff] }
 0x282   : > { %3538 = vmatprep.mubr.f32.mxu0 %v402_v17  ;;  %v1803_v17 = vld [vmem:[%s9512_s22 + $0x2b58] sm:$0xff]  ;;  %v8623_v20 = vpack.c.bf16 %v1225_v10, %v1222_v9  ;;  %v8639_v9 = vpack.c.bf16 %v1297_v2, %v1294_v1  ;;  %v1850_v2 = vld [vmem:[%s9512_s22 + $0x2cd0] sm:$0xff] }
 0x283   : > { %8604 = vmatpush3.bf16.msra.mxu1 %v8603_v16  ;;  %v1823_v4 = vld [vmem:[%s9512_s22 + $0x2bf8] sm:$0xff] }
 0x284   : > { %7868 = vmatpush1.bf16.msra.mxu0 %v7867_v18  ;;  %8606 = vmatprep.subr.bf16.mxu1 %v8605_v19  ;;  %v1806_v18 = vld [vmem:[%s9512_s22 + $0x2b70] sm:$0xff]  ;;  %v7903_v10 = vpack.c.bf16 %v1823_v4, %v1820_v0  ;;  %v1327_v4 = vld [vmem:[%s9512_s22 + $0x1c78] sm:$0xff] }
 0x285   : > { %7870 = vmatprep.subr.bf16.mxu0 %v7869_v23  ;;  %v1802_v23 = vld [vmem:[%s9512_s22 + $0x2b50] sm:$0xff]  ;;  %v7889_v27 = vpack.c.bf16 %v1806_v18, %v1803_v17  ;;  %v1357_v18 = vld [vmem:[%s9512_s22 + $0x1d68] sm:$0xff] }
 0x286   : > { %v7891_v34 = vpack.c.bf16 %v1805_v28, %v1802_v23  ;;  %v1354_v17 = vld [vmem:[%s9512_s22 + $0x1d50] sm:$0xff] }
 0x287   : > { %8608 = vmatpush3.bf16.msra.mxu1 %v8607_v30  ;;  %v1333_v30 = vld [vmem:[%s9512_s22 + $0x1ca8] sm:$0xff]  ;;  %v8645_v23 = vpack.c.bf16 %v1357_v18, %v1354_v17  ;;  %v1859_v18 = vld [vmem:[%s9512_s22 + $0x2d18] sm:$0xff] }
 0x288   : > { %7872 = vmatpush1.bf16.msra.mxu0 %v7871_v31  ;;  %8610 = vmatprep.subr.bf16.mxu1 %v8609_v32  ;;  %v1809_v31 = vld [vmem:[%s9512_s22 + $0x2b88] sm:$0xff]  ;;  %v1812_v32 = vld [vmem:[%s9512_s22 + $0x2ba0] sm:$0xff] }
 0x289   : > { %7874 = vmatprep.subr.bf16.mxu0 %v7873_v36  ;;  %v1282_v36 = vld [vmem:[%s9512_s22 + $0x1b10] sm:$0xff]  ;;  %v7893_v38 = vpack.c.bf16 %v1812_v32, %v1809_v31  ;;  %v1363_v31 = vld [vmem:[%s9512_s22 + $0x1d98] sm:$0xff] }
 0x28a   : > { %v1839_v32 = vld [vmem:[%s9512_s22 + $0x2c78] sm:$0xff] }
 0x28b   : > { %8612 = vmatpush3.bf16.msra.mxu1 %v8611_v43  ;;  %v1815_v43 = vld [vmem:[%s9512_s22 + $0x2bb8] sm:$0xff] }
 0x28c   : > { %7876 = vmatpush1.bf16.msra.mxu0 %v7875_v44  ;;  %8614 = vmatprep.subr.bf16.mxu1 %v8613_v45  ;;  %v1818_v44 = vld [vmem:[%s9512_s22 + $0x2bd0] sm:$0xff]  ;;  %v8631_v45 = vpack.c.bf16 %v1285_v37, %v1282_v36  ;;  %v1312_v37 = vld [vmem:[%s9512_s22 + $0x1c00] sm:$0xff] }
 0x28d   : > { %7878 = vmatprep.subr.bf16.mxu0 %v7877_v49  ;;  %v1288_v49 = vld [vmem:[%s9512_s22 + $0x1b40] sm:$0xff]  ;;  %v7897_v51 = vpack.c.bf16 %v1818_v44, %v1815_v43  ;;  %v1838_v36 = vld [vmem:[%s9512_s22 + $0x2c70] sm:$0xff]  ;;  %v1369_v43 = vld [vmem:[%s9512_s22 + $0x1dc8] sm:$0xff] }
 0x28e   : > { %v8635_v59 = vpack.c.bf16 %v1291_v50, %v1288_v49  ;;  %v1845_v44 = vld [vmem:[%s9512_s22 + $0x2ca8] sm:$0xff]  ;;  %v8653_v48 = vpack.c.bf16 %v1369_v43, %v1366_v42  ;;  %v1844_v49 = vld [vmem:[%s9512_s22 + $0x2ca0] sm:$0xff]  ;;  %v1318_v50 = vld [vmem:[%s9512_s22 + $0x1c30] sm:$0xff] }
 0x28f   : > { %8616 = vmatpush3.bf16.msra.mxu1 %v8615_v55  ;;  %v9285_v55 = vld [vmem:[%s9522_s27 + $0x80] sm:$0xff]  ;;  %v1868_v42 = vld [vmem:[%s9512_s22 + $0x2d60] sm:$0xff]  ;;  %v1390_v43 = vld [vmem:[%s9512_s22 + $0x1e70] sm:$0xff] }
 0x290   : > { %7880 = vmatpush1.bf16.msra.mxu0 %v7879_v56  ;;  %8618 = vmatprep.subr.bf16.mxu1 %v8617_v58  ;;  %v1821_v56 = vld [vmem:[%s9512_s22 + $0x2be8] sm:$0xff]  ;;  %v1824_v58 = vld [vmem:[%s9512_s22 + $0x2c00] sm:$0xff] }
 0x291   : > { %7882 = vmatprep.subr.bf16.mxu0 %v7881_v63  ;;  %v6202_v11 = vpop.f32.mrb[4].mxu1  ;;  %v8637_v63 = vpack.c.bf16 %v1345_v54, %v1342_v53  ;;  %v7901_v3 = vpack.c.bf16 %v1824_v58, %v1821_v56  ;;  %v1847_v54 = vld [vmem:[%s9512_s22 + $0x2cb8] sm:$0xff] }
 0x292   : > { %v6203_v16 = vpop.f32.mrb[5].mxu1  ;;  %v1375_v56 = vld [vmem:[%s9512_s22 + $0x1df8] sm:$0xff]  ;;  %v7919_v0 = vpack.c.bf16 %v1847_v54, %v1844_v49  ;;  %v9288_v49 = vld [vmem:[%s9522_s27 + $0xa8] sm:$0xff] }
 0x293   : > { %v6204_v19 = vadd.f32 %v6203_v16, %v6202_v11  ;;  %8620 = vmatpush3.bf16.msra.mxu1 %v8619_v5  ;;  %v1348_v5 = vld [vmem:[%s9512_s22 + $0x1d20] sm:$0xff]  ;;  %v1829_v16 = vld [vmem:[%s9512_s22 + $0x2c28] sm:$0xff] }
 0x294   : > { %7884 = vmatpush1.bf16.msra.mxu0 %v7883_v6  ;;  %8622 = vmatprep.subr.bf16.mxu1 %v8621_v7  ;;  %v1351_v6 = vld [vmem:[%s9512_s22 + $0x1d38] sm:$0xff] }
 0x295   : > { %v10793_v26 = vadd.f32 %v6204_v19, %v10719_v40  ;;  %7886 = vmatprep.subr.bf16.mxu0 %v7885_v12  ;;  %v8629_v40 = vpack.c.bf16 %v1333_v30, %v1330_v29  ;;  %v1827_v7 = vld [vmem:[%s9512_s22 + $0x2c18] sm:$0xff]  ;;  %v8641_v11 = vpack.c.bf16 %v1351_v6, %v1348_v5  ;;  %v1826_v12 = vld [vmem:[%s9512_s22 + $0x2c10] sm:$0xff]  ;;  %v1833_v19 = vld [vmem:[%s9512_s22 + $0x2c48] sm:$0xff] }
 0x296   : > { %v7905_v15 = vpack.c.bf16 %v1830_v8, %v1827_v7  ;;  %v1835_v29 = vld [vmem:[%s9512_s22 + $0x2c58] sm:$0xff]  ;;  %v1360_v30 = vld [vmem:[%s9512_s22 + $0x1d80] sm:$0xff]  ;;  %v1853_v7 = vld [vmem:[%s9512_s22 + $0x2ce8] sm:$0xff] }
 0x297   : > { %8624 = vmatpush3.bf16.msra.mxu1 %v8623_v20  ;;  %v1836_v20 = vld [vmem:[%s9512_s22 + $0x2c60] sm:$0xff]  ;;  %v8649_v35 = vpack.c.bf16 %v1363_v31, %v1360_v30  ;;  %v1426_v8 = vld [vmem:[%s9512_s22 + $0x1f90] sm:$0xff]  ;;  %v1387_v30 = vld [vmem:[%s9512_s22 + $0x1e58] sm:$0xff] }
 0x298   : > { %7888 = vmatpush1.bf16.msra.mxu0 %v7887_v21  ;;  %8626 = vmatprep.subr.bf16.mxu1 %v8625_v22  ;;  %v8643_v21 = vpack.c.bf16 %v1303_v14, %v1300_v13  ;;  %v7907_v22 = vpack.c.bf16 %v1829_v16, %v1826_v12  ;;  %v7909_v28 = vpack.c.bf16 %v1836_v20, %v1833_v19  ;;  %v1856_v14 = vld [vmem:[%s9512_s22 + $0x2d00] sm:$0xff]  ;;  %v1381_v16 = vld [vmem:[%s9512_s22 + $0x1e28] sm:$0xff]  ;;  %v1435_v20 = vld [vmem:[%s9512_s22 + $0x1fd8] sm:$0xff] }
 0x299   : > { %7890 = vmatprep.subr.bf16.mxu0 %v7889_v27  ;;  %v1309_v27 = vld [vmem:[%s9512_s22 + $0x1be8] sm:$0xff]  ;;  %v1432_v19 = vld [vmem:[%s9512_s22 + $0x1fc0] sm:$0xff] }
 0x29b   : > { %8628 = vmatpush3.bf16.msra.mxu1 %v8627_v33  ;;  %v1842_v33 = vld [vmem:[%s9512_s22 + $0x2c90] sm:$0xff] }
 0x29c   : > { %7892 = vmatpush1.bf16.msra.mxu0 %v7891_v34  ;;  %8630 = vmatprep.subr.bf16.mxu1 %v8629_v40  ;;  %v8647_v34 = vpack.c.bf16 %v1309_v27, %v1306_v25  ;;  %v7911_v40 = vpack.c.bf16 %v1835_v29, %v1832_v24  ;;  %v7913_v39 = vpack.c.bf16 %v1842_v33, %v1839_v32  ;;  %v1384_v29 = vld [vmem:[%s9512_s22 + $0x1e40] sm:$0xff]  ;;  %v1865_v32 = vld [vmem:[%s9512_s22 + $0x2d48] sm:$0xff]  ;;  %v1438_v33 = vld [vmem:[%s9512_s22 + $0x1ff0] sm:$0xff] }
 0x29d   : > { %7894 = vmatprep.subr.bf16.mxu0 %v7893_v38  ;;  %v1315_v38 = vld [vmem:[%s9512_s22 + $0x1c18] sm:$0xff]  ;;  %v7927_v25 = vpack.c.bf16 %v1859_v18, %v1856_v14  ;;  %v8665_v27 = vpack.c.bf16 %v1435_v20, %v1432_v19  ;;  %v1408_v18 = vld [vmem:[%s9512_s22 + $0x1f00] sm:$0xff] }
 0x29e   : > { %4667 = vmatmul.mubr.f32.vlgmr.msra.gmra.mrb[18].mxu1 %v9285_v55  ;;  %v1372_v55 = vld [vmem:[%s9512_s22 + $0x1de0] sm:$0xff]  ;;  %v1411_v19 = vld [vmem:[%s9512_s22 + $0x1f18] sm:$0xff] }
 0x29f   : > { %8632 = vmatpush3.bf16.msra.mxu1 %v8631_v45  ;;  %4736 = vmatprep.mubr.f32.mxu1 %v9286_v60  ;;  %v1848_v45 = vld [vmem:[%s9512_s22 + $0x2cc0] sm:$0xff]  ;;  %v1854_v60 = vld [vmem:[%s9512_s22 + $0x2cf0] sm:$0xff]  ;;  %v8657_v1 = vpack.c.bf16 %v1375_v56, %v1372_v55 }
 0x2a0   : > { %7896 = vmatpush1.bf16.msra.mxu0 %v7895_v46  ;;  %8634 = vmatprep.subr.bf16.mxu1 %v8633_v47  ;;  %v8651_v46 = vpack.c.bf16 %v1315_v38, %v1312_v37  ;;  %v7915_v47 = vpack.c.bf16 %v1841_v41, %v1838_v36  ;;  %v7917_v53 = vpack.c.bf16 %v1848_v45, %v1845_v44  ;;  %v1872_v36 = vld [vmem:[%s9512_s22 + $0x2d80] sm:$0xff]  ;;  %v1393_v44 = vld [vmem:[%s9512_s22 + $0x1e88] sm:$0xff]  ;;  %v1874_v55 = vld [vmem:[%s9512_s22 + $0x2d90] sm:$0xff] }
 0x2a1   : > { %7898 = vmatprep.subr.bf16.mxu0 %v7897_v51  ;;  %v1321_v51 = vld [vmem:[%s9512_s22 + $0x1c48] sm:$0xff]  ;;  %v8667_v37 = vpack.c.bf16 %v1387_v30, %v1384_v29  ;;  %v404_v38 = vld [vmem:[%s9522_s27 + $0xf8] sm:$0xff] }
 0x2a2   : > { %v1396_v56 = vld [vmem:[%s9512_s22 + $0x1ea0] sm:$0xff] }
 0x2a3   : > { %8636 = vmatpush3.bf16.msra.mxu1 %v8635_v59  ;;  %v1851_v59 = vld [vmem:[%s9512_s22 + $0x2cd8] sm:$0xff]  ;;  %v1892_v30 = vld [vmem:[%s9512_s22 + $0x2e20] sm:$0xff] }
 0x2a4   : > { %7900 = vmatpush1.bf16.msra.mxu0 %v7899_v61  ;;  %8638 = vmatprep.subr.bf16.mxu1 %v8637_v63  ;;  %v8655_v63 = vpack.c.bf16 %v1321_v51, %v1318_v50  ;;  %v7921_v6 = vpack.c.bf16 %v1854_v60, %v1851_v59  ;;  %v1875_v50 = vld [vmem:[%s9512_s22 + $0x2d98] sm:$0xff]  ;;  %v1878_v51 = vld [vmem:[%s9512_s22 + $0x2db0] sm:$0xff]  ;;  %v1877_v60 = vld [vmem:[%s9512_s22 + $0x2da8] sm:$0xff] }
 0x2a5   : > { %7902 = vmatprep.subr.bf16.mxu0 %v7901_v3  ;;  %v1324_v3 = vld [vmem:[%s9512_s22 + $0x1c60] sm:$0xff]  ;;  %v7937_v59 = vpack.c.bf16 %v1878_v51, %v1875_v50  ;;  %v1901_v50 = vld [vmem:[%s9512_s22 + $0x2e68] sm:$0xff]  ;;  %v1522_v51 = vld [vmem:[%s9512_s22 + $0x2290] sm:$0xff] }
 0x2a6   : > { %v8659_v12 = vpack.c.bf16 %v1327_v4, %v1324_v3  ;;  %v7939_v3 = vpack.c.bf16 %v1877_v60, %v1874_v55  ;;  %v1477_v60 = vld [vmem:[%s9512_s22 + $0x2128] sm:$0xff] }
 0x2a7   : > { %8640 = vmatpush3.bf16.msra.mxu1 %v8639_v9  ;;  %v1429_v9 = vld [vmem:[%s9512_s22 + $0x1fa8] sm:$0xff] }
 0x2a8   : > { %7904 = vmatpush1.bf16.msra.mxu0 %v7903_v10  ;;  %8642 = vmatprep.subr.bf16.mxu1 %v8641_v11  ;;  %v1857_v10 = vld [vmem:[%s9512_s22 + $0x2d08] sm:$0xff]  ;;  %v1860_v11 = vld [vmem:[%s9512_s22 + $0x2d20] sm:$0xff]  ;;  %v8661_v13 = vpack.c.bf16 %v1429_v9, %v1426_v8 }
 0x2a9   : > { %7906 = vmatprep.subr.bf16.mxu0 %v7905_v15  ;;  %v1378_v15 = vld [vmem:[%s9512_s22 + $0x1e10] sm:$0xff]  ;;  %v7925_v17 = vpack.c.bf16 %v1860_v11, %v1857_v10  ;;  %v1405_v8 = vld [vmem:[%s9512_s22 + $0x1ee8] sm:$0xff]  ;;  %v1883_v10 = vld [vmem:[%s9512_s22 + $0x2dd8] sm:$0xff] }
 0x2aa   : > { %v8663_v24 = vpack.c.bf16 %v1381_v16, %v1378_v15  ;;  %v1456_v11 = vld [vmem:[%s9512_s22 + $0x2080] sm:$0xff] }
 0x2ab   : > { %8644 = vmatpush3.bf16.msra.mxu1 %v8643_v21  ;;  %v1863_v21 = vld [vmem:[%s9512_s22 + $0x2d38] sm:$0xff] }
 0x2ac   : > { %7908 = vmatpush1.bf16.msra.mxu0 %v7907_v22  ;;  %8646 = vmatprep.subr.bf16.mxu1 %v8645_v23  ;;  %v1866_v22 = vld [vmem:[%s9512_s22 + $0x2d50] sm:$0xff]  ;;  %v401_v23 = vld [vmem:[%s9522_s27 + $0xe0] sm:$0xff] }
 0x2ad   : > { %7910 = vmatprep.subr.bf16.mxu0 %v7909_v28  ;;  %v1862_v28 = vld [vmem:[%s9512_s22 + $0x2d30] sm:$0xff]  ;;  %v7929_v31 = vpack.c.bf16 %v1866_v22, %v1863_v21  ;;  %v1889_v21 = vld [vmem:[%s9512_s22 + $0x2e08] sm:$0xff] }
 0x2ae   : > { %v1462_v22 = vld [vmem:[%s9512_s22 + $0x20b0] sm:$0xff] }
 0x2af   : > { %8648 = vmatpush3.bf16.msra.mxu1 %v8647_v34  ;;  %v1441_v34 = vld [vmem:[%s9512_s22 + $0x2008] sm:$0xff] }
 0x2b0   : > { %7912 = vmatpush1.bf16.msra.mxu0 %v7911_v40  ;;  %8650 = vmatprep.subr.bf16.mxu1 %v8649_v35  ;;  %v9287_v40 = vld [vmem:[%s9522_s27 + $0x90] sm:$0xff]  ;;  %v1869_v35 = vld [vmem:[%s9512_s22 + $0x2d68] sm:$0xff]  ;;  %v8669_v41 = vpack.c.bf16 %v1441_v34, %v1438_v33 }
 0x2b1   : > { %v6237_v52 = vpop.f32.mrb[6].mxu1  ;;  %7914 = vmatprep.subr.bf16.mxu0 %v7913_v39  ;;  %v7931_v39 = vpack.c.bf16 %v1865_v32, %v1862_v28  ;;  %v7933_v45 = vpack.c.bf16 %v1872_v36, %v1869_v35  ;;  %v1417_v32 = vld [vmem:[%s9512_s22 + $0x1f48] sm:$0xff]  ;;  %v1468_v35 = vld [vmem:[%s9512_s22 + $0x20e0] sm:$0xff]  ;;  %v1471_v36 = vld [vmem:[%s9512_s22 + $0x20f8] sm:$0xff] }
 0x2b2   : > { %v6238_v58 = vpop.f32.mrb[7].mxu1 }
 0x2b3   : > { %v6239_v61 = vadd.f32 %v6238_v58, %v6237_v52  ;;  %8652 = vmatpush3.bf16.msra.mxu1 %v8651_v46  ;;  %v1871_v46 = vld [vmem:[%s9512_s22 + $0x2d78] sm:$0xff]  ;;  %v8671_v52 = vpack.c.bf16 %v1393_v44, %v1390_v43  ;;  %v8689_v44 = vpack.c.bf16 %v1471_v36, %v1468_v35 }
 0x2b4   : > { %7916 = vmatpush1.bf16.msra.mxu0 %v7915_v47  ;;  %8654 = vmatprep.subr.bf16.mxu1 %v8653_v48  ;;  %v1444_v47 = vld [vmem:[%s9512_s22 + $0x2020] sm:$0xff]  ;;  %v1447_v48 = vld [vmem:[%s9512_s22 + $0x2038] sm:$0xff] }
 0x2b5   : > { %v10862_v5 = vadd.f32 %v6239_v61, %v10793_v26  ;;  %7918 = vmatprep.subr.bf16.mxu0 %v7917_v53  ;;  %v7923_v26 = vpack.c.bf16 %v1853_v7, %v1850_v2  ;;  %v7935_v53 = vpack.c.bf16 %v1871_v46, %v1868_v42  ;;  %v8673_v54 = vpack.c.bf16 %v1447_v48, %v1444_v47  ;;  %v1399_v58 = vld [vmem:[%s9512_s22 + $0x1eb8] sm:$0xff]  ;;  %v1450_v61 = vld [vmem:[%s9512_s22 + $0x2050] sm:$0xff]  ;;  %v1420_v46 = vld [vmem:[%s9512_s22 + $0x1f60] sm:$0xff] }
 0x2b6   : > { %v8675_v2 = vpack.c.bf16 %v1399_v58, %v1396_v56  ;;  %v1402_v7 = vld [vmem:[%s9512_s22 + $0x1ed0] sm:$0xff]  ;;  %v1423_v47 = vld [vmem:[%s9512_s22 + $0x1f78] sm:$0xff]  ;;  %v1904_v58 = vld [vmem:[%s9512_s22 + $0x2e80] sm:$0xff] }
 0x2b7   : > { %8656 = vmatpush3.bf16.msra.mxu1 %v8655_v63  ;;  %v1453_v63 = vld [vmem:[%s9512_s22 + $0x2068] sm:$0xff]  ;;  %v8679_v14 = vpack.c.bf16 %v1405_v8, %v1402_v7  ;;  %v8691_v55 = vpack.c.bf16 %v1423_v47, %v1420_v46  ;;  %v1910_v8 = vld [vmem:[%s9512_s22 + $0x2eb0] sm:$0xff]  ;;  %v1495_v35 = vld [vmem:[%s9512_s22 + $0x21b8] sm:$0xff] }
 0x2b8   : > { %7920 = vmatpush1.bf16.msra.mxu0 %v7919_v0  ;;  %8658 = vmatprep.subr.bf16.mxu1 %v8657_v1  ;;  %v1881_v0 = vld [vmem:[%s9512_s22 + $0x2dc8] sm:$0xff]  ;;  %v1884_v1 = vld [vmem:[%s9512_s22 + $0x2de0] sm:$0xff]  ;;  %v8677_v4 = vpack.c.bf16 %v1453_v63, %v1450_v61  ;;  %v1907_v63 = vld [vmem:[%s9512_s22 + $0x2e98] sm:$0xff] }
 0x2b9   : > { %7922 = vmatprep.subr.bf16.mxu0 %v7921_v6  ;;  %v1880_v6 = vld [vmem:[%s9512_s22 + $0x2dc0] sm:$0xff]  ;;  %v7941_v9 = vpack.c.bf16 %v1884_v1, %v1881_v0  ;;  %v1531_v1 = vld [vmem:[%s9512_s22 + $0x22d8] sm:$0xff]  ;;  %v1498_v47 = vld [vmem:[%s9512_s22 + $0x21d0] sm:$0xff] }
 0x2ba   : > { %v7943_v15 = vpack.c.bf16 %v1883_v10, %v1880_v6  ;;  %v1528_v0 = vld [vmem:[%s9512_s22 + $0x22c0] sm:$0xff]  ;;  %v7959_v6 = vpack.c.bf16 %v1907_v63, %v1904_v58  ;;  %v1483_v10 = vld [vmem:[%s9512_s22 + $0x2158] sm:$0xff] }
 0x2bb   : > { %8660 = vmatpush3.bf16.msra.mxu1 %v8659_v12  ;;  %v1459_v12 = vld [vmem:[%s9512_s22 + $0x2098] sm:$0xff]  ;;  %v8697_v7 = vpack.c.bf16 %v1531_v1, %v1528_v0  ;;  %v1928_v46 = vld [vmem:[%s9512_s22 + $0x2f40] sm:$0xff]  ;;  %v1937_v0 = vld [vmem:[%s9512_s22 + $0x2f88] sm:$0xff] }
 0x2bc   : > { %7924 = vmatpush1.bf16.msra.mxu0 %v7923_v26  ;;  %8662 = vmatprep.subr.bf16.mxu1 %v8661_v13  ;;  %v1887_v26 = vld [vmem:[%s9512_s22 + $0x2df8] sm:$0xff]  ;;  %v1890_v13 = vld [vmem:[%s9512_s22 + $0x2e10] sm:$0xff]  ;;  %v8681_v16 = vpack.c.bf16 %v1459_v12, %v1456_v11  ;;  %v1913_v12 = vld [vmem:[%s9512_s22 + $0x2ec8] sm:$0xff] }
 0x2bd   : > { %7926 = vmatprep.subr.bf16.mxu0 %v7925_v17  ;;  %v1886_v17 = vld [vmem:[%s9512_s22 + $0x2df0] sm:$0xff]  ;;  %v7945_v20 = vpack.c.bf16 %v1890_v13, %v1887_v26  ;;  %v1537_v13 = vld [vmem:[%s9512_s22 + $0x2308] sm:$0xff] }
 0x2be   : > { %4737 = vmatmul.mubr.f32.vlgmr.msra.gmra.mrb[20].mxu1 %v9287_v40  ;;  %v7947_v28 = vpack.c.bf16 %v1889_v21, %v1886_v17  ;;  %v1895_v40 = vld [vmem:[%s9512_s22 + $0x2e38] sm:$0xff]  ;;  %v1534_v26 = vld [vmem:[%s9512_s22 + $0x22f0] sm:$0xff]  ;;  %v1916_v21 = vld [vmem:[%s9512_s22 + $0x2ee0] sm:$0xff] }
 0x2bf   : > { %3539 = vmatmul.mubr.f32.vlgmr.msra.gmra.mrb[0].mxu0 %v401_v23  ;;  %8664 = vmatpush3.bf16.msra.mxu1 %v8663_v24  ;;  %v1465_v23 = vld [vmem:[%s9512_s22 + $0x20c8] sm:$0xff]  ;;  %v7951_v43 = vpack.c.bf16 %v1895_v40, %v1892_v30  ;;  %v1926_v30 = vld [vmem:[%s9512_s22 + $0x2f30] sm:$0xff]  ;;  %v1492_v40 = vld [vmem:[%s9512_s22 + $0x21a0] sm:$0xff] }
 0x2c0   : > { %7928 = vmatpush1.bf16.msra.mxu0 %v7927_v25  ;;  %8666 = vmatprep.subr.bf16.mxu1 %v8665_v27  ;;  %v1893_v24 = vld [vmem:[%s9512_s22 + $0x2e28] sm:$0xff]  ;;  %v1896_v25 = vld [vmem:[%s9512_s22 + $0x2e40] sm:$0xff]  ;;  %v8683_v27 = vpack.c.bf16 %v1411_v19, %v1408_v18  ;;  %v8685_v29 = vpack.c.bf16 %v1465_v23, %v1462_v22  ;;  %v7963_v19 = vpack.c.bf16 %v1913_v12, %v1910_v8  ;;  %v1486_v22 = vld [vmem:[%s9512_s22 + $0x2170] sm:$0xff] }
 0x2c1   : > { %7930 = vmatprep.subr.bf16.mxu0 %v7929_v31  ;;  %4806 = vmatprep.mubr.f32.mxu1 %v9288_v49  ;;  %v1414_v31 = vld [vmem:[%s9512_s22 + $0x1f30] sm:$0xff]  ;;  %v7949_v34 = vpack.c.bf16 %v1896_v25, %v1893_v24  ;;  %v9290_v18 = vld [vmem:[%s9522_s27 + $0xb8] sm:$0xff]  ;;  %v1489_v23 = vld [vmem:[%s9512_s22 + $0x2188] sm:$0xff] }
 0x2c2   : > { %3609 = vmatprep.mubr.f32.mxu0 %v404_v38  ;;  %v1899_v38 = vld [vmem:[%s9512_s22 + $0x2e58] sm:$0xff]  ;;  %v8687_v42 = vpack.c.bf16 %v1417_v32, %v1414_v31  ;;  %v8703_v31 = vpack.c.bf16 %v1489_v23, %v1486_v22  ;;  %v1558_v1 = vld [vmem:[%s9512_s22 + $0x23b0] sm:$0xff] }
 0x2c3   : > { %8668 = vmatpush3.bf16.msra.mxu1 %v8667_v37  ;;  %v1919_v25 = vld [vmem:[%s9512_s22 + $0x2ef8] sm:$0xff]  ;;  %v1946_v23 = vld [vmem:[%s9512_s22 + $0x2fd0] sm:$0xff] }
 0x2c4   : > { %7932 = vmatpush1.bf16.msra.mxu0 %v7931_v39  ;;  %8670 = vmatprep.subr.bf16.mxu1 %v8669_v41  ;;  %v1902_v39 = vld [vmem:[%s9512_s22 + $0x2e70] sm:$0xff]  ;;  %v7967_v32 = vpack.c.bf16 %v1919_v25, %v1916_v21  ;;  %v1519_v25 = vld [vmem:[%s9512_s22 + $0x2278] sm:$0xff] }
 0x2c5   : > { %7934 = vmatprep.subr.bf16.mxu0 %v7933_v45  ;;  %v1898_v45 = vld [vmem:[%s9512_s22 + $0x2e50] sm:$0xff]  ;;  %v7953_v49 = vpack.c.bf16 %v1902_v39, %v1899_v38  ;;  %v1549_v39 = vld [vmem:[%s9512_s22 + $0x2368] sm:$0xff] }
 0x2c6   : > { %v7955_v56 = vpack.c.bf16 %v1901_v50, %v1898_v45  ;;  %v1546_v38 = vld [vmem:[%s9512_s22 + $0x2350] sm:$0xff] }
 0x2c7   : > { %8672 = vmatpush3.bf16.msra.mxu1 %v8671_v52  ;;  %v1525_v52 = vld [vmem:[%s9512_s22 + $0x22a8] sm:$0xff]  ;;  %v8709_v45 = vpack.c.bf16 %v1549_v39, %v1546_v38  ;;  %v1955_v39 = vld [vmem:[%s9512_s22 + $0x3018] sm:$0xff] }
 0x2c8   : > { %7936 = vmatpush1.bf16.msra.mxu0 %v7935_v53  ;;  %8674 = vmatprep.subr.bf16.mxu1 %v8673_v54  ;;  %v1905_v53 = vld [vmem:[%s9512_s22 + $0x2e88] sm:$0xff]  ;;  %v1908_v54 = vld [vmem:[%s9512_s22 + $0x2ea0] sm:$0xff] }
 0x2c9   : > { %7938 = vmatprep.subr.bf16.mxu0 %v7937_v59  ;;  %v1474_v59 = vld [vmem:[%s9512_s22 + $0x2110] sm:$0xff]  ;;  %v7957_v61 = vpack.c.bf16 %v1908_v54, %v1905_v53  ;;  %v1555_v53 = vld [vmem:[%s9512_s22 + $0x2398] sm:$0xff] }
 0x2ca   : > { %v1935_v54 = vld [vmem:[%s9512_s22 + $0x2f78] sm:$0xff] }
 0x2cb   : > { %8676 = vmatpush3.bf16.msra.mxu1 %v8675_v2  ;;  %v1911_v2 = vld [vmem:[%s9512_s22 + $0x2eb8] sm:$0xff] }
 0x2cc   : > { %7940 = vmatpush1.bf16.msra.mxu0 %v7939_v3  ;;  %8678 = vmatprep.subr.bf16.mxu1 %v8677_v4  ;;  %v1914_v3 = vld [vmem:[%s9512_s22 + $0x2ed0] sm:$0xff]  ;;  %v8695_v4 = vpack.c.bf16 %v1477_v60, %v1474_v59  ;;  %v1504_v60 = vld [vmem:[%s9512_s22 + $0x2200] sm:$0xff] }
 0x2cd   : > { %7942 = vmatprep.subr.bf16.mxu0 %v7941_v9  ;;  %v1480_v9 = vld [vmem:[%s9512_s22 + $0x2140] sm:$0xff]  ;;  %v7961_v11 = vpack.c.bf16 %v1914_v3, %v1911_v2  ;;  %v1934_v59 = vld [vmem:[%s9512_s22 + $0x2f70] sm:$0xff]  ;;  %v1561_v2 = vld [vmem:[%s9512_s22 + $0x23c8] sm:$0xff] }
 0x2ce   : > { %v8699_v17 = vpack.c.bf16 %v1483_v10, %v1480_v9  ;;  %v1941_v3 = vld [vmem:[%s9512_s22 + $0x2fa8] sm:$0xff]  ;;  %v8717_v8 = vpack.c.bf16 %v1561_v2, %v1558_v1  ;;  %v1940_v9 = vld [vmem:[%s9512_s22 + $0x2fa0] sm:$0xff]  ;;  %v1510_v10 = vld [vmem:[%s9512_s22 + $0x2230] sm:$0xff] }
 0x2cf   : > { %8680 = vmatpush3.bf16.msra.mxu1 %v8679_v14  ;;  %v9289_v14 = vld [vmem:[%s9522_s27 + $0xa0] sm:$0xff]  ;;  %v1964_v1 = vld [vmem:[%s9512_s22 + $0x3060] sm:$0xff]  ;;  %v1582_v2 = vld [vmem:[%s9512_s22 + $0x2470] sm:$0xff] }
 0x2d0   : > { %7944 = vmatpush1.bf16.msra.mxu0 %v7943_v15  ;;  %8682 = vmatprep.subr.bf16.mxu1 %v8681_v16  ;;  %v1917_v15 = vld [vmem:[%s9512_s22 + $0x2ee8] sm:$0xff]  ;;  %v1920_v16 = vld [vmem:[%s9512_s22 + $0x2f00] sm:$0xff] }
 0x2d1   : > { %v6272_v33 = vpop.f32.mrb[8].mxu1  ;;  %7946 = vmatprep.subr.bf16.mxu0 %v7945_v20  ;;  %v8701_v20 = vpack.c.bf16 %v1537_v13, %v1534_v26  ;;  %v7965_v24 = vpack.c.bf16 %v1920_v16, %v1917_v15  ;;  %v1943_v13 = vld [vmem:[%s9512_s22 + $0x2fb8] sm:$0xff] }
 0x2d2   : > { %v6273_v37 = vpop.f32.mrb[9].mxu1  ;;  %v1567_v15 = vld [vmem:[%s9512_s22 + $0x23f8] sm:$0xff]  ;;  %v7983_v21 = vpack.c.bf16 %v1943_v13, %v1940_v9  ;;  %v9292_v9 = vld [vmem:[%s9522_s27 + $0xc8] sm:$0xff] }
 0x2d3   : > { %v6274_v41 = vadd.f32 %v6273_v37, %v6272_v33  ;;  %8684 = vmatpush3.bf16.msra.mxu1 %v8683_v27  ;;  %v1540_v27 = vld [vmem:[%s9512_s22 + $0x2320] sm:$0xff]  ;;  %v1925_v37 = vld [vmem:[%s9512_s22 + $0x2f28] sm:$0xff] }
 0x2d4   : > { %7948 = vmatpush1.bf16.msra.mxu0 %v7947_v28  ;;  %8686 = vmatprep.subr.bf16.mxu1 %v8685_v29  ;;  %v1543_v28 = vld [vmem:[%s9512_s22 + $0x2338] sm:$0xff] }
 0x2d5   : > { %v10933_v48 = vadd.f32 %v6274_v41, %v10862_v5  ;;  %7950 = vmatprep.subr.bf16.mxu0 %v7949_v34  ;;  %v8693_v5 = vpack.c.bf16 %v1525_v52, %v1522_v51  ;;  %v1923_v29 = vld [vmem:[%s9512_s22 + $0x2f18] sm:$0xff]  ;;  %v8705_v33 = vpack.c.bf16 %v1543_v28, %v1540_v27  ;;  %v1922_v34 = vld [vmem:[%s9512_s22 + $0x2f10] sm:$0xff]  ;;  %v1929_v41 = vld [vmem:[%s9512_s22 + $0x2f48] sm:$0xff] }
 0x2d6   : > { %v7969_v36 = vpack.c.bf16 %v1926_v30, %v1923_v29  ;;  %v1931_v51 = vld [vmem:[%s9512_s22 + $0x2f58] sm:$0xff]  ;;  %v1552_v52 = vld [vmem:[%s9512_s22 + $0x2380] sm:$0xff]  ;;  %v1949_v29 = vld [vmem:[%s9512_s22 + $0x2fe8] sm:$0xff] }
 0x2d7   : > { %8688 = vmatpush3.bf16.msra.mxu1 %v8687_v42  ;;  %v1932_v42 = vld [vmem:[%s9512_s22 + $0x2f60] sm:$0xff]  ;;  %v8713_v58 = vpack.c.bf16 %v1555_v53, %v1552_v52  ;;  %v1618_v30 = vld [vmem:[%s9512_s22 + $0x2590] sm:$0xff]  ;;  %v1579_v52 = vld [vmem:[%s9512_s22 + $0x2458] sm:$0xff] }
 0x2d8   : > { %7952 = vmatpush1.bf16.msra.mxu0 %v7951_v43  ;;  %8690 = vmatprep.subr.bf16.mxu1 %v8689_v44  ;;  %v8707_v43 = vpack.c.bf16 %v1495_v35, %v1492_v40  ;;  %v7971_v44 = vpack.c.bf16 %v1925_v37, %v1922_v34  ;;  %v7973_v50 = vpack.c.bf16 %v1932_v42, %v1929_v41  ;;  %v1952_v35 = vld [vmem:[%s9512_s22 + $0x3000] sm:$0xff]  ;;  %v1573_v37 = vld [vmem:[%s9512_s22 + $0x2428] sm:$0xff]  ;;  %v1627_v42 = vld [vmem:[%s9512_s22 + $0x25d8] sm:$0xff] }
 0x2d9   : > { %7954 = vmatprep.subr.bf16.mxu0 %v7953_v49  ;;  %v1501_v49 = vld [vmem:[%s9512_s22 + $0x21e8] sm:$0xff]  ;;  %v1624_v41 = vld [vmem:[%s9512_s22 + $0x25c0] sm:$0xff] }
 0x2db   : > { %8692 = vmatpush3.bf16.msra.mxu1 %v8691_v55  ;;  %v1938_v55 = vld [vmem:[%s9512_s22 + $0x2f90] sm:$0xff] }
 0x2dc   : > { %7956 = vmatpush1.bf16.msra.mxu0 %v7955_v56  ;;  %8694 = vmatprep.subr.bf16.mxu1 %v8693_v5  ;;  %v8711_v56 = vpack.c.bf16 %v1501_v49, %v1498_v47  ;;  %v7975_v5 = vpack.c.bf16 %v1931_v51, %v1928_v46  ;;  %v7977_v63 = vpack.c.bf16 %v1938_v55, %v1935_v54  ;;  %v1576_v51 = vld [vmem:[%s9512_s22 + $0x2440] sm:$0xff]  ;;  %v1961_v54 = vld [vmem:[%s9512_s22 + $0x3048] sm:$0xff]  ;;  %v1630_v55 = vld [vmem:[%s9512_s22 + $0x25f0] sm:$0xff] }
 0x2dd   : > { %7958 = vmatprep.subr.bf16.mxu0 %v7957_v61  ;;  %v1507_v61 = vld [vmem:[%s9512_s22 + $0x2218] sm:$0xff]  ;;  %v7991_v47 = vpack.c.bf16 %v1955_v39, %v1952_v35  ;;  %v8729_v49 = vpack.c.bf16 %v1627_v42, %v1624_v41  ;;  %v1600_v39 = vld [vmem:[%s9512_s22 + $0x2500] sm:$0xff] }
 0x2de   : > { %4807 = vmatmul.mubr.f32.vlgmr.msra.gmra.mrb[22].mxu1 %v9289_v14  ;;  %v1564_v14 = vld [vmem:[%s9512_s22 + $0x23e0] sm:$0xff]  ;;  %v1603_v41 = vld [vmem:[%s9512_s22 + $0x2518] sm:$0xff] }
 0x2df   : > { %8696 = vmatpush3.bf16.msra.mxu1 %v8695_v4  ;;  %4876 = vmatprep.mubr.f32.mxu1 %v9290_v18  ;;  %v1944_v4 = vld [vmem:[%s9512_s22 + $0x2fc0] sm:$0xff]  ;;  %v1950_v18 = vld [vmem:[%s9512_s22 + $0x2ff0] sm:$0xff]  ;;  %v8721_v22 = vpack.c.bf16 %v1567_v15, %v1564_v14 }
 0x2e0   : > { %7960 = vmatpush1.bf16.msra.mxu0 %v7959_v6  ;;  %8698 = vmatprep.subr.bf16.mxu1 %v8697_v7  ;;  %v8715_v6 = vpack.c.bf16 %v1507_v61, %v1504_v60  ;;  %v7979_v7 = vpack.c.bf16 %v1937_v0, %v1934_v59  ;;  %v7981_v26 = vpack.c.bf16 %v1944_v4, %v1941_v3  ;;  %v1968_v59 = vld [vmem:[%s9512_s22 + $0x3080] sm:$0xff]  ;;  %v406_v61 = vld [vmem:[%s9522_s27 + $0x108] sm:$0xff]  ;;  %v1585_v3 = vld [vmem:[%s9512_s22 + $0x2488] sm:$0xff] }
 0x2e1   : > { %7962 = vmatprep.subr.bf16.mxu0 %v7961_v11  ;;  %v1513_v11 = vld [vmem:[%s9512_s22 + $0x2248] sm:$0xff]  ;;  %v8731_v60 = vpack.c.bf16 %v1579_v52, %v1576_v51  ;;  %v1970_v14 = vld [vmem:[%s9512_s22 + $0x3090] sm:$0xff]  ;;  %v1588_v15 = vld [vmem:[%s9512_s22 + $0x24a0] sm:$0xff] }
 0x2e2   : > { %v1988_v52 = vld [vmem:[%s9512_s22 + $0x3120] sm:$0xff] }
 0x2e3   : > { %8700 = vmatpush3.bf16.msra.mxu1 %v8699_v17  ;;  %v1947_v17 = vld [vmem:[%s9512_s22 + $0x2fd8] sm:$0xff] }
 0x2e4   : > { %7964 = vmatpush1.bf16.msra.mxu0 %v7963_v19  ;;  %8702 = vmatprep.subr.bf16.mxu1 %v8701_v20  ;;  %v8719_v20 = vpack.c.bf16 %v1513_v11, %v1510_v10  ;;  %v7985_v28 = vpack.c.bf16 %v1950_v18, %v1947_v17  ;;  %v1971_v10 = vld [vmem:[%s9512_s22 + $0x3098] sm:$0xff]  ;;  %v1974_v11 = vld [vmem:[%s9512_s22 + $0x30b0] sm:$0xff]  ;;  %v1973_v18 = vld [vmem:[%s9512_s22 + $0x30a8] sm:$0xff] }
 0x2e5   : > { %7966 = vmatprep.subr.bf16.mxu0 %v7965_v24  ;;  %v1516_v24 = vld [vmem:[%s9512_s22 + $0x2260] sm:$0xff]  ;;  %v8001_v17 = vpack.c.bf16 %v1974_v11, %v1971_v10  ;;  %v1997_v10 = vld [vmem:[%s9512_s22 + $0x3168] sm:$0xff]  ;;  %v1714_v11 = vld [vmem:[%s9512_s22 + $0x2890] sm:$0xff] }
 0x2e6   : > { %v8723_v34 = vpack.c.bf16 %v1519_v25, %v1516_v24  ;;  %v8003_v24 = vpack.c.bf16 %v1973_v18, %v1970_v14  ;;  %v1669_v18 = vld [vmem:[%s9512_s22 + $0x2728] sm:$0xff] }
 0x2e7   : > { %8704 = vmatpush3.bf16.msra.mxu1 %v8703_v31  ;;  %v1621_v31 = vld [vmem:[%s9512_s22 + $0x25a8] sm:$0xff] }
 0x2e8   : > { %7968 = vmatpush1.bf16.msra.mxu0 %v7967_v32  ;;  %8706 = vmatprep.subr.bf16.mxu1 %v8705_v33  ;;  %v1953_v32 = vld [vmem:[%s9512_s22 + $0x3008] sm:$0xff]  ;;  %v1956_v33 = vld [vmem:[%s9512_s22 + $0x3020] sm:$0xff]  ;;  %v8725_v40 = vpack.c.bf16 %v1621_v31, %v1618_v30 }
 0x2e9   : > { %7970 = vmatprep.subr.bf16.mxu0 %v7969_v36  ;;  %v1570_v36 = vld [vmem:[%s9512_s22 + $0x2410] sm:$0xff]  ;;  %v7989_v38 = vpack.c.bf16 %v1956_v33, %v1953_v32  ;;  %v1597_v30 = vld [vmem:[%s9512_s22 + $0x24e8] sm:$0xff]  ;;  %v1979_v32 = vld [vmem:[%s9512_s22 + $0x30d8] sm:$0xff] }
 0x2ea   : > { %v8727_v46 = vpack.c.bf16 %v1573_v37, %v1570_v36  ;;  %v1648_v33 = vld [vmem:[%s9512_s22 + $0x2680] sm:$0xff] }
 0x2eb   : > { %8708 = vmatpush3.bf16.msra.mxu1 %v8707_v43  ;;  %v1959_v43 = vld [vmem:[%s9512_s22 + $0x3038] sm:$0xff] }
 0x2ec   : > { %7972 = vmatpush1.bf16.msra.mxu0 %v7971_v44  ;;  %8710 = vmatprep.subr.bf16.mxu1 %v8709_v45  ;;  %v1962_v44 = vld [vmem:[%s9512_s22 + $0x3050] sm:$0xff]  ;;  %v403_v45 = vld [vmem:[%s9522_s27 + $0xf0] sm:$0xff] }
 0x2ed   : > { %7974 = vmatprep.subr.bf16.mxu0 %v7973_v50  ;;  %v1958_v50 = vld [vmem:[%s9512_s22 + $0x3030] sm:$0xff]  ;;  %v7993_v53 = vpack.c.bf16 %v1962_v44, %v1959_v43  ;;  %v1985_v43 = vld [vmem:[%s9512_s22 + $0x3108] sm:$0xff] }
 0x2ee   : > { %v1654_v44 = vld [vmem:[%s9512_s22 + $0x26b0] sm:$0xff] }
 0x2ef   : > { %8712 = vmatpush3.bf16.msra.mxu1 %v8711_v56  ;;  %v1633_v56 = vld [vmem:[%s9512_s22 + $0x2608] sm:$0xff] }
 0x2f0   : > { %7976 = vmatpush1.bf16.msra.mxu0 %v7975_v5  ;;  %8714 = vmatprep.subr.bf16.mxu1 %v8713_v58  ;;  %v9291_v5 = vld [vmem:[%s9522_s27 + $0xb0] sm:$0xff]  ;;  %v1965_v58 = vld [vmem:[%s9512_s22 + $0x3068] sm:$0xff]  ;;  %v8733_v0 = vpack.c.bf16 %v1633_v56, %v1630_v55 }
 0x2f1   : > { %v6307_v12 = vpop.f32.mrb[10].mxu1  ;;  %7978 = vmatprep.subr.bf16.mxu0 %v7977_v63  ;;  %v7995_v63 = vpack.c.bf16 %v1961_v54, %v1958_v50  ;;  %v7997_v4 = vpack.c.bf16 %v1968_v59, %v1965_v58  ;;  %v1609_v54 = vld [vmem:[%s9512_s22 + $0x2548] sm:$0xff]  ;;  %v1660_v58 = vld [vmem:[%s9512_s22 + $0x26e0] sm:$0xff]  ;;  %v1663_v59 = vld [vmem:[%s9512_s22 + $0x26f8] sm:$0xff] }
 0x2f2   : > { %v6308_v16 = vpop.f32.mrb[11].mxu1 }
 0x2f3   : > { %v6309_v19 = vadd.f32 %v6308_v16, %v6307_v12  ;;  %8716 = vmatpush3.bf16.msra.mxu1 %v8715_v6  ;;  %v1967_v6 = vld [vmem:[%s9512_s22 + $0x3078] sm:$0xff]  ;;  %v8735_v12 = vpack.c.bf16 %v1585_v3, %v1582_v2  ;;  %v8753_v3 = vpack.c.bf16 %v1663_v59, %v1660_v58 }
 0x2f4   : > { %7980 = vmatpush1.bf16.msra.mxu0 %v7979_v7  ;;  %8718 = vmatprep.subr.bf16.mxu1 %v8717_v8  ;;  %v1636_v7 = vld [vmem:[%s9512_s22 + $0x2620] sm:$0xff]  ;;  %v1639_v8 = vld [vmem:[%s9512_s22 + $0x2638] sm:$0xff] }
 0x2f5   : > { %v11002_v27 = vadd.f32 %v6309_v19, %v10933_v48  ;;  %7982 = vmatprep.subr.bf16.mxu0 %v7981_v26  ;;  %v7987_v48 = vpack.c.bf16 %v1949_v29, %v1946_v23  ;;  %v7999_v26 = vpack.c.bf16 %v1967_v6, %v1964_v1  ;;  %v8737_v13 = vpack.c.bf16 %v1639_v8, %v1636_v7  ;;  %v1591_v16 = vld [vmem:[%s9512_s22 + $0x24b8] sm:$0xff]  ;;  %v1642_v19 = vld [vmem:[%s9512_s22 + $0x2650] sm:$0xff]  ;;  %v1612_v6 = vld [vmem:[%s9512_s22 + $0x2560] sm:$0xff] }
 0x2f6   : > { %v8739_v23 = vpack.c.bf16 %v1591_v16, %v1588_v15  ;;  %v1594_v29 = vld [vmem:[%s9512_s22 + $0x24d0] sm:$0xff]  ;;  %v1615_v7 = vld [vmem:[%s9512_s22 + $0x2578] sm:$0xff]  ;;  %v2000_v16 = vld [vmem:[%s9512_s22 + $0x3180] sm:$0xff] }
 0x2f7   : > { %8720 = vmatpush3.bf16.msra.mxu1 %v8719_v20  ;;  %v1645_v20 = vld [vmem:[%s9512_s22 + $0x2668] sm:$0xff]  ;;  %v8743_v35 = vpack.c.bf16 %v1597_v30, %v1594_v29  ;;  %v8755_v14 = vpack.c.bf16 %v1615_v7, %v1612_v6  ;;  %v2006_v30 = vld [vmem:[%s9512_s22 + $0x31b0] sm:$0xff]  ;;  %v1687_v58 = vld [vmem:[%s9512_s22 + $0x27b8] sm:$0xff] }
 0x2f8   : > { %7984 = vmatpush1.bf16.msra.mxu0 %v7983_v21  ;;  %8722 = vmatprep.subr.bf16.mxu1 %v8721_v22  ;;  %v1977_v21 = vld [vmem:[%s9512_s22 + $0x30c8] sm:$0xff]  ;;  %v1980_v22 = vld [vmem:[%s9512_s22 + $0x30e0] sm:$0xff]  ;;  %v8741_v25 = vpack.c.bf16 %v1645_v20, %v1642_v19  ;;  %v2003_v20 = vld [vmem:[%s9512_s22 + $0x3198] sm:$0xff] }
 0x2f9   : > { %7986 = vmatprep.subr.bf16.mxu0 %v7985_v28  ;;  %v1976_v28 = vld [vmem:[%s9512_s22 + $0x30c0] sm:$0xff]  ;;  %v8005_v31 = vpack.c.bf16 %v1980_v22, %v1977_v21  ;;  %v1723_v22 = vld [vmem:[%s9512_s22 + $0x28d8] sm:$0xff]  ;;  %v1690_v7 = vld [vmem:[%s9512_s22 + $0x27d0] sm:$0xff] }
 0x2fa   : > { %v8007_v36 = vpack.c.bf16 %v1979_v32, %v1976_v28  ;;  %v1720_v21 = vld [vmem:[%s9512_s22 + $0x28c0] sm:$0xff]  ;;  %v8023_v28 = vpack.c.bf16 %v2003_v20, %v2000_v16  ;;  %v1675_v32 = vld [vmem:[%s9512_s22 + $0x2758] sm:$0xff] }
 0x2fb   : > { %8724 = vmatpush3.bf16.msra.mxu1 %v8723_v34  ;;  %v1651_v34 = vld [vmem:[%s9512_s22 + $0x2698] sm:$0xff]  ;;  %v8761_v29 = vpack.c.bf16 %v1723_v22, %v1720_v21  ;;  %v2024_v6 = vld [vmem:[%s9512_s22 + $0x3240] sm:$0xff]  ;;  %v2033_v21 = vld [vmem:[%s9512_s22 + $0x3288] sm:$0xff] }
 0x2fc   : > { %7988 = vmatpush1.bf16.msra.mxu0 %v7987_v48  ;;  %8726 = vmatprep.subr.bf16.mxu1 %v8725_v40  ;;  %v1983_v48 = vld [vmem:[%s9512_s22 + $0x30f8] sm:$0xff]  ;;  %v1986_v40 = vld [vmem:[%s9512_s22 + $0x3110] sm:$0xff]  ;;  %v8745_v37 = vpack.c.bf16 %v1651_v34, %v1648_v33  ;;  %v2009_v34 = vld [vmem:[%s9512_s22 + $0x31c8] sm:$0xff] }
 0x2fd   : > { %7990 = vmatprep.subr.bf16.mxu0 %v7989_v38  ;;  %v1982_v38 = vld [vmem:[%s9512_s22 + $0x30f0] sm:$0xff]  ;;  %v8009_v42 = vpack.c.bf16 %v1986_v40, %v1983_v48  ;;  %v1729_v40 = vld [vmem:[%s9512_s22 + $0x2908] sm:$0xff] }
 0x2fe   : > { %4877 = vmatmul.mubr.f32.vlgmr.msra.gmra.mrb[24].mxu1 %v9291_v5  ;;  %v8011_v50 = vpack.c.bf16 %v1985_v43, %v1982_v38  ;;  %v1991_v5 = vld [vmem:[%s9512_s22 + $0x3138] sm:$0xff]  ;;  %v1726_v48 = vld [vmem:[%s9512_s22 + $0x28f0] sm:$0xff]  ;;  %v2012_v43 = vld [vmem:[%s9512_s22 + $0x31e0] sm:$0xff] }
 0x2ff   : > { %3610 = vmatmul.mubr.f32.vlgmr.msra.gmra.mrb[0].mxu0 %v403_v45  ;;  %8728 = vmatpush3.bf16.msra.mxu1 %v8727_v46  ;;  %v1657_v45 = vld [vmem:[%s9512_s22 + $0x26c8] sm:$0xff]  ;;  %v8015_v2 = vpack.c.bf16 %v1991_v5, %v1988_v52  ;;  %v2022_v52 = vld [vmem:[%s9512_s22 + $0x3230] sm:$0xff]  ;;  %v1684_v5 = vld [vmem:[%s9512_s22 + $0x27a0] sm:$0xff] }
 0x300   : > { %7992 = vmatpush1.bf16.msra.mxu0 %v7991_v47  ;;  %8730 = vmatprep.subr.bf16.mxu1 %v8729_v49  ;;  %v1989_v46 = vld [vmem:[%s9512_s22 + $0x3128] sm:$0xff]  ;;  %v1992_v47 = vld [vmem:[%s9512_s22 + $0x3140] sm:$0xff]  ;;  %v8747_v49 = vpack.c.bf16 %v1603_v41, %v1600_v39  ;;  %v8749_v51 = vpack.c.bf16 %v1657_v45, %v1654_v44  ;;  %v8027_v41 = vpack.c.bf16 %v2009_v34, %v2006_v30  ;;  %v1678_v44 = vld [vmem:[%s9512_s22 + $0x2770] sm:$0xff] }
 0x301   : > { %7994 = vmatprep.subr.bf16.mxu0 %v7993_v53  ;;  %4946 = vmatprep.mubr.f32.mxu1 %v9292_v9  ;;  %v1606_v53 = vld [vmem:[%s9512_s22 + $0x2530] sm:$0xff]  ;;  %v8013_v56 = vpack.c.bf16 %v1992_v47, %v1989_v46  ;;  %v9294_v39 = vld [vmem:[%s9522_s27 + $0xd8] sm:$0xff]  ;;  %v1681_v45 = vld [vmem:[%s9512_s22 + $0x2788] sm:$0xff] }
 0x302   : > { %3680 = vmatprep.mubr.f32.mxu0 %v406_v61  ;;  %v1995_v61 = vld [vmem:[%s9512_s22 + $0x3158] sm:$0xff]  ;;  %v8751_v1 = vpack.c.bf16 %v1609_v54, %v1606_v53  ;;  %v8767_v53 = vpack.c.bf16 %v1681_v45, %v1678_v44  ;;  %v1750_v22 = vld [vmem:[%s9512_s22 + $0x29b0] sm:$0xff] }
 0x303   : > { %8732 = vmatpush3.bf16.msra.mxu1 %v8731_v60  ;;  %v2015_v47 = vld [vmem:[%s9512_s22 + $0x31f8] sm:$0xff]  ;;  %v2042_v45 = vld [vmem:[%s9512_s22 + $0x32d0] sm:$0xff] }
 0x304   : > { %7996 = vmatpush1.bf16.msra.mxu0 %v7995_v63  ;;  %8734 = vmatprep.subr.bf16.mxu1 %v8733_v0  ;;  %v1998_v63 = vld [vmem:[%s9512_s22 + $0x3170] sm:$0xff]  ;;  %v8031_v54 = vpack.c.bf16 %v2015_v47, %v2012_v43  ;;  %v1711_v47 = vld [vmem:[%s9512_s22 + $0x2878] sm:$0xff] }
 0x305   : > { %7998 = vmatprep.subr.bf16.mxu0 %v7997_v4  ;;  %v1994_v4 = vld [vmem:[%s9512_s22 + $0x3150] sm:$0xff]  ;;  %v8017_v9 = vpack.c.bf16 %v1998_v63, %v1995_v61  ;;  %v1741_v63 = vld [vmem:[%s9512_s22 + $0x2968] sm:$0xff] }
 0x306   : > { %v8019_v15 = vpack.c.bf16 %v1997_v10, %v1994_v4  ;;  %v1738_v61 = vld [vmem:[%s9512_s22 + $0x2950] sm:$0xff] }
 0x307   : > { %8736 = vmatpush3.bf16.msra.mxu1 %v8735_v12  ;;  %v1717_v12 = vld [vmem:[%s9512_s22 + $0x28a8] sm:$0xff]  ;;  %v8773_v4 = vpack.c.bf16 %v1741_v63, %v1738_v61  ;;  %v2051_v63 = vld [vmem:[%s9512_s22 + $0x3318] sm:$0xff] }
 0x308   : > { %8000 = vmatpush1.bf16.msra.mxu0 %v7999_v26  ;;  %8738 = vmatprep.subr.bf16.mxu1 %v8737_v13  ;;  %v2001_v26 = vld [vmem:[%s9512_s22 + $0x3188] sm:$0xff]  ;;  %v2004_v13 = vld [vmem:[%s9512_s22 + $0x31a0] sm:$0xff] }
 0x309   : > { %8002 = vmatprep.subr.bf16.mxu0 %v8001_v17  ;;  %v1666_v17 = vld [vmem:[%s9512_s22 + $0x2710] sm:$0xff]  ;;  %v8021_v19 = vpack.c.bf16 %v2004_v13, %v2001_v26  ;;  %v1747_v26 = vld [vmem:[%s9512_s22 + $0x2998] sm:$0xff] }
 0x30a   : > { %v2031_v13 = vld [vmem:[%s9512_s22 + $0x3278] sm:$0xff] }
 0x30b   : > { %8740 = vmatpush3.bf16.msra.mxu1 %v8739_v23  ;;  %v2007_v23 = vld [vmem:[%s9512_s22 + $0x31b8] sm:$0xff] }
 0x30c   : > { %8004 = vmatpush1.bf16.msra.mxu0 %v8003_v24  ;;  %8742 = vmatprep.subr.bf16.mxu1 %v8741_v25  ;;  %v2010_v24 = vld [vmem:[%s9512_s22 + $0x31d0] sm:$0xff]  ;;  %v8759_v25 = vpack.c.bf16 %v1669_v18, %v1666_v17  ;;  %v1696_v18 = vld [vmem:[%s9512_s22 + $0x2800] sm:$0xff] }
 0x30d   : > { %8006 = vmatprep.subr.bf16.mxu0 %v8005_v31  ;;  %v1672_v31 = vld [vmem:[%s9512_s22 + $0x2740] sm:$0xff]  ;;  %v8025_v33 = vpack.c.bf16 %v2010_v24, %v2007_v23  ;;  %v2030_v17 = vld [vmem:[%s9512_s22 + $0x3270] sm:$0xff]  ;;  %v1753_v23 = vld [vmem:[%s9512_s22 + $0x29c8] sm:$0xff] }
 0x30e   : > { %v8763_v38 = vpack.c.bf16 %v1675_v32, %v1672_v31  ;;  %v2037_v24 = vld [vmem:[%s9512_s22 + $0x32a8] sm:$0xff]  ;;  %v8781_v30 = vpack.c.bf16 %v1753_v23, %v1750_v22  ;;  %v2036_v31 = vld [vmem:[%s9512_s22 + $0x32a0] sm:$0xff]  ;;  %v1702_v32 = vld [vmem:[%s9512_s22 + $0x2830] sm:$0xff] }
 0x30f   : > { %8744 = vmatpush3.bf16.msra.mxu1 %v8743_v35  ;;  %v9293_v35 = vld [vmem:[%s9522_s27 + $0xc0] sm:$0xff]  ;;  %v2060_v22 = vld [vmem:[%s9512_s22 + $0x3360] sm:$0xff]  ;;  %v1774_v23 = vld [vmem:[%s9512_s22 + $0x2a70] sm:$0xff] }
 0x310   : > { %8008 = vmatpush1.bf16.msra.mxu0 %v8007_v36  ;;  %8746 = vmatprep.subr.bf16.mxu1 %v8745_v37  ;;  %v2013_v36 = vld [vmem:[%s9512_s22 + $0x31e8] sm:$0xff]  ;;  %v2016_v37 = vld [vmem:[%s9512_s22 + $0x3200] sm:$0xff] }
 0x311   : > { %v6342_v55 = vpop.f32.mrb[12].mxu1  ;;  %8010 = vmatprep.subr.bf16.mxu0 %v8009_v42  ;;  %v8765_v42 = vpack.c.bf16 %v1729_v40, %v1726_v48  ;;  %v8029_v46 = vpack.c.bf16 %v2016_v37, %v2013_v36  ;;  %v2039_v40 = vld [vmem:[%s9512_s22 + $0x32b8] sm:$0xff] }
 0x312   : > { %v6343_v60 = vpop.f32.mrb[13].mxu1  ;;  %v1759_v36 = vld [vmem:[%s9512_s22 + $0x29f8] sm:$0xff]  ;;  %v8047_v43 = vpack.c.bf16 %v2039_v40, %v2036_v31  ;;  %v9296_v31 = vld [vmem:[%s9522_s27 + $0xe8] sm:$0xff] }
 0x313   : > { %v6344_v0 = vadd.f32 %v6343_v60, %v6342_v55  ;;  %8748 = vmatpush3.bf16.msra.mxu1 %v8747_v49  ;;  %v1732_v49 = vld [vmem:[%s9512_s22 + $0x2920] sm:$0xff]  ;;  %v2021_v60 = vld [vmem:[%s9512_s22 + $0x3228] sm:$0xff] }
 0x314   : > { %8012 = vmatpush1.bf16.msra.mxu0 %v8011_v50  ;;  %8750 = vmatprep.subr.bf16.mxu1 %v8749_v51  ;;  %v1735_v50 = vld [vmem:[%s9512_s22 + $0x2938] sm:$0xff] }
 0x315   : > { %v11073_v8 = vadd.f32 %v6344_v0, %v11002_v27  ;;  %8014 = vmatprep.subr.bf16.mxu0 %v8013_v56  ;;  %v8757_v27 = vpack.c.bf16 %v1717_v12, %v1714_v11  ;;  %v2019_v51 = vld [vmem:[%s9512_s22 + $0x3218] sm:$0xff]  ;;  %v8769_v55 = vpack.c.bf16 %v1735_v50, %v1732_v49  ;;  %v2018_v56 = vld [vmem:[%s9512_s22 + $0x3210] sm:$0xff]  ;;  %v2025_v0 = vld [vmem:[%s9512_s22 + $0x3248] sm:$0xff] }
 0x316   : > { %v8033_v59 = vpack.c.bf16 %v2022_v52, %v2019_v51  ;;  %v2027_v11 = vld [vmem:[%s9512_s22 + $0x3258] sm:$0xff]  ;;  %v1744_v12 = vld [vmem:[%s9512_s22 + $0x2980] sm:$0xff]  ;;  %v2045_v51 = vld [vmem:[%s9512_s22 + $0x32e8] sm:$0xff] }
 0x317   : > { %8752 = vmatpush3.bf16.msra.mxu1 %v8751_v1  ;;  %v2028_v1 = vld [vmem:[%s9512_s22 + $0x3260] sm:$0xff]  ;;  %v8777_v16 = vpack.c.bf16 %v1747_v26, %v1744_v12  ;;  %v1810_v52 = vld [vmem:[%s9512_s22 + $0x2b90] sm:$0xff]  ;;  %v1771_v12 = vld [vmem:[%s9512_s22 + $0x2a58] sm:$0xff] }
 0x318   : > { %8016 = vmatpush1.bf16.msra.mxu0 %v8015_v2  ;;  %8754 = vmatprep.subr.bf16.mxu1 %v8753_v3  ;;  %v8771_v2 = vpack.c.bf16 %v1687_v58, %v1684_v5  ;;  %v8035_v3 = vpack.c.bf16 %v2021_v60, %v2018_v56  ;;  %v8037_v10 = vpack.c.bf16 %v2028_v1, %v2025_v0  ;;  %v2048_v58 = vld [vmem:[%s9512_s22 + $0x3300] sm:$0xff]  ;;  %v1765_v60 = vld [vmem:[%s9512_s22 + $0x2a28] sm:$0xff]  ;;  %v1819_v1 = vld [vmem:[%s9512_s22 + $0x2bd8] sm:$0xff] }
 0x319   : > { %8018 = vmatprep.subr.bf16.mxu0 %v8017_v9  ;;  %v1693_v9 = vld [vmem:[%s9512_s22 + $0x27e8] sm:$0xff]  ;;  %v1816_v0 = vld [vmem:[%s9512_s22 + $0x2bc0] sm:$0xff] }
 0x31b   : > { %8756 = vmatpush3.bf16.msra.mxu1 %v8755_v14  ;;  %v2034_v14 = vld [vmem:[%s9512_s22 + $0x3290] sm:$0xff] }
 0x31c   : > { %8020 = vmatpush1.bf16.msra.mxu0 %v8019_v15  ;;  %8758 = vmatprep.subr.bf16.mxu1 %v8757_v27  ;;  %v8775_v15 = vpack.c.bf16 %v1693_v9, %v1690_v7  ;;  %v8039_v27 = vpack.c.bf16 %v2027_v11, %v2024_v6  ;;  %v8041_v20 = vpack.c.bf16 %v2034_v14, %v2031_v13  ;;  %v1768_v11 = vld [vmem:[%s9512_s22 + $0x2a40] sm:$0xff]  ;;  %v2057_v13 = vld [vmem:[%s9512_s22 + $0x3348] sm:$0xff]  ;;  %v1822_v14 = vld [vmem:[%s9512_s22 + $0x2bf0] sm:$0xff] }
 0x31d   : > { %8022 = vmatprep.subr.bf16.mxu0 %v8021_v19  ;;  %v1699_v19 = vld [vmem:[%s9512_s22 + $0x2818] sm:$0xff]  ;;  %v8055_v7 = vpack.c.bf16 %v2051_v63, %v2048_v58  ;;  %v8793_v9 = vpack.c.bf16 %v1819_v1, %v1816_v0  ;;  %v1792_v63 = vld [vmem:[%s9512_s22 + $0x2b00] sm:$0xff] }
 0x31e   : > { %4947 = vmatmul.mubr.f32.vlgmr.msra.gmra.mrb[26].mxu1 %v9293_v35  ;;  %v1756_v35 = vld [vmem:[%s9512_s22 + $0x29e0] sm:$0xff]  ;;  %v1795_v0 = vld [vmem:[%s9512_s22 + $0x2b18] sm:$0xff] }
 0x31f   : > { %8760 = vmatpush3.bf16.msra.mxu1 %v8759_v25  ;;  %5016 = vmatprep.mubr.f32.mxu1 %v9294_v39  ;;  %v2040_v25 = vld [vmem:[%s9512_s22 + $0x32c0] sm:$0xff]  ;;  %v2046_v39 = vld [vmem:[%s9512_s22 + $0x32f0] sm:$0xff]  ;;  %v8785_v44 = vpack.c.bf16 %v1759_v36, %v1756_v35 }
 0x320   : > { %8024 = vmatpush1.bf16.msra.mxu0 %v8023_v28  ;;  %8762 = vmatprep.subr.bf16.mxu1 %v8761_v29  ;;  %v8779_v28 = vpack.c.bf16 %v1699_v19, %v1696_v18  ;;  %v8043_v29 = vpack.c.bf16 %v2033_v21, %v2030_v17  ;;  %v8045_v48 = vpack.c.bf16 %v2040_v25, %v2037_v24  ;;  %v2064_v17 = vld [vmem:[%s9512_s22 + $0x3380] sm:$0xff]  ;;  %v1777_v24 = vld [vmem:[%s9512_s22 + $0x2a88] sm:$0xff]  ;;  %v2066_v35 = vld [vmem:[%s9512_s22 + $0x3390] sm:$0xff] }
 0x321   : > { %8026 = vmatprep.subr.bf16.mxu0 %v8025_v33  ;;  %v1705_v33 = vld [vmem:[%s9512_s22 + $0x2848] sm:$0xff]  ;;  %v8795_v18 = vpack.c.bf16 %v1771_v12, %v1768_v11  ;;  %v11171_v19 = vld [vmem:[%s9522_s27 + $0x118] sm:$0xff] }
 0x322   : > { %v1780_v36 = vld [vmem:[%s9512_s22 + $0x2aa0] sm:$0xff] }
 0x323   : > { %8764 = vmatpush3.bf16.msra.mxu1 %v8763_v38  ;;  %v2043_v38 = vld [vmem:[%s9512_s22 + $0x32d8] sm:$0xff] }
 0x324   : > { %8028 = vmatpush1.bf16.msra.mxu0 %v8027_v41  ;;  %8766 = vmatprep.subr.bf16.mxu1 %v8765_v42  ;;  %v8783_v42 = vpack.c.bf16 %v1705_v33, %v1702_v32  ;;  %v8049_v50 = vpack.c.bf16 %v2046_v39, %v2043_v38  ;;  %v2067_v32 = vld [vmem:[%s9512_s22 + $0x3398] sm:$0xff]  ;;  %v2070_v33 = vld [vmem:[%s9512_s22 + $0x33b0] sm:$0xff]  ;;  %v2069_v39 = vld [vmem:[%s9512_s22 + $0x33a8] sm:$0xff] }
 0x325   : > { %8030 = vmatprep.subr.bf16.mxu0 %v8029_v46  ;;  %v1708_v46 = vld [vmem:[%s9512_s22 + $0x2860] sm:$0xff]  ;;  %v8065_v38 = vpack.c.bf16 %v2070_v33, %v2067_v32 }
 0x326   : > { %v8787_v56 = vpack.c.bf16 %v1711_v47, %v1708_v46  ;;  %v8067_v46 = vpack.c.bf16 %v2069_v39, %v2066_v35  ;;  %v2097_v35 = vld [vmem:[%s9512_s22 + $0x3488] sm:$0xff]  ;;  %v2096_v39 = vld [vmem:[%s9512_s22 + $0x3480] sm:$0xff] }
 0x327   : > { %8768 = vmatpush3.bf16.msra.mxu1 %v8767_v53  ;;  %v1813_v53 = vld [vmem:[%s9512_s22 + $0x2ba8] sm:$0xff] }
 0x328   : > { %8032 = vmatpush1.bf16.msra.mxu0 %v8031_v54  ;;  %8770 = vmatprep.subr.bf16.mxu1 %v8769_v55  ;;  %v2049_v54 = vld [vmem:[%s9512_s22 + $0x3308] sm:$0xff]  ;;  %v2052_v55 = vld [vmem:[%s9512_s22 + $0x3320] sm:$0xff]  ;;  %v8789_v5 = vpack.c.bf16 %v1813_v53, %v1810_v52 }
 0x329   : > { %8034 = vmatprep.subr.bf16.mxu0 %v8033_v59  ;;  %v1762_v59 = vld [vmem:[%s9512_s22 + $0x2a10] sm:$0xff]  ;;  %v8053_v61 = vpack.c.bf16 %v2052_v55, %v2049_v54  ;;  %v1789_v52 = vld [vmem:[%s9512_s22 + $0x2ae8] sm:$0xff]  ;;  %v2075_v54 = vld [vmem:[%s9512_s22 + $0x33d8] sm:$0xff] }
 0x32a   : > { %v8791_v6 = vpack.c.bf16 %v1765_v60, %v1762_v59  ;;  %v1840_v55 = vld [vmem:[%s9512_s22 + $0x2c80] sm:$0xff] }
 0x32b   : > { %8772 = vmatpush3.bf16.msra.mxu1 %v8771_v2  ;;  %v2055_v2 = vld [vmem:[%s9512_s22 + $0x3338] sm:$0xff] }
 0x32c   : > { %8036 = vmatpush1.bf16.msra.mxu0 %v8035_v3  ;;  %8774 = vmatprep.subr.bf16.mxu1 %v8773_v4  ;;  %v2058_v3 = vld [vmem:[%s9512_s22 + $0x3350] sm:$0xff]  ;;  %v11158_v4 = vld [vmem:[%s9522_s27 + $0x100] sm:$0xff] }
 0x32d   : > { %8038 = vmatprep.subr.bf16.mxu0 %v8037_v10  ;;  %v2054_v10 = vld [vmem:[%s9512_s22 + $0x3330] sm:$0xff]  ;;  %v8057_v26 = vpack.c.bf16 %v2058_v3, %v2055_v2  ;;  %v2081_v2 = vld [vmem:[%s9512_s22 + $0x3408] sm:$0xff] }
 0x32e   : > { %v1846_v3 = vld [vmem:[%s9512_s22 + $0x2cb0] sm:$0xff] }
 0x32f   : > { %8776 = vmatpush3.bf16.msra.mxu1 %v8775_v15  ;;  %v1825_v15 = vld [vmem:[%s9512_s22 + $0x2c08] sm:$0xff] }
 0x330   : > { %8040 = vmatpush1.bf16.msra.mxu0 %v8039_v27  ;;  %8778 = vmatprep.subr.bf16.mxu1 %v8777_v16  ;;  %v9295_v27 = vld [vmem:[%s9522_s27 + $0xd0] sm:$0xff]  ;;  %v2061_v16 = vld [vmem:[%s9512_s22 + $0x3368] sm:$0xff]  ;;  %v8797_v21 = vpack.c.bf16 %v1825_v15, %v1822_v14 }
 0x331   : > { %v6377_v34 = vpop.f32.mrb[14].mxu1  ;;  %8042 = vmatprep.subr.bf16.mxu0 %v8041_v20  ;;  %v8059_v20 = vpack.c.bf16 %v2057_v13, %v2054_v10  ;;  %v8061_v25 = vpack.c.bf16 %v2064_v17, %v2061_v16  ;;  %v8811_v10 = vpack.c.bf16 %v1795_v0, %v1792_v63  ;;  %v1798_v13 = vld [vmem:[%s9512_s22 + $0x2b30] sm:$0xff]  ;;  %v1801_v14 = vld [vmem:[%s9512_s22 + $0x2b48] sm:$0xff]  ;;  %v2087_v16 = vld [vmem:[%s9512_s22 + $0x3438] sm:$0xff] }
 0x332   : > { %v6378_v37 = vpop.f32.mrb[15].mxu1  ;;  %v1852_v17 = vld [vmem:[%s9512_s22 + $0x2ce0] sm:$0xff] }
 0x333   : > { %v6379_v41 = vadd.f32 %v6378_v37, %v6377_v34  ;;  %8780 = vmatpush3.bf16.msra.mxu1 %v8779_v28  ;;  %v2063_v28 = vld [vmem:[%s9512_s22 + $0x3378] sm:$0xff]  ;;  %v8799_v34 = vpack.c.bf16 %v1777_v24, %v1774_v23  ;;  %v8815_v24 = vpack.c.bf16 %v1801_v14, %v1798_v13  ;;  %v2112_v63 = vld [vmem:[%s9512_s22 + $0x3500] sm:$0xff]  ;;  %v2118_v14 = vld [vmem:[%s9512_s22 + $0x3530] sm:$0xff] }
 0x334   : > { %8044 = vmatpush1.bf16.msra.mxu0 %v8043_v29  ;;  %8782 = vmatprep.subr.bf16.mxu1 %v8781_v30  ;;  %v1828_v29 = vld [vmem:[%s9512_s22 + $0x2c20] sm:$0xff]  ;;  %v1831_v30 = vld [vmem:[%s9512_s22 + $0x2c38] sm:$0xff] }
 0x335   : > { %v11142_v49 = vadd.f32 %v6379_v41, %v11073_v8  ;;  %8046 = vmatprep.subr.bf16.mxu0 %v8045_v48  ;;  %v8051_v8 = vpack.c.bf16 %v2045_v51, %v2042_v45  ;;  %v8063_v48 = vpack.c.bf16 %v2063_v28, %v2060_v22  ;;  %v8801_v40 = vpack.c.bf16 %v1831_v30, %v1828_v29  ;;  %v1783_v37 = vld [vmem:[%s9512_s22 + $0x2ab8] sm:$0xff]  ;;  %v1834_v41 = vld [vmem:[%s9512_s22 + $0x2c50] sm:$0xff]  ;;  %v1804_v30 = vld [vmem:[%s9512_s22 + $0x2b60] sm:$0xff] }
 0x336   : > { %v8803_v45 = vpack.c.bf16 %v1783_v37, %v1780_v36  ;;  %v1786_v51 = vld [vmem:[%s9512_s22 + $0x2ad0] sm:$0xff]  ;;  %v2100_v36 = vld [vmem:[%s9512_s22 + $0x34a0] sm:$0xff]  ;;  %v2115_v13 = vld [vmem:[%s9512_s22 + $0x3518] sm:$0xff] }
 0x337   : > { %8784 = vmatpush3.bf16.msra.mxu1 %v8783_v42  ;;  %v1837_v42 = vld [vmem:[%s9512_s22 + $0x2c68] sm:$0xff]  ;;  %v8807_v58 = vpack.c.bf16 %v1789_v52, %v1786_v51  ;;  %v2094_v22 = vld [vmem:[%s9512_s22 + $0x3470] sm:$0xff] }
 0x338   : > { %8048 = vmatpush1.bf16.msra.mxu0 %v8047_v43  ;;  %8786 = vmatprep.subr.bf16.mxu1 %v8785_v44  ;;  %v2073_v43 = vld [vmem:[%s9512_s22 + $0x33c8] sm:$0xff]  ;;  %v2076_v44 = vld [vmem:[%s9512_s22 + $0x33e0] sm:$0xff]  ;;  %v8805_v47 = vpack.c.bf16 %v1837_v42, %v1834_v41  ;;  %v2090_v29 = vld [vmem:[%s9512_s22 + $0x3450] sm:$0xff] }
 0x339   : > { %8050 = vmatprep.subr.bf16.mxu0 %v8049_v50  ;;  %v2072_v50 = vld [vmem:[%s9512_s22 + $0x33c0] sm:$0xff]  ;;  %v8069_v53 = vpack.c.bf16 %v2076_v44, %v2073_v43  ;;  %v1858_v41 = vld [vmem:[%s9512_s22 + $0x2d10] sm:$0xff]  ;;  %v1861_v42 = vld [vmem:[%s9512_s22 + $0x2d28] sm:$0xff]  ;;  %v8085_v43 = vpack.c.bf16 %v2100_v36, %v2097_v35 }
 0x33a   : > { %v8071_v59 = vpack.c.bf16 %v2075_v54, %v2072_v50  ;;  %v2099_v44 = vld [vmem:[%s9512_s22 + $0x3498] sm:$0xff]  ;;  %v2106_v50 = vld [vmem:[%s9512_s22 + $0x34d0] sm:$0xff]  ;;  %v8823_v51 = vpack.c.bf16 %v1861_v42, %v1858_v41  ;;  %v1936_v36 = vld [vmem:[%s9512_s22 + $0x2f80] sm:$0xff] }
 0x33b   : > { %8788 = vmatpush3.bf16.msra.mxu1 %v8787_v56  ;;  %v1843_v56 = vld [vmem:[%s9512_s22 + $0x2c98] sm:$0xff]  ;;  %v8087_v52 = vpack.c.bf16 %v2099_v44, %v2096_v39  ;;  %v2102_v54 = vld [vmem:[%s9512_s22 + $0x34b0] sm:$0xff]  ;;  %v1888_v44 = vld [vmem:[%s9512_s22 + $0x2e00] sm:$0xff] }
 0x33c   : > { %8052 = vmatpush1.bf16.msra.mxu0 %v8051_v8  ;;  %8790 = vmatprep.subr.bf16.mxu1 %v8789_v5  ;;  %v2079_v8 = vld [vmem:[%s9512_s22 + $0x33f8] sm:$0xff]  ;;  %v2082_v5 = vld [vmem:[%s9512_s22 + $0x3410] sm:$0xff]  ;;  %v8809_v60 = vpack.c.bf16 %v1843_v56, %v1840_v55  ;;  %v1864_v55 = vld [vmem:[%s9512_s22 + $0x2d40] sm:$0xff] }
 0x33d   : > { %8054 = vmatprep.subr.bf16.mxu0 %v8053_v61  ;;  %v2078_v61 = vld [vmem:[%s9512_s22 + $0x33f0] sm:$0xff]  ;;  %v8073_v1 = vpack.c.bf16 %v2082_v5, %v2079_v8  ;;  %v1867_v56 = vld [vmem:[%s9512_s22 + $0x2d58] sm:$0xff]  ;;  %v2105_v5 = vld [vmem:[%s9512_s22 + $0x34c8] sm:$0xff] }
 0x33e   : > { %5017 = vmatmul.mubr.f32.vlgmr.msra.gmra.mrb[28].mxu1 %v9295_v27  ;;  %v8075_v11 = vpack.c.bf16 %v2081_v2, %v2078_v61  ;;  %v2109_v61 = vld [vmem:[%s9512_s22 + $0x34e8] sm:$0xff]  ;;  %v8827_v0 = vpack.c.bf16 %v1867_v56, %v1864_v55  ;;  %v8091_v2 = vpack.c.bf16 %v2105_v5, %v2102_v54  ;;  %v2123_v35 = vld [vmem:[%s9512_s22 + $0x3558] sm:$0xff]  ;;  %v1894_v5 = vld [vmem:[%s9512_s22 + $0x2e30] sm:$0xff] }
 0x33f   : > { %3681 = vmatmul.mubr.f32.vlgmr.msra.gmra.mrb[0].mxu0 %v11158_v4  ;;  %8792 = vmatpush3.bf16.msra.mxu1 %v8791_v6  ;;  %v1849_v6 = vld [vmem:[%s9512_s22 + $0x2cc8] sm:$0xff] }
 0x340   : > { %8056 = vmatpush1.bf16.msra.mxu0 %v8055_v7  ;;  %8794 = vmatprep.subr.bf16.mxu1 %v8793_v9  ;;  %v2085_v7 = vld [vmem:[%s9512_s22 + $0x3428] sm:$0xff]  ;;  %v2088_v9 = vld [vmem:[%s9512_s22 + $0x3440] sm:$0xff]  ;;  %v8813_v12 = vpack.c.bf16 %v1849_v6, %v1846_v3 }
 0x341   : > { %8058 = vmatprep.subr.bf16.mxu0 %v8057_v26  ;;  %5086 = vmatprep.mubr.f32.mxu1 %v9296_v31  ;;  %v2084_v26 = vld [vmem:[%s9512_s22 + $0x3420] sm:$0xff]  ;;  %v8077_v27 = vpack.c.bf16 %v2088_v9, %v2085_v7  ;;  %v1807_v31 = vld [vmem:[%s9512_s22 + $0x2b78] sm:$0xff]  ;;  %v1870_v7 = vld [vmem:[%s9512_s22 + $0x2d70] sm:$0xff] }
 0x342   : > { %3751 = vmatprep.mubr.f32.mxu0 %v11171_v19  ;;  %v8819_v37 = vpack.c.bf16 %v1807_v31, %v1804_v30  ;;  %v2108_v6 = vld [vmem:[%s9512_s22 + $0x34e0] sm:$0xff]  ;;  %v1873_v9 = vld [vmem:[%s9512_s22 + $0x2d88] sm:$0xff] }
 0x343   : > { %8796 = vmatpush3.bf16.msra.mxu1 %v8795_v18  ;;  %v1855_v18 = vld [vmem:[%s9512_s22 + $0x2cf8] sm:$0xff] }
 0x344   : > { %8060 = vmatpush1.bf16.msra.mxu0 %v8059_v20  ;;  %8798 = vmatprep.subr.bf16.mxu1 %v8797_v21  ;;  %v2091_v21 = vld [vmem:[%s9512_s22 + $0x3458] sm:$0xff]  ;;  %v8817_v28 = vpack.c.bf16 %v1855_v18, %v1852_v17  ;;  %v2114_v17 = vld [vmem:[%s9512_s22 + $0x3510] sm:$0xff]  ;;  %v1876_v18 = vld [vmem:[%s9512_s22 + $0x2da0] sm:$0xff] }
 0x345   : > { %8062 = vmatprep.subr.bf16.mxu0 %v8061_v25  ;;  %v8079_v25 = vpack.c.bf16 %v2087_v16, %v2084_v26  ;;  %v8081_v33 = vpack.c.bf16 %v2094_v22, %v2091_v21  ;;  %v1927_v26 = vld [vmem:[%s9512_s22 + $0x2f38] sm:$0xff]  ;;  %v8097_v21 = vpack.c.bf16 %v2118_v14, %v2115_v13  ;;  %v2117_v22 = vld [vmem:[%s9512_s22 + $0x3528] sm:$0xff] }
 0x346   : > { %v8099_v30 = vpack.c.bf16 %v2117_v22, %v2114_v17  ;;  %v2145_v17 = vld [vmem:[%s9512_s22 + $0x3608] sm:$0xff]  ;;  %v2144_v22 = vld [vmem:[%s9512_s22 + $0x3600] sm:$0xff] }
 0x347   : > { %8800 = vmatpush3.bf16.msra.mxu1 %v8799_v34  ;;  %v2093_v34 = vld [vmem:[%s9512_s22 + $0x3468] sm:$0xff] }
 0x348   : > { %8064 = vmatpush1.bf16.msra.mxu0 %v8063_v48  ;;  %8802 = vmatprep.subr.bf16.mxu1 %v8801_v40  ;;  %v1906_v48 = vld [vmem:[%s9512_s22 + $0x2e90] sm:$0xff]  ;;  %v1909_v40 = vld [vmem:[%s9512_s22 + $0x2ea8] sm:$0xff] }
 0x349   : > { %8066 = vmatprep.subr.bf16.mxu0 %v8065_v38  ;;  %v8083_v38 = vpack.c.bf16 %v2093_v34, %v2090_v29  ;;  %v1882_v34 = vld [vmem:[%s9512_s22 + $0x2dd0] sm:$0xff] }
 0x34b   : > { %8804 = vmatpush3.bf16.msra.mxu1 %v8803_v45  ;;  %v1912_v45 = vld [vmem:[%s9512_s22 + $0x2ec0] sm:$0xff] }
 0x34c   : > { %8068 = vmatpush1.bf16.msra.mxu0 %v8067_v46  ;;  %8806 = vmatprep.subr.bf16.mxu1 %v8805_v47  ;;  %v1915_v46 = vld [vmem:[%s9512_s22 + $0x2ed8] sm:$0xff] }
 0x34d   : > { %8070 = vmatprep.subr.bf16.mxu0 %v8069_v53  ;;  %v2103_v47 = vld [vmem:[%s9512_s22 + $0x34b8] sm:$0xff]  ;;  %v8825_v53 = vpack.c.bf16 %v1915_v46, %v1912_v45 }
 0x34e   : > { %v8089_v8 = vpack.c.bf16 %v2106_v50, %v2103_v47  ;;  %v1891_v45 = vld [vmem:[%s9512_s22 + $0x2e18] sm:$0xff]  ;;  %v2129_v47 = vld [vmem:[%s9512_s22 + $0x3588] sm:$0xff]  ;;  %v1942_v50 = vld [vmem:[%s9512_s22 + $0x2fb0] sm:$0xff] }
 0x34f   : > { %8808 = vmatpush3.bf16.msra.mxu1 %v8807_v58  ;;  %v1918_v58 = vld [vmem:[%s9512_s22 + $0x2ef0] sm:$0xff]  ;;  %v8843_v54 = vpack.c.bf16 %v1891_v45, %v1888_v44  ;;  %v2157_v44 = vld [vmem:[%s9512_s22 + $0x3668] sm:$0xff]  ;;  %v2160_v45 = vld [vmem:[%s9512_s22 + $0x3680] sm:$0xff] }
 0x350   : > { %8072 = vmatpush1.bf16.msra.mxu0 %v8071_v59  ;;  %8810 = vmatprep.subr.bf16.mxu1 %v8809_v60  ;;  %v1921_v59 = vld [vmem:[%s9512_s22 + $0x2f08] sm:$0xff] }
 0x351   : > { %v6412_v15 = vpop.f32.mrb[16].mxu1  ;;  %8074 = vmatprep.subr.bf16.mxu0 %v8073_v1  ;;  %v9297_v60 = vld [vmem:[%s9522_s27 + $0xe0] sm:$0xff]  ;;  %v9298_v1 = vld [vmem:[%s9522_s27 + $0xf8] sm:$0xff]  ;;  %v8829_v3 = vpack.c.bf16 %v1921_v59, %v1918_v58 }
 0x352   : > { %v6413_v20 = vpop.f32.mrb[17].mxu1  ;;  %v1897_v58 = vld [vmem:[%s9512_s22 + $0x2e48] sm:$0xff] }
 0x353   : > { %v6414_v23 = vadd.f32 %v6413_v20, %v6412_v15  ;;  %8812 = vmatpush3.bf16.msra.mxu1 %v8811_v10  ;;  %v8093_v10 = vpack.c.bf16 %v2112_v63, %v2109_v61  ;;  %v8831_v15 = vpack.c.bf16 %v1873_v9, %v1870_v7  ;;  %v1879_v20 = vld [vmem:[%s9512_s22 + $0x2db8] sm:$0xff]  ;;  %v1948_v63 = vld [vmem:[%s9512_s22 + $0x2fe0] sm:$0xff]  ;;  %v8847_v7 = vpack.c.bf16 %v1897_v58, %v1894_v5  ;;  %v9300_v58 = vld [vmem:[%s9522_s27 + $0x108] sm:$0xff] }
 0x354   : > { %8076 = vmatpush1.bf16.msra.mxu0 %v8075_v11  ;;  %8814 = vmatprep.subr.bf16.mxu1 %v8813_v12  ;;  %v2111_v11 = vld [vmem:[%s9512_s22 + $0x34f8] sm:$0xff]  ;;  %v1924_v12 = vld [vmem:[%s9512_s22 + $0x2f20] sm:$0xff]  ;;  %v8835_v29 = vpack.c.bf16 %v1879_v20, %v1876_v18 }
 0x355   : > { %v11219_v32 = vadd.f32 %v6414_v23, %v11142_v49  ;;  %8078 = vmatprep.subr.bf16.mxu0 %v8077_v27  ;;  %v8821_v49 = vpack.c.bf16 %v1909_v40, %v1906_v48  ;;  %v8095_v27 = vpack.c.bf16 %v2111_v11, %v2108_v6  ;;  %v8833_v16 = vpack.c.bf16 %v1927_v26, %v1924_v12  ;;  %v1930_v23 = vld [vmem:[%s9512_s22 + $0x2f50] sm:$0xff]  ;;  %v1885_v48 = vld [vmem:[%s9512_s22 + $0x2de8] sm:$0xff]  ;;  %v2135_v61 = vld [vmem:[%s9512_s22 + $0x35b8] sm:$0xff] }
 0x356   : > { %v8839_v39 = vpack.c.bf16 %v1885_v48, %v1882_v34  ;;  %v2138_v11 = vld [vmem:[%s9512_s22 + $0x35d0] sm:$0xff]  ;;  %v1900_v12 = vld [vmem:[%s9512_s22 + $0x2e60] sm:$0xff]  ;;  %v1903_v26 = vld [vmem:[%s9512_s22 + $0x2e78] sm:$0xff] }
 0x357   : > { %8816 = vmatpush3.bf16.msra.mxu1 %v8815_v24  ;;  %v1933_v24 = vld [vmem:[%s9512_s22 + $0x2f68] sm:$0xff]  ;;  %v2148_v18 = vld [vmem:[%s9512_s22 + $0x3620] sm:$0xff]  ;;  %v8851_v20 = vpack.c.bf16 %v1903_v26, %v1900_v12  ;;  %v11304_v34 = vld [vmem:[%s9522_s27 + $0x110] sm:$0xff] }
 0x358   : > { %8080 = vmatpush1.bf16.msra.mxu0 %v8079_v25  ;;  %8818 = vmatprep.subr.bf16.mxu1 %v8817_v28  ;;  %v2121_v25 = vld [vmem:[%s9512_s22 + $0x3548] sm:$0xff]  ;;  %v2124_v28 = vld [vmem:[%s9512_s22 + $0x3560] sm:$0xff]  ;;  %v8837_v31 = vpack.c.bf16 %v1933_v24, %v1930_v23  ;;  %v1954_v23 = vld [vmem:[%s9512_s22 + $0x3010] sm:$0xff] }
 0x359   : > { %8082 = vmatprep.subr.bf16.mxu0 %v8081_v33  ;;  %v2120_v33 = vld [vmem:[%s9512_s22 + $0x3540] sm:$0xff]  ;;  %v8101_v40 = vpack.c.bf16 %v2124_v28, %v2121_v25  ;;  %v1957_v24 = vld [vmem:[%s9512_s22 + $0x3028] sm:$0xff]  ;;  %v8117_v25 = vpack.c.bf16 %v2148_v18, %v2145_v17  ;;  %v2147_v28 = vld [vmem:[%s9512_s22 + $0x3618] sm:$0xff] }
 0x35a   : > { %v8103_v41 = vpack.c.bf16 %v2123_v35, %v2120_v33  ;;  %v2154_v33 = vld [vmem:[%s9512_s22 + $0x3650] sm:$0xff]  ;;  %v8855_v48 = vpack.c.bf16 %v1957_v24, %v1954_v23  ;;  %v2023_v5 = vld [vmem:[%s9512_s22 + $0x3238] sm:$0xff]  ;;  %v2172_v12 = vld [vmem:[%s9512_s22 + $0x36e0] sm:$0xff] }
 0x35b   : > { %8820 = vmatpush3.bf16.msra.mxu1 %v8819_v37  ;;  %v1939_v37 = vld [vmem:[%s9512_s22 + $0x2f98] sm:$0xff]  ;;  %v1981_v17 = vld [vmem:[%s9512_s22 + $0x30e8] sm:$0xff]  ;;  %v2178_v23 = vld [vmem:[%s9512_s22 + $0x3710] sm:$0xff] }
 0x35c   : > { %8084 = vmatpush1.bf16.msra.mxu0 %v8083_v38  ;;  %8822 = vmatprep.subr.bf16.mxu1 %v8821_v49  ;;  %v2127_v38 = vld [vmem:[%s9512_s22 + $0x3578] sm:$0xff]  ;;  %v2130_v49 = vld [vmem:[%s9512_s22 + $0x3590] sm:$0xff]  ;;  %v8841_v42 = vpack.c.bf16 %v1939_v37, %v1936_v36  ;;  %v1960_v37 = vld [vmem:[%s9512_s22 + $0x3040] sm:$0xff] }
 0x35d   : > { %8086 = vmatprep.subr.bf16.mxu0 %v8085_v43  ;;  %v2126_v43 = vld [vmem:[%s9512_s22 + $0x3570] sm:$0xff]  ;;  %v8105_v46 = vpack.c.bf16 %v2130_v49, %v2127_v38  ;;  %v1963_v38 = vld [vmem:[%s9512_s22 + $0x3058] sm:$0xff] }
 0x35e   : > { %5087 = vmatmul.mubr.f32.vlgmr.msra.gmra.mrb[30].mxu1 %v9297_v60  ;;  %v8107_v55 = vpack.c.bf16 %v2129_v47, %v2126_v43  ;;  %v2150_v36 = vld [vmem:[%s9512_s22 + $0x3630] sm:$0xff]  ;;  %v9299_v43 = vld [vmem:[%s9522_s27 + $0xf0] sm:$0xff] }
 0x35f   : > { %8824 = vmatpush3.bf16.msra.mxu1 %v8823_v51  ;;  %5156 = vmatprep.mubr.f32.mxu1 %v9298_v1  ;;  %v1945_v51 = vld [vmem:[%s9512_s22 + $0x2fc8] sm:$0xff]  ;;  %v11317_v47 = vld [vmem:[%s9522_s27 + $0x128] sm:$0xff] }
 0x360   : > { %8088 = vmatpush1.bf16.msra.mxu0 %v8087_v52  ;;  %8826 = vmatprep.subr.bf16.mxu1 %v8825_v53  ;;  %v2133_v52 = vld [vmem:[%s9512_s22 + $0x35a8] sm:$0xff]  ;;  %v2136_v53 = vld [vmem:[%s9512_s22 + $0x35c0] sm:$0xff]  ;;  %v8845_v56 = vpack.c.bf16 %v1945_v51, %v1942_v50 }
 0x361   : > { %8090 = vmatprep.subr.bf16.mxu0 %v8089_v8  ;;  %v2132_v8 = vld [vmem:[%s9512_s22 + $0x35a0] sm:$0xff]  ;;  %v8109_v60 = vpack.c.bf16 %v2136_v53, %v2133_v52  ;;  %v1966_v53 = vld [vmem:[%s9512_s22 + $0x3070] sm:$0xff] }
 0x362   : > { %v8111_v9 = vpack.c.bf16 %v2135_v61, %v2132_v8  ;;  %v2156_v52 = vld [vmem:[%s9512_s22 + $0x3660] sm:$0xff] }
 0x363   : > { %8828 = vmatpush3.bf16.msra.mxu1 %v8827_v0  ;;  %v1951_v0 = vld [vmem:[%s9512_s22 + $0x2ff8] sm:$0xff]  ;;  %v2020_v8 = vld [vmem:[%s9512_s22 + $0x3220] sm:$0xff] }
 0x364   : > { %8092 = vmatpush1.bf16.msra.mxu0 %v8091_v2  ;;  %8830 = vmatprep.subr.bf16.mxu1 %v8829_v3  ;;  %v2139_v2 = vld [vmem:[%s9512_s22 + $0x35d8] sm:$0xff]  ;;  %v2142_v3 = vld [vmem:[%s9512_s22 + $0x35f0] sm:$0xff] }
 0x365   : > { %8094 = vmatprep.subr.bf16.mxu0 %v8093_v10  ;;  %v8849_v10 = vpack.c.bf16 %v1951_v0, %v1948_v63  ;;  %v8113_v14 = vpack.c.bf16 %v2142_v3, %v2139_v2  ;;  %v8865_v0 = vpack.c.bf16 %v2023_v5, %v2020_v8  ;;  %v1972_v2 = vld [vmem:[%s9512_s22 + $0x30a0] sm:$0xff]  ;;  %v1975_v3 = vld [vmem:[%s9512_s22 + $0x30b8] sm:$0xff] }
 0x366   : > { %v8867_v26 = vpack.c.bf16 %v1975_v3, %v1972_v2  ;;  %v2101_v2 = vld [vmem:[%s9512_s22 + $0x34a8] sm:$0xff] }
 0x367   : > { %8832 = vmatpush3.bf16.msra.mxu1 %v8831_v15  ;;  %v2141_v15 = vld [vmem:[%s9512_s22 + $0x35e8] sm:$0xff] }
 0x368   : > { %8096 = vmatpush1.bf16.msra.mxu0 %v8095_v27  ;;  %8834 = vmatprep.subr.bf16.mxu1 %v8833_v16  ;;  %v2002_v27 = vld [vmem:[%s9512_s22 + $0x3190] sm:$0xff]  ;;  %v2005_v16 = vld [vmem:[%s9512_s22 + $0x31a8] sm:$0xff] }
 0x369   : > { %8098 = vmatprep.subr.bf16.mxu0 %v8097_v21  ;;  %v8853_v21 = vpack.c.bf16 %v2005_v16, %v2002_v27  ;;  %v2168_v27 = vld [vmem:[%s9512_s22 + $0x36c0] sm:$0xff]  ;;  %v1978_v16 = vld [vmem:[%s9512_s22 + $0x30d0] sm:$0xff]  ;;  %v2193_v3 = vld [vmem:[%s9512_s22 + $0x3788] sm:$0xff] }
 0x36a   : > { %v8871_v24 = vpack.c.bf16 %v1981_v17, %v1978_v16  ;;  %v2199_v16 = vld [vmem:[%s9512_s22 + $0x37b8] sm:$0xff]  ;;  %v2202_v17 = vld [vmem:[%s9512_s22 + $0x37d0] sm:$0xff] }
 0x36b   : > { %8836 = vmatpush3.bf16.msra.mxu1 %v8835_v29  ;;  %v2008_v29 = vld [vmem:[%s9512_s22 + $0x31c0] sm:$0xff] }
 0x36c   : > { %8100 = vmatpush1.bf16.msra.mxu0 %v8099_v30  ;;  %8838 = vmatprep.subr.bf16.mxu1 %v8837_v31  ;;  %v2011_v30 = vld [vmem:[%s9512_s22 + $0x31d8] sm:$0xff] }
 0x36d   : > { %8102 = vmatprep.subr.bf16.mxu0 %v8101_v40  ;;  %v2151_v31 = vld [vmem:[%s9512_s22 + $0x3638] sm:$0xff]  ;;  %v8119_v40 = vpack.c.bf16 %v2147_v28, %v2144_v22  ;;  %v8857_v35 = vpack.c.bf16 %v2011_v30, %v2008_v29  ;;  %v2174_v29 = vld [vmem:[%s9512_s22 + $0x36f0] sm:$0xff]  ;;  %v1984_v30 = vld [vmem:[%s9512_s22 + $0x3100] sm:$0xff] }
 0x36e   : > { %v8121_v49 = vpack.c.bf16 %v2154_v33, %v2151_v31  ;;  %v2175_v22 = vld [vmem:[%s9512_s22 + $0x36f8] sm:$0xff] }
 0x36f   : > { %8840 = vmatpush3.bf16.msra.mxu1 %v8839_v39  ;;  %v2153_v39 = vld [vmem:[%s9512_s22 + $0x3648] sm:$0xff]  ;;  %v1987_v31 = vld [vmem:[%s9512_s22 + $0x3118] sm:$0xff]  ;;  %v8137_v33 = vpack.c.bf16 %v2178_v23, %v2175_v22  ;;  %v2056_v22 = vld [vmem:[%s9512_s22 + $0x3340] sm:$0xff] }
 0x370   : > { %8104 = vmatpush1.bf16.msra.mxu0 %v8103_v41  ;;  %8842 = vmatprep.subr.bf16.mxu1 %v8841_v42  ;;  %v2014_v41 = vld [vmem:[%s9512_s22 + $0x31f0] sm:$0xff]  ;;  %v2017_v42 = vld [vmem:[%s9512_s22 + $0x3208] sm:$0xff]  ;;  %v8123_v50 = vpack.c.bf16 %v2153_v39, %v2150_v36  ;;  %v2059_v23 = vld [vmem:[%s9512_s22 + $0x3358] sm:$0xff] }
 0x371   : > { %v6447_v59 = vpop.f32.mrb[18].mxu1  ;;  %8106 = vmatprep.subr.bf16.mxu0 %v8105_v46  ;;  %v8859_v46 = vpack.c.bf16 %v1963_v38, %v1960_v37  ;;  %v8861_v51 = vpack.c.bf16 %v2017_v42, %v2014_v41  ;;  %v2181_v36 = vld [vmem:[%s9512_s22 + $0x3728] sm:$0xff]  ;;  %v2184_v37 = vld [vmem:[%s9512_s22 + $0x3740] sm:$0xff]  ;;  %v8875_v38 = vpack.c.bf16 %v1987_v31, %v1984_v30  ;;  %v1990_v42 = vld [vmem:[%s9512_s22 + $0x3130] sm:$0xff] }
 0x372   : > { %v6448_v1 = vpop.f32.mrb[19].mxu1  ;;  %v2180_v41 = vld [vmem:[%s9512_s22 + $0x3720] sm:$0xff]  ;;  %v2205_v30 = vld [vmem:[%s9512_s22 + $0x37e8] sm:$0xff] }
 0x373   : > { %v6449_v6 = vadd.f32 %v6448_v1, %v6447_v59  ;;  %8844 = vmatpush3.bf16.msra.mxu1 %v8843_v54  ;;  %v1969_v54 = vld [vmem:[%s9512_s22 + $0x3088] sm:$0xff]  ;;  %v2163_v59 = vld [vmem:[%s9512_s22 + $0x3698] sm:$0xff]  ;;  %v2162_v1 = vld [vmem:[%s9512_s22 + $0x3690] sm:$0xff] }
 0x374   : > { %8108 = vmatpush1.bf16.msra.mxu0 %v8107_v55  ;;  %8846 = vmatprep.subr.bf16.mxu1 %v8845_v56  ;;  %v8125_v55 = vpack.c.bf16 %v2160_v45, %v2157_v44  ;;  %v2159_v56 = vld [vmem:[%s9512_s22 + $0x3678] sm:$0xff]  ;;  %v8863_v61 = vpack.c.bf16 %v1969_v54, %v1966_v53  ;;  %v8141_v45 = vpack.c.bf16 %v2184_v37, %v2181_v36  ;;  %v2190_v54 = vld [vmem:[%s9512_s22 + $0x3770] sm:$0xff]  ;;  %v2208_v31 = vld [vmem:[%s9512_s22 + $0x3800] sm:$0xff] }
 0x375   : > { %v11288_v13 = vadd.f32 %v6449_v6, %v11219_v32  ;;  %8110 = vmatprep.subr.bf16.mxu0 %v8109_v60  ;;  %v8115_v32 = vpack.c.bf16 %v2141_v15, %v2138_v11  ;;  %v2166_v60 = vld [vmem:[%s9512_s22 + $0x36b0] sm:$0xff]  ;;  %v8127_v63 = vpack.c.bf16 %v2159_v56, %v2156_v52  ;;  %v2169_v11 = vld [vmem:[%s9512_s22 + $0x36c8] sm:$0xff]  ;;  %v2187_v53 = vld [vmem:[%s9512_s22 + $0x3758] sm:$0xff] }
 0x376   : > { %v8129_v6 = vpack.c.bf16 %v2166_v60, %v2163_v59  ;;  %v8133_v18 = vpack.c.bf16 %v2172_v12, %v2169_v11  ;;  %v1996_v59 = vld [vmem:[%s9512_s22 + $0x3160] sm:$0xff]  ;;  %v1999_v60 = vld [vmem:[%s9512_s22 + $0x3178] sm:$0xff]  ;;  %v2050_v11 = vld [vmem:[%s9512_s22 + $0x3310] sm:$0xff] }
 0x377   : > { %8848 = vmatpush3.bf16.msra.mxu1 %v8847_v7  ;;  %v2165_v7 = vld [vmem:[%s9512_s22 + $0x36a8] sm:$0xff]  ;;  %v2062_v36 = vld [vmem:[%s9512_s22 + $0x3370] sm:$0xff] }
 0x378   : > { %8112 = vmatpush1.bf16.msra.mxu0 %v8111_v9  ;;  %8850 = vmatprep.subr.bf16.mxu1 %v8849_v10  ;;  %v2026_v9 = vld [vmem:[%s9512_s22 + $0x3250] sm:$0xff]  ;;  %v2029_v10 = vld [vmem:[%s9512_s22 + $0x3268] sm:$0xff] }
 0x379   : > { %8114 = vmatprep.subr.bf16.mxu0 %v8113_v14  ;;  %v8131_v14 = vpack.c.bf16 %v2165_v7, %v2162_v1  ;;  %v8869_v15 = vpack.c.bf16 %v2029_v10, %v2026_v9  ;;  %v2098_v1 = vld [vmem:[%s9512_s22 + $0x3490] sm:$0xff]  ;;  %v8883_v7 = vpack.c.bf16 %v1999_v60, %v1996_v59  ;;  %v2192_v10 = vld [vmem:[%s9512_s22 + $0x3780] sm:$0xff]  ;;  %v2053_v12 = vld [vmem:[%s9512_s22 + $0x3328] sm:$0xff] }
 0x37a   : > { %v2065_v37 = vld [vmem:[%s9512_s22 + $0x3388] sm:$0xff]  ;;  %v2216_v59 = vld [vmem:[%s9512_s22 + $0x3840] sm:$0xff]  ;;  %v2074_v60 = vld [vmem:[%s9512_s22 + $0x33d0] sm:$0xff] }
 0x37b   : > { %8852 = vmatpush3.bf16.msra.mxu1 %v8851_v20  ;;  %v2171_v20 = vld [vmem:[%s9512_s22 + $0x36d8] sm:$0xff] }
 0x37c   : > { %8116 = vmatpush1.bf16.msra.mxu0 %v8115_v32  ;;  %8854 = vmatprep.subr.bf16.mxu1 %v8853_v21  ;;  %v2032_v32 = vld [vmem:[%s9512_s22 + $0x3280] sm:$0xff]  ;;  %v2035_v21 = vld [vmem:[%s9512_s22 + $0x3298] sm:$0xff] }
 0x37d   : > { %8118 = vmatprep.subr.bf16.mxu0 %v8117_v25  ;;  %v8135_v25 = vpack.c.bf16 %v2171_v20, %v2168_v27  ;;  %v8873_v28 = vpack.c.bf16 %v2035_v21, %v2032_v32  ;;  %v2107_v27 = vld [vmem:[%s9512_s22 + $0x34d8] sm:$0xff]  ;;  %v2198_v21 = vld [vmem:[%s9512_s22 + $0x37b0] sm:$0xff] }
 0x37e   : > { %5157 = vmatmul.mubr.f32.vlgmr.msra.gmra.mrb[32].mxu1 %v9299_v43  ;;  %v1993_v43 = vld [vmem:[%s9512_s22 + $0x3148] sm:$0xff] }
 0x37f   : > { %3752 = vmatmul.mubr.f32.vlgmr.msra.gmra.mrb[0].mxu0 %v11304_v34  ;;  %8856 = vmatpush3.bf16.msra.mxu1 %v8855_v48  ;;  %v2177_v48 = vld [vmem:[%s9512_s22 + $0x3708] sm:$0xff]  ;;  %v8879_v56 = vpack.c.bf16 %v1993_v43, %v1990_v42  ;;  %v8895_v42 = vpack.c.bf16 %v2065_v37, %v2062_v36 }
 0x380   : > { %8120 = vmatpush1.bf16.msra.mxu0 %v8119_v40  ;;  %8858 = vmatprep.subr.bf16.mxu1 %v8857_v35  ;;  %v2038_v40 = vld [vmem:[%s9512_s22 + $0x32b0] sm:$0xff]  ;;  %v2041_v35 = vld [vmem:[%s9512_s22 + $0x32c8] sm:$0xff] }
 0x381   : > { %8122 = vmatprep.subr.bf16.mxu0 %v8121_v49  ;;  %5226 = vmatprep.mubr.f32.mxu1 %v9300_v58  ;;  %v8139_v49 = vpack.c.bf16 %v2177_v48, %v2174_v29  ;;  %v8877_v39 = vpack.c.bf16 %v2041_v35, %v2038_v40  ;;  %v2186_v58 = vld [vmem:[%s9512_s22 + $0x3750] sm:$0xff]  ;;  %v2113_v29 = vld [vmem:[%s9512_s22 + $0x3508] sm:$0xff]  ;;  %v2204_v35 = vld [vmem:[%s9512_s22 + $0x37e0] sm:$0xff] }
 0x382   : > { %3822 = vmatprep.mubr.f32.mxu0 %v11317_v47 }
 0x383   : > { %8860 = vmatpush3.bf16.msra.mxu1 %v8859_v46  ;;  %v2183_v46 = vld [vmem:[%s9512_s22 + $0x3738] sm:$0xff] }
 0x384   : > { %8124 = vmatpush1.bf16.msra.mxu0 %v8123_v50  ;;  %8862 = vmatprep.subr.bf16.mxu1 %v8861_v51  ;;  %v2044_v50 = vld [vmem:[%s9512_s22 + $0x32e0] sm:$0xff]  ;;  %v2047_v51 = vld [vmem:[%s9512_s22 + $0x32f8] sm:$0xff]  ;;  %v8143_v8 = vpack.c.bf16 %v2183_v46, %v2180_v41 }
 0x385   : > { %8126 = vmatprep.subr.bf16.mxu0 %v8125_v55  ;;  %v8881_v5 = vpack.c.bf16 %v2047_v51, %v2044_v50  ;;  %v2211_v41 = vld [vmem:[%s9512_s22 + $0x3818] sm:$0xff]  ;;  %v2068_v46 = vld [vmem:[%s9512_s22 + $0x33a0] sm:$0xff] }
 0x386   : > { %v2071_v50 = vld [vmem:[%s9512_s22 + $0x33b8] sm:$0xff] }
 0x387   : > { %8864 = vmatpush3.bf16.msra.mxu1 %v8863_v61 }
 0x388   : > { %8128 = vmatpush1.bf16.msra.mxu0 %v8127_v63  ;;  %8866 = vmatprep.subr.bf16.mxu1 %v8865_v0  ;;  %v8145_v63 = vpack.c.bf16 %v2190_v54, %v2187_v53  ;;  %v2189_v0 = vld [vmem:[%s9512_s22 + $0x3768] sm:$0xff]  ;;  %v2122_v53 = vld [vmem:[%s9512_s22 + $0x3550] sm:$0xff] }
 0x389   : > { %8130 = vmatprep.subr.bf16.mxu0 %v8129_v6  ;;  %v2196_v6 = vld [vmem:[%s9512_s22 + $0x37a0] sm:$0xff]  ;;  %v8147_v9 = vpack.c.bf16 %v2189_v0, %v2186_v58  ;;  %v2125_v54 = vld [vmem:[%s9512_s22 + $0x3568] sm:$0xff] }
 0x38a   : > { %v8901_v58 = vpack.c.bf16 %v2125_v54, %v2122_v53  ;;  %v2146_v53 = vld [vmem:[%s9512_s22 + $0x3610] sm:$0xff]  ;;  %v2149_v54 = vld [vmem:[%s9512_s22 + $0x3628] sm:$0xff] }
 0x38b   : > { %8868 = vmatpush3.bf16.msra.mxu1 %v8867_v26  ;;  %v8149_v26 = vpack.c.bf16 %v2196_v6, %v2193_v3  ;;  %v2131_v3 = vld [vmem:[%s9512_s22 + $0x3598] sm:$0xff] }
 0x38c   : > { %8132 = vmatpush1.bf16.msra.mxu0 %v8131_v14  ;;  %8870 = vmatprep.subr.bf16.mxu1 %v8869_v15  ;;  %v2195_v14 = vld [vmem:[%s9512_s22 + $0x3798] sm:$0xff]  ;;  %v2104_v15 = vld [vmem:[%s9512_s22 + $0x34c0] sm:$0xff] }
 0x38d   : > { %8134 = vmatprep.subr.bf16.mxu0 %v8133_v18  ;;  %v8887_v18 = vpack.c.bf16 %v2053_v12, %v2050_v11  ;;  %v8151_v20 = vpack.c.bf16 %v2195_v14, %v2192_v10  ;;  %v8889_v32 = vpack.c.bf16 %v2107_v27, %v2104_v15  ;;  %v2223_v6 = vld [vmem:[%s9512_s22 + $0x3878] sm:$0xff]  ;;  %v2222_v11 = vld [vmem:[%s9512_s22 + $0x3870] sm:$0xff]  ;;  %v2080_v12 = vld [vmem:[%s9512_s22 + $0x3400] sm:$0xff] }
 0x38e   : > { %v2225_v15 = vld [vmem:[%s9512_s22 + $0x3888] sm:$0xff]  ;;  %v2134_v27 = vld [vmem:[%s9512_s22 + $0x35b0] sm:$0xff] }
 0x38f   : > { %8872 = vmatpush3.bf16.msra.mxu1 %v8871_v24  ;;  %v8153_v24 = vpack.c.bf16 %v2202_v17, %v2199_v16  ;;  %v2137_v16 = vld [vmem:[%s9512_s22 + $0x35c8] sm:$0xff] }
 0x390   : > { %8136 = vmatpush1.bf16.msra.mxu0 %v8135_v25  ;;  %8874 = vmatprep.subr.bf16.mxu1 %v8873_v28  ;;  %v2201_v25 = vld [vmem:[%s9512_s22 + $0x37c8] sm:$0xff]  ;;  %v2110_v28 = vld [vmem:[%s9512_s22 + $0x34f0] sm:$0xff] }
 0x391   : > { %v6482_v44 = vpop.f32.mrb[20].mxu1  ;;  %8138 = vmatprep.subr.bf16.mxu0 %v8137_v33  ;;  %v8891_v33 = vpack.c.bf16 %v2059_v23, %v2056_v22  ;;  %v8155_v48 = vpack.c.bf16 %v2201_v25, %v2198_v21  ;;  %v8893_v40 = vpack.c.bf16 %v2113_v29, %v2110_v28  ;;  %v2229_v17 = vld [vmem:[%s9512_s22 + $0x38a8] sm:$0xff]  ;;  %v8909_v21 = vpack.c.bf16 %v2137_v16, %v2134_v27  ;;  %v2228_v22 = vld [vmem:[%s9512_s22 + $0x38a0] sm:$0xff]  ;;  %v2086_v23 = vld [vmem:[%s9512_s22 + $0x3430] sm:$0xff] }
 0x392   : > { %v6483_v52 = vpop.f32.mrb[21].mxu1  ;;  %v2231_v29 = vld [vmem:[%s9512_s22 + $0x38b8] sm:$0xff]  ;;  %v2252_v16 = vld [vmem:[%s9512_s22 + $0x3960] sm:$0xff] }
 0x393   : > { %v6484_v55 = vadd.f32 %v6483_v52, %v6482_v44  ;;  %8876 = vmatpush3.bf16.msra.mxu1 %v8875_v38  ;;  %v2207_v38 = vld [vmem:[%s9512_s22 + $0x37f8] sm:$0xff]  ;;  %v2213_v52 = vld [vmem:[%s9512_s22 + $0x3828] sm:$0xff]  ;;  %v8175_v37 = vpack.c.bf16 %v2231_v29, %v2228_v22  ;;  %v2258_v29 = vld [vmem:[%s9512_s22 + $0x3990] sm:$0xff] }
 0x394   : > { %8140 = vmatpush1.bf16.msra.mxu0 %v8139_v49  ;;  %8878 = vmatprep.subr.bf16.mxu1 %v8877_v39  ;;  %v2116_v49 = vld [vmem:[%s9512_s22 + $0x3520] sm:$0xff]  ;;  %v2119_v39 = vld [vmem:[%s9512_s22 + $0x3538] sm:$0xff]  ;;  %v8159_v43 = vpack.c.bf16 %v2207_v38, %v2204_v35  ;;  %v2234_v38 = vld [vmem:[%s9512_s22 + $0x38d0] sm:$0xff] }
 0x395   : > { %v11365_v61 = vadd.f32 %v6484_v55, %v11288_v13  ;;  %8142 = vmatprep.subr.bf16.mxu0 %v8141_v45  ;;  %v8885_v13 = vpack.c.bf16 %v2101_v2, %v2098_v1  ;;  %v8897_v44 = vpack.c.bf16 %v2119_v39, %v2116_v49  ;;  %v2210_v45 = vld [vmem:[%s9512_s22 + $0x3810] sm:$0xff]  ;;  %v2217_v55 = vld [vmem:[%s9512_s22 + $0x3848] sm:$0xff]  ;;  %v2219_v1 = vld [vmem:[%s9512_s22 + $0x3858] sm:$0xff] }
 0x396   : > { %v2128_v2 = vld [vmem:[%s9512_s22 + $0x3580] sm:$0xff]  ;;  %v2095_v39 = vld [vmem:[%s9512_s22 + $0x3478] sm:$0xff] }
 0x397   : > { %8880 = vmatpush3.bf16.msra.mxu1 %v8879_v56  ;;  %v2220_v56 = vld [vmem:[%s9512_s22 + $0x3860] sm:$0xff]  ;;  %v8905_v10 = vpack.c.bf16 %v2131_v3, %v2128_v2  ;;  %v2246_v2 = vld [vmem:[%s9512_s22 + $0x3930] sm:$0xff]  ;;  %v2259_v22 = vld [vmem:[%s9512_s22 + $0x3998] sm:$0xff] }
 0x398   : > { %8144 = vmatpush1.bf16.msra.mxu0 %v8143_v8  ;;  %8882 = vmatprep.subr.bf16.mxu1 %v8881_v5  ;;  %v8899_v8 = vpack.c.bf16 %v2071_v50, %v2068_v46  ;;  %v8163_v5 = vpack.c.bf16 %v2213_v52, %v2210_v45  ;;  %v8165_v0 = vpack.c.bf16 %v2220_v56, %v2217_v55  ;;  %v2092_v49 = vld [vmem:[%s9512_s22 + $0x3460] sm:$0xff]  ;;  %v2241_v45 = vld [vmem:[%s9512_s22 + $0x3908] sm:$0xff]  ;;  %v2243_v56 = vld [vmem:[%s9512_s22 + $0x3918] sm:$0xff] }
 0x399   : > { %8146 = vmatprep.subr.bf16.mxu0 %v8145_v63  ;;  %v2077_v63 = vld [vmem:[%s9512_s22 + $0x33e8] sm:$0xff]  ;;  %v2244_v46 = vld [vmem:[%s9512_s22 + $0x3920] sm:$0xff]  ;;  %v8915_v50 = vpack.c.bf16 %v2095_v39, %v2092_v49  ;;  %v2170_v39 = vld [vmem:[%s9512_s22 + $0x36d0] sm:$0xff] }
 0x39a   : > { %v2240_v52 = vld [vmem:[%s9512_s22 + $0x3900] sm:$0xff]  ;;  %v8181_v55 = vpack.c.bf16 %v2244_v46, %v2241_v45  ;;  %v2227_v45 = vld [vmem:[%s9512_s22 + $0x3898] sm:$0xff] }
 0x39b   : > { %8884 = vmatpush3.bf16.msra.mxu1 %v8883_v7  ;;  %v2226_v7 = vld [vmem:[%s9512_s22 + $0x3890] sm:$0xff]  ;;  %v2152_v3 = vld [vmem:[%s9512_s22 + $0x3640] sm:$0xff]  ;;  %v2271_v46 = vld [vmem:[%s9512_s22 + $0x39f8] sm:$0xff] }
 0x39c   : > { %8148 = vmatpush1.bf16.msra.mxu0 %v8147_v9  ;;  %8886 = vmatprep.subr.bf16.mxu1 %v8885_v13  ;;  %v8903_v9 = vpack.c.bf16 %v2077_v63, %v2074_v60  ;;  %v8167_v13 = vpack.c.bf16 %v2219_v1, %v2216_v59  ;;  %v8169_v14 = vpack.c.bf16 %v2226_v7, %v2223_v6  ;;  %v2250_v59 = vld [vmem:[%s9512_s22 + $0x3950] sm:$0xff]  ;;  %v11450_v60 = vld [vmem:[%s9522_s27 + $0x120] sm:$0xff]  ;;  %v2155_v6 = vld [vmem:[%s9512_s22 + $0x3658] sm:$0xff] }
 0x39d   : > { %8150 = vmatprep.subr.bf16.mxu0 %v8149_v26  ;;  %v2083_v26 = vld [vmem:[%s9512_s22 + $0x3418] sm:$0xff]  ;;  %v8919_v63 = vpack.c.bf16 %v2149_v54, %v2146_v53  ;;  %v2264_v49 = vld [vmem:[%s9512_s22 + $0x39c0] sm:$0xff]  ;;  %v2270_v53 = vld [vmem:[%s9512_s22 + $0x39f0] sm:$0xff] }
 0x39e   : > { %5227 = vmatmul.mubr.f32.vlgmr.msra.gmra.mrb[34].mxu1 %v11158_v4  ;;  %v8157_v4 = vpack.c.bf16 %v2208_v31, %v2205_v30  ;;  %v2140_v30 = vld [vmem:[%s9512_s22 + $0x35e0] sm:$0xff]  ;;  %v2143_v31 = vld [vmem:[%s9512_s22 + $0x35f8] sm:$0xff] }
 0x39f   : > { %8888 = vmatpush3.bf16.msra.mxu1 %v8887_v18  ;;  %5296 = vmatprep.mubr.f32.mxu1 %v11171_v19  ;;  %v2214_v19 = vld [vmem:[%s9512_s22 + $0x3830] sm:$0xff]  ;;  %v2232_v18 = vld [vmem:[%s9512_s22 + $0x38c0] sm:$0xff] }
 0x3a0   : > { %8152 = vmatpush1.bf16.msra.mxu0 %v8151_v20  ;;  %8890 = vmatprep.subr.bf16.mxu1 %v8889_v32  ;;  %v8161_v51 = vpack.c.bf16 %v2214_v19, %v2211_v41  ;;  %v8907_v20 = vpack.c.bf16 %v2083_v26, %v2080_v12  ;;  %v8171_v32 = vpack.c.bf16 %v2225_v15, %v2222_v11  ;;  %v2253_v11 = vld [vmem:[%s9512_s22 + $0x3968] sm:$0xff]  ;;  %v2256_v12 = vld [vmem:[%s9512_s22 + $0x3980] sm:$0xff] }
 0x3a1   : > { %8154 = vmatprep.subr.bf16.mxu0 %v8153_v24  ;;  %v2089_v24 = vld [vmem:[%s9512_s22 + $0x3448] sm:$0xff]  ;;  %v8173_v28 = vpack.c.bf16 %v2232_v18, %v2229_v17  ;;  %v8923_v26 = vpack.c.bf16 %v2155_v6, %v2152_v3  ;;  %v2158_v17 = vld [vmem:[%s9512_s22 + $0x3670] sm:$0xff]  ;;  %v8189_v18 = vpack.c.bf16 %v2256_v12, %v2253_v11  ;;  %v2176_v54 = vld [vmem:[%s9512_s22 + $0x3700] sm:$0xff] }
 0x3a2   : > { %v8911_v36 = vpack.c.bf16 %v2089_v24, %v2086_v23  ;;  %v2262_v23 = vld [vmem:[%s9512_s22 + $0x39b0] sm:$0xff]  ;;  %v2276_v3 = vld [vmem:[%s9512_s22 + $0x3a20] sm:$0xff]  ;;  %v2239_v12 = vld [vmem:[%s9512_s22 + $0x38f8] sm:$0xff] }
 0x3a3   : > { %8892 = vmatpush3.bf16.msra.mxu1 %v8891_v33  ;;  %v2182_v6 = vld [vmem:[%s9512_s22 + $0x3730] sm:$0xff]  ;;  %v2236_v11 = vld [vmem:[%s9512_s22 + $0x38e0] sm:$0xff] }
 0x3a4   : > { %8156 = vmatpush1.bf16.msra.mxu0 %v8155_v48  ;;  %8894 = vmatprep.subr.bf16.mxu1 %v8893_v40  ;;  %v2235_v48 = vld [vmem:[%s9512_s22 + $0x38d8] sm:$0xff]  ;;  %v2238_v40 = vld [vmem:[%s9512_s22 + $0x38f0] sm:$0xff] }
 0x3a5   : > { %8158 = vmatprep.subr.bf16.mxu0 %v8157_v4  ;;  %v8913_v4 = vpack.c.bf16 %v2143_v31, %v2140_v30  ;;  %v8177_v19 = vpack.c.bf16 %v2238_v40, %v2235_v48  ;;  %v2164_v30 = vld [vmem:[%s9512_s22 + $0x36a0] sm:$0xff]  ;;  %v2167_v31 = vld [vmem:[%s9512_s22 + $0x36b8] sm:$0xff]  ;;  %v2218_v48 = vld [vmem:[%s9512_s22 + $0x3850] sm:$0xff] }
 0x3a6   : > { %v2221_v40 = vld [vmem:[%s9512_s22 + $0x3868] sm:$0xff] }
 0x3a7   : > { %8896 = vmatpush3.bf16.msra.mxu1 %v8895_v42  ;;  %v2237_v42 = vld [vmem:[%s9512_s22 + $0x38e8] sm:$0xff] }
 0x3a8   : > { %8160 = vmatpush1.bf16.msra.mxu0 %v8159_v43  ;;  %8898 = vmatprep.subr.bf16.mxu1 %v8897_v44  ;;  %v2194_v43 = vld [vmem:[%s9512_s22 + $0x3790] sm:$0xff]  ;;  %v2197_v44 = vld [vmem:[%s9512_s22 + $0x37a8] sm:$0xff] }
 0x3a9   : > { %8162 = vmatprep.subr.bf16.mxu0 %v8161_v51  ;;  %v8917_v51 = vpack.c.bf16 %v2197_v44, %v2194_v43  ;;  %v2267_v43 = vld [vmem:[%s9512_s22 + $0x39d8] sm:$0xff]  ;;  %v2224_v44 = vld [vmem:[%s9512_s22 + $0x3880] sm:$0xff] }
 0x3ab   : > { %8900 = vmatpush3.bf16.msra.mxu1 %v8899_v8  ;;  %v2200_v8 = vld [vmem:[%s9512_s22 + $0x37c0] sm:$0xff] }
 0x3ac   : > { %8164 = vmatpush1.bf16.msra.mxu0 %v8163_v5  ;;  %8902 = vmatprep.subr.bf16.mxu1 %v8901_v58  ;;  %v2203_v5 = vld [vmem:[%s9512_s22 + $0x37d8] sm:$0xff] }
 0x3ad   : > { %8166 = vmatprep.subr.bf16.mxu0 %v8165_v0  ;;  %v2247_v58 = vld [vmem:[%s9512_s22 + $0x3938] sm:$0xff]  ;;  %v8183_v0 = vpack.c.bf16 %v2243_v56, %v2240_v52  ;;  %v8921_v1 = vpack.c.bf16 %v2203_v5, %v2200_v8  ;;  %v8937_v52 = vpack.c.bf16 %v2227_v45, %v2224_v44  ;;  %v2273_v8 = vld [vmem:[%s9512_s22 + $0x3a08] sm:$0xff]  ;;  %v2230_v5 = vld [vmem:[%s9512_s22 + $0x38b0] sm:$0xff] }
 0x3ae   : > { %v8185_v7 = vpack.c.bf16 %v2250_v59, %v2247_v58  ;;  %v2233_v58 = vld [vmem:[%s9512_s22 + $0x38c8] sm:$0xff]  ;;  %v2248_v44 = vld [vmem:[%s9512_s22 + $0x3940] sm:$0xff]  ;;  %v2251_v45 = vld [vmem:[%s9512_s22 + $0x3958] sm:$0xff] }
 0x3af   : > { %8904 = vmatpush3.bf16.msra.mxu1 %v8903_v9  ;;  %v2249_v9 = vld [vmem:[%s9512_s22 + $0x3948] sm:$0xff] }
 0x3b0   : > { %8168 = vmatpush1.bf16.msra.mxu0 %v8167_v13  ;;  %8906 = vmatprep.subr.bf16.mxu1 %v8905_v10  ;;  %v2206_v13 = vld [vmem:[%s9512_s22 + $0x37f0] sm:$0xff]  ;;  %v2209_v10 = vld [vmem:[%s9512_s22 + $0x3808] sm:$0xff]  ;;  %v8187_v15 = vpack.c.bf16 %v2249_v9, %v2246_v2  ;;  %v8941_v2 = vpack.c.bf16 %v2233_v58, %v2230_v5 }
 0x3b1   : > { %v6517_v25 = vpop.f32.mrb[22].mxu1  ;;  %8170 = vmatprep.subr.bf16.mxu0 %v8169_v14  ;;  %v11463_v14 = vld [vmem:[%s9522_s27 + $0x138] sm:$0xff]  ;;  %v8925_v27 = vpack.c.bf16 %v2209_v10, %v2206_v13  ;;  %v2277_v59 = vld [vmem:[%s9512_s22 + $0x3a28] sm:$0xff]  ;;  %v2279_v10 = vld [vmem:[%s9512_s22 + $0x3a38] sm:$0xff] }
 0x3b2   : > { %v6518_v33 = vpop.f32.mrb[23].mxu1  ;;  %v2254_v5 = vld [vmem:[%s9512_s22 + $0x3970] sm:$0xff]  ;;  %v2257_v58 = vld [vmem:[%s9512_s22 + $0x3988] sm:$0xff] }
 0x3b3   : > { %v6519_v35 = vadd.f32 %v6518_v33, %v6517_v25  ;;  %8908 = vmatpush3.bf16.msra.mxu1 %v8907_v20  ;;  %v2255_v20 = vld [vmem:[%s9512_s22 + $0x3978] sm:$0xff]  ;;  %v2261_v33 = vld [vmem:[%s9512_s22 + $0x39a8] sm:$0xff] }
 0x3b4   : > { %8172 = vmatpush1.bf16.msra.mxu0 %v8171_v32  ;;  %8910 = vmatprep.subr.bf16.mxu1 %v8909_v21  ;;  %v2212_v32 = vld [vmem:[%s9512_s22 + $0x3820] sm:$0xff]  ;;  %v2215_v21 = vld [vmem:[%s9512_s22 + $0x3838] sm:$0xff]  ;;  %v8191_v25 = vpack.c.bf16 %v2255_v20, %v2252_v16  ;;  %v2282_v20 = vld [vmem:[%s9512_s22 + $0x3a50] sm:$0xff] }
 0x3b5   : > { %v11434_v41 = vadd.f32 %v6519_v35, %v11365_v61  ;;  %8174 = vmatprep.subr.bf16.mxu0 %v8173_v28  ;;  %v8179_v61 = vpack.c.bf16 %v2237_v42, %v2234_v38  ;;  %v8929_v28 = vpack.c.bf16 %v2215_v21, %v2212_v32  ;;  %v2265_v35 = vld [vmem:[%s9512_s22 + $0x39c8] sm:$0xff]  ;;  %v8933_v38 = vpack.c.bf16 %v2221_v40, %v2218_v48  ;;  %v2188_v32 = vld [vmem:[%s9512_s22 + $0x3760] sm:$0xff]  ;;  %v2191_v21 = vld [vmem:[%s9512_s22 + $0x3778] sm:$0xff] }
 0x3b6   : > { %v2242_v48 = vld [vmem:[%s9512_s22 + $0x3910] sm:$0xff]  ;;  %v2245_v40 = vld [vmem:[%s9512_s22 + $0x3928] sm:$0xff] }
 0x3b7   : > { %8912 = vmatpush3.bf16.msra.mxu1 %v8911_v36  ;;  %v2268_v36 = vld [vmem:[%s9512_s22 + $0x39e0] sm:$0xff] }
 0x3b8   : > { %8176 = vmatpush1.bf16.msra.mxu0 %v8175_v37  ;;  %8914 = vmatprep.subr.bf16.mxu1 %v8913_v4  ;;  %v8931_v37 = vpack.c.bf16 %v2167_v31, %v2164_v30  ;;  %v8195_v4 = vpack.c.bf16 %v2261_v33, %v2258_v29  ;;  %v8197_v42 = vpack.c.bf16 %v2268_v36, %v2265_v35  ;;  %v2289_v29 = vld [vmem:[%s9512_s22 + $0x3a88] sm:$0xff]  ;;  %v2292_v30 = vld [vmem:[%s9512_s22 + $0x3aa0] sm:$0xff]  ;;  %v2291_v36 = vld [vmem:[%s9512_s22 + $0x3a98] sm:$0xff] }
 0x3b9   : > { %8178 = vmatprep.subr.bf16.mxu0 %v8177_v19  ;;  %v2173_v19 = vld [vmem:[%s9512_s22 + $0x36e8] sm:$0xff]  ;;  %v8947_v31 = vpack.c.bf16 %v2191_v21, %v2188_v32  ;;  %v2288_v33 = vld [vmem:[%s9512_s22 + $0x3a80] sm:$0xff]  ;;  %v8213_v35 = vpack.c.bf16 %v2292_v30, %v2289_v29  ;;  %v2322_v29 = vld [vmem:[%s9512_s22 + $0x3b90] sm:$0xff] }
 0x3ba   : > { %v2269_v32 = vld [vmem:[%s9512_s22 + $0x39e8] sm:$0xff] }
 0x3bb   : > { %8916 = vmatpush3.bf16.msra.mxu1 %v8915_v50  ;;  %v2274_v50 = vld [vmem:[%s9512_s22 + $0x3a10] sm:$0xff] }
 0x3bc   : > { %8180 = vmatpush1.bf16.msra.mxu0 %v8179_v61  ;;  %8918 = vmatprep.subr.bf16.mxu1 %v8917_v51  ;;  %v8935_v61 = vpack.c.bf16 %v2173_v19, %v2170_v39  ;;  %v8199_v51 = vpack.c.bf16 %v2267_v43, %v2264_v49  ;;  %v8201_v56 = vpack.c.bf16 %v2274_v50, %v2271_v46  ;;  %v2298_v49 = vld [vmem:[%s9512_s22 + $0x3ad0] sm:$0xff]  ;;  %v2297_v50 = vld [vmem:[%s9512_s22 + $0x3ac8] sm:$0xff] }
 0x3bd   : > { %8182 = vmatprep.subr.bf16.mxu0 %v8181_v55  ;;  %v2179_v55 = vld [vmem:[%s9512_s22 + $0x3718] sm:$0xff]  ;;  %v8951_v39 = vpack.c.bf16 %v2245_v40, %v2242_v48  ;;  %v8215_v19 = vpack.c.bf16 %v2291_v36, %v2288_v33  ;;  %v2294_v43 = vld [vmem:[%s9512_s22 + $0x3ab0] sm:$0xff]  ;;  %v2272_v33 = vld [vmem:[%s9512_s22 + $0x3a00] sm:$0xff] }
 0x3be   : > { %5297 = vmatmul.mubr.f32.vlgmr.msra.gmra.mrb[36].mxu1 %v11304_v34  ;;  %v2161_v34 = vld [vmem:[%s9512_s22 + $0x3688] sm:$0xff]  ;;  %v2275_v48 = vld [vmem:[%s9512_s22 + $0x3a18] sm:$0xff]  ;;  %v2326_v36 = vld [vmem:[%s9512_s22 + $0x3bb0] sm:$0xff] }
 0x3bf   : > { %3823 = vmatmul.mubr.f32.vlgmr.msra.gmra.mrb[0].mxu0 %v11450_v60  ;;  %8920 = vmatpush3.bf16.msra.mxu1 %v8919_v63  ;;  %v8927_v24 = vpack.c.bf16 %v2161_v34, %v2158_v17  ;;  %v2280_v63 = vld [vmem:[%s9512_s22 + $0x3a40] sm:$0xff]  ;;  %v8207_v34 = vpack.c.bf16 %v2279_v10, %v2276_v3 }
 0x3c0   : > { %8184 = vmatpush1.bf16.msra.mxu0 %v8183_v0  ;;  %8922 = vmatprep.subr.bf16.mxu1 %v8921_v1  ;;  %v8939_v0 = vpack.c.bf16 %v2179_v55, %v2176_v54  ;;  %v8203_v1 = vpack.c.bf16 %v2273_v8, %v2270_v53  ;;  %v8205_v13 = vpack.c.bf16 %v2280_v63, %v2277_v59  ;;  %v2304_v53 = vld [vmem:[%s9512_s22 + $0x3b00] sm:$0xff]  ;;  %v2303_v59 = vld [vmem:[%s9512_s22 + $0x3af8] sm:$0xff] }
 0x3c1   : > { %8186 = vmatprep.subr.bf16.mxu0 %v8185_v7  ;;  %5366 = vmatprep.mubr.f32.mxu1 %v11317_v47  ;;  %v8193_v47 = vpack.c.bf16 %v2262_v23, %v2259_v22  ;;  %v2185_v7 = vld [vmem:[%s9512_s22 + $0x3748] sm:$0xff]  ;;  %v8955_v54 = vpack.c.bf16 %v2251_v45, %v2248_v44  ;;  %v8219_v55 = vpack.c.bf16 %v2297_v50, %v2294_v43  ;;  %v2300_v8 = vld [vmem:[%s9512_s22 + $0x3ae0] sm:$0xff]  ;;  %v2278_v43 = vld [vmem:[%s9512_s22 + $0x3a30] sm:$0xff] }
 0x3c2   : > { %3893 = vmatprep.mubr.f32.mxu0 %v11463_v14  ;;  %v8943_v17 = vpack.c.bf16 %v2185_v7, %v2182_v6  ;;  %v2308_v63 = vld [vmem:[%s9512_s22 + $0x3b20] sm:$0xff]  ;;  %v8223_v3 = vpack.c.bf16 %v2303_v59, %v2300_v8  ;;  %v2306_v7 = vld [vmem:[%s9512_s22 + $0x3b10] sm:$0xff]  ;;  %v2281_v44 = vld [vmem:[%s9512_s22 + $0x3a48] sm:$0xff] }
 0x3c3   : > { %8924 = vmatpush3.bf16.msra.mxu1 %v8923_v26  ;;  %v2327_v50 = vld [vmem:[%s9512_s22 + $0x3bb8] sm:$0xff] }
 0x3c4   : > { %8188 = vmatpush1.bf16.msra.mxu0 %v8187_v15  ;;  %8926 = vmatprep.subr.bf16.mxu1 %v8925_v27  ;;  %v2283_v15 = vld [vmem:[%s9512_s22 + $0x3a58] sm:$0xff]  ;;  %v2286_v27 = vld [vmem:[%s9512_s22 + $0x3a70] sm:$0xff] }
 0x3c5   : > { %8190 = vmatprep.subr.bf16.mxu0 %v8189_v18  ;;  %v8945_v18 = vpack.c.bf16 %v2239_v12, %v2236_v11  ;;  %v8209_v23 = vpack.c.bf16 %v2286_v27, %v2283_v15  ;;  %v2309_v11 = vld [vmem:[%s9512_s22 + $0x3b28] sm:$0xff]  ;;  %v2314_v12 = vld [vmem:[%s9512_s22 + $0x3b50] sm:$0xff]  ;;  %v2316_v27 = vld [vmem:[%s9512_s22 + $0x3b60] sm:$0xff] }
 0x3c6   : > { %v2313_v15 = vld [vmem:[%s9512_s22 + $0x3b48] sm:$0xff]  ;;  %v2287_v59 = vld [vmem:[%s9512_s22 + $0x3a78] sm:$0xff] }
 0x3c7   : > { %8928 = vmatpush3.bf16.msra.mxu1 %v8927_v24  ;;  %v2285_v24 = vld [vmem:[%s9512_s22 + $0x3a68] sm:$0xff]  ;;  %v8229_v21 = vpack.c.bf16 %v2316_v27, %v2313_v15  ;;  %v2392_v15 = vld [vmem:[%s9512_s22 + $0x3dc0] sm:$0xff]  ;;  %v2395_v27 = vld [vmem:[%s9512_s22 + $0x3dd8] sm:$0xff] }
 0x3c8   : > { %8192 = vmatpush1.bf16.msra.mxu0 %v8191_v25  ;;  %8930 = vmatprep.subr.bf16.mxu1 %v8929_v28  ;;  %v2290_v25 = vld [vmem:[%s9512_s22 + $0x3a90] sm:$0xff]  ;;  %v2293_v28 = vld [vmem:[%s9512_s22 + $0x3aa8] sm:$0xff] }
 0x3c9   : > { %8194 = vmatprep.subr.bf16.mxu0 %v8193_v47  ;;  %v8211_v47 = vpack.c.bf16 %v2285_v24, %v2282_v20  ;;  %v2266_v20 = vld [vmem:[%s9512_s22 + $0x39d0] sm:$0xff]  ;;  %v2320_v24 = vld [vmem:[%s9512_s22 + $0x3b80] sm:$0xff] }
 0x3ca   : > { %v8967_v30 = vpack.c.bf16 %v2269_v32, %v2266_v20  ;;  %v8985_v32 = vpack.c.bf16 %v2395_v27, %v2392_v15  ;;  %v2369_v15 = vld [vmem:[%s9512_s22 + $0x3d08] sm:$0xff]  ;;  %v2422_v27 = vld [vmem:[%s9512_s22 + $0x3eb0] sm:$0xff] }
 0x3cb   : > { %8932 = vmatpush3.bf16.msra.mxu1 %v8931_v37  ;;  %v2296_v37 = vld [vmem:[%s9512_s22 + $0x3ac0] sm:$0xff] }
 0x3cc   : > { %8196 = vmatpush1.bf16.msra.mxu0 %v8195_v4  ;;  %8934 = vmatprep.subr.bf16.mxu1 %v8933_v38  ;;  %v2299_v4 = vld [vmem:[%s9512_s22 + $0x3ad8] sm:$0xff] }
 0x3cd   : > { %8198 = vmatprep.subr.bf16.mxu0 %v8197_v42  ;;  %v2295_v38 = vld [vmem:[%s9512_s22 + $0x3ab8] sm:$0xff]  ;;  %v8953_v42 = vpack.c.bf16 %v2299_v4, %v2296_v37  ;;  %v2329_v37 = vld [vmem:[%s9512_s22 + $0x3bc8] sm:$0xff] }
 0x3ce   : > { %v8217_v46 = vpack.c.bf16 %v2298_v49, %v2295_v38  ;;  %v2325_v4 = vld [vmem:[%s9512_s22 + $0x3ba8] sm:$0xff]  ;;  %v2328_v38 = vld [vmem:[%s9512_s22 + $0x3bc0] sm:$0xff]  ;;  %v8971_v49 = vpack.c.bf16 %v2275_v48, %v2272_v33 }
 0x3cf   : > { %8936 = vmatpush3.bf16.msra.mxu1 %v8935_v61  ;;  %v2302_v61 = vld [vmem:[%s9512_s22 + $0x3af0] sm:$0xff] }
 0x3d0   : > { %8200 = vmatpush1.bf16.msra.mxu0 %v8199_v51  ;;  %8938 = vmatprep.subr.bf16.mxu1 %v8937_v52  ;;  %v2305_v51 = vld [vmem:[%s9512_s22 + $0x3b08] sm:$0xff] }
 0x3d1   : > { %v6552_v9 = vpop.f32.mrb[24].mxu1  ;;  %8202 = vmatprep.subr.bf16.mxu0 %v8201_v56  ;;  %v2301_v52 = vld [vmem:[%s9512_s22 + $0x3ae8] sm:$0xff]  ;;  %v8957_v56 = vpack.c.bf16 %v2305_v51, %v2302_v61  ;;  %v2332_v61 = vld [vmem:[%s9512_s22 + $0x3be0] sm:$0xff]  ;;  %v2335_v51 = vld [vmem:[%s9512_s22 + $0x3bf8] sm:$0xff] }
 0x3d2   : > { %v6553_v26 = vpop.f32.mrb[25].mxu1 }
 0x3d3   : > { %v6554_v16 = vadd.f32 %v6553_v26, %v6552_v9  ;;  %8940 = vmatpush3.bf16.msra.mxu1 %v8939_v0  ;;  %v2311_v0 = vld [vmem:[%s9512_s22 + $0x3b38] sm:$0xff]  ;;  %v2260_v9 = vld [vmem:[%s9512_s22 + $0x39a0] sm:$0xff]  ;;  %v2317_v26 = vld [vmem:[%s9512_s22 + $0x3b68] sm:$0xff] }
 0x3d4   : > { %8204 = vmatpush1.bf16.msra.mxu0 %v8203_v1  ;;  %8942 = vmatprep.subr.bf16.mxu1 %v8941_v2  ;;  %v2307_v1 = vld [vmem:[%s9512_s22 + $0x3b18] sm:$0xff]  ;;  %v8959_v2 = vpack.c.bf16 %v2257_v58, %v2254_v5  ;;  %v8961_v6 = vpack.c.bf16 %v2311_v0, %v2308_v63  ;;  %v8977_v5 = vpack.c.bf16 %v2335_v51, %v2332_v61  ;;  %v2330_v58 = vld [vmem:[%s9512_s22 + $0x3bd0] sm:$0xff] }
 0x3d5   : > { %v11511_v22 = vadd.f32 %v6554_v16, %v11434_v41  ;;  %8206 = vmatprep.subr.bf16.mxu0 %v8205_v13  ;;  %v8949_v41 = vpack.c.bf16 %v2293_v28, %v2290_v25  ;;  %v2263_v13 = vld [vmem:[%s9512_s22 + $0x39b8] sm:$0xff] }
 0x3d6   : > { %v8963_v16 = vpack.c.bf16 %v2263_v13, %v2260_v9  ;;  %v2323_v25 = vld [vmem:[%s9512_s22 + $0x3b98] sm:$0xff]  ;;  %v2336_v13 = vld [vmem:[%s9512_s22 + $0x3c00] sm:$0xff] }
 0x3d7   : > { %8944 = vmatpush3.bf16.msra.mxu1 %v8943_v17  ;;  %v8227_v17 = vpack.c.bf16 %v2309_v11, %v2306_v7  ;;  %v2319_v28 = vld [vmem:[%s9512_s22 + $0x3b78] sm:$0xff]  ;;  %v2341_v11 = vld [vmem:[%s9512_s22 + $0x3c28] sm:$0xff] }
 0x3d8   : > { %8208 = vmatpush1.bf16.msra.mxu0 %v8207_v34  ;;  %8946 = vmatprep.subr.bf16.mxu1 %v8945_v18  ;;  %v8965_v34 = vpack.c.bf16 %v2317_v26, %v2314_v12  ;;  %v2312_v18 = vld [vmem:[%s9512_s22 + $0x3b40] sm:$0xff]  ;;  %v8233_v40 = vpack.c.bf16 %v2322_v29, %v2319_v28  ;;  %v2339_v26 = vld [vmem:[%s9512_s22 + $0x3c18] sm:$0xff]  ;;  %v2345_v28 = vld [vmem:[%s9512_s22 + $0x3c48] sm:$0xff] }
 0x3d9   : > { %8210 = vmatprep.subr.bf16.mxu0 %v8209_v23  ;;  %v2315_v23 = vld [vmem:[%s9512_s22 + $0x3b58] sm:$0xff]  ;;  %v8247_v20 = vpack.c.bf16 %v2339_v26, %v2336_v13  ;;  %v2398_v29 = vld [vmem:[%s9512_s22 + $0x3df0] sm:$0xff] }
 0x3da   : > { %v2359_v61 = vld [vmem:[%s9512_s22 + $0x3cb8] sm:$0xff] }
 0x3db   : > { %8948 = vmatpush3.bf16.msra.mxu1 %v8947_v31  ;;  %v8231_v31 = vpack.c.bf16 %v2315_v23, %v2312_v18  ;;  %v2344_v23 = vld [vmem:[%s9512_s22 + $0x3c40] sm:$0xff] }
 0x3dc   : > { %8212 = vmatpush1.bf16.msra.mxu0 %v8211_v47  ;;  %8950 = vmatprep.subr.bf16.mxu1 %v8949_v41  ;;  %v8969_v47 = vpack.c.bf16 %v2323_v25, %v2320_v24  ;;  %v2318_v41 = vld [vmem:[%s9512_s22 + $0x3b70] sm:$0xff]  ;;  %v2347_v24 = vld [vmem:[%s9512_s22 + $0x3c58] sm:$0xff] }
 0x3dd   : > { %8214 = vmatprep.subr.bf16.mxu0 %v8213_v35  ;;  %v2321_v35 = vld [vmem:[%s9512_s22 + $0x3b88] sm:$0xff]  ;;  %v8987_v33 = vpack.c.bf16 %v2347_v24, %v2344_v23  ;;  %v2374_v23 = vld [vmem:[%s9512_s22 + $0x3d30] sm:$0xff] }
 0x3de   : > { %5367 = vmatmul.mubr.f32.vlgmr.msra.gmra.mrb[38].mxu1 %v11450_v60  ;;  %v8221_v60 = vpack.c.bf16 %v2304_v53, %v2301_v52  ;;  %v2331_v53 = vld [vmem:[%s9512_s22 + $0x3bd8] sm:$0xff]  ;;  %v2377_v24 = vld [vmem:[%s9512_s22 + $0x3d48] sm:$0xff] }
 0x3df   : > { %8952 = vmatpush3.bf16.msra.mxu1 %v8951_v39  ;;  %5436 = vmatprep.mubr.f32.mxu1 %v11463_v14  ;;  %v2310_v14 = vld [vmem:[%s9512_s22 + $0x3b30] sm:$0xff]  ;;  %v8235_v39 = vpack.c.bf16 %v2321_v35, %v2318_v41  ;;  %v2348_v35 = vld [vmem:[%s9512_s22 + $0x3c60] sm:$0xff] }
 0x3e0   : > { %8216 = vmatpush1.bf16.msra.mxu0 %v8215_v19  ;;  %8954 = vmatprep.subr.bf16.mxu1 %v8953_v42  ;;  %v8225_v10 = vpack.c.bf16 %v2310_v14, %v2307_v1  ;;  %v8973_v19 = vpack.c.bf16 %v2329_v37, %v2326_v36  ;;  %v2324_v42 = vld [vmem:[%s9512_s22 + $0x3ba0] sm:$0xff]  ;;  %v2333_v1 = vld [vmem:[%s9512_s22 + $0x3be8] sm:$0xff]  ;;  %v2386_v14 = vld [vmem:[%s9512_s22 + $0x3d90] sm:$0xff] }
 0x3e1   : > { %8218 = vmatprep.subr.bf16.mxu0 %v8217_v46  ;;  %v8237_v46 = vpack.c.bf16 %v2328_v38, %v2325_v4  ;;  %v8239_v8 = vpack.c.bf16 %v2327_v50, %v2324_v42  ;;  %v414_v41 = vld [vmem:[%s9522_s27 + $0x148] sm:$0xff]  ;;  %v2353_v37 = vld [vmem:[%s9512_s22 + $0x3c88] sm:$0xff]  ;;  %v2351_v38 = vld [vmem:[%s9512_s22 + $0x3c78] sm:$0xff] }
 0x3e2   : > { %v2350_v36 = vld [vmem:[%s9512_s22 + $0x3c70] sm:$0xff]  ;;  %v2356_v50 = vld [vmem:[%s9512_s22 + $0x3ca0] sm:$0xff] }
 0x3e3   : > { %8956 = vmatpush3.bf16.msra.mxu1 %v8955_v54  ;;  %v2334_v54 = vld [vmem:[%s9512_s22 + $0x3bf0] sm:$0xff] }
 0x3e4   : > { %8220 = vmatpush1.bf16.msra.mxu0 %v8219_v55  ;;  %8958 = vmatprep.subr.bf16.mxu1 %v8957_v56  ;;  %v8975_v56 = vpack.c.bf16 %v2281_v44, %v2278_v43  ;;  %v8241_v0 = vpack.c.bf16 %v2334_v54, %v2331_v53  ;;  %v2358_v42 = vld [vmem:[%s9512_s22 + $0x3cb0] sm:$0xff]  ;;  %v8991_v43 = vpack.c.bf16 %v2353_v37, %v2350_v36  ;;  %v2413_v54 = vld [vmem:[%s9512_s22 + $0x3e68] sm:$0xff]  ;;  %v2380_v37 = vld [vmem:[%s9512_s22 + $0x3d60] sm:$0xff] }
 0x3e5   : > { %8222 = vmatprep.subr.bf16.mxu0 %v8221_v60  ;;  %v2284_v60 = vld [vmem:[%s9512_s22 + $0x3a60] sm:$0xff]  ;;  %v8255_v44 = vpack.c.bf16 %v2351_v38, %v2348_v35  ;;  %v2410_v53 = vld [vmem:[%s9512_s22 + $0x3e50] sm:$0xff] }
 0x3e6   : > { %v8979_v7 = vpack.c.bf16 %v2287_v59, %v2284_v60  ;;  %v2360_v60 = vld [vmem:[%s9512_s22 + $0x3cc0] sm:$0xff]  ;;  %v2362_v59 = vld [vmem:[%s9512_s22 + $0x3cd0] sm:$0xff] }
 0x3e7   : > { %8960 = vmatpush3.bf16.msra.mxu1 %v8959_v2  ;;  %v2389_v2 = vld [vmem:[%s9512_s22 + $0x3da8] sm:$0xff] }
 0x3e8   : > { %8224 = vmatpush1.bf16.msra.mxu0 %v8223_v3  ;;  %8962 = vmatprep.subr.bf16.mxu1 %v8961_v6  ;;  %v2337_v3 = vld [vmem:[%s9512_s22 + $0x3c08] sm:$0xff]  ;;  %v2340_v6 = vld [vmem:[%s9512_s22 + $0x3c20] sm:$0xff]  ;;  %v8981_v9 = vpack.c.bf16 %v2389_v2, %v2386_v14  ;;  %v2363_v14 = vld [vmem:[%s9512_s22 + $0x3cd8] sm:$0xff] }
 0x3e9   : > { %8226 = vmatprep.subr.bf16.mxu0 %v8225_v10  ;;  %v2338_v10 = vld [vmem:[%s9512_s22 + $0x3c10] sm:$0xff]  ;;  %v8245_v12 = vpack.c.bf16 %v2340_v6, %v2337_v3  ;;  %v2416_v2 = vld [vmem:[%s9512_s22 + $0x3e80] sm:$0xff]  ;;  %v2419_v3 = vld [vmem:[%s9512_s22 + $0x3e98] sm:$0xff] }
 0x3ea   : > { %v8983_v18 = vpack.c.bf16 %v2341_v11, %v2338_v10  ;;  %v2367_v6 = vld [vmem:[%s9512_s22 + $0x3cf8] sm:$0xff]  ;;  %v9001_v13 = vpack.c.bf16 %v2419_v3, %v2416_v2  ;;  %v2366_v10 = vld [vmem:[%s9512_s22 + $0x3cf0] sm:$0xff]  ;;  %v2368_v11 = vld [vmem:[%s9512_s22 + $0x3d00] sm:$0xff]  ;;  %v9373_v3 = vmov 0.0  }
 0x3eb   : > { %8964 = vmatpush3.bf16.msra.mxu1 %v8963_v16  ;;  %v2343_v16 = vld [vmem:[%s9512_s22 + $0x3c38] sm:$0xff] }
 0x3ec   : > { %8228 = vmatpush1.bf16.msra.mxu0 %v8227_v17  ;;  %8966 = vmatprep.subr.bf16.mxu1 %v8965_v34  ;;  %v2346_v17 = vld [vmem:[%s9512_s22 + $0x3c50] sm:$0xff]  ;;  %v411_v34 = vld [vmem:[%s9522_s27 + $0x130] sm:$0xff] }
 0x3ed   : > { %8230 = vmatprep.subr.bf16.mxu0 %v8229_v21  ;;  %v2342_v21 = vld [vmem:[%s9512_s22 + $0x3c30] sm:$0xff]  ;;  %v8249_v25 = vpack.c.bf16 %v2346_v17, %v2343_v16  ;;  %v2425_v16 = vld [vmem:[%s9512_s22 + $0x3ec8] sm:$0xff] }
 0x3ee   : > { %v8251_v48 = vpack.c.bf16 %v2345_v28, %v2342_v21  ;;  %v2373_v17 = vld [vmem:[%s9512_s22 + $0x3d28] sm:$0xff]  ;;  %v2372_v21 = vld [vmem:[%s9512_s22 + $0x3d20] sm:$0xff] }
 0x3ef   : > { %8968 = vmatpush3.bf16.msra.mxu1 %v8967_v30  ;;  %v2401_v30 = vld [vmem:[%s9512_s22 + $0x3e08] sm:$0xff] }
 0x3f0   : > { %8232 = vmatpush1.bf16.msra.mxu0 %v8231_v31  ;;  %8970 = vmatprep.subr.bf16.mxu1 %v8969_v47  ;;  %v2349_v31 = vld [vmem:[%s9512_s22 + $0x3c68] sm:$0xff]  ;;  %v2352_v47 = vld [vmem:[%s9512_s22 + $0x3c80] sm:$0xff] }
 0x3f1   : > { %v6587_v45 = vpop.f32.mrb[26].mxu1  ;;  %8234 = vmatprep.subr.bf16.mxu0 %v8233_v40  ;;  %v8989_v40 = vpack.c.bf16 %v2401_v30, %v2398_v29  ;;  %v8253_v4 = vpack.c.bf16 %v2352_v47, %v2349_v31  ;;  %v2375_v29 = vld [vmem:[%s9512_s22 + $0x3d38] sm:$0xff]  ;;  %v2428_v30 = vld [vmem:[%s9512_s22 + $0x3ee0] sm:$0xff] }
 0x3f2   : > { %v6588_v52 = vpop.f32.mrb[27].mxu1  ;;  %v2431_v31 = vld [vmem:[%s9512_s22 + $0x3ef8] sm:$0xff]  ;;  %v8271_v35 = vpack.c.bf16 %v2375_v29, %v2372_v21  ;;  %v2408_v29 = vld [vmem:[%s9512_s22 + $0x3e40] sm:$0xff] }
 0x3f3   : > { %v6589_v55 = vadd.f32 %v6588_v52, %v6587_v45  ;;  %8972 = vmatpush3.bf16.msra.mxu1 %v8971_v49  ;;  %v2404_v49 = vld [vmem:[%s9512_s22 + $0x3e20] sm:$0xff]  ;;  %v2357_v52 = vld [vmem:[%s9512_s22 + $0x3ca8] sm:$0xff]  ;;  %v9009_v36 = vpack.c.bf16 %v2431_v31, %v2428_v30  ;;  %v2411_v30 = vld [vmem:[%s9512_s22 + $0x3e58] sm:$0xff] }
 0x3f4   : > { %8236 = vmatpush1.bf16.msra.mxu0 %v8235_v39  ;;  %8974 = vmatprep.subr.bf16.mxu1 %v8973_v19  ;;  %v2407_v39 = vld [vmem:[%s9512_s22 + $0x3e38] sm:$0xff] }
 0x3f5   : > { %v11580_v63 = vadd.f32 %v6589_v55, %v11511_v22  ;;  %8238 = vmatprep.subr.bf16.mxu0 %v8237_v46  ;;  %v8243_v22 = vpack.c.bf16 %v2333_v1, %v2330_v58  ;;  %v2355_v19 = vld [vmem:[%s9512_s22 + $0x3c98] sm:$0xff]  ;;  %v8993_v45 = vpack.c.bf16 %v2407_v39, %v2404_v49  ;;  %v2354_v46 = vld [vmem:[%s9512_s22 + $0x3c90] sm:$0xff]  ;;  %v2361_v55 = vld [vmem:[%s9512_s22 + $0x3cc8] sm:$0xff]  ;;  %v8997_v58 = vpack.c.bf16 %v2413_v54, %v2410_v53 }
 0x3f6   : > { %v8257_v51 = vpack.c.bf16 %v2358_v42, %v2355_v19  ;;  %v2378_v39 = vld [vmem:[%s9512_s22 + $0x3d50] sm:$0xff]  ;;  %v2381_v19 = vld [vmem:[%s9512_s22 + $0x3d68] sm:$0xff]  ;;  %v2415_v31 = vld [vmem:[%s9512_s22 + $0x3e78] sm:$0xff] }
 0x3f7   : > { %8976 = vmatpush3.bf16.msra.mxu1 %v8975_v56  ;;  %v2364_v56 = vld [vmem:[%s9512_s22 + $0x3ce0] sm:$0xff]  ;;  %v2385_v42 = vld [vmem:[%s9512_s22 + $0x3d88] sm:$0xff]  ;;  %v2394_v53 = vld [vmem:[%s9512_s22 + $0x3dd0] sm:$0xff] }
 0x3f8   : > { %8240 = vmatpush1.bf16.msra.mxu0 %v8239_v8  ;;  %8978 = vmatprep.subr.bf16.mxu1 %v8977_v5  ;;  %v8995_v8 = vpack.c.bf16 %v2359_v61, %v2356_v50  ;;  %v8259_v5 = vpack.c.bf16 %v2357_v52, %v2354_v46  ;;  %v8261_v1 = vpack.c.bf16 %v2364_v56, %v2361_v55  ;;  %v2434_v46 = vld [vmem:[%s9512_s22 + $0x3f10] sm:$0xff]  ;;  %v2384_v61 = vld [vmem:[%s9512_s22 + $0x3d80] sm:$0xff]  ;;  %v2391_v52 = vld [vmem:[%s9512_s22 + $0x3db8] sm:$0xff]  ;;  %v9371_v56 = vmov 0.0|0.0  }
 0x3f9   : > { %8242 = vmatprep.subr.bf16.mxu0 %v8241_v0  ;;  %v2365_v0 = vld [vmem:[%s9512_s22 + $0x3ce8] sm:$0xff] }
 0x3fa   : > { %v11661_v54 = vld [vmem:[%s9522_s27 + $0x140] sm:$0xff] }
 0x3fb   : > { %8980 = vmatpush3.bf16.msra.mxu1 %v8979_v7  ;;  %v2370_v7 = vld [vmem:[%s9512_s22 + $0x3d10] sm:$0xff] }
 0x3fc   : > { %8244 = vmatpush1.bf16.msra.mxu0 %v8243_v22  ;;  %8982 = vmatprep.subr.bf16.mxu1 %v8981_v9  ;;  %v8999_v22 = vpack.c.bf16 %v2365_v0, %v2362_v59  ;;  %v8263_v9 = vpack.c.bf16 %v2363_v14, %v2360_v60  ;;  %v8265_v26 = vpack.c.bf16 %v2370_v7, %v2367_v6  ;;  %v2390_v59 = vld [vmem:[%s9512_s22 + $0x3db0] sm:$0xff]  ;;  %v2393_v0 = vld [vmem:[%s9512_s22 + $0x3dc8] sm:$0xff]  ;;  %v2400_v14 = vld [vmem:[%s9512_s22 + $0x3e00] sm:$0xff] }
 0x3fd   : > { %8246 = vmatprep.subr.bf16.mxu0 %v8245_v12  ;;  %v2371_v12 = vld [vmem:[%s9512_s22 + $0x3d18] sm:$0xff]  ;;  %v8281_v60 = vpack.c.bf16 %v2394_v53, %v2391_v52  ;;  %v8283_v6 = vpack.c.bf16 %v2393_v0, %v2390_v59  ;;  %v2446_v7 = vld [vmem:[%s9512_s22 + $0x3f70] sm:$0xff]  ;;  %v2429_v0 = vld [vmem:[%s9512_s22 + $0x3ee8] sm:$0xff] }
 0x3fe   : > { %5437 = vmatmul.mubr.f32.vlgmr.msra.gmra.mrb[40].mxu1 %v411_v34  ;;  %v2426_v59 = vld [vmem:[%s9512_s22 + $0x3ed0] sm:$0xff] }
 0x3ff   : > { %3894 = vmatmul.mubr.f32.vlgmr.msra.gmra.mrb[0].mxu0 %v411_v34  ;;  %8984 = vmatpush3.bf16.msra.mxu1 %v8983_v18  ;;  %v2376_v34 = vld [vmem:[%s9512_s22 + $0x3d40] sm:$0xff]  ;;  %v9003_v18 = vpack.c.bf16 %v2371_v12, %v2368_v11  ;;  %v2403_v11 = vld [vmem:[%s9512_s22 + $0x3e18] sm:$0xff]  ;;  %v2406_v12 = vld [vmem:[%s9512_s22 + $0x3e30] sm:$0xff] }
 0x400   : > { %8248 = vmatpush1.bf16.msra.mxu0 %v8247_v20  ;;  %8986 = vmatprep.subr.bf16.mxu1 %v8985_v32  ;;  %v8267_v20 = vpack.c.bf16 %v2369_v15, %v2366_v10  ;;  %v9005_v32 = vpack.c.bf16 %v2425_v16, %v2422_v27  ;;  %v8269_v28 = vpack.c.bf16 %v2376_v34, %v2373_v17  ;;  %v2399_v10 = vld [vmem:[%s9512_s22 + $0x3df8] sm:$0xff]  ;;  %v2452_v27 = vld [vmem:[%s9512_s22 + $0x3fa0] sm:$0xff]  ;;  %v2402_v34 = vld [vmem:[%s9512_s22 + $0x3e10] sm:$0xff] }
 0x401   : > { %8250 = vmatprep.subr.bf16.mxu0 %v8249_v25  ;;  %5506 = vmatprep.mubr.f32.mxu1 %v414_v41  ;;  %v2455_v16 = vld [vmem:[%s9512_s22 + $0x3fb8] sm:$0xff]  ;;  %v8289_v17 = vpack.c.bf16 %v2406_v12, %v2403_v11  ;;  %v2438_v12 = vld [vmem:[%s9512_s22 + $0x3f30] sm:$0xff] }
 0x402   : > { %3964 = vmatprep.mubr.f32.mxu0 %v414_v41  ;;  %v2379_v41 = vld [vmem:[%s9512_s22 + $0x3d58] sm:$0xff]  ;;  %v9023_v21 = vpack.c.bf16 %v2455_v16, %v2452_v27  ;;  %v2448_v27 = vld [vmem:[%s9512_s22 + $0x3f80] sm:$0xff] }
 0x403   : > { %8988 = vmatpush3.bf16.msra.mxu1 %v8987_v33  ;;  %v2382_v33 = vld [vmem:[%s9512_s22 + $0x3d70] sm:$0xff] }
 0x404   : > { %8252 = vmatpush1.bf16.msra.mxu0 %v8251_v48  ;;  %8990 = vmatprep.subr.bf16.mxu1 %v8989_v40  ;;  %v9007_v40 = vpack.c.bf16 %v2377_v24, %v2374_v23  ;;  %v8273_v49 = vpack.c.bf16 %v2382_v33, %v2379_v41  ;;  %v2458_v24 = vld [vmem:[%s9512_s22 + $0x3fd0] sm:$0xff]  ;;  %v8295_v33 = vpack.c.bf16 %v2411_v30, %v2408_v29  ;;  %v2456_v30 = vld [vmem:[%s9512_s22 + $0x3fc0] sm:$0xff] }
 0x405   : > { %8254 = vmatprep.subr.bf16.mxu0 %v8253_v4  ;;  %v2383_v4 = vld [vmem:[%s9512_s22 + $0x3d78] sm:$0xff] }
 0x407   : > { %8992 = vmatpush3.bf16.msra.mxu1 %v8991_v43  ;;  %v2388_v43 = vld [vmem:[%s9512_s22 + $0x3da0] sm:$0xff] }
 0x408   : > { %8256 = vmatpush1.bf16.msra.mxu0 %v8255_v44  ;;  %8994 = vmatprep.subr.bf16.mxu1 %v8993_v45  ;;  %v9011_v44 = vpack.c.bf16 %v2383_v4, %v2380_v37  ;;  %v8275_v45 = vpack.c.bf16 %v2381_v19, %v2378_v39  ;;  %v8277_v50 = vpack.c.bf16 %v2388_v43, %v2385_v42  ;;  %v2417_v37 = vld [vmem:[%s9512_s22 + $0x3e88] sm:$0xff]  ;;  %v2470_v42 = vld [vmem:[%s9512_s22 + $0x4030] sm:$0xff] }
 0x409   : > { %8258 = vmatprep.subr.bf16.mxu0 %v8257_v51  ;;  %v2387_v51 = vld [vmem:[%s9512_s22 + $0x3d98] sm:$0xff]  ;;  %v2421_v4 = vld [vmem:[%s9512_s22 + $0x3ea8] sm:$0xff] }
 0x40a   : > { %v2473_v43 = vld [vmem:[%s9512_s22 + $0x4048] sm:$0xff] }
 0x40b   : > { %8996 = vmatpush3.bf16.msra.mxu1 %v8995_v8  ;;  %v8279_v8 = vpack.c.bf16 %v2387_v51, %v2384_v61  ;;  %v2427_v61 = vld [vmem:[%s9512_s22 + $0x3ed8] sm:$0xff]  ;;  %v2430_v51 = vld [vmem:[%s9512_s22 + $0x3ef0] sm:$0xff]  ;;  %v9032_v53 = vpack.c.bf16 %v2473_v43, %v2470_v42 }
 0x40c   : > { %8260 = vmatpush1.bf16.msra.mxu0 %v8259_v5  ;;  %8998 = vmatprep.subr.bf16.mxu1 %v8997_v58  ;;  %v2440_v5 = vld [vmem:[%s9512_s22 + $0x3f40] sm:$0xff]  ;;  %v2443_v58 = vld [vmem:[%s9512_s22 + $0x3f58] sm:$0xff] }
 0x40d   : > { %8262 = vmatprep.subr.bf16.mxu0 %v8261_v1  ;;  %v2397_v1 = vld [vmem:[%s9512_s22 + $0x3de8] sm:$0xff]  ;;  %v9017_v2 = vpack.c.bf16 %v2443_v58, %v2440_v5  ;;  %v2479_v5 = vld [vmem:[%s9512_s22 + $0x4078] sm:$0xff] }
 0x40e   : > { %v2471_v42 = vld [vmem:[%s9512_s22 + $0x4038] sm:$0xff] }
 0x40f   : > { %9000 = vmatpush3.bf16.msra.mxu1 %v8999_v22  ;;  %v2449_v22 = vld [vmem:[%s9512_s22 + $0x3f88] sm:$0xff] }
 0x410   : > { %8264 = vmatpush1.bf16.msra.mxu0 %v8263_v9  ;;  %9002 = vmatprep.subr.bf16.mxu1 %v9001_v13  ;;  %v8285_v9 = vpack.c.bf16 %v2400_v14, %v2397_v1  ;;  %v2396_v13 = vld [vmem:[%s9512_s22 + $0x3de0] sm:$0xff]  ;;  %v2433_v1 = vld [vmem:[%s9512_s22 + $0x3f08] sm:$0xff] }
 0x411   : > { %v6622_v25 = vpop.f32.mrb[28].mxu1  ;;  %8266 = vmatprep.subr.bf16.mxu0 %v8265_v26  ;;  %v9020_v26 = vpack.c.bf16 %v2449_v22, %v2446_v7  ;;  %v8287_v15 = vpack.c.bf16 %v2399_v10, %v2396_v13  ;;  %v2436_v14 = vld [vmem:[%s9512_s22 + $0x3f20] sm:$0xff]  ;;  %v2435_v22 = vld [vmem:[%s9512_s22 + $0x3f18] sm:$0xff]  ;;  %v2442_v13 = vld [vmem:[%s9512_s22 + $0x3f50] sm:$0xff] }
 0x412   : > { %v6623_v47 = vpop.f32.mrb[29].mxu1  ;;  %v2432_v7 = vld [vmem:[%s9512_s22 + $0x3f00] sm:$0xff]  ;;  %v11723_v10 = vld [vmem:[%s9522_s27 + $0x150] sm:$0xff] }
 0x413   : > { %v6624_v48 = vadd.f32 %v6623_v47, %v6622_v25  ;;  %9004 = vmatpush3.bf16.msra.mxu1 %v9003_v18  ;;  %v2405_v18 = vld [vmem:[%s9512_s22 + $0x3e28] sm:$0xff]  ;;  %v2418_v47 = vld [vmem:[%s9512_s22 + $0x3e90] sm:$0xff]  ;;  %v8311_v11 = vpack.c.bf16 %v2435_v22, %v2432_v7 }
 0x414   : > { %8268 = vmatpush1.bf16.msra.mxu0 %v8267_v20  ;;  %9006 = vmatprep.subr.bf16.mxu1 %v9005_v32  ;;  %v2409_v20 = vld [vmem:[%s9512_s22 + $0x3e48] sm:$0xff]  ;;  %v2412_v32 = vld [vmem:[%s9512_s22 + $0x3e60] sm:$0xff]  ;;  %v8291_v23 = vpack.c.bf16 %v2405_v18, %v2402_v34  ;;  %v2447_v18 = vld [vmem:[%s9512_s22 + $0x3f78] sm:$0xff] }
 0x415   : > { %v11648_v38 = vadd.f32 %v6624_v48, %v11580_v63  ;;  %8270 = vmatprep.subr.bf16.mxu0 %v8269_v28  ;;  %v2437_v63 = vld [vmem:[%s9512_s22 + $0x3f28] sm:$0xff]  ;;  %v8293_v28 = vpack.c.bf16 %v2412_v32, %v2409_v20  ;;  %v2464_v48 = vld [vmem:[%s9512_s22 + $0x4000] sm:$0xff]  ;;  %v2451_v20 = vld [vmem:[%s9512_s22 + $0x3f98] sm:$0xff] }
 0x416   : > { %v9014_v55 = vpack.c.bf16 %v2437_v63, %v2434_v46  ;;  %v2461_v25 = vld [vmem:[%s9512_s22 + $0x3fe8] sm:$0xff]  ;;  %v2420_v46 = vld [vmem:[%s9512_s22 + $0x3ea0] sm:$0xff]  ;;  %v2423_v63 = vld [vmem:[%s9512_s22 + $0x3eb8] sm:$0xff] }
 0x417   : > { %9008 = vmatpush3.bf16.msra.mxu1 %v9007_v40  ;;  %v9026_v41 = vpack.c.bf16 %v2461_v25, %v2458_v24  ;;  %v2467_v40 = vld [vmem:[%s9512_s22 + $0x4018] sm:$0xff]  ;;  %v2444_v34 = vld [vmem:[%s9512_s22 + $0x3f60] sm:$0xff]  ;;  %v2454_v32 = vld [vmem:[%s9512_s22 + $0x3fb0] sm:$0xff] }
 0x418   : > { %8272 = vmatpush1.bf16.msra.mxu0 %v8271_v35  ;;  %9010 = vmatprep.subr.bf16.mxu1 %v9009_v36  ;;  %v8297_v35 = vpack.c.bf16 %v2418_v47, %v2415_v31  ;;  %v2414_v36 = vld [vmem:[%s9512_s22 + $0x3e70] sm:$0xff]  ;;  %v9029_v39 = vpack.c.bf16 %v2467_v40, %v2464_v48  ;;  %v2453_v24 = vld [vmem:[%s9512_s22 + $0x3fa8] sm:$0xff]  ;;  %v2459_v31 = vld [vmem:[%s9512_s22 + $0x3fd8] sm:$0xff] }
 0x419   : > { %8274 = vmatprep.subr.bf16.mxu0 %v8273_v49  ;;  %v2424_v49 = vld [vmem:[%s9512_s22 + $0x3ec0] sm:$0xff]  ;;  %v8299_v19 = vpack.c.bf16 %v2417_v37, %v2414_v36  ;;  %v2457_v25 = vld [vmem:[%s9512_s22 + $0x3fc8] sm:$0xff]  ;;  %v2463_v47 = vld [vmem:[%s9512_s22 + $0x3ff8] sm:$0xff] }
 0x41a   : > { %v2462_v40 = vld [vmem:[%s9512_s22 + $0x3ff0] sm:$0xff]  ;;  %v2469_v36 = vld [vmem:[%s9512_s22 + $0x4028] sm:$0xff]  ;;  %v2472_v37 = vld [vmem:[%s9512_s22 + $0x4040] sm:$0xff] }
 0x41b   : > { %9012 = vmatpush3.bf16.msra.mxu1 %v9011_v44 }
 0x41c   : > { %8276 = vmatpush1.bf16.msra.mxu0 %v8275_v45  ;;  %9013 = vmatprep.subr.bf16.mxu1 %v9371_v56  ;;  %v8301_v45 = vpack.c.bf16 %v2424_v49, %v2421_v4 }
 0x41d   : > { %8278 = vmatprep.subr.bf16.mxu0 %v8277_v50 }
 0x41e   : > { %5507 = vmatmul.mubr.f32.vlgmr.msra.gmra.mrb[42].mxu1 %v11661_v54 }
 0x41f   : > { %9015 = vmatpush3.bf16.msra.mxu1 %v9014_v55  ;;  %6933 = vmatprep.mubr.msk.f32.mxu1 %vm9372_vm1, %v9373_v3  ;;  %v8303_v55 = vpack.c.bf16 %v2423_v63, %v2420_v46 }
 0x420   : > { %8280 = vmatpush1.bf16.msra.mxu0 %v8279_v8  ;;  %9016 = vmatprep.subr.bf16.mxu1 %v9371_v56  ;;  %v2476_v8 = vld [vmem:[%s9512_s22 + $0x4060] sm:$0xff] }
 0x421   : > { %8282 = vmatprep.subr.bf16.mxu0 %v8281_v60  ;;  %v8305_v60 = vpack.c.bf16 %v2430_v51, %v2427_v61  ;;  %v2474_v51 = vld [vmem:[%s9512_s22 + $0x4050] sm:$0xff] }
 0x423   : > { %9018 = vmatpush3.bf16.msra.mxu1 %v9017_v2  ;;  %v9035_v2 = vpack.c.bf16 %v2479_v5, %v2476_v8 }
 0x424   : > { %8284 = vmatpush1.bf16.msra.mxu0 %v8283_v6  ;;  %9019 = vmatprep.subr.bf16.mxu1 %v9371_v56  ;;  %v8307_v6 = vpack.c.bf16 %v2429_v0, %v2426_v59 }
 0x425   : > { %8286 = vmatprep.subr.bf16.mxu0 %v8285_v9  ;;  %v2439_v9 = vld [vmem:[%s9512_s22 + $0x3f38] sm:$0xff] }
 0x427   : > { %9021 = vmatpush3.bf16.msra.mxu1 %v9020_v26  ;;  %v2441_v26 = vld [vmem:[%s9512_s22 + $0x3f48] sm:$0xff] }
 0x428   : > { %8288 = vmatpush1.bf16.msra.mxu0 %v8287_v15  ;;  %9022 = vmatprep.subr.bf16.mxu1 %v9371_v56  ;;  %v2445_v15 = vld [vmem:[%s9512_s22 + $0x3f68] sm:$0xff]  ;;  %v8315_v16 = vpack.c.bf16 %v2441_v26, %v2438_v12  ;;  %v372_v26 = vld [vmem:[#allocation2 + $0x10] sm:$0xff] }
 0x429   : > { %8290 = vmatprep.subr.bf16.mxu0 %v8289_v17  ;;  %v8317_v17 = vpack.c.bf16 %v2448_v27, %v2445_v15 }
 0x42b   : > { %9024 = vmatpush3.bf16.msra.mxu1 %v9023_v21  ;;  %v8319_v21 = vpack.c.bf16 %v2447_v18, %v2444_v34  ;;  %v370_v34 = vld [vmem:[#allocation2] sm:$0xff] }
 0x42c   : > { %8292 = vmatpush1.bf16.msra.mxu0 %v8291_v23  ;;  %9025 = vmatprep.subr.bf16.mxu1 %v9371_v56  ;;  %v2450_v23 = vld [vmem:[%s9512_s22 + $0x3f90] sm:$0xff] }
 0x42d   : > { %8294 = vmatprep.subr.bf16.mxu0 %v8293_v28  ;;  %v8323_v28 = vpack.c.bf16 %v2453_v24, %v2450_v23 }
 0x42f   : > { %9027 = vmatpush3.bf16.msra.mxu1 %v9026_v41  ;;  %v2466_v41 = vld [vmem:[%s9512_s22 + $0x4010] sm:$0xff] }
 0x430   : > { %8296 = vmatpush1.bf16.msra.mxu0 %v8295_v33  ;;  %9028 = vmatprep.subr.bf16.mxu1 %v9371_v56  ;;  %v8327_v33 = vpack.c.bf16 %v2459_v31, %v2456_v30  ;;  %v8329_v48 = vpack.c.bf16 %v2466_v41, %v2463_v47  ;;  %v5626_v30 = vld [vmem:[%s12176_s3 + $0x38] sm:$0xff] (!%p6124_p7)  ;;  %v5623_v41 = vld [vmem:[%s12176_s3 + $0x20] sm:$0xff] (!%p6124_p7) }
 0x431   : > { %v6657_v44 = vpop.f32.mrb[30].mxu1  ;;  %8298 = vmatprep.subr.bf16.mxu0 %v8297_v35  ;;  %v2465_v35 = vld [vmem:[%s9512_s22 + $0x4008] sm:$0xff] }
 0x432   : > { %v6658_v50 = vpop.f32.mrb[31].mxu1  ;;  %v8331_v4 = vpack.c.bf16 %v2465_v35, %v2462_v40  ;;  %v9374_v40 = vmov (!%p6124_p7), 0.0|0.0   ;;  %v5630_v35 = vld [vmem:[%s12176_s3 + $0x58] sm:$0xff] (!%p6124_p7) }
 0x433   : > { %v6659_v52 = vadd.f32 %v6658_v50, %v6657_v44  ;;  %9030 = vmatpush3.bf16.msra.mxu1 %v9029_v39  ;;  %v8333_v39 = vpack.c.bf16 %v2472_v37, %v2469_v36  ;;  %v2475_v44 = vld [vmem:[%s9512_s22 + $0x4058] sm:$0xff] }
 0x434   : > { %8300 = vmatpush1.bf16.msra.mxu0 %v8299_v19  ;;  %9031 = vmatprep.subr.bf16.mxu1 %v9371_v56  ;;  %v2468_v19 = vld [vmem:[%s9512_s22 + $0x4020] sm:$0xff] }
 0x435   : > { %v11711_v58 = vadd.f32 %v6659_v52, %v11648_v38  ;;  %8302 = vmatprep.subr.bf16.mxu0 %v8301_v45  ;;  %v8309_v38 = vpack.c.bf16 %v2436_v14, %v2433_v1  ;;  %v2478_v45 = vld [vmem:[%s9512_s22 + $0x4070] sm:$0xff]  ;;  %v8335_v63 = vpack.c.bf16 %v2471_v42, %v2468_v19  ;;  %v2477_v52 = vld [vmem:[%s9512_s22 + $0x4068] sm:$0xff]  ;;  %v5634_v19 = vld [vmem:[%s12176_s3 + $0x78] sm:$0xff] (!%p6124_p7) }
 0x436   : > { %v8337_v61 = vpack.c.bf16 %v2478_v45, %v2475_v44  ;;  %v5631_v44 = vld [vmem:[%s12176_s3 + $0x60] sm:$0xff] (!%p6124_p7)  ;;  %v5633_v45 = vld [vmem:[%s12176_s3 + $0x70] sm:$0xff] (!%p6124_p7) }
 0x437   : > { %9033 = vmatpush3.bf16.msra.mxu1 %v9032_v53  ;;  %v8339_v53 = vpack.c.bf16 %v2477_v52, %v2474_v51  ;;  %v5635_v52 = vld [vmem:[%s12176_s3 + $0x80] sm:$0xff] (!%p6124_p7) }
 0x438   : > { %8304 = vmatpush1.bf16.msra.mxu0 %v8303_v55  ;;  %9034 = vmatprep.subr.bf16.mxu1 %v9371_v56  ;;  %v8313_v56 = vpack.c.bf16 %v2442_v13, %v2439_v9 }
 0x439   : > { %8306 = vmatprep.subr.bf16.mxu0 %v8305_v60 }
 0x43b   : > { %9036 = vmatpush3.bf16.msra.mxu1 %v9035_v2 }
 0x43c   : > { %8308 = vmatpush1.bf16.msra.mxu0 %v8307_v6  ;;  %9115 = vmatprep.subr.bf16.mxu1 (!%p6124_p7), %v9374_v40 }
 0x43d   : > { %8310 = vmatprep.subr.bf16.mxu0 %v8309_v38 }
 0x43e   : > { %6934 = vmatmul.mubr.f32.vlgmr.msra.gmra.mrb[44].mxu1 %v11723_v10 }
 0x43f   : > { %3965 = vmatmul.mubr.f32.vlgmr.msra.gmra.mrb[0].mxu0 %v11661_v54  ;;  %v8321_v54 = vpack.c.bf16 %v2454_v32, %v2451_v20  ;;  %v371_v32 = vld [vmem:[#allocation2 + $0x8] sm:$0xff] }
 0x440   : > { %8312 = vmatpush1.bf16.msra.mxu0 %v8311_v11  ;;  %4035 = vmatprep.mubr.f32.mxu0 %v9373_v3  ;;  %v2460_v3 = vld [vmem:[%s9512_s22 + $0x3fe0] sm:$0xff] }
 0x441   : > { %8314 = vmatprep.subr.bf16.mxu0 %v8313_v56  ;;  %v8325_v29 = vpack.c.bf16 %v2460_v3, %v2457_v25  ;;  %v5620_v25 = vld [vmem:[%s12176_s3 + $0x8] sm:$0xff] (!%p6124_p7)  ;;  %v5622_v3 = vld [vmem:[%s12176_s3 + $0x18] sm:$0xff] (!%p6124_p7) }
 0x444   : > { %8316 = vmatpush1.bf16.msra.mxu0 %v8315_v16 }
 0x445   : > { %8318 = vmatprep.subr.bf16.mxu0 %v8317_v17 }
 0x448   : > { %8320 = vmatpush1.bf16.msra.mxu0 %v8319_v21 }
 0x449   : > { %8322 = vmatprep.subr.bf16.mxu0 %v8321_v54 }
 0x44c   : > { %8324 = vmatpush1.bf16.msra.mxu0 %v8323_v28  ;;  %v5621_v28 = vld [vmem:[%s12176_s3 + $0x10] sm:$0xff] (!%p6124_p7) }
 0x44d   : > { %8326 = vmatprep.subr.bf16.mxu0 %v8325_v29  ;;  %v5624_v29 = vld [vmem:[%s12176_s3 + $0x28] sm:$0xff] (!%p6124_p7) }
 0x44e   : > { %v9041_v47 = vpack.c.bf16 (!%p6124_p7), %v5626_v30, %v5624_v29  ;;  %v5865_v30 = vld [vmem:[%s12178_s5 + $0x20] sm:$0xff] (!%p6124_p7) }
 0x450   : > { %8328 = vmatpush1.bf16.msra.mxu0 %v8327_v33  ;;  %v5625_v33 = vld [vmem:[%s12176_s3 + $0x30] sm:$0xff] (!%p6124_p7) }
 0x451   : > { %v6692_v49 = vpop.f32.mrb[32].mxu1  ;;  %8330 = vmatprep.subr.bf16.mxu0 %v8329_v48  ;;  %v5628_v48 = vld [vmem:[%s12176_s3 + $0x48] sm:$0xff] (!%p6124_p7)  ;;  %v9043_v36 = vpack.c.bf16 (!%p6124_p7), %v5625_v33, %v5623_v41  ;;  %v5655_v33 = vld [vmem:[%s12176_s3 + $0x120] sm:$0xff] (!%p6124_p7) }
 0x452   : > { %v6693_v43 = vpop.f32.mrb[33].mxu1  ;;  %v9045_v37 = vpack.c.bf16 (!%p6124_p7), %v5630_v35, %v5628_v48  ;;  %v5657_v48 = vld [vmem:[%s12176_s3 + $0x130] sm:$0xff] (!%p6124_p7)  ;;  %v5660_v35 = vld [vmem:[%s12176_s3 + $0x148] sm:$0xff] (!%p6124_p7) }
 0x453   : > { %v6694_v46 = vadd.f32 %v6693_v43, %v6692_v49  ;;  %v5629_v49 = vld [vmem:[%s12176_s3 + $0x50] sm:$0xff] (!%p6124_p7) }
 0x454   : > { %8332 = vmatpush1.bf16.msra.mxu0 %v8331_v4  ;;  %v5627_v4 = vld [vmem:[%s12176_s3 + $0x40] sm:$0xff] (!%p6124_p7) }
 0x455   : > { %v5159_v50 = vadd.f32 %v6694_v46, %v11711_v58  ;;  %8334 = vmatprep.subr.bf16.mxu0 %v8333_v39  ;;  %v5632_v39 = vld [vmem:[%s12176_s3 + $0x68] sm:$0xff] (!%p6124_p7)  ;;  %v9047_v42 = vpack.c.bf16 (!%p6124_p7), %v5629_v49, %v5627_v4  ;;  %v5867_v4 = vld [vmem:[%s12178_s5 + $0x30] sm:$0xff] (!%p6124_p7)  ;;  %v5868_v49 = vld [vmem:[%s12178_s5 + $0x38] sm:$0xff] (!%p6124_p7) }
 0x456   : > { %v9049_v43 = vpack.c.bf16 (!%p6124_p7), %v5634_v19, %v5632_v39  ;;  %v5636_v46 = vld [vmem:[%s12176_s3 + $0x88] sm:$0xff] (!%p6124_p7)  ;;  %v9075_v39 = vpack.c.bf16 (!%p6124_p7), %v5657_v48, %v5655_v33  ;;  %v5686_v33 = vld [vmem:[%s12176_s3 + $0x218] sm:$0xff] (!%p6124_p7) }
 0x458   : > { %8336 = vmatpush1.bf16.msra.mxu0 %v8335_v63  ;;  %v5638_v63 = vld [vmem:[%s12176_s3 + $0x98] sm:$0xff] (!%p6124_p7) }
 0x459   : > { %8338 = vmatprep.subr.bf16.mxu0 %v8337_v61  ;;  %v9051_v61 = vpack.c.bf16 (!%p6124_p7), %v5633_v45, %v5631_v44  ;;  %v9053_v51 = vpack.c.bf16 (!%p6124_p7), %v5638_v63, %v5636_v46  ;;  %v5664_v44 = vld [vmem:[%s12176_s3 + $0x168] sm:$0xff] (!%p6124_p7)  ;;  %v5666_v45 = vld [vmem:[%s12176_s3 + $0x178] sm:$0xff] (!%p6124_p7)  ;;  %v9125_v46 = vpack.c.bf16 (!%p6124_p7), %v5868_v49, %v5867_v4  ;;  %v5869_v63 = vld [vmem:[%s12178_s5 + $0x40] sm:$0xff] (!%p6124_p7) }
 0x45c   : > { %8340 = vmatpush1.bf16.msra.mxu0 %v8339_v53  ;;  %v5637_v53 = vld [vmem:[%s12176_s3 + $0x90] sm:$0xff] (!%p6124_p7) }
 0x45f   : > { %4036 = vmatmul.mubr.f32.vlgmr.msra.gmra.mrb[0].mxu0 %v11723_v10 }
 0x471   : > { %v6727_v55 = vpop.f32.mrb[34].mxu1 }
 0x472   : > { %v6728_v8 = vpop.f32.mrb[35].mxu1 }
 0x473   : > { %v6729_v5 = vadd.f32 %v6728_v8, %v6727_v55  ;;  %v5640_v55 = vld [vmem:[%s12176_s3 + $0xa8] sm:$0xff] (!%p6124_p7)  ;;  %v5642_v8 = vld [vmem:[%s12176_s3 + $0xb8] sm:$0xff] (!%p6124_p7) }
 0x475   : > { %v5229_v60 = vadd.f32 %v6729_v5, %v5159_v50  ;;  %v5598_v50 = vlaneseq (!%p6124_p7) }
 0x477   : > { %v11827_v5 = vshrl.u32 (!%p6124_p7), %v5598_v50, 7  ;;  %v5870_v50 = vld [vmem:[%s12178_s5 + $0x48] sm:$0xff] (!%p6124_p7) }
 0x491   : > { %v6762_v59 = vpop.f32.mrb[36].mxu1 }
 0x492   : > { %v6763_v0 = vpop.f32.mrb[37].mxu1 }
 0x493   : > { %v6764_v1 = vadd.f32 %v6763_v0, %v6762_v59  ;;  %v9057_v59 = vpack.c.bf16 (!%p6124_p7), %v5642_v8, %v5640_v55  ;;  %v5639_v0 = vld [vmem:[%s12176_s3 + $0xa0] sm:$0xff] (!%p6124_p7)  ;;  %v5668_v55 = vld [vmem:[%s12176_s3 + $0x188] sm:$0xff] (!%p6124_p7)  ;;  %v5670_v8 = vld [vmem:[%s12176_s3 + $0x198] sm:$0xff] (!%p6124_p7) }
 0x495   : > { %v5299_v14 = vadd.f32 %v6764_v1, %v5229_v60  ;;  %v9055_v60 = vpack.c.bf16 (!%p6124_p7), %v5637_v53, %v5635_v52  ;;  %v5641_v1 = vld [vmem:[%s12176_s3 + $0xb0] sm:$0xff] (!%p6124_p7)  ;;  %v5663_v52 = vld [vmem:[%s12176_s3 + $0x160] sm:$0xff] (!%p6124_p7) }
 0x496   : > { %v5665_v53 = vld [vmem:[%s12176_s3 + $0x170] sm:$0xff] (!%p6124_p7) }
 0x4b1   : > { %v6797_v2 = vpop.f32.mrb[38].mxu1 }
 0x4b2   : > { %v6798_v58 = vpop.f32.mrb[39].mxu1 }
 0x4b3   : > { %v6799_v6 = vadd.f32 %v6798_v58, %v6797_v2  ;;  %v5646_v2 = vld [vmem:[%s12176_s3 + $0xd8] sm:$0xff] (!%p6124_p7)  ;;  %v5604_v58 = vsub.s32 (!%p6124_p7), 1, %v11827_v5 }
 0x4b5   : > { %v5369_v38 = vadd.f32 %v6799_v6, %v5299_v14  ;;  %v5644_v14 = vld [vmem:[%s12176_s3 + $0xc8] sm:$0xff] (!%p6124_p7)  ;;  %v9059_v6 = vpack.c.bf16 (!%p6124_p7), %v5641_v1, %v5639_v0  ;;  %v5872_v0 = vld [vmem:[%s12178_s5 + $0x58] sm:$0xff] (!%p6124_p7)  ;;  %v9083_v1 = vpack.c.bf16 (!%p6124_p7), %v5665_v53, %v5663_v52  ;;  %v5687_v52 = vld [vmem:[%s12176_s3 + $0x220] sm:$0xff] (!%p6124_p7) }
 0x4b6   : > { %v5689_v53 = vld [vmem:[%s12176_s3 + $0x230] sm:$0xff] (!%p6124_p7) }
 0x4d1   : > { %v6832_v7 = vpop.f32.mrb[40].mxu1 }
 0x4d2   : > { %v6833_v22 = vpop.f32.mrb[41].mxu1 }
 0x4d3   : > { %v6834_v9 = vadd.f32 %v6833_v22, %v6832_v7  ;;  %v9061_v7 = vpack.c.bf16 (!%p6124_p7), %v5646_v2, %v5644_v14  ;;  %v5645_v22 = vld [vmem:[%s12176_s3 + $0xd0] sm:$0xff] (!%p6124_p7)  ;;  %v9085_v14 = vpack.c.bf16 (!%p6124_p7), %v5670_v8, %v5668_v55  ;;  %v5667_v2 = vld [vmem:[%s12176_s3 + $0x180] sm:$0xff] (!%p6124_p7)  ;;  %v5692_v55 = vld [vmem:[%s12176_s3 + $0x248] sm:$0xff] (!%p6124_p7) }
 0x4d4   : > { %v5694_v8 = vld [vmem:[%s12176_s3 + $0x258] sm:$0xf] (!%p6124_p7) }
 0x4d5   : > { %v5439_v13 = vadd.f32 %v6834_v9, %v5369_v38  ;;  %v5643_v38 = vld [vmem:[%s12176_s3 + $0xc0] sm:$0xff] (!%p6124_p7) }
 0x4f1   : > { %v6867_v11 = vpop.f32.mrb[42].mxu1 }
 0x4f2   : > { %v6868_v56 = vpop.f32.mrb[43].mxu1 }
 0x4f3   : > { %v6869_v12 = vadd.f32 %v6868_v56, %v6867_v11  ;;  %v5648_v11 = vld [vmem:[%s12176_s3 + $0xe8] sm:$0xff] (!%p6124_p7)  ;;  %v5650_v56 = vld [vmem:[%s12176_s3 + $0xf8] sm:$0xff] (!%p6124_p7) }
 0x4f5   : > { %v5509_v10 = vadd.f32 %v6869_v12, %v5439_v13  ;;  %v11851_v13 = vld [vmem:[%s12175_s2] sm:$0x7] (!%p6124_p7) }
 0x4f6   : > { %v5605_v12 = vrot.slane (!%p6124_p7), %v11851_v13, %v5604_v58 }
 0x511   : > { %v5578_v15 = vpop.f32.mrb[44].mxu1 }
 0x512   : > { %v5579_v27 = vadd.f32 %v5578_v15, %v5509_v10  ;;  %v6935_v16 = vpop.f32.mrb[45].mxu1  ;;  %v9063_v10 = vpack.c.bf16 (!%p6124_p7), %v5645_v22, %v5643_v38  ;;  %v9065_v15 = vpack.c.bf16 (!%p6124_p7), %v5650_v56, %v5648_v11  ;;  %v5672_v38 = vld [vmem:[%s12176_s3 + $0x1a8] sm:$0xff] (!%p6124_p7) }
 0x513   : > { %v5649_v16 = vld [vmem:[%s12176_s3 + $0xf0] sm:$0xff] (!%p6124_p7)  ;;  %v5874_v11 = vld [vmem:[%s12178_s5 + $0x68] sm:$0xff] (!%p6124_p7) }
 0x514   : > { %v5584_v17 = vadd.f32 %v5579_v27, %v372_v26  ;;  %v5647_v27 = vld [vmem:[%s12176_s3 + $0xe0] sm:$0xff] (!%p6124_p7) }
 0x516   : > { %5588 = vst.msk [vmem:[#allocation2 + $0x10] sm:$0xff] %vm5587_vm2, %v5584_v17  ;;  %v5652_v17 = vld [vmem:[%s12176_s3 + $0x108] sm:$0xff] (!%p6124_p7) }
 0x532   : > { %v4037_v18 = vpop.f32.mrb[0].mxu0  ;;  %5592 = sbr.rel (%p6124_p7) target bundleno = 2059 (0x80b), region = 68 }
 0x533   : > { %v9169_v20 = vadd.f32 %v4037_v18, %v10644_v57  ;;  %v4039_v21 = vpop.f32.mrb[1].mxu0  ;;  %v5619_v57 = vld [vmem:[%s12176_s3] sm:$0xff] (!%p6124_p7) }
 0x534   : > { %v9170_v54 = vadd.f32 %v4039_v21, %v10649_v62  ;;  %v9037_v62 = vpack.c.bf16 (!%p6124_p7), %v5622_v3, %v5620_v25  ;;  %v9039_v31 = vpack.c.bf16 (!%p6124_p7), %v5621_v28, %v5619_v57  ;;  %v5863_v21 = vld [vmem:[%s12178_s5 + $0x10] sm:$0xff] (!%p6124_p7)  ;;  %v5651_v3 = vld [vmem:[%s12176_s3 + $0x100] sm:$0xff] (!%p6124_p7)  ;;  %v5658_v28 = vld [vmem:[%s12176_s3 + $0x138] sm:$0xff] (!%p6124_p7) }
 0x535   : > { %v5582_v23 = vadd.f32 %v9169_v20, %v370_v34  ;;  %v5654_v34 = vld [vmem:[%s12176_s3 + $0x118] sm:$0xff] (!%p6124_p7)  ;;  %v5861_v20 = vld [vmem:[%s12178_s5] sm:$0xff] (!%p6124_p7)  ;;  %v5653_v57 = vld [vmem:[%s12176_s3 + $0x110] sm:$0xff] (!%p6124_p7) }
 0x536   : > { %v5583_v24 = vadd.f32 %v9170_v54, %v371_v32  ;;  %9038 = vmatprep.subr.bf16.mxu0 (!%p6124_p7), %v9037_v62  ;;  %v5862_v32 = vld [vmem:[%s12178_s5 + $0x8] sm:$0xff] (!%p6124_p7)  ;;  %v9067_v54 = vpack.c.bf16 (!%p6124_p7), %v5649_v16, %v5647_v27  ;;  %v9069_v25 = vpack.c.bf16 (!%p6124_p7), %v5654_v34, %v5652_v17  ;;  %v5678_v27 = vld [vmem:[%s12176_s3 + $0x1d8] sm:$0xff] (!%p6124_p7)  ;;  %v5600_v17 = vsub.s32 (!%p6124_p7), 0, %v11827_v5  ;;  %v5875_v34 = vld [vmem:[%s12178_s5 + $0x70] sm:$0xff] (!%p6124_p7) }
 0x537   : > { %5585 = vst [vmem:[#allocation2] sm:$0xff] %v5582_v23  ;;  %9040 = vmatpush1.bf16.msra.mxu0 (!%p6124_p7), %v9039_v31  ;;  %v9116_v23 = vpack.c.bf16 (!%p6124_p7), %v5862_v32, %v5861_v20  ;;  %v5656_v62 = vld [vmem:[%s12176_s3 + $0x128] sm:$0xff] (!%p6124_p7) }
 0x538   : > { %5586 = vst [vmem:[#allocation2 + $0x8] sm:$0xff] %v5583_v24  ;;  %9042 = vmatprep.subr.bf16.mxu0 (!%p6124_p7), %v9041_v47  ;;  %v5864_v24 = vld [vmem:[%s12178_s5 + $0x18] sm:$0xff] (!%p6124_p7)  ;;  %v5866_v31 = vld [vmem:[%s12178_s5 + $0x28] sm:$0xff] (!%p6124_p7)  ;;  %v9071_v47 = vpack.c.bf16 (!%p6124_p7), %v5653_v57, %v5651_v3  ;;  %v9073_v41 = vpack.c.bf16 (!%p6124_p7), %v5658_v28, %v5656_v62  ;;  %v5601_v3 = vrot.slane (!%p6124_p7), %v11851_v13, %v5600_v17  ;;  %v5877_v57 = vld [vmem:[%s12178_s5 + $0x80] sm:$0xff] (!%p6124_p7) }
 0x539   : > { %9117 = vmatpush1.bf16.msra.mxu1 %v9116_v23  ;;  %v9119_v29 = vpack.c.bf16 %v5864_v24, %v5863_v21  ;;  %v5675_v21 = vld [vmem:[%s12176_s3 + $0x1c0] sm:$0xff]  ;;  %v5680_v23 = vld [vmem:[%s12176_s3 + $0x1e8] sm:$0xff]  ;;  %v5682_v24 = vld [vmem:[%s12176_s3 + $0x1f8] sm:$0xff] }
 0x53a   : > { %9118 = vmatprep.subr.bf16.mxu1 %v9374_v40  ;;  %v5878_v62 = vld [vmem:[%s12178_s5 + $0x88] sm:$0xff] }
 0x53b   : > { %9044 = vmatpush1.bf16.msra.mxu0 %v9043_v36  ;;  %v5662_v36 = vld [vmem:[%s12176_s3 + $0x158] sm:$0xff]  ;;  %v9140_v48 = vpack.c.bf16 %v5878_v62, %v5877_v57  ;;  %v5974_v57 = vld [vmem:[%s12180_s7 + $0x30] sm:$0xff] }
 0x53c   : > { %9046 = vmatprep.subr.bf16.mxu0 %v9045_v37  ;;  %v9122_v37 = vpack.c.bf16 %v5866_v31, %v5865_v30  ;;  %v9077_v19 = vpack.c.bf16 %v5662_v36, %v5660_v35  ;;  %v9097_v30 = vpack.c.bf16 %v5682_v24, %v5680_v23  ;;  %v5679_v31 = vld [vmem:[%s12176_s3 + $0x1e0] sm:$0xff]  ;;  %v5879_v36 = vld [vmem:[%s12178_s5 + $0x90] sm:$0xff]  ;;  %v5975_v62 = vld [vmem:[%s12180_s7 + $0x38] sm:$0xff] }
 0x53d   : > { %9120 = vmatpush1.bf16.msra.mxu1 %v9119_v29  ;;  %v5972_v24 = vld [vmem:[%s12180_s7 + $0x20] sm:$0xff] }
 0x53e   : > { %9121 = vmatprep.subr.bf16.mxu1 %v9374_v40  ;;  %v5593_v29 = vld [vmem:[#allocation2] sm:$0xff] }
 0x53f   : > { %9048 = vmatpush1.bf16.msra.mxu0 %v9047_v42  ;;  %v5594_v9 = vld [vmem:[#allocation2 + $0x8] sm:$0xff]  ;;  %v5659_v42 = vld [vmem:[%s12176_s3 + $0x140] sm:$0xff]  ;;  %v5613_v35 = vadd.f32 %v5601_v3, %v5593_v29 }
 0x540   : > { %9050 = vmatprep.subr.bf16.mxu0 %v9049_v43  ;;  %v5614_v26 = vadd.f32 %v5605_v12, %v5594_v9  ;;  %v5661_v43 = vld [vmem:[%s12176_s3 + $0x150] sm:$0xff]  ;;  %v5873_v9 = vld [vmem:[%s12178_s5 + $0x60] sm:$0xff] }
 0x541   : > { %9123 = vmatpush1.bf16.msra.mxu1 %v9122_v37  ;;  %v9134_v16 = vpack.c.bf16 %v5874_v11, %v5873_v9  ;;  %v5880_v37 = vld [vmem:[%s12178_s5 + $0x98] sm:$0xff]  ;;  %v5883_v9 = vld [vmem:[%s12178_s5 + $0xb0] sm:$0xff]  ;;  %v5976_v29 = vld [vmem:[%s12180_s7 + $0x40] sm:$0xff] }
 0x542   : > { %v5617_v18 = vmax.f32 %v5614_v26, 0.0  ;;  %9124 = vmatprep.subr.bf16.mxu1 %v9374_v40  ;;  %v5673_v26 = vld [vmem:[%s12176_s3 + $0x1b0] sm:$0xff]  ;;  %v5884_v11 = vld [vmem:[%s12178_s5 + $0xb8] sm:$0xff] }
 0x543   : > { %9052 = vmatpush1.bf16.msra.mxu0 %v9051_v61  ;;  %v9079_v61 = vpack.c.bf16 %v5661_v43, %v5659_v42  ;;  %v5688_v42 = vld [vmem:[%s12176_s3 + $0x228] sm:$0xff]  ;;  %v5690_v43 = vld [vmem:[%s12176_s3 + $0x238] sm:$0xff] }
 0x544   : > { %9054 = vmatprep.subr.bf16.mxu0 %v9053_v51  ;;  %5781 = vmatprep.mubr.f32.mxu0 %v5617_v18  ;;  %v9081_v51 = vpack.c.bf16 %v5666_v45, %v5664_v44  ;;  %v5876_v18 = vld [vmem:[%s12178_s5 + $0x78] sm:$0xff]  ;;  %v9143_v44 = vpack.c.bf16 %v5880_v37, %v5879_v36  ;;  %v5608_v45 = vsub.s32 2, %v11827_v5  ;;  %v5970_v5 = vld [vmem:[%s12180_s7 + $0x10] sm:$0xff] }
 0x545   : > { %9126 = vmatpush1.bf16.msra.mxu1 %v9125_v46  ;;  %v5616_v46 = vmax.f32 %v5613_v35, 0.0 }
 0x546   : > { %9127 = vmatprep.subr.bf16.mxu1 %v9374_v40 }
 0x547   : > { %9056 = vmatpush1.bf16.msra.mxu0 %v9055_v60  ;;  %v9128_v60 = vpack.c.bf16 %v5870_v50, %v5869_v63  ;;  %v5881_v63 = vld [vmem:[%s12178_s5 + $0xa0] sm:$0xff]  ;;  %v5882_v50 = vld [vmem:[%s12178_s5 + $0xa8] sm:$0xff] }
 0x548   : > { %9058 = vmatprep.subr.bf16.mxu0 %v9057_v59  ;;  %v5871_v59 = vld [vmem:[%s12178_s5 + $0x50] sm:$0xff] }
 0x549   : > { %9129 = vmatpush1.bf16.msra.mxu1 %v9128_v60  ;;  %v9131_v22 = vpack.c.bf16 %v5872_v0, %v5871_v59  ;;  %v9146_v60 = vpack.c.bf16 %v5882_v50, %v5881_v63  ;;  %v5609_v59 = vrot.slane %v11851_v13, %v5608_v45  ;;  %v9107_v0 = vpack.c.bf16 %v5689_v53, %v5687_v52  ;;  %v5693_v13 = vld [vmem:[%s12176_s3 + $0x250] sm:$0xf] }
 0x54a   : > { %9130 = vmatprep.subr.bf16.mxu1 %v9374_v40 }
 0x54b   : > { %9060 = vmatpush1.bf16.msra.mxu0 %v9059_v6  ;;  %v5669_v6 = vld [vmem:[%s12176_s3 + $0x190] sm:$0xff] }
 0x54c   : > { %9062 = vmatprep.subr.bf16.mxu0 %v9061_v7  ;;  %v5674_v7 = vld [vmem:[%s12176_s3 + $0x1b8] sm:$0xff]  ;;  %v9087_v56 = vpack.c.bf16 %v5669_v6, %v5667_v2  ;;  %v9109_v2 = vpack.c.bf16 %v5694_v8, %v5692_v55  ;;  %v5691_v6 = vld [vmem:[%s12176_s3 + $0x240] sm:$0xff] }
 0x54d   : > { %v9089_v12 = vpack.c.bf16 %v5674_v7, %v5672_v38  ;;  %9132 = vmatpush1.bf16.msra.mxu1 %v9131_v22  ;;  %v9112_v7 = vpack.c.bf16 %v5693_v13, %v5691_v6 }
 0x54e   : > { %9133 = vmatprep.subr.bf16.mxu1 %v9374_v40 }
 0x54f   : > { %9064 = vmatpush1.bf16.msra.mxu0 %v9063_v10  ;;  %v5671_v10 = vld [vmem:[%s12176_s3 + $0x1a0] sm:$0xff] }
 0x550   : > { %9066 = vmatprep.subr.bf16.mxu0 %v9065_v15  ;;  %v5676_v15 = vld [vmem:[%s12176_s3 + $0x1c8] sm:$0xff]  ;;  %v9091_v20 = vpack.c.bf16 %v5673_v26, %v5671_v10  ;;  %v5695_v10 = vld [vmem:[%s12177_s4] sm:$0x3] }
 0x551   : > { %v9093_v32 = vpack.c.bf16 %v5678_v27, %v5676_v15  ;;  %9135 = vmatpush1.bf16.msra.mxu1 %v9134_v16  ;;  %v5700_v26 = vrot.slane %v5695_v10, %v5600_v17  ;;  %v5704_v15 = vrot.slane %v5695_v10, %v5604_v58  ;;  %v5971_v58 = vld [vmem:[%s12180_s7 + $0x18] sm:$0xff] }
 0x552   : > { %9136 = vmatprep.subr.bf16.mxu1 %v9374_v40  ;;  %v9155_v17 = vpack.c.bf16 %v5971_v58, %v5970_v5 }
 0x553   : > { %9068 = vmatpush1.bf16.msra.mxu0 %v9067_v54  ;;  %v5677_v54 = vld [vmem:[%s12176_s3 + $0x1d0] sm:$0xff] }
 0x554   : > { %9070 = vmatprep.subr.bf16.mxu0 %v9069_v25  ;;  %v9137_v25 = vpack.c.bf16 %v5876_v18, %v5875_v34  ;;  %v9095_v28 = vpack.c.bf16 %v5677_v54, %v5675_v21  ;;  %v5968_v18 = vld [vmem:[%s12180_s7] sm:$0xff] }
 0x556   : > { %9138 = vmatpush1.bf16.msra.mxu1 %v9137_v25  ;;  %v5973_v25 = vld [vmem:[%s12180_s7 + $0x28] sm:$0xff] }
 0x557   : > { %9072 = vmatpush1.bf16.msra.mxu0 %v9071_v47  ;;  %v5681_v47 = vld [vmem:[%s12176_s3 + $0x1f0] sm:$0xff]  ;;  %9139 = vmatprep.subr.bf16.mxu1 %v9374_v40  ;;  %v9158_v3 = vpack.c.bf16 %v5973_v25, %v5972_v24 }
 0x558   : > { %9074 = vmatprep.subr.bf16.mxu0 %v9073_v41  ;;  %v5684_v41 = vld [vmem:[%s12176_s3 + $0x208] sm:$0xff]  ;;  %v9099_v4 = vpack.c.bf16 %v5681_v47, %v5679_v31  ;;  %v5978_v47 = vld [vmem:[%s12180_s7 + $0x50] sm:$0xff] }
 0x559   : > { %v9101_v49 = vpack.c.bf16 %v5686_v33, %v5684_v41  ;;  %v5979_v41 = vld [vmem:[%s12180_s7 + $0x58] sm:$0xff] }
 0x55a   : > { %9141 = vmatpush1.bf16.msra.mxu1 %v9140_v48  ;;  %v9167_v33 = vpack.c.bf16 %v5979_v41, %v5978_v47  ;;  %v5980_v48 = vld [vmem:[%s12180_s7 + $0x60] sm:$0xf] }
 0x55b   : > { %9076 = vmatpush1.bf16.msra.mxu0 %v9075_v39  ;;  %v5683_v39 = vld [vmem:[%s12176_s3 + $0x200] sm:$0xff]  ;;  %9142 = vmatprep.subr.bf16.mxu1 %v9374_v40 }
 0x55c   : > { %9078 = vmatprep.subr.bf16.mxu0 %v9077_v19  ;;  %v5685_v19 = vld [vmem:[%s12176_s3 + $0x210] sm:$0xff] }
 0x55e   : > { %9144 = vmatpush1.bf16.msra.mxu1 %v9143_v44 }
 0x55f   : > { %9080 = vmatpush1.bf16.msra.mxu0 %v9079_v61  ;;  %v9103_v61 = vpack.c.bf16 %v5685_v19, %v5683_v39  ;;  %9145 = vmatprep.subr.bf16.mxu1 %v9374_v40 }
 0x560   : > { %9082 = vmatprep.subr.bf16.mxu0 %v9081_v51  ;;  %v9105_v51 = vpack.c.bf16 %v5690_v43, %v5688_v42 }
 0x562   : > { %9147 = vmatpush1.bf16.msra.mxu1 %v9146_v60 }
 0x563   : > { %9084 = vmatpush1.bf16.msra.mxu0 %v9083_v1  ;;  %v9375_v1 = vmov 0.0   ;;  %9148 = vmatprep.subr.bf16.mxu1 %v9374_v40 }
 0x564   : > { %9086 = vmatprep.subr.bf16.mxu0 %v9085_v14  ;;  %v5595_v14 = vld [vmem:[#allocation2 + $0x10] sm:$0xff] }
 0x565   : > { %v5615_v38 = vadd.f32 %v5609_v59, %v5595_v14 }
 0x567   : > { %9088 = vmatpush1.bf16.msra.mxu0 %v9087_v56  ;;  %v5618_v22 = vmax.f32 %v5615_v38, 0.0  ;;  %v9149_v56 = vpack.c.bf16 %v5884_v11, %v5883_v9 }
 0x568   : > { %9090 = vmatprep.subr.bf16.mxu0 %v9089_v12  ;;  %v5885_v12 = vld [vmem:[%s12178_s5 + $0xc0] sm:$0xff] }
 0x569   : > { %9150 = vmatpush1.bf16.msra.mxu1 %v9149_v56 }
 0x56a   : > { %5945 = vmatprep.subr.mxu1 %v9375_v1 }
 0x56b   : > { %9092 = vmatpush1.bf16.msra.mxu0 %v9091_v20  ;;  %v5969_v20 = vld [vmem:[%s12180_s7 + $0x8] sm:$0xff] }
 0x56c   : > { %9094 = vmatprep.subr.bf16.mxu0 %v9093_v32  ;;  %v9152_v54 = vpack.c.bf16 %v5969_v20, %v5968_v18 }
 0x56d   : > { %5946 = vmatpush1.msra.mxu1 %v5885_v12 }
 0x56e   : > { %9151 = vmatprep.subr.bf16.mxu1 %v9374_v40 }
 0x56f   : > { %9096 = vmatpush1.bf16.msra.mxu0 %v9095_v28  ;;  %v9161_v28 = vpack.c.bf16 %v5975_v62, %v5974_v57 }
 0x570   : > { %9098 = vmatprep.subr.bf16.mxu0 %v9097_v30  ;;  %v5977_v30 = vld [vmem:[%s12180_s7 + $0x48] sm:$0xff] }
 0x571   : > { %v9164_v31 = vpack.c.bf16 %v5977_v30, %v5976_v29 }
 0x573   : > { %9100 = vmatpush1.bf16.msra.mxu0 %v9099_v4 }
 0x574   : > { %9102 = vmatprep.subr.bf16.mxu0 %v9101_v49  ;;  %v6130_v49 = vld [vmem:[%s12181_s8] ss:$0 sm:$0xff] }
 0x576   : > { %5782 = vmatmul.mubr.f32.vlgmr.msra.gmra.mrb[0].mxu0 %v5616_v46 }
 0x577   : > { %9104 = vmatpush1.bf16.msra.mxu0 %v9103_v61  ;;  %5852 = vmatprep.mubr.f32.mxu0 %v9375_v1 }
 0x578   : > { %9106 = vmatprep.subr.bf16.mxu0 %v9105_v51 }
 0x57b   : > { %9108 = vmatpush1.bf16.msra.mxu0 %v9107_v0 }
 0x57c   : > { %9111 = vmatprep.subr.msk.bf16.mxu0 %vm9110_vm5, %v9109_v2 }
 0x57f   : > { %9114 = vmatpush1.bf16.msk.msra.mxu0 %vm9110_vm5, %v9112_v7 }
 0x582   : > { %6127 = vmatmul.mubr.msk.f32.vlgmr.msra.gmra.mrb[0].mxu0 %vm5587_vm2, %v5618_v22 }
 0x655   : > { %v5854_v27 = vpop.f32.mrb[0].mxu0 }
 0x656   : > { %v9211_v16 = vadd.f32 %v5854_v27, %v5700_v26  ;;  %v5856_v34 = vpop.f32.mrb[1].mxu0 }
 0x657   : > { %v9212_v32 = vadd.f32 %v5856_v34, %v5704_v15 }
 0x658   : > { %v5859_v23 = vmax.f32 %v9211_v16, 0.0 }
 0x659   : > { %v5860_v21 = vmax.f32 %v9212_v32, 0.0 }
 0x65b   : > { %6129 = vmatprep.mubr.msk.f32.mxu1 %vm5893_vm6, %v5860_v21 }
 0x65c   : > { %5962 = vmatmul.mubr.f32.vlgmr.msra.gmra.mrb[0].mxu1 %v5859_v23 }
 0x65d   : > { %9153 = vmatpush3.bf16.msra.mxu1 %v9152_v54  ;;  %6962 = vmatprep.mubr.msk.f32.mxu1 %vm9377_vm7, %v9375_v1 }
 0x65e   : > { %9154 = vmatprep.subr.bf16.mxu1 %v9374_v40 }
 0x661   : > { %9156 = vmatpush3.bf16.msra.mxu1 %v9155_v17 }
 0x662   : > { %9157 = vmatprep.subr.bf16.mxu1 %v9374_v40 }
 0x665   : > { %9159 = vmatpush3.bf16.msra.mxu1 %v9158_v3 }
 0x666   : > { %9160 = vmatprep.subr.bf16.mxu1 %v9374_v40 }
 0x669   : > { %9162 = vmatpush3.bf16.msra.mxu1 %v9161_v28 }
 0x66a   : > { %9163 = vmatprep.subr.bf16.mxu1 %v9374_v40 }
 0x66d   : > { %9165 = vmatpush3.bf16.msra.mxu1 %v9164_v31 }
 0x66e   : > { %9166 = vmatprep.subr.bf16.mxu1 %v9374_v40  ;;  %v6128_v40 = vld [vmem:[%s12179_s6] ss:$0 sm:$0xff] }
 0x671   : > { %9168 = vmatpush3.bf16.msra.mxu1 %v9167_v33 }
 0x672   : > { %6960 = vmatprep.subr.mxu1 %v9375_v1 }
 0x675   : > { %6961 = vmatpush3.msk.msra.mxu1 %vm5710_vm3, %v5980_v48 }
 0x72f   : > { %v5963_v35 = vpop.f32.mrb[0].mxu1 }
 0x730   : > { %v5964_v36 = vadd.f32 %v6128_v40, %v5963_v35  ;;  %v5965_v37 = vpop.f32.mrb[1].mxu1 }
 0x732   : > { %v5967_v4 = vmax.f32 %v5964_v36, 0.0 }
 0x734   : > { %6963 = vmatmul.mubr.msk.f32.vlgmr.msra.gmra.mrb[2].mxu1 %vm5988_vm8, %v5967_v4 }
 0x807   : > { %v6061_v39 = vpop.f32.mrb[2].mxu1 }
 0x808   : > { %v6062_v19 = vadd.f32 %v6130_v49, %v6061_v39  ;;  %v6964_v42 = vpop.f32.mrb[3].mxu1 }
 0x80a   : > { %6065 = vst [vmem:[%s12182_s9] sm:$0xff] %v6062_v19 }
 0x80b PF: > { %p19_p4 = scmp.ge.s32.totalorder %s9450_s14, 6   ;;  %s12185_s30 = smov %s9357_s10 }
 0x80c   : > { %s12186_s10 = smov %s9361_s11  ;;  %s12187_s11 = smov %s9460_s17 }
 0x80d   : > { %s12188_s12 = smov %s9450_s14  ;;  %21 = sbr.rel (!%p19_p4) target bundleno = 3 (0x3), region = 103 }
 0x814   :  { %6077 = vsyncpa [#allocation4], 1 }
 0x815   :  { %6079 = vsyncpa [#allocation4 + $0x1], 1 }

</bundles_post_ra>
